<compile_context>
chip_gen: v6e
topology: v6e:2x2x1
jax: 0.10.0
libtpu: 0.0.40
codegen_flags: <defaults>
</compile_context>

<pallas_src>
import functools

import jax
import jax.numpy as jnp
from jax.experimental import pallas as pl
from jax.experimental.pallas import tpu as pltpu


def _round_up(x, m):
    return ((x + m - 1) // m) * m


_TAPS = [(dy, dx) for dy in range(3) for dx in range(3)]


def _double_conv_kernel(x_ref, valid_ref, w1_ref, b1_ref, w2_ref, b2_ref,
                        o_ref, xpad_ref, midpad_ref, *, H, W):
    """Fused 3x3 conv + ReLU -> 3x3 conv + ReLU for one image.

    Flat-slab layout: spatial dims are flattened with a row pitch of W+2
    (2 junk columns per row), so the zero-padded image is one contiguous
    (P, C) slab and every 3x3 tap is a contiguous window of H*(W+2) rows
    starting at offset dy*(W+2)+dx.

    x_ref     : (1, H*(W+2), Cin)   bf16 input rows (junk cols already zero)
    valid_ref : (H*(W+2), 1)        f32, 1.0 on real pixels / 0.0 on junk cols
    w1_ref    : (9, Cin,  Cmid)     bf16 per-tap conv1 weights
    b1_ref    : (1, Cmid)           f32 conv1 bias
    w2_ref    : (9, Cmid, Coutp)    bf16 per-tap conv2 weights
    b2_ref    : (1, Coutp)          f32 conv2 bias
    o_ref     : (1, H*(W+2), Coutp) bf16 lane-dense output slab
    xpad_ref  : (P, Cin)   bf16 scratch, zero-padded input slab
    midpad_ref: (P, Cmid)  bf16 scratch, zero-padded intermediate slab
    """
    Wp = W + 2
    M2 = H * Wp
    off = Wp + 1                       # flat slab offset of pixel (0, 0)
    P = xpad_ref.shape[0]
    cin = xpad_ref.shape[1]
    cmid = midpad_ref.shape[1]
    cdt = xpad_ref.dtype

    # ---- stage padded input: 3 contiguous stores cover [0, P) exactly ----
    # (x_ref's junk columns are zero, so they land exactly on the left/right
    #  halo cells; prefix/suffix stores zero the top/bottom halo rows.)
    xpad_ref[0:off, :] = jnp.zeros((off, cin), cdt)
    xpad_ref[off:off + M2, :] = x_ref[0]
    xpad_ref[off + M2:P, :] = jnp.zeros((P - off - M2, cin), cdt)

    # ---- conv1: 9 accumulated tap matmuls (bf16 operands, f32 accumulate) ----
    acc = None
    for t, (dy, dx) in enumerate(_TAPS):
        o_t = dy * Wp + dx
        win = xpad_ref[o_t:o_t + M2, :]                     # contiguous rows
        part = jnp.dot(win, w1_ref[t], preferred_element_type=jnp.float32)
        acc = part if acc is None else acc + part
    mid = jnp.maximum(acc + b1_ref[...], 0.0)
    # Junk rows land exactly on midpad's halo columns below -> force them to 0.
    mid = (mid * valid_ref[...]).astype(cdt)

    # ---- stage padded intermediate (never leaves HBM/VMEM boundary) ----
    midpad_ref[0:off, :] = jnp.zeros((off, cmid), cdt)
    midpad_ref[off:off + M2, :] = mid
    midpad_ref[off + M2:P, :] = jnp.zeros((P - off - M2, cmid), cdt)

    # ---- conv2 ----
    acc = None
    for t, (dy, dx) in enumerate(_TAPS):
        o_t = dy * Wp + dx
        win = midpad_ref[o_t:o_t + M2, :]
        part = jnp.dot(win, w2_ref[t], preferred_element_type=jnp.float32)
        acc = part if acc is None else acc + part
    out = jnp.maximum(acc + b2_ref[...], 0.0)

    # Lane-dense (M2, Coutp) store; Coutp is a multiple of 128 -> unmasked vst.
    o_ref[0] = out.astype(o_ref.dtype)


def double_conv(x_nchw, params, *, mxu_dtype=jnp.bfloat16):
    """DoubleConv forward. x_nchw: (N, Cin, H, W) -> (N, Cout, H, W)."""
    w1, b1, w2, b2 = params            # w*: (3, 3, Cin_or_Cout, Cout) HWIO
    N, Cin, H, W = x_nchw.shape
    Cout = w1.shape[-1]

    Wp = W + 2
    M2 = H * Wp
    cmid = _round_up(Cout, 16)         # right-sized intermediate channels
    cout_p = _round_up(Cout, 128)      # lane-dense output channels
    # Slab rows: the last junk row's last tap window must stay in bounds.
    P = _round_up((H + 2) * Wp + 2, 8)

    # Layout glue kept outside the kernel (one fused XLA pass over the small
    # input): NCHW -> NHWC, append 2 zero junk columns per row, flatten, bf16.
    x_rows = jnp.pad(jnp.transpose(x_nchw, (0, 2, 3, 1)),
                     ((0, 0), (0, 0), (0, 2), (0, 0)))
    x_rows = x_rows.reshape(N, M2, Cin).astype(mxu_dtype)

    # 1.0 on real pixels, 0.0 on the two junk columns of each row.
    valid = ((jnp.arange(M2) % Wp) < W).astype(jnp.float32).reshape(M2, 1)

    # Per-tap weight matrices, zero-padded along the output-channel axis.
    w1_taps = jnp.zeros((9, Cin, cmid), mxu_dtype)
    w1_taps = w1_taps.at[:, :, :Cout].set(
        w1.reshape(9, Cin, Cout).astype(mxu_dtype))
    b1_p = jnp.zeros((1, cmid), jnp.float32).at[0, :Cout].set(
        b1.astype(jnp.float32))
    w2_taps = jnp.zeros((9, cmid, cout_p), mxu_dtype)
    w2_taps = w2_taps.at[:, :Cout, :Cout].set(
        w2.reshape(9, Cout, Cout).astype(mxu_dtype))
    b2_p = jnp.zeros((1, cout_p), jnp.float32).at[0, :Cout].set(
        b2.astype(jnp.float32))

    # Explicit scoped-VMEM budget from actual scratch + double-buffered blocks
    # (generous 4x margin, clamped to a v7x-safe ceiling).
    ws = jnp.dtype(mxu_dtype).itemsize
    scratch_bytes = P * (Cin + cmid) * ws
    block_bytes = (M2 * Cin * ws + M2 * 4
                   + 9 * Cin * cmid * ws + cmid * 4
                   + 9 * cmid * cout_p * ws + cout_p * 4
                   + M2 * cout_p * ws)
    vmem_limit = int(min(max(4 * (scratch_bytes + 2 * block_bytes) + (4 << 20),
                             16 << 20), 56 << 20))

    kernel = functools.partial(_double_conv_kernel, H=H, W=W)

    out = pl.pallas_call(
        kernel,
        out_shape=jax.ShapeDtypeStruct((N, M2, cout_p), mxu_dtype),
        grid_spec=pltpu.PrefetchScalarGridSpec(
            num_scalar_prefetch=0,
            grid=(N,),
            in_specs=[
                pl.BlockSpec((1, M2, Cin), lambda n: (n, 0, 0)),
                pl.BlockSpec((M2, 1), lambda n: (0, 0)),
                pl.BlockSpec((9, Cin, cmid), lambda n: (0, 0, 0)),
                pl.BlockSpec((1, cmid), lambda n: (0, 0)),
                pl.BlockSpec((9, cmid, cout_p), lambda n: (0, 0, 0)),
                pl.BlockSpec((1, cout_p), lambda n: (0, 0)),
            ],
            out_specs=pl.BlockSpec((1, M2, cout_p), lambda n: (n, 0, 0)),
            scratch_shapes=[
                pltpu.VMEM((P, Cin), mxu_dtype),    # padded input slab
                pltpu.VMEM((P, cmid), mxu_dtype),   # padded intermediate slab
            ],
        ),
        compiler_params=pltpu.CompilerParams(
            dimension_semantics=("parallel",),
            vmem_limit_bytes=vmem_limit,
        ),
    )(x_rows, valid, w1_taps, b1_p, w2_taps, b2_p)

    # Drop junk columns and padded channels, back to NCHW in the input dtype.
    out = out.reshape(N, H, Wp, cout_p)[:, :, :W, :Cout]
    return jnp.transpose(out, (0, 3, 1, 2)).astype(x_nchw.dtype)


def init_params(key, in_channels, out_channels, dtype=jnp.float32):
    """Deterministic synthetic init (PyTorch-like uniform fan-in scaling)."""
    k1, k2, k3, k4 = jax.random.split(key, 4)
    fan1 = in_channels * 9
    fan2 = out_channels * 9
    # HWIO weight layout (3, 3, Cin, Cout).
    w1 = jax.random.uniform(k1, (3, 3, in_channels, out_channels), dtype,
                            minval=-1.0, maxval=1.0) / jnp.sqrt(fan1)
    b1 = jax.random.uniform(k2, (out_channels,), dtype,
                            minval=-1.0, maxval=1.0) / jnp.sqrt(fan1)
    w2 = jax.random.uniform(k3, (3, 3, out_channels, out_channels), dtype,
                            minval=-1.0, maxval=1.0) / jnp.sqrt(fan2)
    b2 = jax.random.uniform(k4, (out_channels,), dtype,
                            minval=-1.0, maxval=1.0) / jnp.sqrt(fan2)
    return w1, b1, w2, b2


if __name__ == "__main__":
    # Small shapes consistent with the module: batch=2, in_channels=4,
    # out_channels=8, spatial 16x16.
    N, Cin, Cout, H, W = 2, 4, 8, 16, 16

    key = jax.random.PRNGKey(0)
    kx, kp = jax.random.split(key)
    x = jax.random.normal(kx, (N, Cin, H, W), dtype=jnp.float32)
    params = init_params(kp, Cin, Cout)

    out = double_conv(x, params)
    out = jax.block_until_ready(out)

    assert out.shape == (N, Cout, H, W), out.shape
    assert out.dtype == jnp.float32

    # Sanity check vs pure-JAX f32 reference (lax conv). Kernel uses bf16 MXU
    # operands + bf16 output slab with f32 accumulation, so use a bf16
    # tolerance.
    w1, b1, w2, b2 = params
    dn = jax.lax.conv_dimension_numbers(x.shape, (Cout, Cin, 3, 3),
                                        ("NCHW", "OIHW", "NCHW"))
    w1_oihw = jnp.transpose(w1, (3, 2, 0, 1))
    w2_oihw = jnp.transpose(w2, (3, 2, 0, 1))
    ref = jax.lax.conv_general_dilated(x, w1_oihw, (1, 1), "SAME",
                                       dimension_numbers=dn)
    ref = jnp.maximum(ref + b1[None, :, None, None], 0.0)
    dn2 = jax.lax.conv_dimension_numbers(ref.shape, (Cout, Cout, 3, 3),
                                         ("NCHW", "OIHW", "NCHW"))
    ref = jax.lax.conv_general_dilated(ref, w2_oihw, (1, 1), "SAME",
                                       dimension_numbers=dn2)
    ref = jnp.maximum(ref + b2[None, :, None, None], 0.0)

    max_err = float(jnp.max(jnp.abs(out - ref)))
    assert jnp.allclose(out, ref, atol=5e-2, rtol=5e-2), (
        f"mismatch vs reference, max abs err {max_err}")

    print("KERNEL_OK")
</pallas_src>

<mosaic_0001>
module attributes {stable_mosaic.version = 11 : i64} {
  func.func @_double_conv_kernel(%arg0: i32, %arg1: memref<1x288x4xbf16, #tpu.memory_space<vmem>>, %arg2: memref<288x1xf32, #tpu.memory_space<vmem>>, %arg3: memref<9x4x16xbf16, #tpu.memory_space<vmem>>, %arg4: memref<1x16xf32, #tpu.memory_space<vmem>>, %arg5: memref<9x16x128xbf16, #tpu.memory_space<vmem>>, %arg6: memref<1x128xf32, #tpu.memory_space<vmem>>, %arg7: memref<1x288x128xbf16, #tpu.memory_space<vmem>>, %arg8: memref<328x4xbf16, #tpu.memory_space<vmem>>, %arg9: memref<328x16xbf16, #tpu.memory_space<vmem>>) attributes {dimension_semantics = [#tpu.dimension_semantics<parallel>], iteration_bounds = array<i64: 2>, scalar_prefetch = 0 : i64, scratch_operands = 2 : i64, tpu.core_type = #tpu.core_type<tc>, window_params = [{transform_indices = @transform_0, window_bounds = array<i64: 1, 288, 4>}, {pipeline_mode = #tpu.pipeline_mode<synchronous>, transform_indices = @transform_1, window_bounds = array<i64: 288, 1>}, {pipeline_mode = #tpu.pipeline_mode<synchronous>, transform_indices = @transform_2, window_bounds = array<i64: 9, 4, 16>}, {pipeline_mode = #tpu.pipeline_mode<synchronous>, transform_indices = @transform_3, window_bounds = array<i64: 1, 16>}, {pipeline_mode = #tpu.pipeline_mode<synchronous>, transform_indices = @transform_4, window_bounds = array<i64: 9, 16, 128>}, {pipeline_mode = #tpu.pipeline_mode<synchronous>, transform_indices = @transform_5, window_bounds = array<i64: 1, 128>}, {transform_indices = @transform_6, window_bounds = array<i64: 1, 288, 128>}]} {
    %cst = arith.constant 0.000000e+00 : bf16
    %0 = vector.broadcast %cst : bf16 to vector<19x4xbf16>
    %c0 = arith.constant 0 : index
    %c0_0 = arith.constant 0 : index
    %1 = vector.load %arg8[%c0, %c0_0] : memref<328x4xbf16, #tpu.memory_space<vmem>>, vector<19x4xbf16>
    tpu.vector_store %arg8[%c0, %c0_0], %0 {strides = array<i32>} : memref<328x4xbf16, #tpu.memory_space<vmem>>, vector<19x4xbf16>,
    %c0_1 = arith.constant 0 : index
    %c0_2 = arith.constant 0 : index
    %c0_3 = arith.constant 0 : index
    %2 = vector.load %arg1[%c0_1, %c0_2, %c0_3] : memref<1x288x4xbf16, #tpu.memory_space<vmem>>, vector<1x288x4xbf16>
    %3 = vector.shape_cast %2 : vector<1x288x4xbf16> to vector<288x4xbf16>
    %c19 = arith.constant 19 : index
    %c0_4 = arith.constant 0 : index
    %4 = vector.load %arg8[%c19, %c0_4] : memref<328x4xbf16, #tpu.memory_space<vmem>>, vector<288x4xbf16>
    tpu.vector_store %arg8[%c19, %c0_4], %3 {strides = array<i32>} : memref<328x4xbf16, #tpu.memory_space<vmem>>, vector<288x4xbf16>,
    %cst_5 = arith.constant 0.000000e+00 : bf16
    %5 = vector.broadcast %cst_5 : bf16 to vector<21x4xbf16>
    %c307 = arith.constant 307 : index
    %c0_6 = arith.constant 0 : index
    %6 = vector.load %arg8[%c307, %c0_6] : memref<328x4xbf16, #tpu.memory_space<vmem>>, vector<21x4xbf16>
    tpu.vector_store %arg8[%c307, %c0_6], %5 {strides = array<i32>} : memref<328x4xbf16, #tpu.memory_space<vmem>>, vector<21x4xbf16>,
    %c0_7 = arith.constant 0 : index
    %c0_8 = arith.constant 0 : index
    %7 = vector.load %arg8[%c0_7, %c0_8] : memref<328x4xbf16, #tpu.memory_space<vmem>>, vector<288x4xbf16>
    %c0_9 = arith.constant 0 : index
    %c0_10 = arith.constant 0 : index
    %c0_11 = arith.constant 0 : index
    %8 = vector.load %arg3[%c0_9, %c0_10, %c0_11] : memref<9x4x16xbf16, #tpu.memory_space<vmem>>, vector<1x4x16xbf16>
    %9 = vector.shape_cast %8 : vector<1x4x16xbf16> to vector<4x16xbf16>
    %cst_12 = arith.constant dense<0.000000e+00> : vector<288x16xf32>
    %10 = tpu.matmul %7, %9, %cst_12 {dimension_numbers = #tpu.dot_dimension_numbers<[1], [0], [0], [1], [0, 0, 1, 1], [], []>} : vector<288x4xbf16>, vector<4x16xbf16>, vector<288x16xf32> -> vector<288x16xf32>
    %c1 = arith.constant 1 : index
    %c0_13 = arith.constant 0 : index
    %11 = vector.load %arg8[%c1, %c0_13] : memref<328x4xbf16, #tpu.memory_space<vmem>>, vector<288x4xbf16>
    %c1_14 = arith.constant 1 : index
    %c0_15 = arith.constant 0 : index
    %c0_16 = arith.constant 0 : index
    %12 = vector.load %arg3[%c1_14, %c0_15, %c0_16] : memref<9x4x16xbf16, #tpu.memory_space<vmem>>, vector<1x4x16xbf16>
    %13 = vector.shape_cast %12 : vector<1x4x16xbf16> to vector<4x16xbf16>
    %cst_17 = arith.constant dense<0.000000e+00> : vector<288x16xf32>
    %14 = tpu.matmul %11, %13, %cst_17 {dimension_numbers = #tpu.dot_dimension_numbers<[1], [0], [0], [1], [0, 0, 1, 1], [], []>} : vector<288x4xbf16>, vector<4x16xbf16>, vector<288x16xf32> -> vector<288x16xf32>
    %15 = arith.addf %10, %14 : vector<288x16xf32>
    %c2 = arith.constant 2 : index
    %c0_18 = arith.constant 0 : index
    %16 = vector.load %arg8[%c2, %c0_18] : memref<328x4xbf16, #tpu.memory_space<vmem>>, vector<288x4xbf16>
    %c2_19 = arith.constant 2 : index
    %c0_20 = arith.constant 0 : index
    %c0_21 = arith.constant 0 : index
    %17 = vector.load %arg3[%c2_19, %c0_20, %c0_21] : memref<9x4x16xbf16, #tpu.memory_space<vmem>>, vector<1x4x16xbf16>
    %18 = vector.shape_cast %17 : vector<1x4x16xbf16> to vector<4x16xbf16>
    %cst_22 = arith.constant dense<0.000000e+00> : vector<288x16xf32>
    %19 = tpu.matmul %16, %18, %cst_22 {dimension_numbers = #tpu.dot_dimension_numbers<[1], [0], [0], [1], [0, 0, 1, 1], [], []>} : vector<288x4xbf16>, vector<4x16xbf16>, vector<288x16xf32> -> vector<288x16xf32>
    %20 = arith.addf %15, %19 : vector<288x16xf32>
    %c18 = arith.constant 18 : index
    %c0_23 = arith.constant 0 : index
    %21 = vector.load %arg8[%c18, %c0_23] : memref<328x4xbf16, #tpu.memory_space<vmem>>, vector<288x4xbf16>
    %c3 = arith.constant 3 : index
    %c0_24 = arith.constant 0 : index
    %c0_25 = arith.constant 0 : index
    %22 = vector.load %arg3[%c3, %c0_24, %c0_25] : memref<9x4x16xbf16, #tpu.memory_space<vmem>>, vector<1x4x16xbf16>
    %23 = vector.shape_cast %22 : vector<1x4x16xbf16> to vector<4x16xbf16>
    %cst_26 = arith.constant dense<0.000000e+00> : vector<288x16xf32>
    %24 = tpu.matmul %21, %23, %cst_26 {dimension_numbers = #tpu.dot_dimension_numbers<[1], [0], [0], [1], [0, 0, 1, 1], [], []>} : vector<288x4xbf16>, vector<4x16xbf16>, vector<288x16xf32> -> vector<288x16xf32>
    %25 = arith.addf %20, %24 : vector<288x16xf32>
    %c19_27 = arith.constant 19 : index
    %c0_28 = arith.constant 0 : index
    %26 = vector.load %arg8[%c19_27, %c0_28] : memref<328x4xbf16, #tpu.memory_space<vmem>>, vector<288x4xbf16>
    %c4 = arith.constant 4 : index
    %c0_29 = arith.constant 0 : index
    %c0_30 = arith.constant 0 : index
    %27 = vector.load %arg3[%c4, %c0_29, %c0_30] : memref<9x4x16xbf16, #tpu.memory_space<vmem>>, vector<1x4x16xbf16>
    %28 = vector.shape_cast %27 : vector<1x4x16xbf16> to vector<4x16xbf16>
    %cst_31 = arith.constant dense<0.000000e+00> : vector<288x16xf32>
    %29 = tpu.matmul %26, %28, %cst_31 {dimension_numbers = #tpu.dot_dimension_numbers<[1], [0], [0], [1], [0, 0, 1, 1], [], []>} : vector<288x4xbf16>, vector<4x16xbf16>, vector<288x16xf32> -> vector<288x16xf32>
    %30 = arith.addf %25, %29 : vector<288x16xf32>
    %c20 = arith.constant 20 : index
    %c0_32 = arith.constant 0 : index
    %31 = vector.load %arg8[%c20, %c0_32] : memref<328x4xbf16, #tpu.memory_space<vmem>>, vector<288x4xbf16>
    %c5 = arith.constant 5 : index
    %c0_33 = arith.constant 0 : index
    %c0_34 = arith.constant 0 : index
    %32 = vector.load %arg3[%c5, %c0_33, %c0_34] : memref<9x4x16xbf16, #tpu.memory_space<vmem>>, vector<1x4x16xbf16>
    %33 = vector.shape_cast %32 : vector<1x4x16xbf16> to vector<4x16xbf16>
    %cst_35 = arith.constant dense<0.000000e+00> : vector<288x16xf32>
    %34 = tpu.matmul %31, %33, %cst_35 {dimension_numbers = #tpu.dot_dimension_numbers<[1], [0], [0], [1], [0, 0, 1, 1], [], []>} : vector<288x4xbf16>, vector<4x16xbf16>, vector<288x16xf32> -> vector<288x16xf32>
    %35 = arith.addf %30, %34 : vector<288x16xf32>
    %c36 = arith.constant 36 : index
    %c0_36 = arith.constant 0 : index
    %36 = vector.load %arg8[%c36, %c0_36] : memref<328x4xbf16, #tpu.memory_space<vmem>>, vector<288x4xbf16>
    %c6 = arith.constant 6 : index
    %c0_37 = arith.constant 0 : index
    %c0_38 = arith.constant 0 : index
    %37 = vector.load %arg3[%c6, %c0_37, %c0_38] : memref<9x4x16xbf16, #tpu.memory_space<vmem>>, vector<1x4x16xbf16>
    %38 = vector.shape_cast %37 : vector<1x4x16xbf16> to vector<4x16xbf16>
    %cst_39 = arith.constant dense<0.000000e+00> : vector<288x16xf32>
    %39 = tpu.matmul %36, %38, %cst_39 {dimension_numbers = #tpu.dot_dimension_numbers<[1], [0], [0], [1], [0, 0, 1, 1], [], []>} : vector<288x4xbf16>, vector<4x16xbf16>, vector<288x16xf32> -> vector<288x16xf32>
    %40 = arith.addf %35, %39 : vector<288x16xf32>
    %c37 = arith.constant 37 : index
    %c0_40 = arith.constant 0 : index
    %41 = vector.load %arg8[%c37, %c0_40] : memref<328x4xbf16, #tpu.memory_space<vmem>>, vector<288x4xbf16>
    %c7 = arith.constant 7 : index
    %c0_41 = arith.constant 0 : index
    %c0_42 = arith.constant 0 : index
    %42 = vector.load %arg3[%c7, %c0_41, %c0_42] : memref<9x4x16xbf16, #tpu.memory_space<vmem>>, vector<1x4x16xbf16>
    %43 = vector.shape_cast %42 : vector<1x4x16xbf16> to vector<4x16xbf16>
    %cst_43 = arith.constant dense<0.000000e+00> : vector<288x16xf32>
    %44 = tpu.matmul %41, %43, %cst_43 {dimension_numbers = #tpu.dot_dimension_numbers<[1], [0], [0], [1], [0, 0, 1, 1], [], []>} : vector<288x4xbf16>, vector<4x16xbf16>, vector<288x16xf32> -> vector<288x16xf32>
    %45 = arith.addf %40, %44 : vector<288x16xf32>
    %c38 = arith.constant 38 : index
    %c0_44 = arith.constant 0 : index
    %46 = vector.load %arg8[%c38, %c0_44] : memref<328x4xbf16, #tpu.memory_space<vmem>>, vector<288x4xbf16>
    %c8 = arith.constant 8 : index
    %c0_45 = arith.constant 0 : index
    %c0_46 = arith.constant 0 : index
    %47 = vector.load %arg3[%c8, %c0_45, %c0_46] : memref<9x4x16xbf16, #tpu.memory_space<vmem>>, vector<1x4x16xbf16>
    %48 = vector.shape_cast %47 : vector<1x4x16xbf16> to vector<4x16xbf16>
    %cst_47 = arith.constant dense<0.000000e+00> : vector<288x16xf32>
    %49 = tpu.matmul %46, %48, %cst_47 {dimension_numbers = #tpu.dot_dimension_numbers<[1], [0], [0], [1], [0, 0, 1, 1], [], []>} : vector<288x4xbf16>, vector<4x16xbf16>, vector<288x16xf32> -> vector<288x16xf32>
    %50 = arith.addf %45, %49 : vector<288x16xf32>
    %c0_48 = arith.constant 0 : index
    %c0_49 = arith.constant 0 : index
    %51 = vector.load %arg4[%c0_48, %c0_49] : memref<1x16xf32, #tpu.memory_space<vmem>>, vector<1x16xf32>
    %52 = vector.broadcast %51 : vector<1x16xf32> to vector<288x16xf32>
    %53 = arith.addf %50, %52 : vector<288x16xf32>
    %cst_50 = arith.constant 0.000000e+00 : f32
    %54 = vector.broadcast %cst_50 : f32 to vector<288x16xf32>
    %55 = arith.maximumf %53, %54 : vector<288x16xf32>
    %c0_51 = arith.constant 0 : index
    %c0_52 = arith.constant 0 : index
    %56 = vector.load %arg2[%c0_51, %c0_52] : memref<288x1xf32, #tpu.memory_space<vmem>>, vector<288x1xf32>
    %57 = vector.broadcast %56 : vector<288x1xf32> to vector<288x16xf32>
    %58 = arith.mulf %55, %57 : vector<288x16xf32>
    %59 = arith.truncf %58 : vector<288x16xf32> to vector<288x16xbf16>
    %cst_53 = arith.constant 0.000000e+00 : bf16
    %60 = vector.broadcast %cst_53 : bf16 to vector<19x16xbf16>
    %c0_54 = arith.constant 0 : index
    %c0_55 = arith.constant 0 : index
    %61 = vector.load %arg9[%c0_54, %c0_55] : memref<328x16xbf16, #tpu.memory_space<vmem>>, vector<19x16xbf16>
    tpu.vector_store %arg9[%c0_54, %c0_55], %60 {strides = array<i32>} : memref<328x16xbf16, #tpu.memory_space<vmem>>, vector<19x16xbf16>,
    %c19_56 = arith.constant 19 : index
    %c0_57 = arith.constant 0 : index
    %62 = vector.load %arg9[%c19_56, %c0_57] : memref<328x16xbf16, #tpu.memory_space<vmem>>, vector<288x16xbf16>
    tpu.vector_store %arg9[%c19_56, %c0_57], %59 {strides = array<i32>} : memref<328x16xbf16, #tpu.memory_space<vmem>>, vector<288x16xbf16>,
    %cst_58 = arith.constant 0.000000e+00 : bf16
    %63 = vector.broadcast %cst_58 : bf16 to vector<21x16xbf16>
    %c307_59 = arith.constant 307 : index
    %c0_60 = arith.constant 0 : index
    %64 = vector.load %arg9[%c307_59, %c0_60] : memref<328x16xbf16, #tpu.memory_space<vmem>>, vector<21x16xbf16>
    tpu.vector_store %arg9[%c307_59, %c0_60], %63 {strides = array<i32>} : memref<328x16xbf16, #tpu.memory_space<vmem>>, vector<21x16xbf16>,
    %c0_61 = arith.constant 0 : index
    %c0_62 = arith.constant 0 : index
    %65 = vector.load %arg9[%c0_61, %c0_62] : memref<328x16xbf16, #tpu.memory_space<vmem>>, vector<288x16xbf16>
    %c0_63 = arith.constant 0 : index
    %c0_64 = arith.constant 0 : index
    %c0_65 = arith.constant 0 : index
    %66 = vector.load %arg5[%c0_63, %c0_64, %c0_65] : memref<9x16x128xbf16, #tpu.memory_space<vmem>>, vector<1x16x128xbf16>
    %67 = vector.shape_cast %66 : vector<1x16x128xbf16> to vector<16x128xbf16>
    %cst_66 = arith.constant dense<0.000000e+00> : vector<288x128xf32>
    %68 = tpu.matmul %65, %67, %cst_66 {dimension_numbers = #tpu.dot_dimension_numbers<[1], [0], [0], [1], [0, 0, 1, 1], [], []>} : vector<288x16xbf16>, vector<16x128xbf16>, vector<288x128xf32> -> vector<288x128xf32>
    %c1_67 = arith.constant 1 : index
    %c0_68 = arith.constant 0 : index
    %69 = vector.load %arg9[%c1_67, %c0_68] : memref<328x16xbf16, #tpu.memory_space<vmem>>, vector<288x16xbf16>
    %c1_69 = arith.constant 1 : index
    %c0_70 = arith.constant 0 : index
    %c0_71 = arith.constant 0 : index
    %70 = vector.load %arg5[%c1_69, %c0_70, %c0_71] : memref<9x16x128xbf16, #tpu.memory_space<vmem>>, vector<1x16x128xbf16>
    %71 = vector.shape_cast %70 : vector<1x16x128xbf16> to vector<16x128xbf16>
    %cst_72 = arith.constant dense<0.000000e+00> : vector<288x128xf32>
    %72 = tpu.matmul %69, %71, %cst_72 {dimension_numbers = #tpu.dot_dimension_numbers<[1], [0], [0], [1], [0, 0, 1, 1], [], []>} : vector<288x16xbf16>, vector<16x128xbf16>, vector<288x128xf32> -> vector<288x128xf32>
    %73 = arith.addf %68, %72 : vector<288x128xf32>
    %c2_73 = arith.constant 2 : index
    %c0_74 = arith.constant 0 : index
    %74 = vector.load %arg9[%c2_73, %c0_74] : memref<328x16xbf16, #tpu.memory_space<vmem>>, vector<288x16xbf16>
    %c2_75 = arith.constant 2 : index
    %c0_76 = arith.constant 0 : index
    %c0_77 = arith.constant 0 : index
    %75 = vector.load %arg5[%c2_75, %c0_76, %c0_77] : memref<9x16x128xbf16, #tpu.memory_space<vmem>>, vector<1x16x128xbf16>
    %76 = vector.shape_cast %75 : vector<1x16x128xbf16> to vector<16x128xbf16>
    %cst_78 = arith.constant dense<0.000000e+00> : vector<288x128xf32>
    %77 = tpu.matmul %74, %76, %cst_78 {dimension_numbers = #tpu.dot_dimension_numbers<[1], [0], [0], [1], [0, 0, 1, 1], [], []>} : vector<288x16xbf16>, vector<16x128xbf16>, vector<288x128xf32> -> vector<288x128xf32>
    %78 = arith.addf %73, %77 : vector<288x128xf32>
    %c18_79 = arith.constant 18 : index
    %c0_80 = arith.constant 0 : index
    %79 = vector.load %arg9[%c18_79, %c0_80] : memref<328x16xbf16, #tpu.memory_space<vmem>>, vector<288x16xbf16>
    %c3_81 = arith.constant 3 : index
    %c0_82 = arith.constant 0 : index
    %c0_83 = arith.constant 0 : index
    %80 = vector.load %arg5[%c3_81, %c0_82, %c0_83] : memref<9x16x128xbf16, #tpu.memory_space<vmem>>, vector<1x16x128xbf16>
    %81 = vector.shape_cast %80 : vector<1x16x128xbf16> to vector<16x128xbf16>
    %cst_84 = arith.constant dense<0.000000e+00> : vector<288x128xf32>
    %82 = tpu.matmul %79, %81, %cst_84 {dimension_numbers = #tpu.dot_dimension_numbers<[1], [0], [0], [1], [0, 0, 1, 1], [], []>} : vector<288x16xbf16>, vector<16x128xbf16>, vector<288x128xf32> -> vector<288x128xf32>
    %83 = arith.addf %78, %82 : vector<288x128xf32>
    %c19_85 = arith.constant 19 : index
    %c0_86 = arith.constant 0 : index
    %84 = vector.load %arg9[%c19_85, %c0_86] : memref<328x16xbf16, #tpu.memory_space<vmem>>, vector<288x16xbf16>
    %c4_87 = arith.constant 4 : index
    %c0_88 = arith.constant 0 : index
    %c0_89 = arith.constant 0 : index
    %85 = vector.load %arg5[%c4_87, %c0_88, %c0_89] : memref<9x16x128xbf16, #tpu.memory_space<vmem>>, vector<1x16x128xbf16>
    %86 = vector.shape_cast %85 : vector<1x16x128xbf16> to vector<16x128xbf16>
    %cst_90 = arith.constant dense<0.000000e+00> : vector<288x128xf32>
    %87 = tpu.matmul %84, %86, %cst_90 {dimension_numbers = #tpu.dot_dimension_numbers<[1], [0], [0], [1], [0, 0, 1, 1], [], []>} : vector<288x16xbf16>, vector<16x128xbf16>, vector<288x128xf32> -> vector<288x128xf32>
    %88 = arith.addf %83, %87 : vector<288x128xf32>
    %c20_91 = arith.constant 20 : index
    %c0_92 = arith.constant 0 : index
    %89 = vector.load %arg9[%c20_91, %c0_92] : memref<328x16xbf16, #tpu.memory_space<vmem>>, vector<288x16xbf16>
    %c5_93 = arith.constant 5 : index
    %c0_94 = arith.constant 0 : index
    %c0_95 = arith.constant 0 : index
    %90 = vector.load %arg5[%c5_93, %c0_94, %c0_95] : memref<9x16x128xbf16, #tpu.memory_space<vmem>>, vector<1x16x128xbf16>
    %91 = vector.shape_cast %90 : vector<1x16x128xbf16> to vector<16x128xbf16>
    %cst_96 = arith.constant dense<0.000000e+00> : vector<288x128xf32>
    %92 = tpu.matmul %89, %91, %cst_96 {dimension_numbers = #tpu.dot_dimension_numbers<[1], [0], [0], [1], [0, 0, 1, 1], [], []>} : vector<288x16xbf16>, vector<16x128xbf16>, vector<288x128xf32> -> vector<288x128xf32>
    %93 = arith.addf %88, %92 : vector<288x128xf32>
    %c36_97 = arith.constant 36 : index
    %c0_98 = arith.constant 0 : index
    %94 = vector.load %arg9[%c36_97, %c0_98] : memref<328x16xbf16, #tpu.memory_space<vmem>>, vector<288x16xbf16>
    %c6_99 = arith.constant 6 : index
    %c0_100 = arith.constant 0 : index
    %c0_101 = arith.constant 0 : index
    %95 = vector.load %arg5[%c6_99, %c0_100, %c0_101] : memref<9x16x128xbf16, #tpu.memory_space<vmem>>, vector<1x16x128xbf16>
    %96 = vector.shape_cast %95 : vector<1x16x128xbf16> to vector<16x128xbf16>
    %cst_102 = arith.constant dense<0.000000e+00> : vector<288x128xf32>
    %97 = tpu.matmul %94, %96, %cst_102 {dimension_numbers = #tpu.dot_dimension_numbers<[1], [0], [0], [1], [0, 0, 1, 1], [], []>} : vector<288x16xbf16>, vector<16x128xbf16>, vector<288x128xf32> -> vector<288x128xf32>
    %98 = arith.addf %93, %97 : vector<288x128xf32>
    %c37_103 = arith.constant 37 : index
    %c0_104 = arith.constant 0 : index
    %99 = vector.load %arg9[%c37_103, %c0_104] : memref<328x16xbf16, #tpu.memory_space<vmem>>, vector<288x16xbf16>
    %c7_105 = arith.constant 7 : index
    %c0_106 = arith.constant 0 : index
    %c0_107 = arith.constant 0 : index
    %100 = vector.load %arg5[%c7_105, %c0_106, %c0_107] : memref<9x16x128xbf16, #tpu.memory_space<vmem>>, vector<1x16x128xbf16>
    %101 = vector.shape_cast %100 : vector<1x16x128xbf16> to vector<16x128xbf16>
    %cst_108 = arith.constant dense<0.000000e+00> : vector<288x128xf32>
    %102 = tpu.matmul %99, %101, %cst_108 {dimension_numbers = #tpu.dot_dimension_numbers<[1], [0], [0], [1], [0, 0, 1, 1], [], []>} : vector<288x16xbf16>, vector<16x128xbf16>, vector<288x128xf32> -> vector<288x128xf32>
    %103 = arith.addf %98, %102 : vector<288x128xf32>
    %c38_109 = arith.constant 38 : index
    %c0_110 = arith.constant 0 : index
    %104 = vector.load %arg9[%c38_109, %c0_110] : memref<328x16xbf16, #tpu.memory_space<vmem>>, vector<288x16xbf16>
    %c8_111 = arith.constant 8 : index
    %c0_112 = arith.constant 0 : index
    %c0_113 = arith.constant 0 : index
    %105 = vector.load %arg5[%c8_111, %c0_112, %c0_113] : memref<9x16x128xbf16, #tpu.memory_space<vmem>>, vector<1x16x128xbf16>
    %106 = vector.shape_cast %105 : vector<1x16x128xbf16> to vector<16x128xbf16>
    %cst_114 = arith.constant dense<0.000000e+00> : vector<288x128xf32>
    %107 = tpu.matmul %104, %106, %cst_114 {dimension_numbers = #tpu.dot_dimension_numbers<[1], [0], [0], [1], [0, 0, 1, 1], [], []>} : vector<288x16xbf16>, vector<16x128xbf16>, vector<288x128xf32> -> vector<288x128xf32>
    %108 = arith.addf %103, %107 : vector<288x128xf32>
    %c0_115 = arith.constant 0 : index
    %c0_116 = arith.constant 0 : index
    %109 = vector.load %arg6[%c0_115, %c0_116] : memref<1x128xf32, #tpu.memory_space<vmem>>, vector<1x128xf32>
    %110 = vector.broadcast %109 : vector<1x128xf32> to vector<288x128xf32>
    %111 = arith.addf %108, %110 : vector<288x128xf32>
    %cst_117 = arith.constant 0.000000e+00 : f32
    %112 = vector.broadcast %cst_117 : f32 to vector<288x128xf32>
    %113 = arith.maximumf %111, %112 : vector<288x128xf32>
    %114 = arith.truncf %113 : vector<288x128xf32> to vector<288x128xbf16>
    %c0_118 = arith.constant 0 : index
    %c0_119 = arith.constant 0 : index
    %c0_120 = arith.constant 0 : index
    %115 = vector.load %arg7[%c0_118, %c0_119, %c0_120] : memref<1x288x128xbf16, #tpu.memory_space<vmem>>, vector<1x288x128xbf16>
    %116 = vector.shape_cast %115 : vector<1x288x128xbf16> to vector<288x128xbf16>
    %117 = vector.shape_cast %114 : vector<288x128xbf16> to vector<1x288x128xbf16>
    tpu.vector_store %arg7[%c0_118, %c0_119, %c0_120], %117 {strides = array<i32>} : memref<1x288x128xbf16, #tpu.memory_space<vmem>>, vector<1x288x128xbf16>,
    return
  }
  func.func @transform_0(%arg0: i32) -> (i32, i32, i32) {
    %c0_i32 = arith.constant 0 : i32
    %c0_i32_0 = arith.constant 0 : i32
    %c0_i32_1 = arith.constant 0 : i32
    return %arg0, %c0_i32, %c0_i32_0 : i32, i32, i32
  }
  func.func @transform_1(%arg0: i32) -> (i32, i32) {
    %c0_i32 = arith.constant 0 : i32
    %c0_i32_0 = arith.constant 0 : i32
    %c0_i32_1 = arith.constant 0 : i32
    return %c0_i32, %c0_i32_0 : i32, i32
  }
  func.func @transform_2(%arg0: i32) -> (i32, i32, i32) {
    %c0_i32 = arith.constant 0 : i32
    %c0_i32_0 = arith.constant 0 : i32
    %c0_i32_1 = arith.constant 0 : i32
    %c0_i32_2 = arith.constant 0 : i32
    return %c0_i32, %c0_i32_0, %c0_i32_1 : i32, i32, i32
  }
  func.func @transform_3(%arg0: i32) -> (i32, i32) {
    %c0_i32 = arith.constant 0 : i32
    %c0_i32_0 = arith.constant 0 : i32
    %c0_i32_1 = arith.constant 0 : i32
    return %c0_i32, %c0_i32_0 : i32, i32
  }
  func.func @transform_4(%arg0: i32) -> (i32, i32, i32) {
    %c0_i32 = arith.constant 0 : i32
    %c0_i32_0 = arith.constant 0 : i32
    %c0_i32_1 = arith.constant 0 : i32
    %c0_i32_2 = arith.constant 0 : i32
    return %c0_i32, %c0_i32_0, %c0_i32_1 : i32, i32, i32
  }
  func.func @transform_5(%arg0: i32) -> (i32, i32) {
    %c0_i32 = arith.constant 0 : i32
    %c0_i32_0 = arith.constant 0 : i32
    %c0_i32_1 = arith.constant 0 : i32
    return %c0_i32, %c0_i32_0 : i32, i32
  }
  func.func @transform_6(%arg0: i32) -> (i32, i32, i32) {
    %c0_i32 = arith.constant 0 : i32
    %c0_i32_0 = arith.constant 0 : i32
    %c0_i32_1 = arith.constant 0 : i32
    return %arg0, %c0_i32, %c0_i32_0 : i32, i32, i32
  }
}

</mosaic_0001>

<bundles_post_ra>
// kernel: tpu_custom_call.1
= control target key start
LH: loop header
LB: loop body
LE: loop exit
PB: predicated region body
PF: predicated region fallthrough
CT: control target
= control target key end

     0   :  { %11 = vsyncpa [#allocation5], 0  ;;  %s14925_s0 = inlined_call_operand.vmem [shape: bf16[2,288,4], index: 0, kind: input, shape index: {}]   ;;  %s14926_s1 = inlined_call_operand.vmem [shape: f32[288,1], index: 1, kind: input, shape index: {}]   ;;  %s14927_s2 = inlined_call_operand.vmem [shape: bf16[9,4,16], index: 2, kind: input, shape index: {}]   ;;  %s14928_s3 = inlined_call_operand.vmem [shape: f32[1,16], index: 3, kind: input, shape index: {}]   ;;  %s14929_s4 = inlined_call_operand.vmem [shape: bf16[9,16,128], index: 4, kind: input, shape index: {}]   ;;  %s14930_s5 = inlined_call_operand.vmem [shape: f32[1,128], index: 5, kind: input, shape index: {}]   ;;  %s14931_s6 = inlined_call_operand.hbm [shape: bf16[2,288,128], index: 6, kind: output, shape index: {}]  }
   0x1   :  { %13 = vsyncpa [#allocation5 + $0x1], 0  ;;  %s10958_s21 = smov 0   ;;  %s10960_s22 = smov 0  }
   0x2   :  { %s10962_s23 = smov 0   ;;  %s10964_s24 = smov 0  }
   0x3 LB: > { %s10979_s25 = sadd.s32 4294967295, %s10917_s24   ;;  %s8894_s26 = sadd.s32 4294967294, %s10917_s24   ;;  %s10917_s24 = sphi %s10964_s24, %s15160_s24   ;;  %s10913_s23 = sphi %s10962_s23, %s15159_s23   ;;  %s10909_s22 = sphi %s10960_s22, %s15158_s22   ;;  %s10905_s21 = sphi %s10958_s21, %s15157_s21  }
   0x4   : > { %s10983_s27 = sadd.s32 1, %s10917_s24   ;;  %s157_s28 = sadd.s32 1, %s10913_s23 }
   0x5   : > { %s154_s29 = ssub.s32 %s10917_s24, %s10983_s27  ;;  %p167_p0 = scmp.ne.s32.totalorder %s10913_s23, %s10909_s22 }
   0x6   : > { %p155_p1 = scmp.eq.s32.totalorder %s154_s29, 0  ;;  %p168_p2 = scmp.eq.s32.totalorder %s10979_s25, 1 }
   0x7   : > { %p173_p3 = scmp.ne.s32.totalorder %s10909_s22, %s10905_s21  ;;  %p174_p4 = scmp.eq.s32.totalorder %s8894_s26, 1 }
   0x8   : > { %s10994_s30 = scalar_select %p155_p1, %s10913_s23, %s157_s28  }
   0x9   : > { %p10996_p5 = por %p168_p2, %p167_p0  ;;  %p11000_p6 = por %p174_p4, %p173_p3 }
   0xa   : > { %p8897_p7 = scmp.ge.s32.totalorder %s10917_s24, 1  ;;  %p215_p8 = scmp.lt.s32.totalorder %s10917_s24, 3 }
   0xc   : > { %p216_p9 = pnand %p8897_p7, %p215_p8 }
   0xe   : > { %219 = sbr.rel (%p216_p9) target bundleno = 1212 (0x4bc), region = 44 }
  0x13   : > { %v8899_v0 = vld [vmem:[%s14927_s2 + $0x2] sm:$0x3]  ;;  %vm1080_vm0 = vcmask 1041408   ;;  %v779_v1 = vld [vmem:[%s14927_s2] sm:$0x3]  ;;  %p245_p10 = scmp.lt.s32.totalorder %s10979_s25, 1 }
  0x14   : > { %10662 = vmatprep.subr.msk.bf16.mxu0 %vm1080_vm0, %v8899_v0  ;;  %v1082_v2 = vsel %vm1080_vm0, %v8899_v0, 0  ;;  %10663 = vmatprep.subr.msk.bf16.mxu1 %vm1080_vm0, %v779_v1  ;;  %v1298_v3 = vsel %vm1080_vm0, %v779_v1, 0  ;;  %vm251_vm1 = vcmask 27648   ;;  %v257_v4 = vld [vmem:[#allocation2 + $0x8] sm:$0x3]  ;;  %v14932_v5 = vmov 0  }
  0x15   : > { %9979 = vmatpush3.bf16.msra.mxu0 %v1082_v2  ;;  %10017 = vmatpush3.bf16.msra.mxu1 %v1298_v3  ;;  %s246_s13 = scalar_select %p245_p10, %s10979_s25, 1  ;;  %252 = vst.msk [vmem:[#allocation2] sm:$0xf] %vm251_vm1, %v14932_v5  ;;  %253 = vst.msk [vmem:[#allocation2 + $0x4] sm:$0xf] %vm251_vm1, %v14932_v5  ;;  %vm254_vm2 = vcmask 25600  }
  0x16   : > { %vm255_vm3 = vsmask.f32 1280  ;;  %741 = vst.msk [vmem:[#allocation2 + $0x9c] sm:$0xf] %vm251_vm1, %v14932_v5  ;;  %742 = vst.msk [vmem:[#allocation2 + $0xa0] sm:$0xf] %vm251_vm1, %v14932_v5  ;;  %10716 = vset.pattern.permute.xlu0 %v14932_v5  ;;  %10717 = vset.pattern.permute.xlu1 %v14932_v5 }
  0x17   : > { %vm11027_vm4 = vmand %vm254_vm2, %vm255_vm3  ;;  %s10672_s14 = smul.u32 144, %s246_s13  ;;  %v8955_v8 = vld [vmem:[%s14927_s2 + $0x4] sm:$0x3]  ;;  %v8975_v9 = vld [vmem:[%s14927_s2 + $0x6] sm:$0x3]  ;;  %vm694_vm6 = vcmask 27649  }
  0x18   : > { %v258_v7 = vsel %vm11027_vm4, 0, %v257_v4  ;;  %vm296_vm5 = vsmask.f32 5392  ;;  %vm695_vm7 = vsmask.f32 7942  ;;  %10664 = vmatprep.subr.msk.bf16.mxu0 %vm1080_vm0, %v8955_v8  ;;  %10665 = vmatprep.subr.msk.bf16.mxu1 %vm1080_vm0, %v8975_v9  ;;  %vm1025_vm8 = vcmask 31744  }
  0x19   : > { %259 = vst [vmem:[#allocation2 + $0x8] sm:$0x3] %v258_v7  ;;  %s11046_s26 = scalar_lea.vmem %s14925_s0, %s10672_s14  ;;  %v11049_v10 = vsel %vm1080_vm0, %v8955_v8, 0  ;;  %vm11060_vm9 = vmand %vm694_vm6, %vm695_vm7  ;;  %v14956_v38 = vmov 0  ;;  %v11078_v43 = vsel %vm1080_vm0, %v8975_v9, 0  ;;  %vm1483_vm12 = vcmask 1046528  }
  0x1a   : > { %v260_v11 = vld [vmem:[%s11046_s26] sm:$0xf]  ;;  %v261_v12 = vld [vmem:[%s11046_s26 + $0x4] sm:$0xf]  ;;  %v262_v13 = vld [vmem:[%s11046_s26 + $0x8] sm:$0xf] }
  0x1b   : > { %v299_v14 = vshrl.u32 %v260_v11, 16  ;;  %v302_v15 = vshll.u32 %v260_v11, 16  ;;  %v308_v16 = vshrl.u32 %v261_v12, 16  ;;  %v311_v17 = vshll.u32 %v261_v12, 16  ;;  %v263_v18 = vld [vmem:[%s11046_s26 + $0xc] sm:$0xf]  ;;  %vm11069_vm10 = vmor %vm255_vm3, %vm296_vm5 }
  0x1c   : > { %v743_v19 = vld [vmem:[#allocation2] sm:$0xf]  ;;  %v11055_v20 = vld [vmem:[#allocation2 + $0x4] sm:$0xf]  ;;  %v318_v21 = vshrl.u32 %v262_v13, 16  ;;  %v321_v22 = vshll.u32 %v262_v13, 16 }
  0x1d   : > { %v301_v23 = vrot.slane %v299_v14, 6  ;;  %v304_v24 = vrot.slane %v302_v15, 7  ;;  %v310_v25 = vrot.slane %v308_v16, 6  ;;  %v313_v26 = vrot.slane %v311_v17, 7  ;;  %v264_v27 = vld [vmem:[%s11046_s26 + $0x10] sm:$0xf] }
  0x1e   : > { %v11065_v29 = vcombine.low %v743_v19, %v11055_v20  ;;  %v320_v30 = vrot.slane %v318_v21, 6  ;;  %v323_v31 = vrot.slane %v321_v22, 7  ;;  %v328_v32 = vshrl.u32 %v263_v18, 16  ;;  %v265_v42 = vld [vmem:[%s11046_s26 + $0x14] sm:$0xf]  ;;  %s242_s10 = sand.u32 1, %s10909_s22  }
  0x1f   : > { %v305_v33 = vor.u32 %v304_v24, %v301_v23  ;;  %v314_v34 = vor.u32 %v313_v26, %v310_v25  ;;  %v331_v36 = vshll.u32 %v263_v18, 16  ;;  %v338_v37 = vshrl.u32 %v264_v27, 16  ;;  %v266_v48 = vld [vmem:[%s11046_s26 + $0x18] sm:$0xf]  ;;  %v267_v57 = vld [vmem:[%s11046_s26 + $0x1c] sm:$0xf] }
  0x20   : > { %v697_v35 = vld [vmem:[#allocation2 + $0x8] sm:$0xe]  ;;  %v14957_v38 = vsel %vm11069_vm10, 4294967295, %v14956_v38  ;;  %v880_v39 = vshll.u32 %v11065_v29, 16  ;;  %10018 = vmatprep.mubr.msk.bf16.mxu1 %vm1025_vm8, %v11065_v29  ;;  %v324_v40 = vor.u32 %v323_v31, %v320_v30  ;;  %v330_v41 = vrot.slane %v328_v32, 6  ;;  %s10671_s11 = smul.u32 144, %s242_s10 }
  0x21   : > { %14958 = vst [vmem:[#allocation7_spill] sm:$0xff] %v14957_v38  ;;  %v306_v44 = vrot.slane %v305_v33, 4  ;;  %v316_v45 = vrot.slane %v314_v34, 4  ;;  %v698_v46 = vsel %vm11060_vm9, %v305_v33, %v697_v35  ;;  %v333_v47 = vrot.slane %v331_v36, 7  ;;  %v268_v62 = vld [vmem:[%s11046_s26 + $0x20] sm:$0xf] }
  0x22   : > { %699 = vst [vmem:[#allocation2 + $0x8] sm:$0xe] %v698_v46  ;;  %v878_v49 = vshrl.u32 %v11065_v29, 16  ;;  %v326_v50 = vrot.slane %v324_v40, 4  ;;  %v340_v51 = vrot.slane %v338_v37, 6  ;;  %v341_v52 = vshll.u32 %v264_v27, 16 }
  0x23   : > { %v315_v53 = vsel %vm11069_vm10, %v306_v44, %v314_v34  ;;  %v325_v54 = vsel %vm11069_vm10, %v316_v45, %v324_v40  ;;  %v334_v55 = vor.u32 %v333_v47, %v330_v41  ;;  %v348_v56 = vshrl.u32 %v265_v42, 16  ;;  %v269_v12 = vld [vmem:[%s11046_s26 + $0x24] sm:$0xf]  ;;  %v270_v19 = vld [vmem:[%s11046_s26 + $0x28] sm:$0xf]  ;;  %s14766_s12 = scalar_lea.vmem [#allocation4], %s10671_s11 }
  0x24   : > { %700 = vst.msk [vmem:[#allocation2 + $0xc] sm:$0xf] %vm251_vm1, %v315_v53  ;;  %v882_v58 = vrot.slane %v880_v39, 1  ;;  %701 = vst.msk [vmem:[#allocation2 + $0x10] sm:$0xf] %vm251_vm1, %v325_v54  ;;  %v343_v59 = vrot.slane %v341_v52, 7 }
  0x25   : > { %v351_v60 = vshll.u32 %v265_v42, 16  ;;  %v358_v61 = vshrl.u32 %v266_v48, 16  ;;  %v335_v63 = vsel %vm11069_vm10, %v326_v50, %v334_v55  ;;  %v336_v0 = vrot.slane %v334_v55, 4  ;;  %v271_v39 = vld [vmem:[%s11046_s26 + $0x2c] sm:$0xf]  ;;  %s10673_s13 = smul.u32 2304, %s10979_s25 }
  0x26   : > { %v350_v1 = vrot.slane %v348_v56, 6  ;;  %v361_v2 = vshll.u32 %v266_v48, 16  ;;  %vm876_vm11 = vsmask.f32 7424  ;;  %702 = vst.msk [vmem:[#allocation2 + $0x14] sm:$0xf] %vm251_vm1, %v335_v63  ;;  %v344_v3 = vor.u32 %v343_v59, %v340_v51 }
  0x27   : > { %v353_v4 = vrot.slane %v351_v60, 7  ;;  %v360_v7 = vrot.slane %v358_v61, 6  ;;  %v368_v8 = vshrl.u32 %v267_v57, 16  ;;  %v371_v11 = vshll.u32 %v267_v57, 16  ;;  %v272_v51 = vld [vmem:[%s11046_s26 + $0x30] sm:$0xf]  ;;  %s14880_s17 = scalar_lea.hbm %s14931_s6, %s10673_s13 }
  0x28   : > { %v363_v9 = vrot.slane %v361_v2, 7  ;;  %v378_v13 = vshrl.u32 %v268_v62, 16  ;;  %v381_v14 = vshll.u32 %v268_v62, 16  ;;  %v345_v15 = vsel %vm11069_vm10, %v336_v0, %v344_v3  ;;  %v273_v56 = vld [vmem:[%s11046_s26 + $0x34] sm:$0xf]  ;;  %s8832_s14 = sshll.u32 %s14766_s12, 4  ;;  %s14874_s14 = int_to_ptr.vmem [resolvable:$true] %s8832_s14 }
  0x29   : > { %v346_v16 = vrot.slane %v344_v3, 4  ;;  %v354_v17 = vor.u32 %v353_v4, %v350_v1  ;;  %v370_v18 = vrot.slane %v368_v8, 6  ;;  %703 = vst.msk [vmem:[#allocation2 + $0x18] sm:$0xf] %vm251_vm1, %v345_v15  ;;  %v373_v22 = vrot.slane %v371_v11, 7  ;;  %s14885_s18 = scalar_lea.sflag [#allocation5], %s242_s10 }
  0x2a   : > { %v364_v21 = vor.u32 %v363_v9, %v360_v7  ;;  %v380_v23 = vrot.slane %v378_v13, 6  ;;  %v383_v24 = vrot.slane %v381_v14, 7  ;;  %v388_v27 = vshrl.u32 %v269_v12, 16  ;;  %v11140_v13 = vld [vmem:[%s14927_s2 + $0x8] sm:$0x3]  ;;  %s10857_s25 = scalar_lea.vmem %s14874_s14, 2304 }
  0x2b   : > { %v355_v25 = vsel %vm11069_vm10, %v346_v16, %v354_v17  ;;  %v356_v26 = vrot.slane %v354_v17, 4  ;;  %v391_v29 = vshll.u32 %v269_v12, 16  ;;  %v11102_v30 = vld [vmem:[#allocation2 + $0x8] sm:$0xff]   ;;  %v883_v31 = vor.u32 %v882_v58, %v878_v49  ;;  %v274_v12 = vld [vmem:[%s11046_s26 + $0x38] sm:$0xf]  ;;  %p10858_p11 = scmp.ne.s32.totalorder %s14874_s14, %s10857_s25  ;;  %s10920_s19 = smov [#allocation4]  }
  0x2c   : > { %704 = vst.msk [vmem:[#allocation2 + $0x1c] sm:$0xf] %vm251_vm1, %v355_v25  ;;  %v366_v32 = vrot.slane %v364_v21, 4  ;;  %v374_v33 = vor.u32 %v373_v22, %v370_v18  ;;  %v384_v34 = vor.u32 %v383_v24, %v380_v23  ;;  %v390_v36 = vrot.slane %v388_v27, 6  ;;  %10019 = vmatmul.mubr.msk.bf16.vlgmr.msra.gmra.mxu1 %vm1025_vm8, %v11102_v30  ;;  %s10861_s20 = sshll.u32 %s10920_s19, 4  ;;  %s10862_s20 = int_to_ptr.vmem [resolvable:$false] %s10861_s20 }
  0x2d   : > { %v365_v35 = vsel %vm11069_vm10, %v356_v26, %v364_v21  ;;  %v393_v37 = vrot.slane %v391_v29, 7  ;;  %v398_v40 = vshrl.u32 %v270_v19, 16  ;;  %v885_v41 = vshll.u32 %v11102_v30, 16  ;;  %v11110_v44 = vld [vmem:[#allocation2 + $0x10] sm:$0xff]   ;;  %10093 = vmatpush3.bf16.msra.mxu1 %v11078_v43  ;;  %v275_v26 = vld [vmem:[%s11046_s26 + $0x3c] sm:$0xf]  ;;  %p10859_p12 = pnand %p10858_p11, %p10996_p5  ;;  %p10864_p0 = scmp.lt.s32.totalorder %s14874_s14, %s10862_s20 }
  0x2e   : > { %v889_v42 = vshrl.u32 %v11102_v30, 16  ;;  %v375_v45 = vsel %vm11069_vm10, %v366_v32, %v374_v33  ;;  %705 = vst.msk [vmem:[#allocation2 + $0x20] sm:$0xf] %vm251_vm1, %v365_v35  ;;  %v376_v46 = vrot.slane %v374_v33, 4  ;;  %v386_v47 = vrot.slane %v384_v34, 4  ;;  %10022 = vmatprep.mubr.msk.bf16.mxu1 %vm1025_vm8, %v11110_v44 }
  0x2f   : > { %706 = vst.msk [vmem:[#allocation2 + $0x24] sm:$0xf] %vm251_vm1, %v375_v45  ;;  %v394_v48 = vor.u32 %v393_v37, %v390_v36  ;;  %v400_v49 = vrot.slane %v398_v40, 6  ;;  %v401_v50 = vshll.u32 %v270_v19, 16  ;;  %v887_v52 = vrot.slane %v885_v41, 1  ;;  %p10860_p13 = pneg %p10859_p12 }
  0x30   : > { %v893_v53 = vshll.u32 %v11110_v44, 16  ;;  %v897_v54 = vshrl.u32 %v11110_v44, 16  ;;  %v385_v55 = vsel %vm11069_vm10, %v376_v46, %v384_v34  ;;  %v408_v43 = vshrl.u32 %v271_v39, 16  ;;  %v276_v46 = vld [vmem:[%s11046_s26 + $0x40] sm:$0xf] }
  0x31   : > { %v395_v57 = vsel %vm11069_vm10, %v386_v47, %v394_v48  ;;  %707 = vst.msk [vmem:[#allocation2 + $0x28] sm:$0xf] %vm251_vm1, %v385_v55  ;;  %v396_v58 = vrot.slane %v394_v48, 4  ;;  %v403_v59 = vrot.slane %v401_v50, 7  ;;  %v888_v60 = vsel %vm876_vm11, %v883_v31, %v887_v52  ;;  %v277_v55 = vld [vmem:[%s11046_s26 + $0x44] sm:$0xf] }
  0x32   : > { %v891_v61 = vor.u32 %v889_v42, %v887_v52  ;;  %v895_v62 = vrot.slane %v893_v53, 1  ;;  %708 = vst.msk [vmem:[#allocation2 + $0x2c] sm:$0xf] %vm251_vm1, %v395_v57  ;;  %v411_v63 = vshll.u32 %v271_v39, 16  ;;  %9980 = vmatprep.mubr.msk.bf16.mxu0 %vm1025_vm8, %v888_v60  ;;  %v410_v2 = vrot.slane %v408_v43, 6 }
  0x33   : > { %v11133_v0 = vld [vmem:[#allocation2 + $0x18] sm:$0xff]   ;;  %v404_v1 = vor.u32 %v403_v59, %v400_v49  ;;  %v418_v3 = vshrl.u32 %v272_v51, 16  ;;  %v421_v4 = vshll.u32 %v272_v51, 16  ;;  %v428_v11 = vshrl.u32 %v273_v56, 16 }
  0x34   : > { %v896_v7 = vsel %vm876_vm11, %v891_v61, %v895_v62  ;;  %v899_v8 = vor.u32 %v897_v54, %v895_v62  ;;  %v413_v9 = vrot.slane %v411_v63, 7  ;;  %v901_v14 = vshll.u32 %v11133_v0, 16  ;;  %10023 = vmatmul.mubr.msk.bf16.gmra.mxu1 %vm1025_vm8, %v11133_v0 }
  0x35   : > { %9981 = vmatmul.mubr.msk.bf16.vlgmr.msra.gmra.mxu0 %vm1025_vm8, %v896_v7  ;;  %v905_v15 = vshrl.u32 %v11133_v0, 16  ;;  %v405_v16 = vsel %vm11069_vm10, %v396_v58, %v404_v1  ;;  %v406_v17 = vrot.slane %v404_v1, 4  ;;  %v420_v21 = vrot.slane %v418_v3, 6  ;;  %v279_v1 = vld [vmem:[%s11046_s26 + $0x4c] sm:$0xf] }
  0x36   : > { %10055 = vmatpush3.bf16.msra.mxu0 %v11049_v10  ;;  %v11148_v18 = vld [vmem:[#allocation2 + $0x20] sm:$0xff]   ;;  %v414_v19 = vor.u32 %v413_v9, %v410_v2  ;;  %709 = vst.msk [vmem:[#allocation2 + $0x30] sm:$0xf] %vm251_vm1, %v405_v16  ;;  %v423_v22 = vrot.slane %v421_v4, 7  ;;  %v430_v23 = vrot.slane %v428_v11, 6  ;;  %v903_v24 = vrot.slane %v901_v14, 1 }
  0x37   : > { %v431_v25 = vshll.u32 %v273_v56, 16  ;;  %v438_v27 = vshrl.u32 %v274_v12, 16  ;;  %v441_v29 = vshll.u32 %v274_v12, 16  ;;  %10666 = vmatprep.subr.msk.bf16.mxu0 %vm1080_vm0, %v11140_v13  ;;  %v909_v10 = vshll.u32 %v11148_v18, 16  ;;  %10026 = vmatprep.mubr.msk.bf16.mxu1 %vm1025_vm8, %v11148_v18  ;;  %v278_v56 = vld [vmem:[%s11046_s26 + $0x48] sm:$0xf] }
  0x38   : > { %v913_v31 = vshrl.u32 %v11148_v18, 16  ;;  %v415_v32 = vsel %vm11069_vm10, %v406_v17, %v414_v19  ;;  %v416_v33 = vrot.slane %v414_v19, 4  ;;  %v904_v34 = vsel %vm876_vm11, %v899_v8, %v903_v24 }
  0x39   : > { %v907_v35 = vor.u32 %v905_v15, %v903_v24  ;;  %v11163_v36 = vld [vmem:[#allocation2 + $0x28] sm:$0xff]   ;;  %710 = vst.msk [vmem:[#allocation2 + $0x34] sm:$0xf] %vm251_vm1, %v415_v32  ;;  %v424_v37 = vor.u32 %v423_v22, %v420_v21  ;;  %v433_v39 = vrot.slane %v431_v25, 7  ;;  %9984 = vmatprep.mubr.msk.bf16.mxu0 %vm1025_vm8, %v904_v34  ;;  %v911_v40 = vrot.slane %v909_v10, 1 }
  0x3a   : > { %v440_v41 = vrot.slane %v438_v27, 6  ;;  %v443_v42 = vrot.slane %v441_v29, 7  ;;  %v448_v45 = vshrl.u32 %v275_v26, 16  ;;  %v917_v47 = vshll.u32 %v11163_v36, 16  ;;  %v280_v25 = vld [vmem:[%s11046_s26 + $0x50] sm:$0xf] }
  0x3b   : > { %v921_v48 = vshrl.u32 %v11163_v36, 16  ;;  %v425_v49 = vsel %vm11069_vm10, %v416_v33, %v424_v37  ;;  %v426_v50 = vrot.slane %v424_v37, 4  ;;  %v912_v51 = vsel %vm876_vm11, %v907_v35, %v911_v40  ;;  %v281_v35 = vld [vmem:[%s11046_s26 + $0x54] sm:$0xf] }
  0x3c   : > { %v915_v52 = vor.u32 %v913_v31, %v911_v40  ;;  %v434_v53 = vor.u32 %v433_v39, %v430_v23  ;;  %711 = vst.msk [vmem:[#allocation2 + $0x38] sm:$0xf] %vm251_vm1, %v425_v49  ;;  %v444_v54 = vor.u32 %v443_v42, %v440_v41  ;;  %v919_v57 = vrot.slane %v917_v47, 1  ;;  %10027 = vmatmul.mubr.msk.bf16.gmra.mxu1 %vm1025_vm8, %v11163_v36  ;;  %v282_v42 = vld [vmem:[%s11046_s26 + $0x58] sm:$0xf] }
  0x3d   : > { %9985 = vmatmul.mubr.msk.bf16.gmra.mxu0 %vm1025_vm8, %v912_v51  ;;  %v450_v58 = vrot.slane %v448_v45, 6  ;;  %v451_v59 = vshll.u32 %v275_v26, 16  ;;  %v458_v43 = vshrl.u32 %v276_v46, 16  ;;  %v461_v63 = vshll.u32 %v276_v46, 16 }
  0x3e   : > { %v435_v60 = vsel %vm11069_vm10, %v426_v50, %v434_v53  ;;  %v436_v61 = vrot.slane %v434_v53, 4  ;;  %v446_v62 = vrot.slane %v444_v54, 4  ;;  %v920_v2 = vsel %vm876_vm11, %v915_v52, %v919_v57 }
  0x3f   : > { %v923_v3 = vor.u32 %v921_v48, %v919_v57  ;;  %712 = vst.msk [vmem:[#allocation2 + $0x3c] sm:$0xf] %vm251_vm1, %v435_v60  ;;  %v453_v4 = vrot.slane %v451_v59, 7  ;;  %v460_v7 = vrot.slane %v458_v43, 6  ;;  %9988 = vmatprep.mubr.msk.bf16.mxu0 %vm1025_vm8, %v920_v2  ;;  %v463_v11 = vrot.slane %v461_v63, 7 }
  0x40   : > { %v11185_v8 = vld [vmem:[#allocation2 + $0x30] sm:$0xff]   ;;  %v445_v9 = vsel %vm11069_vm10, %v436_v61, %v444_v54  ;;  %v468_v12 = vshrl.u32 %v277_v55, 16  ;;  %v471_v14 = vshll.u32 %v277_v55, 16  ;;  %v478_v16 = vshrl.u32 %v278_v56, 16  ;;  %v283_v61 = vld [vmem:[%s11046_s26 + $0x5c] sm:$0xf] }
  0x41   : > { %v454_v15 = vor.u32 %v453_v4, %v450_v58  ;;  %713 = vst.msk [vmem:[#allocation2 + $0x40] sm:$0xf] %vm251_vm1, %v445_v9  ;;  %v481_v17 = vshll.u32 %v278_v56, 16  ;;  %v488_v19 = vshrl.u32 %v279_v1, 16  ;;  %v925_v21 = vshll.u32 %v11185_v8, 16  ;;  %10030 = vmatprep.mubr.msk.bf16.mxu1 %vm1025_vm8, %v11185_v8 }
  0x42   : > { %v929_v22 = vshrl.u32 %v11185_v8, 16  ;;  %v464_v23 = vor.u32 %v463_v11, %v460_v7  ;;  %v470_v24 = vrot.slane %v468_v12, 6  ;;  %v473_v29 = vrot.slane %v471_v14, 7 }
  0x43   : > { %v455_v26 = vsel %vm11069_vm10, %v446_v62, %v454_v15  ;;  %v456_v27 = vrot.slane %v454_v15, 4  ;;  %v480_v10 = vrot.slane %v478_v16, 6  ;;  %v927_v31 = vrot.slane %v925_v21, 1  ;;  %v284_v62 = vld [vmem:[%s11046_s26 + $0x60] sm:$0xf] }
  0x44   : > { %714 = vst.msk [vmem:[#allocation2 + $0x44] sm:$0xf] %vm251_vm1, %v455_v26  ;;  %v466_v32 = vrot.slane %v464_v23, 4  ;;  %v483_v33 = vrot.slane %v481_v17, 7  ;;  %v490_v34 = vrot.slane %v488_v19, 6  ;;  %v474_v39 = vor.u32 %v473_v29, %v470_v24 }
  0x45   : > { %v465_v37 = vsel %vm11069_vm10, %v456_v27, %v464_v23  ;;  %v491_v40 = vshll.u32 %v279_v1, 16  ;;  %v498_v41 = vshrl.u32 %v280_v25, 16  ;;  %v928_v45 = vsel %vm876_vm11, %v923_v3, %v927_v31  ;;  %v285_v27 = vld [vmem:[%s11046_s26 + $0x64] sm:$0xf] }
  0x46   : > { %v11203_v46 = vld [vmem:[#allocation2 + $0x38] sm:$0xff]   ;;  %v931_v47 = vor.u32 %v929_v22, %v927_v31  ;;  %715 = vst.msk [vmem:[#allocation2 + $0x48] sm:$0xf] %vm251_vm1, %v465_v37  ;;  %v484_v48 = vor.u32 %v483_v33, %v480_v10  ;;  %v501_v49 = vshll.u32 %v280_v25, 16  ;;  %9989 = vmatmul.mubr.msk.bf16.gmra.mxu0 %vm1025_vm8, %v928_v45  ;;  %v475_v50 = vsel %vm11069_vm10, %v466_v32, %v474_v39  ;;  %v11234_v10 = vld [vmem:[#allocation2] sm:$0xe] }
  0x47   : > { %v476_v51 = vrot.slane %v474_v39, 4  ;;  %v493_v52 = vrot.slane %v491_v40, 7  ;;  %v500_v53 = vrot.slane %v498_v41, 6  ;;  %v933_v54 = vshll.u32 %v11203_v46, 16  ;;  %10031 = vmatmul.mubr.msk.bf16.gmra.mxu1 %vm1025_vm8, %v11203_v46  ;;  %716 = vst.msk [vmem:[#allocation2 + $0x4c] sm:$0xf] %vm251_vm1, %v475_v50 }
  0x48   : > { %v937_v55 = vshrl.u32 %v11203_v46, 16  ;;  %v486_v56 = vrot.slane %v484_v48, 4  ;;  %v503_v57 = vrot.slane %v501_v49, 7  ;;  %v508_v43 = vshrl.u32 %v281_v35, 16  ;;  %v286_v37 = vld [vmem:[%s11046_s26 + $0x68] sm:$0xf] }
  0x49   : > { %v485_v58 = vsel %vm11069_vm10, %v476_v51, %v484_v48  ;;  %v494_v59 = vor.u32 %v493_v52, %v490_v34  ;;  %v511_v60 = vshll.u32 %v281_v35, 16  ;;  %v935_v63 = vrot.slane %v933_v54, 1  ;;  %v1791_v54 = vld [vmem:[#allocation2 + $0x8] sm:$0xe] }
  0x4a   : > { %717 = vst.msk [vmem:[#allocation2 + $0x50] sm:$0xf] %vm251_vm1, %v485_v58  ;;  %v504_v1 = vor.u32 %v503_v57, %v500_v53  ;;  %v518_v2 = vshrl.u32 %v282_v42, 16  ;;  %v521_v3 = vshll.u32 %v282_v42, 16  ;;  %v510_v11 = vrot.slane %v508_v43, 6 }
  0x4b   : > { %v11219_v4 = vld [vmem:[#allocation2 + $0x40] sm:$0xff]   ;;  %v495_v7 = vsel %vm11069_vm10, %v486_v56, %v494_v59  ;;  %v496_v9 = vrot.slane %v494_v59, 4  ;;  %v513_v12 = vrot.slane %v511_v60, 7  ;;  %v936_v14 = vsel %vm876_vm11, %v931_v47, %v935_v63  ;;  %v287_v59 = vld [vmem:[%s11046_s26 + $0x6c] sm:$0xf] }
  0x4c   : > { %v939_v15 = vor.u32 %v937_v55, %v935_v63  ;;  %718 = vst.msk [vmem:[#allocation2 + $0x54] sm:$0xf] %vm251_vm1, %v495_v7  ;;  %v506_v16 = vrot.slane %v504_v1, 4  ;;  %v520_v17 = vrot.slane %v518_v2, 6  ;;  %9992 = vmatprep.mubr.msk.bf16.mxu0 %vm1025_vm8, %v936_v14  ;;  %v941_v19 = vshll.u32 %v11219_v4, 16  ;;  %10034 = vmatprep.mubr.msk.bf16.mxu1 %vm1025_vm8, %v11219_v4 }
  0x4d   : > { %v945_v21 = vshrl.u32 %v11219_v4, 16  ;;  %v505_v22 = vsel %vm11069_vm10, %v496_v9, %v504_v1  ;;  %v514_v23 = vor.u32 %v513_v12, %v510_v11  ;;  %v523_v24 = vrot.slane %v521_v3, 7  ;;  %v288_v43 = vld [vmem:[%s11046_s26 + $0x70] sm:$0xf]  ;;  %v11259_v2 = vld [vmem:[#allocation2 + $0xc] sm:$0xf] }
  0x4e   : > { %719 = vst.msk [vmem:[#allocation2 + $0x58] sm:$0xf] %vm251_vm1, %v505_v22  ;;  %v528_v25 = vshrl.u32 %v283_v61, 16  ;;  %v531_v26 = vshll.u32 %v283_v61, 16  ;;  %v538_v29 = vshrl.u32 %v284_v62, 16  ;;  %v943_v31 = vrot.slane %v941_v19, 1 }
  0x4f   : > { %v11236_v32 = vld [vmem:[#allocation2 + $0x48] sm:$0xff]   ;;  %v515_v33 = vsel %vm11069_vm10, %v506_v16, %v514_v23  ;;  %v516_v34 = vrot.slane %v514_v23, 4  ;;  %v541_v35 = vshll.u32 %v284_v62, 16  ;;  %v524_v39 = vor.u32 %v523_v24, %v520_v17 }
  0x50   : > { %720 = vst.msk [vmem:[#allocation2 + $0x5c] sm:$0xf] %vm251_vm1, %v515_v33  ;;  %v530_v40 = vrot.slane %v528_v25, 6  ;;  %v533_v41 = vrot.slane %v531_v26, 7  ;;  %v540_v42 = vrot.slane %v538_v29, 6  ;;  %v944_v45 = vsel %vm876_vm11, %v939_v15, %v943_v31  ;;  %10035 = vmatmul.mubr.msk.bf16.gmra.mxu1 %vm1025_vm8, %v11236_v32 }
  0x51   : > { %v947_v47 = vor.u32 %v945_v21, %v943_v31  ;;  %v949_v48 = vshll.u32 %v11236_v32, 16  ;;  %v953_v49 = vshrl.u32 %v11236_v32, 16  ;;  %9993 = vmatmul.mubr.msk.bf16.gmra.mxu0 %vm1025_vm8, %v944_v45  ;;  %v525_v50 = vsel %vm11069_vm10, %v516_v34, %v524_v39 }
  0x52   : > { %v526_v51 = vrot.slane %v524_v39, 4  ;;  %v534_v52 = vor.u32 %v533_v41, %v530_v40  ;;  %v543_v53 = vrot.slane %v541_v35, 7  ;;  %721 = vst.msk [vmem:[#allocation2 + $0x60] sm:$0xf] %vm251_vm1, %v525_v50  ;;  %v548_v57 = vshrl.u32 %v285_v27, 16 }
  0x53   : > { %v951_v55 = vrot.slane %v949_v48, 1  ;;  %v11250_v56 = vld [vmem:[#allocation2 + $0x50] sm:$0xff]   ;;  %v551_v58 = vshll.u32 %v285_v27, 16  ;;  %v8956_v60 = vcombine.low %v11234_v10, %v11055_v20  ;;  %v558_v1 = vshrl.u32 %v286_v37, 16 }
  0x54   : > { %v535_v61 = vsel %vm11069_vm10, %v526_v51, %v534_v52  ;;  %v536_v62 = vrot.slane %v534_v52, 4  ;;  %v544_v63 = vor.u32 %v543_v53, %v540_v42  ;;  %v957_v9 = vshll.u32 %v11250_v56, 16  ;;  %10038 = vmatprep.mubr.msk.bf16.mxu1 %vm1025_vm8, %v11250_v56  ;;  %v289_v35 = vld [vmem:[%s11046_s26 + $0x74] sm:$0xf] }
  0x55   : > { %v952_v3 = vsel %vm876_vm11, %v947_v47, %v951_v55  ;;  %v955_v7 = vor.u32 %v953_v49, %v951_v55  ;;  %v961_v11 = vshrl.u32 %v11250_v56, 16  ;;  %722 = vst.msk [vmem:[#allocation2 + $0x64] sm:$0xf] %vm251_vm1, %v535_v61  ;;  %v550_v15 = vrot.slane %v548_v57, 6  ;;  %v11353_v20 = vld [vmem:[#allocation2 + $0x10] sm:$0xff]  }
  0x56   : > { %9996 = vmatprep.mubr.msk.bf16.mxu0 %vm1025_vm8, %v952_v3  ;;  %v545_v12 = vsel %vm11069_vm10, %v536_v62, %v544_v63  ;;  %v546_v14 = vrot.slane %v544_v63, 4  ;;  %v553_v16 = vrot.slane %v551_v58, 7  ;;  %v959_v17 = vrot.slane %v957_v9, 1  ;;  %v11294_v62 = vld [vmem:[%s14927_s2 + $0xa] sm:$0x3] }
  0x57   : > { %v11270_v19 = vld [vmem:[#allocation2 + $0x58] sm:$0xff]   ;;  %723 = vst.msk [vmem:[#allocation2 + $0x68] sm:$0xf] %vm251_vm1, %v545_v12  ;;  %v560_v21 = vrot.slane %v558_v1, 6  ;;  %v561_v22 = vshll.u32 %v286_v37, 16  ;;  %v11274_v23 = vcombine.low %v1791_v54, %v11259_v2  ;;  %v568_v25 = vshrl.u32 %v287_v59, 16  ;;  %10667 = vmatprep.subr.msk.bf16.mxu1 %vm1080_vm0, %v11294_v62 }
  0x58   : > { %v554_v24 = vor.u32 %v553_v16, %v550_v15  ;;  %v571_v26 = vshll.u32 %v287_v59, 16  ;;  %v578_v27 = vshrl.u32 %v288_v43, 16  ;;  %v960_v29 = vsel %vm876_vm11, %v955_v7, %v959_v17  ;;  %10039 = vmatmul.mubr.msk.bf16.gmra.mxu1 %vm1025_vm8, %v11270_v19  ;;  %v290_v37 = vld [vmem:[%s11046_s26 + $0x78] sm:$0xf]  ;;  %v291_v54 = vld [vmem:[%s11046_s26 + $0x7c] sm:$0xf] }
  0x59   : > { %v963_v31 = vor.u32 %v961_v11, %v959_v17  ;;  %v965_v33 = vshll.u32 %v11270_v19, 16  ;;  %v969_v34 = vshrl.u32 %v11270_v19, 16  ;;  %9997 = vmatmul.mubr.msk.bf16.gmra.mxu0 %vm1025_vm8, %v960_v29  ;;  %v563_v41 = vrot.slane %v561_v22, 7 }
  0x5a   : > { %v555_v39 = vsel %vm11069_vm10, %v546_v14, %v554_v24  ;;  %v556_v40 = vrot.slane %v554_v24, 4  ;;  %v570_v42 = vrot.slane %v568_v25, 6  ;;  %v573_v47 = vrot.slane %v571_v26, 7 }
  0x5b   : > { %v967_v45 = vrot.slane %v965_v33, 1  ;;  %724 = vst.msk [vmem:[#allocation2 + $0x6c] sm:$0xf] %vm251_vm1, %v555_v39  ;;  %v580_v48 = vrot.slane %v578_v27, 6  ;;  %v581_v49 = vshll.u32 %v288_v43, 16  ;;  %v564_v51 = vor.u32 %v563_v41, %v560_v21 }
  0x5c   : > { %v11287_v50 = vld [vmem:[#allocation2 + $0x60] sm:$0xff]   ;;  %v588_v52 = vshrl.u32 %v289_v35, 16  ;;  %v591_v53 = vshll.u32 %v289_v35, 16  ;;  %v598_v55 = vshrl.u32 %v290_v37, 16  ;;  %v574_v59 = vor.u32 %v573_v47, %v570_v42 }
  0x5d   : > { %v968_v57 = vsel %vm876_vm11, %v963_v31, %v967_v45  ;;  %v971_v58 = vor.u32 %v969_v34, %v967_v45  ;;  %v583_v61 = vrot.slane %v581_v49, 7  ;;  %v973_v43 = vshll.u32 %v11287_v50, 16  ;;  %10042 = vmatprep.mubr.msk.bf16.mxu1 %vm1025_vm8, %v11287_v50  ;;  %v292_v21 = vld [vmem:[%s11046_s26 + $0x80] sm:$0xf]  ;;  %v293_v27 = vld [vmem:[%s11046_s26 + $0x84] sm:$0xf] }
  0x5e   : > { %10000 = vmatprep.mubr.msk.bf16.mxu0 %vm1025_vm8, %v968_v57  ;;  %v977_v63 = vshrl.u32 %v11287_v50, 16  ;;  %v565_v1 = vsel %vm11069_vm10, %v556_v40, %v564_v51  ;;  %v566_v3 = vrot.slane %v564_v51, 4  ;;  %v576_v7 = vrot.slane %v574_v59, 4 }
  0x5f   : > { %725 = vst.msk [vmem:[#allocation2 + $0x70] sm:$0xf] %vm251_vm1, %v565_v1  ;;  %v584_v9 = vor.u32 %v583_v61, %v580_v48  ;;  %v590_v11 = vrot.slane %v588_v52, 6  ;;  %v593_v12 = vrot.slane %v591_v53, 7  ;;  %v975_v14 = vrot.slane %v973_v43, 1 }
  0x60   : > { %v575_v15 = vsel %vm11069_vm10, %v566_v3, %v574_v59  ;;  %v600_v16 = vrot.slane %v598_v55, 6  ;;  %v601_v17 = vshll.u32 %v290_v37, 16  ;;  %v608_v26 = vshrl.u32 %v291_v54, 16  ;;  %v294_v37 = vld [vmem:[%s11046_s26 + $0x88] sm:$0xf] }
  0x61   : > { %726 = vst.msk [vmem:[#allocation2 + $0x74] sm:$0xf] %vm251_vm1, %v575_v15  ;;  %v585_v22 = vsel %vm11069_vm10, %v576_v7, %v584_v9  ;;  %v586_v24 = vrot.slane %v584_v9, 4  ;;  %v594_v25 = vor.u32 %v593_v12, %v590_v11  ;;  %v976_v29 = vsel %vm876_vm11, %v971_v58, %v975_v14 }
  0x62   : > { %v11314_v31 = vld [vmem:[#allocation2 + $0x68] sm:$0xff]   ;;  %v979_v33 = vor.u32 %v977_v63, %v975_v14  ;;  %727 = vst.msk [vmem:[#allocation2 + $0x78] sm:$0xf] %vm251_vm1, %v585_v22  ;;  %v603_v34 = vrot.slane %v601_v17, 7  ;;  %v611_v35 = vshll.u32 %v291_v54, 16  ;;  %10001 = vmatmul.mubr.msk.bf16.gmra.mxu0 %vm1025_vm8, %v976_v29  ;;  %v610_v41 = vrot.slane %v608_v26, 6 }
  0x63   : > { %v595_v39 = vsel %vm11069_vm10, %v586_v24, %v594_v25  ;;  %v596_v40 = vrot.slane %v594_v25, 4  ;;  %v618_v42 = vshrl.u32 %v292_v21, 16  ;;  %v981_v45 = vshll.u32 %v11314_v31, 16  ;;  %10043 = vmatmul.mubr.msk.bf16.gmra.mxu1 %vm1025_vm8, %v11314_v31 }
  0x64   : > { %v985_v47 = vshrl.u32 %v11314_v31, 16  ;;  %728 = vst.msk [vmem:[#allocation2 + $0x7c] sm:$0xf] %vm251_vm1, %v595_v39  ;;  %v604_v48 = vor.u32 %v603_v34, %v600_v16  ;;  %v613_v49 = vrot.slane %v611_v35, 7  ;;  %v621_v52 = vshll.u32 %v292_v21, 16 }
  0x65   : > { %v620_v51 = vrot.slane %v618_v42, 6  ;;  %v628_v53 = vshrl.u32 %v293_v27, 16  ;;  %v631_v54 = vshll.u32 %v293_v27, 16  ;;  %v983_v55 = vrot.slane %v981_v45, 1 }
  0x66   : > { %v605_v57 = vsel %vm11069_vm10, %v596_v40, %v604_v48  ;;  %v606_v58 = vrot.slane %v604_v48, 4  ;;  %v614_v59 = vor.u32 %v613_v49, %v610_v41  ;;  %v623_v61 = vrot.slane %v621_v52, 7 }
  0x67   : > { %729 = vst.msk [vmem:[#allocation2 + $0x80] sm:$0xf] %vm251_vm1, %v605_v57  ;;  %v630_v43 = vrot.slane %v628_v53, 6  ;;  %v633_v63 = vrot.slane %v631_v54, 7  ;;  %v638_v1 = vshrl.u32 %v294_v37, 16  ;;  %v984_v3 = vsel %vm876_vm11, %v979_v33, %v983_v55 }
  0x68   : > { %v11330_v7 = vld [vmem:[#allocation2 + $0x70] sm:$0xff]   ;;  %v987_v9 = vor.u32 %v985_v47, %v983_v55  ;;  %v615_v11 = vsel %vm11069_vm10, %v606_v58, %v614_v59  ;;  %v616_v12 = vrot.slane %v614_v59, 4  ;;  %10004 = vmatprep.mubr.msk.bf16.mxu0 %vm1025_vm8, %v984_v3  ;;  %v624_v14 = vor.u32 %v623_v61, %v620_v51  ;;  %v11377_v51 = vld [vmem:[#allocation2 + $0x18] sm:$0xff]   ;;  %v11387_v59 = vld [vmem:[#allocation2 + $0x20] sm:$0xff]  }
  0x69   : > { %730 = vst.msk [vmem:[#allocation2 + $0x84] sm:$0xf] %vm251_vm1, %v615_v11  ;;  %v634_v15 = vor.u32 %v633_v63, %v630_v43  ;;  %v640_v16 = vrot.slane %v638_v1, 6  ;;  %v641_v17 = vshll.u32 %v294_v37, 16  ;;  %v989_v21 = vshll.u32 %v11330_v7, 16  ;;  %10046 = vmatprep.mubr.msk.bf16.mxu1 %vm1025_vm8, %v11330_v7  ;;  %v11400_v63 = vld [vmem:[#allocation2 + $0x28] sm:$0xff]  }
  0x6a   : > { %v993_v22 = vshrl.u32 %v11330_v7, 16  ;;  %v1484_v24 = vrot.slane %v8956_v60, 1  ;;  %v1485_v25 = vrot.slane %v11102_v30, 1  ;;  %v625_v27 = vsel %vm11069_vm10, %v616_v12, %v624_v14 }
  0x6b   : > { %v11344_v26 = vld [vmem:[#allocation2 + $0x78] sm:$0xff]   ;;  %v626_v29 = vrot.slane %v624_v14, 4  ;;  %v636_v33 = vrot.slane %v634_v15, 4  ;;  %v643_v34 = vrot.slane %v641_v17, 7  ;;  %v991_v35 = vrot.slane %v989_v21, 1 }
  0x6c   : > { %731 = vst.msk [vmem:[#allocation2 + $0x88] sm:$0xf] %vm251_vm1, %v625_v27  ;;  %v11350_v37 = vsel %vm1483_vm12, %v1484_v24, %v1485_v25  ;;  %v1487_v39 = vrot.slane %v11110_v44, 1  ;;  %v997_v30 = vshll.u32 %v11344_v26, 16  ;;  %v1001_v10 = vshrl.u32 %v11344_v26, 16  ;;  %10047 = vmatmul.mubr.msk.bf16.gmra.mxu1 %vm1025_vm8, %v11344_v26  ;;  %v11421_v24 = vld [vmem:[#allocation2 + $0x40] sm:$0xff]  }
  0x6d   : > { %v635_v60 = vsel %vm11069_vm10, %v626_v29, %v634_v15  ;;  %v11361_v40 = vor.u32 %v643_v34, %v640_v16  ;;  %v992_v41 = vsel %vm876_vm11, %v987_v9, %v991_v35  ;;  %v995_v42 = vor.u32 %v993_v22, %v991_v35  ;;  %v11404_v9 = vld [vmem:[#allocation2 + $0x30] sm:$0xff]   ;;  %v11408_v15 = vld [vmem:[#allocation2 + $0x38] sm:$0xff]   ;;  %v11424_v27 = vld [vmem:[#allocation2 + $0x48] sm:$0xff]  }
  0x6e   : > { %732 = vst.msk [vmem:[#allocation2 + $0x8c] sm:$0xf] %vm251_vm1, %v635_v60  ;;  %v11366_v44 = vsel %vm1483_vm12, %v1485_v25, %v1487_v39  ;;  %10005 = vmatmul.mubr.msk.bf16.gmra.mxu0 %vm1025_vm8, %v992_v41  ;;  %v999_v45 = vrot.slane %v997_v30, 1  ;;  %v11374_v48 = vsel %vm1080_vm0, %v11140_v13, 0  ;;  %v1923_v49 = vrot.slane %v11274_v23, 1  ;;  %v11438_v35 = vld [vmem:[#allocation2 + $0x50] sm:$0xff]  }
  0x6f   : > { %v645_v47 = vsel %vm11069_vm10, %v636_v33, %v11361_v40  ;;  %v1924_v53 = vrot.slane %v11353_v20, 1  ;;  %v1489_v54 = vrot.slane %v11133_v0, 1  ;;  %v1491_v55 = vrot.slane %v11148_v18, 1  ;;  %v11445_v41 = vld [vmem:[#allocation2 + $0x58] sm:$0xff]  }
  0x70   : > { %v11379_v52 = vld [vmem:[#allocation2 + $0x80] sm:$0xff]   ;;  %733 = vst.msk [vmem:[#allocation2 + $0x90] sm:$0xf] %vm251_vm1, %v645_v47  ;;  %v1000_v57 = vsel %vm876_vm11, %v995_v42, %v999_v45  ;;  %v1003_v58 = vor.u32 %v1001_v10, %v999_v45  ;;  %v646_v13 = vrot.slane %v11361_v40, 4  ;;  %v1493_v1 = vrot.slane %v11163_v36, 1 }
  0x71   : > { %10008 = vmatprep.mubr.msk.bf16.mxu0 %vm1025_vm8, %v1000_v57  ;;  %v1005_v61 = vshll.u32 %v11379_v52, 16  ;;  %v1009_v43 = vshrl.u32 %v11379_v52, 16  ;;  %10050 = vmatprep.mubr.msk.bf16.mxu1 %vm1025_vm8, %v11379_v52  ;;  %v11395_v0 = vsel %vm1483_vm12, %v1487_v39, %v1489_v54  ;;  %v11398_v18 = vsel %vm1483_vm12, %v1489_v54, %v1491_v55 }
  0x72   : > { %v1495_v3 = vrot.slane %v11185_v8, 1  ;;  %v1925_v12 = vsel %vm1483_vm12, %v1923_v49, %v1924_v53  ;;  %v1926_v14 = vrot.slane %v11377_v51, 1  ;;  %v1497_v16 = vrot.slane %v11203_v46, 1 }
  0x73   : > { %v1007_v11 = vrot.slane %v1005_v61, 1  ;;  %v1928_v21 = vrot.slane %v11387_v59, 1  ;;  %v11415_v22 = vsel %vm1483_vm12, %v1491_v55, %v1493_v1  ;;  %v1499_v8 = vrot.slane %v11219_v4, 1 }
  0x74   : > { %v11418_v36 = vsel %vm1483_vm12, %v1493_v1, %v1495_v3  ;;  %v11433_v34 = vsel %vm1483_vm12, %v1495_v3, %v1497_v16  ;;  %v1927_v30 = vsel %vm1483_vm12, %v1924_v53, %v1926_v14  ;;  %v1501_v10 = vrot.slane %v11236_v32, 1 }
  0x75   : > { %v11411_v17 = vld [vmem:[#allocation2 + $0x88] sm:$0xff]   ;;  %v1008_v25 = vsel %vm876_vm11, %v1003_v58, %v1007_v11  ;;  %v1011_v46 = vor.u32 %v1009_v43, %v1007_v11  ;;  %v11436_v4 = vsel %vm1483_vm12, %v1497_v16, %v1499_v8  ;;  %v1503_v60 = vrot.slane %v11250_v56, 1  ;;  %v11458_v56 = vld [vmem:[#allocation2 + $0x60] sm:$0xff]  }
  0x76   : > { %10009 = vmatmul.mubr.msk.bf16.gmra.mxu0 %vm1025_vm8, %v1008_v25  ;;  %v1013_v29 = vshll.u32 %v11411_v17, 16  ;;  %10051 = vmatmul.mubr.msk.bf16.gmra.mxu1 %vm1025_vm8, %v11411_v17  ;;  %v1017_v39 = vshrl.u32 %v11411_v17, 16  ;;  %v1930_v47 = vrot.slane %v11400_v63, 1  ;;  %v1932_v49 = vrot.slane %v11404_v9, 1 }
  0x77   : > { %v11428_v33 = vld [vmem:[#allocation2 + $0x90] ss:$0 sps:$4 sm:$0x11]   ;;  %10094 = vmatprep.mubr.msk.bf16.mxu1 %vm1025_vm8, %v1925_v12  ;;  %v1934_v54 = vrot.slane %v11408_v15, 1  ;;  %v11452_v55 = vsel %vm1483_vm12, %v1499_v8, %v1501_v10  ;;  %v11455_v53 = vsel %vm1483_vm12, %v1501_v10, %v1503_v60  ;;  %v1505_v32 = vrot.slane %v11270_v19, 1 }
  0x78   : > { %v1015_v42 = vrot.slane %v1013_v29, 1  ;;  %v1021_v45 = vshll.u32 %v11428_v33, 16  ;;  %v1936_v43 = vrot.slane %v11421_v24, 1  ;;  %v1929_v1 = vsel %vm1483_vm12, %v1926_v14, %v1928_v21 }
  0x79   : > { %v1938_v3 = vrot.slane %v11424_v27, 1  ;;  %v11466_v11 = vsel %vm1483_vm12, %v1503_v60, %v1505_v32  ;;  %v1507_v12 = vrot.slane %v11287_v50, 1  ;;  %v1940_v16 = vrot.slane %v11438_v35, 1 }
  0x7a   : > { %v1016_v57 = vsel %vm876_vm11, %v1011_v46, %v1015_v42  ;;  %v1019_v58 = vor.u32 %v1017_v39, %v1015_v42  ;;  %v1023_v61 = vrot.slane %v1021_v45, 1  ;;  %v1509_v8 = vrot.slane %v11314_v31, 1  ;;  %v295_v46 = vld [vmem:[%s11046_s26 + $0x8c] sm:$0xf]  ;;  %s10863_s26 = scalar_lea.vmem %s10862_s20, 4608 }
  0x7b   : > { %10012 = vmatprep.mubr.msk.bf16.mxu0 %vm1025_vm8, %v1016_v57  ;;  %v1511_v25 = vrot.slane %v11330_v7, 1  ;;  %v1931_v29 = vsel %vm1483_vm12, %v1928_v21, %v1930_v47  ;;  %v1933_v14 = vsel %vm1483_vm12, %v1930_v47, %v1932_v49  ;;  %v1942_v39 = vrot.slane %v11445_v41, 1  ;;  %v11485_v31 = vld [vmem:[#allocation2 + $0x68] sm:$0xff]   ;;  %p10865_p1 = scmp.lt.s32.totalorder %s10863_s26, %s10857_s25 }
  0x7c   : > { %v1024_v19 = vsel %vm876_vm11, %v1019_v58, %v1023_v61  ;;  %v11478_v10 = vsel %vm1483_vm12, %v1505_v32, %v1507_v12  ;;  %v11483_v50 = vsel %vm1483_vm12, %v1932_v49, %v1934_v54  ;;  %v11488_v7 = vsel %vm1483_vm12, %v1507_v12, %v1509_v8 }
  0x7d   : > { %v11491_v21 = vsel %vm1483_vm12, %v1509_v8, %v1511_v25  ;;  %v1513_v60 = vrot.slane %v11344_v26, 1  ;;  %v11501_v42 = vsel %vm1483_vm12, %v1936_v43, %v1938_v3  ;;  %v1944_v45 = vrot.slane %v11458_v56, 1  ;;  %v2677_v8 = vld [vmem:[#allocation2 + $0x8] sm:$0xc]  ;;  %p10866_p2 = por %p10865_p1, %p10864_p0 }
  0x7e   : > { %10013 = vmatmul.mubr.msk.bf16.gmra.mxu0 %vm1025_vm8, %v1024_v19  ;;  %10095 = vmatmul.mubr.msk.bf16.vlgmr.msra.gmra.mxu1 %vm1025_vm8, %v1927_v30  ;;  %v11498_v30 = vsel %vm1483_vm12, %v1934_v54, %v1936_v43  ;;  %v1515_v47 = vrot.slane %v11379_v52, 1  ;;  %v11506_v49 = vsel %vm1483_vm12, %v1938_v3, %v1940_v16  ;;  %v1519_v32 = vrot.slane %v11428_v33, 1 }
  0x7f   : > { %10056 = vmatprep.mubr.msk.bf16.mxu0 %vm1025_vm8, %v11350_v37  ;;  %10098 = vmatprep.mubr.msk.bf16.mxu1 %vm1025_vm8, %v1929_v1  ;;  %v11509_v26 = vsel %vm1483_vm12, %v1511_v25, %v1513_v60  ;;  %v1517_v37 = vrot.slane %v11411_v17, 1  ;;  %v11514_v54 = vsel %vm1483_vm12, %v1940_v16, %v1942_v39  ;;  %v648_v58 = vshrl.u32 %v295_v46, 16  ;;  %v11537_v16 = vld [vmem:[%s14927_s2 + $0xc] sm:$0x3]  ;;  %v735_v25 = vld [vmem:[#allocation2 + $0x98] sm:$0x3]  ;;  %p10867_p3 = pnand %p10866_p2, %p10860_p13 }
  0x80   : > { %v11517_v57 = vsel %vm1483_vm12, %v1513_v60, %v1515_v47  ;;  %v651_v61 = vshll.u32 %v295_v46, 16  ;;  %v1946_v52 = vrot.slane %v11485_v31, 1  ;;  %v2776_v17 = vsel %vm1080_vm0, %v11294_v62, 0 }
  0x81   : > { %v11521_v43 = vsel %vm1483_vm12, %v1515_v47, %v1517_v37  ;;  %v11524_v1 = vsel %vm1483_vm12, %v1517_v37, %v1519_v32  ;;  %v11531_v33 = vsel %vm1483_vm12, %v1942_v39, %v1944_v45  ;;  %v650_v3 = vrot.slane %v648_v58, 6  ;;  %10169 = vmatpush3.bf16.msra.mxu1 %v2776_v17 }
  0x82   : > { %v653_v12 = vrot.slane %v651_v61, 7  ;;  %v2238_v19 = vshrl.u32 %v11274_v23, 16  ;;  %v2241_v46 = vshll.u32 %v11274_v23, 16  ;;  %v2246_v62 = vshrl.u32 %v11353_v20, 16 }
  0x83   : > { %v2249_v60 = vshll.u32 %v11353_v20, 16  ;;  %v2255_v39 = vshrl.u32 %v11377_v51, 16  ;;  %vm2236_vm13 = vsmask.f32 6400  ;;  %v2258_v32 = vshll.u32 %v11377_v51, 16 }
  0x84   : > { %v654_v47 = vor.u32 %v653_v12, %v650_v3  ;;  %v2240_v37 = vrot.slane %v2238_v19, 1  ;;  %v2243_v58 = vrot.slane %v2241_v46, 2  ;;  %v2248_v61 = vrot.slane %v2246_v62, 1 }
  0x85   : > { %v2251_v17 = vrot.slane %v2249_v60, 2  ;;  %v2257_v23 = vrot.slane %v2255_v39, 1  ;;  %v2260_v19 = vrot.slane %v2258_v32, 2  ;;  %vm2683_vm14 = vcmask 1045504  }
  0x86   : > { %10057 = vmatmul.mubr.msk.bf16.vlgmr.msra.gmra.mxu0 %vm1025_vm8, %v11366_v44  ;;  %10099 = vmatmul.mubr.msk.bf16.gmra.mxu1 %vm1025_vm8, %v1931_v29  ;;  %v655_v3 = vsel %vm11069_vm10, %v646_v13, %v654_v47  ;;  %v656_v12 = vrot.slane %v654_v47, 4  ;;  %v9034_v44 = vcombine.low %v2677_v8, %v11259_v2  ;;  %v2244_v29 = vor.u32 %v2243_v58, %v2240_v37  ;;  %v11580_v58 = vld [vmem:[#allocation2 + $0x70] sm:$0xff]  }
  0x87   : > { %10131 = vmatpush3.bf16.msra.mxu0 %v11374_v48  ;;  %10060 = vmatprep.mubr.msk.bf16.mxu0 %vm1025_vm8, %v11395_v0  ;;  %734 = vst.msk [vmem:[#allocation2 + $0x94] sm:$0xf] %vm251_vm1, %v655_v3  ;;  %v2252_v46 = vor.u32 %v2251_v17, %v2248_v61  ;;  %v2685_v48 = vrot.slane %v11353_v20, 2  ;;  %v2261_v13 = vor.u32 %v2260_v19, %v2257_v23  ;;  %v2687_v62 = vrot.slane %v11377_v51, 2 }
  0x88   : > { %10102 = vmatprep.mubr.msk.bf16.mxu1 %vm1025_vm8, %v1933_v14  ;;  %10668 = vmatprep.subr.msk.bf16.mxu0 %vm1080_vm0, %v11537_v16  ;;  %v736_v40 = vsel %vm11027_vm4, %v656_v12, %v735_v25  ;;  %v2684_v0 = vrot.slane %v9034_v44, 2  ;;  %v2264_v14 = vshrl.u32 %v11387_v59, 16  ;;  %v2267_v8 = vshll.u32 %v11387_v59, 16 }
  0x89   : > { %737 = vst [vmem:[#allocation2 + $0x98] sm:$0x3] %v736_v40  ;;  %v11564_v2 = vsel %vm2236_vm13, %v2244_v29, %v2252_v46  ;;  %v2273_v60 = vshrl.u32 %v11400_v63, 16  ;;  %v11570_v39 = vsel %vm2236_vm13, %v2252_v46, %v2261_v13  ;;  %v11576_v20 = vsel %vm2683_vm14, %v2685_v48, %v2687_v62 }
  0x8a   : > { %v11573_v6 = vsel %vm2683_vm14, %v2684_v0, %v2685_v48  ;;  %v2276_v51 = vshll.u32 %v11400_v63, 16  ;;  %v2266_v25 = vrot.slane %v2264_v14, 1  ;;  %v2269_v47 = vrot.slane %v2267_v8, 2 }
  0x8b   : > { %v2275_v37 = vrot.slane %v2273_v60, 1  ;;  %v2689_v32 = vrot.slane %v11387_v59, 2  ;;  %v2691_v17 = vrot.slane %v11400_v63, 2  ;;  %v2282_v23 = vshrl.u32 %v11404_v9, 16  ;;  %v11597_v63 = vld [vmem:[%s14927_s2 + $0xe] sm:$0x3] }
  0x8c   : > { %v2278_v61 = vrot.slane %v2276_v51, 2  ;;  %v2285_v3 = vshll.u32 %v11404_v9, 16  ;;  %v2270_v12 = vor.u32 %v2269_v47, %v2266_v25  ;;  %v2291_v59 = vshrl.u32 %v11408_v15, 16  ;;  %10669 = vmatprep.subr.msk.bf16.mxu1 %vm1080_vm0, %v11597_v63 }
  0x8d   : > { %v11590_v19 = vsel %vm2683_vm14, %v2687_v62, %v2689_v32  ;;  %v2294_v44 = vshll.u32 %v11408_v15, 16  ;;  %v11606_v29 = vsel %vm2683_vm14, %v2689_v32, %v2691_v17  ;;  %v2284_v46 = vrot.slane %v2282_v23, 1 }
  0x8e   : > { %10061 = vmatmul.mubr.msk.bf16.gmra.mxu0 %vm1025_vm8, %v11398_v18  ;;  %10103 = vmatmul.mubr.msk.bf16.gmra.mxu1 %vm1025_vm8, %v11483_v50  ;;  %v11603_v18 = vld [vmem:[#allocation2 + $0x78] sm:$0xff]   ;;  %v2279_v50 = vor.u32 %v2278_v61, %v2275_v37  ;;  %v2287_v48 = vrot.slane %v2285_v3, 2  ;;  %v11609_v40 = vsel %vm2236_vm13, %v2261_v13, %v2270_v12  ;;  %v2293_v0 = vrot.slane %v2291_v59, 1 }
  0x8f   : > { %10064 = vmatprep.mubr.msk.bf16.mxu0 %vm1025_vm8, %v11415_v22  ;;  %10106 = vmatprep.mubr.msk.bf16.mxu1 %vm1025_vm8, %v11498_v30  ;;  %v2296_v62 = vrot.slane %v2294_v44, 2  ;;  %v2693_v14 = vrot.slane %v11404_v9, 2  ;;  %v14934_v22 = vrot.slane %v11580_v58, 1  ;;  %v2695_v51 = vrot.slane %v11408_v15, 2 }
  0x90   : > { %v738_v30 = vld [vmem:[#allocation2 + $0x98] sm:$0xe]  ;;  %v11616_v8 = vsel %vm2236_vm13, %v2270_v12, %v2279_v50  ;;  %v2288_v60 = vor.u32 %v2287_v48, %v2284_v46  ;;  %v2300_v9 = vshrl.u32 %v11421_v24, 16  ;;  %v2303_v15 = vshll.u32 %v11421_v24, 16 }
  0x91   : > { %v739_v13 = vsel %vm11060_vm9, 0, %v738_v30  ;;  %v2297_v25 = vor.u32 %v2296_v62, %v2293_v0  ;;  %v11622_v47 = vsel %vm2683_vm14, %v2691_v17, %v2693_v14  ;;  %v11630_v61 = vsel %vm2683_vm14, %v2693_v14, %v2695_v51 }
  0x92   : > { %740 = vst [vmem:[#allocation2 + $0x98] sm:$0xe] %v739_v13  ;;  %v11627_v32 = vsel %vm2236_vm13, %v2279_v50, %v2288_v60  ;;  %v11638_v28 = vsel %vm1483_vm12, %v1944_v45, %v1946_v52  ;;  %v2302_v23 = vrot.slane %v2300_v9, 1  ;;  %v2309_v3 = vshrl.u32 %v11424_v27, 16 }
  0x93   : > { %v11641_v17 = vsel %vm2236_vm13, %v2288_v60, %v2297_v25  ;;  %v2305_v12 = vrot.slane %v2303_v15, 2  ;;  %v2312_v59 = vshll.u32 %v11424_v27, 16  ;;  %v2697_v44 = vrot.slane %v11421_v24, 2 }
  0x94   : > { %v2699_v50 = vrot.slane %v11424_v27, 2  ;;  %v11656_v45 = vsel %vm1483_vm12, %v1946_v52, %v14934_v22  ;;  %v2311_v46 = vrot.slane %v2309_v3, 1  ;;  %v2318_v48 = vshrl.u32 %v11438_v35, 16 }
  0x95   : > { %v2321_v24 = vshll.u32 %v11438_v35, 16  ;;  %v2314_v27 = vrot.slane %v2312_v59, 2  ;;  %v2327_v14 = vshrl.u32 %v11445_v41, 16  ;;  %v2330_v30 = vshll.u32 %v11445_v41, 16 }
  0x96   : > { %10065 = vmatmul.mubr.msk.bf16.gmra.mxu0 %vm1025_vm8, %v11418_v36  ;;  %10107 = vmatmul.mubr.msk.bf16.gmra.mxu1 %vm1025_vm8, %v11501_v42  ;;  %v2306_v36 = vor.u32 %v2305_v12, %v2302_v23  ;;  %v11665_v42 = vsel %vm2683_vm14, %v2695_v51, %v2697_v44  ;;  %v11668_v0 = vsel %vm2683_vm14, %v2697_v44, %v2699_v50  ;;  %v2320_v52 = vrot.slane %v2318_v48, 1 }
  0x97   : > { %10068 = vmatprep.mubr.msk.bf16.mxu0 %vm1025_vm8, %v11433_v34  ;;  %10110 = vmatprep.mubr.msk.bf16.mxu1 %vm1025_vm8, %v11506_v49  ;;  %v2323_v62 = vrot.slane %v2321_v24, 2  ;;  %v2315_v34 = vor.u32 %v2314_v27, %v2311_v46  ;;  %v2701_v49 = vrot.slane %v11438_v35, 2  ;;  %v2703_v13 = vrot.slane %v11445_v41, 2 }
  0x98   : > { %v11673_v60 = vsel %vm2236_vm13, %v2297_v25, %v2306_v36  ;;  %v2329_v51 = vrot.slane %v2327_v14, 1  ;;  %v2332_v15 = vrot.slane %v2330_v30, 2  ;;  %v2336_v23 = vshrl.u32 %v11458_v56, 16  ;;  %v10752_v30 = vld [vmem:[#allocation2 + $0x80] sm:$0xff]  }
  0x99   : > { %v2324_v9 = vor.u32 %v2323_v62, %v2320_v52  ;;  %v11679_v3 = vsel %vm2236_vm13, %v2306_v36, %v2315_v34  ;;  %v11682_v12 = vsel %vm2683_vm14, %v2699_v50, %v2701_v49  ;;  %v11685_v59 = vsel %vm2683_vm14, %v2701_v49, %v2703_v13 }
  0x9a   : > { %v2339_v25 = vshll.u32 %v11458_v56, 16  ;;  %v2333_v41 = vor.u32 %v2332_v15, %v2329_v51  ;;  %v2338_v44 = vrot.slane %v2336_v23, 1  ;;  %v2345_v46 = vshrl.u32 %v11485_v31, 16 }
  0x9b   : > { %v11689_v35 = vsel %vm2236_vm13, %v2315_v34, %v2324_v9  ;;  %v2348_v24 = vshll.u32 %v11485_v31, 16  ;;  %v2705_v36 = vrot.slane %v11458_v56, 2  ;;  %v2707_v50 = vrot.slane %v11485_v31, 2 }
  0x9c   : > { %v2341_v48 = vrot.slane %v2339_v25, 2  ;;  %v11700_v27 = vsel %vm2236_vm13, %v2324_v9, %v2333_v41  ;;  %v2347_v52 = vrot.slane %v2345_v46, 1  ;;  %v2354_v62 = vshrl.u32 %v11580_v58, 16 }
  0x9d   : > { %v2357_v14 = vshll.u32 %v11580_v58, 16  ;;  %v2350_v31 = vrot.slane %v2348_v24, 2  ;;  %v2363_v9 = vshrl.u32 %v11603_v18, 16  ;;  %v2366_v51 = vshll.u32 %v11603_v18, 16 }
  0x9e   : > { %10069 = vmatmul.mubr.msk.bf16.gmra.mxu0 %vm1025_vm8, %v11436_v4  ;;  %10111 = vmatmul.mubr.msk.bf16.gmra.mxu1 %vm1025_vm8, %v11514_v54  ;;  %v2342_v56 = vor.u32 %v2341_v48, %v2338_v44  ;;  %v11709_v4 = vsel %vm2683_vm14, %v2703_v13, %v2705_v36  ;;  %v11712_v54 = vsel %vm2683_vm14, %v2705_v36, %v2707_v50  ;;  %v2356_v34 = vrot.slane %v2354_v62, 1  ;;  %v10753_v13 = vld [vmem:[#allocation2 + $0x88] sm:$0xff]  }
  0x9f   : > { %10072 = vmatprep.mubr.msk.bf16.mxu0 %vm1025_vm8, %v11452_v55  ;;  %10114 = vmatprep.mubr.msk.bf16.mxu1 %vm1025_vm8, %v11531_v33  ;;  %v2359_v49 = vrot.slane %v2357_v14, 2  ;;  %v2351_v15 = vor.u32 %v2350_v31, %v2347_v52  ;;  %v2709_v33 = vrot.slane %v11580_v58, 2  ;;  %v2711_v23 = vrot.slane %v11603_v18, 2  ;;  %v11730_v52 = vld [vmem:[#allocation2 + $0x90] sm:$0xff]  }
  0xa0   : > { %v11717_v55 = vsel %vm2236_vm13, %v2333_v41, %v2342_v56  ;;  %v2365_v44 = vrot.slane %v2363_v9, 1  ;;  %v2368_v46 = vrot.slane %v2366_v51, 2  ;;  %v2372_v48 = vshrl.u32 %v10752_v30, 16 }
  0xa1   : > { %v2360_v25 = vor.u32 %v2359_v49, %v2356_v34  ;;  %v11722_v24 = vsel %vm2236_vm13, %v2342_v56, %v2351_v15  ;;  %v11725_v36 = vsel %vm2683_vm14, %v2707_v50, %v2709_v33  ;;  %v11728_v62 = vsel %vm2683_vm14, %v2709_v33, %v2711_v23 }
  0xa2   : > { %v2375_v41 = vshll.u32 %v10752_v30, 16  ;;  %v2369_v31 = vor.u32 %v2368_v46, %v2365_v44  ;;  %v2374_v34 = vrot.slane %v2372_v48, 1  ;;  %v2381_v49 = vshrl.u32 %v10753_v13, 16 }
  0xa3   : > { %v11733_v14 = vsel %vm2236_vm13, %v2351_v15, %v2360_v25  ;;  %v2384_v51 = vshll.u32 %v10753_v13, 16  ;;  %v2713_v5 = vrot.slane %v10752_v30, 2  ;;  %v2715_v56 = vrot.slane %v10753_v13, 2 }
  0xa4   : > { %v2377_v9 = vrot.slane %v2375_v41, 2  ;;  %v11740_v50 = vsel %vm2236_vm13, %v2360_v25, %v2369_v31  ;;  %v2383_v33 = vrot.slane %v2381_v49, 1  ;;  %v2390_v15 = vshrl.u32 %v11730_v52, 16 }
  0xa5   : > { %v2393_v44 = vshll.u32 %v11730_v52, 16  ;;  %v2386_v48 = vrot.slane %v2384_v51, 2  ;;  %v1952_v25 = vrot.slane %v10752_v30, 1  ;;  %vm3883_vm15 = vcmask 1044480  }
  0xa6   : > { %10073 = vmatmul.mubr.msk.bf16.gmra.mxu0 %vm1025_vm8, %v11455_v53  ;;  %10115 = vmatmul.mubr.msk.bf16.gmra.mxu1 %vm1025_vm8, %v11638_v28  ;;  %v2378_v46 = vor.u32 %v2377_v9, %v2374_v34  ;;  %v11749_v53 = vsel %vm2683_vm14, %v2711_v23, %v2713_v5  ;;  %v11752_v28 = vsel %vm2683_vm14, %v2713_v5, %v2715_v56  ;;  %v2392_v41 = vrot.slane %v2390_v15, 1 }
  0xa7   : > { %10076 = vmatprep.mubr.msk.bf16.mxu0 %vm1025_vm8, %v11466_v11  ;;  %10118 = vmatprep.mubr.msk.bf16.mxu1 %vm1025_vm8, %v11656_v45  ;;  %v2395_v49 = vrot.slane %v2393_v44, 2  ;;  %v2387_v37 = vor.u32 %v2386_v48, %v2383_v33  ;;  %v2717_v11 = vrot.slane %v11730_v52, 2  ;;  %v14959_v45 = vrot.slane %v11603_v18, 1  ;;  %v10755_v33 = vld [vmem:[#allocation2 + $0x98] ss:$0 sps:$4 sm:$0x11]  }
  0xa8   : > { %v11755_v22 = vsel %vm2236_vm13, %v2369_v31, %v2378_v46  ;;  %v14960_v34 = vrot.slane %v11580_v58, 1  ;;  %v1954_v58 = vrot.slane %v10753_v13, 1  ;;  %vm3436_vm1 = vsmask.f32 5376 }
  0xa9   : > { %v11758_v38 = vor.u32 %v2395_v49, %v2392_v41  ;;  %v11766_v5 = vsel %vm2236_vm13, %v2378_v46, %v2387_v37  ;;  %v11771_v30 = vsel %vm2683_vm14, %v2715_v56, %v2717_v11  ;;  %v14961_v31 = vmov %v14959_v45  ;;  %v4274_v46 = vld [vmem:[%s14926_s1 + $0x20] sm:$0xff]  ;;  %v11913_v41 = vld [vmem:[#allocation2 + $0x48] sm:$0xff]   ;;  %v11918_v49 = vld [vmem:[#allocation2 + $0x50] sm:$0xff]  }
  0xaa   : > { %v1951_v23 = vsel %vm1483_vm12, %v14960_v34, %v14959_v45  ;;  %v1953_v9 = vsel %vm1483_vm12, %v14961_v31, %v1952_v25  ;;  %v1956_v56 = vrot.slane %v11730_v52, 1  ;;  %v1955_v18 = vsel %vm1483_vm12, %v1952_v25, %v1954_v58  ;;  %v2991_v25 = vld [vmem:[#allocation2 + $0x10] sm:$0xc] }
  0xab   : > { %v11778_v51 = vsel %vm2236_vm13, %v2387_v37, %v11758_v38  ;;  %v3897_v45 = vrot.slane %v11913_v41, 3  ;;  %vm5371_vm4 = vcmask 130048   ;;  %vm5034_vm5 = vcmask 125953  }
  0xac   : > { %v1957_v15 = vsel %vm1483_vm12, %v1954_v58, %v1956_v56  ;;  %vm12960_vm6 = vmand %vm5034_vm5, %vm695_vm7 }
  0xae   : > { %10077 = vmatmul.mubr.msk.bf16.gmra.mxu0 %vm1025_vm8, %v11478_v10  ;;  %10119 = vmatmul.mubr.msk.bf16.gmra.mxu1 %vm1025_vm8, %v1951_v23  ;;  %v1958_v10 = vrot.slane %v10755_v33, 1  ;;  %v3899_v23 = vrot.slane %v11918_v49, 3 }
  0xaf   : > { %10080 = vmatprep.mubr.msk.bf16.mxu0 %vm1025_vm8, %v11488_v7  ;;  %10122 = vmatprep.mubr.msk.bf16.mxu1 %vm1025_vm8, %v1953_v9  ;;  %v4277_v9 = vld [vmem:[%s14926_s1 + $0x38] sm:$0xff] }
  0xb0   : > { %v1959_v7 = vsel %vm1483_vm12, %v1956_v56, %v1958_v10  ;;  %v11936_v33 = vsel %vm3883_vm15, %v3897_v45, %v3899_v23  ;;  %v4278_v10 = vld [vmem:[%s14926_s1 + $0x40] sm:$0xff] }
  0xb1   : > { %14962 = vst [vmem:[#allocation8_spill] sm:$0xff] %v11936_v33  ;;  %v12213_v33 = vld [vmem:[#allocation2 + $0x90] sm:$0xff]  }
  0xb6   : > { %10081 = vmatmul.mubr.msk.bf16.gmra.mxu0 %vm1025_vm8, %v11491_v21  ;;  %10123 = vmatmul.mubr.msk.bf16.gmra.mxu1 %vm1025_vm8, %v1955_v18  ;;  %v3662_v21 = vsel %vm1080_vm0, %v11597_v63, 0 }
  0xb7   : > { %10084 = vmatprep.mubr.msk.bf16.mxu0 %vm1025_vm8, %v11509_v26  ;;  %10126 = vmatprep.mubr.msk.bf16.mxu1 %vm1025_vm8, %v1957_v15  ;;  %v3215_v26 = vsel %vm1080_vm0, %v11537_v16, 0  ;;  %v11838_v16 = vld [vmem:[#allocation2 + $0x18] sm:$0xff]  }
  0xbe   : > { %10085 = vmatmul.mubr.msk.bf16.gmra.mxu0 %vm1025_vm8, %v11517_v57  ;;  %10127 = vmatmul.mubr.msk.bf16.gmra.mxu1 %vm1025_vm8, %v1959_v7  ;;  %v11818_v57 = vld [vmem:[%s14927_s2 + $0x10] sm:$0x3] }
  0xbf   : > { %10088 = vmatprep.mubr.msk.bf16.mxu0 %vm1025_vm8, %v11521_v43  ;;  %10170 = vmatprep.mubr.msk.bf16.mxu1 %vm1025_vm8, %v11573_v6  ;;  %v2992_v43 = vld [vmem:[#allocation2 + $0x14] sm:$0xf] }
  0xc0   : > { %v11924_v34 = vcombine.low %v2991_v25, %v2992_v43  ;;  %v4281_v25 = vld [vmem:[%s14926_s1 + $0x58] sm:$0xff] }
  0xc6   : > { %10089 = vmatmul.mubr.msk.bf16.gmra.mxu0 %vm1025_vm8, %v11524_v1  ;;  %10171 = vmatmul.mubr.msk.bf16.vlgmr.msra.gmra.mxu1 %vm1025_vm8, %v11576_v20  ;;  %v3877_v1 = vld [vmem:[#allocation2 + $0x10] sm:$0x8]  ;;  %v3885_v20 = vrot.slane %v11838_v16, 3 }
  0xc7   : > { %10132 = vmatprep.mubr.msk.bf16.mxu0 %vm1025_vm8, %v11564_v2  ;;  %10174 = vmatprep.mubr.msk.bf16.mxu1 %vm1025_vm8, %v11590_v19  ;;  %v9112_v2 = vcombine.low %v3877_v1, %v2992_v43  ;;  %v3441_v43 = vshll.u32 %v11924_v34, 16  ;;  %v3449_v1 = vshll.u32 %v11838_v16, 16 }
  0xc8   : > { %10245 = vmatpush3.bf16.msra.mxu1 %v3662_v21 }
  0xc9   : > { %v3884_v6 = vrot.slane %v9112_v2, 3  ;;  %v11955_v2 = vld [vmem:[#allocation2 + $0x58] sm:$0xff]  }
  0xcb   : > { %v11845_v63 = vsel %vm3883_vm15, %v3884_v6, %v3885_v20 }
  0xce   : > { %10133 = vmatmul.mubr.msk.bf16.vlgmr.msra.gmra.mxu0 %vm1025_vm8, %v11570_v39  ;;  %10175 = vmatmul.mubr.msk.bf16.gmra.mxu1 %vm1025_vm8, %v11606_v29  ;;  %v11840_v39 = vld [vmem:[#allocation2 + $0x20] sm:$0xff]  }
  0xcf   : > { %10207 = vmatpush3.bf16.msra.mxu0 %v3215_v26  ;;  %10136 = vmatprep.mubr.msk.bf16.mxu0 %vm1025_vm8, %v11609_v40  ;;  %v3887_v19 = vrot.slane %v11840_v39, 3  ;;  %v11858_v40 = vld [vmem:[#allocation2 + $0x28] sm:$0xff]   ;;  %v3438_v26 = vshrl.u32 %v11924_v34, 16 }
  0xd0   : > { %10178 = vmatprep.mubr.msk.bf16.mxu1 %vm1025_vm8, %v11622_v47  ;;  %10670 = vmatprep.subr.msk.bf16.mxu0 %vm1080_vm0, %v11818_v57  ;;  %v3889_v47 = vrot.slane %v11858_v40, 3 }
  0xd1   : > { %v11848_v29 = vsel %vm3883_vm15, %v3885_v20, %v3887_v19  ;;  %v11962_v20 = vld [vmem:[#allocation2 + $0x60] sm:$0xff]  }
  0xd2   : > { %14963 = vst [vmem:[#allocation9_spill] sm:$0xff] %v11962_v20 }
  0xd6   : > { %10137 = vmatmul.mubr.msk.bf16.gmra.mxu0 %vm1025_vm8, %v11616_v8  ;;  %10179 = vmatmul.mubr.msk.bf16.gmra.mxu1 %vm1025_vm8, %v11630_v61  ;;  %v11860_v8 = vld [vmem:[#allocation2 + $0x30] sm:$0xff]  }
  0xd7   : > { %10140 = vmatprep.mubr.msk.bf16.mxu0 %vm1025_vm8, %v11627_v32  ;;  %10182 = vmatprep.mubr.msk.bf16.mxu1 %vm1025_vm8, %v11665_v42  ;;  %v3891_v37 = vrot.slane %v11860_v8, 3  ;;  %v11865_v32 = vsel %vm3883_vm15, %v3887_v19, %v3889_v47  ;;  %v11881_v42 = vld [vmem:[#allocation2 + $0x38] sm:$0xff]  }
  0xd9   : > { %v11868_v61 = vsel %vm3883_vm15, %v3889_v47, %v3891_v37  ;;  %v10756_v47 = vld [vmem:[#allocation2 + $0x98] ss:$0 sps:$4 sm:$0x33]  }
  0xde   : > { %10141 = vmatmul.mubr.msk.bf16.gmra.mxu0 %vm1025_vm8, %v11641_v17  ;;  %10183 = vmatmul.mubr.msk.bf16.gmra.mxu1 %vm1025_vm8, %v11668_v0  ;;  %v4270_v17 = vld [vmem:[%s14926_s1] sm:$0xff]  ;;  %v4272_v0 = vld [vmem:[%s14926_s1 + $0x10] sm:$0xff] }
  0xdf   : > { %10144 = vmatprep.mubr.msk.bf16.mxu0 %vm1025_vm8, %v11673_v60  ;;  %10186 = vmatprep.mubr.msk.bf16.mxu1 %vm1025_vm8, %v11682_v12  ;;  %v11886_v60 = vld [vmem:[#allocation2 + $0x40] sm:$0xff]   ;;  %v3893_v12 = vrot.slane %v11881_v42, 3 }
  0xe0   : > { %4308 = vperm.xlu0 %10716, %v4270_v17   ;;  %4318 = vperm.xlu1 %10717, %v4272_v0   ;;  %v3901_v17 = vrot.slane %v11955_v2, 3 }
  0xe6   : > { %10145 = vmatmul.mubr.msk.bf16.gmra.mxu0 %vm1025_vm8, %v11679_v3  ;;  %10187 = vmatmul.mubr.msk.bf16.gmra.mxu1 %vm1025_vm8, %v11685_v59  ;;  %v4271_v3 = vld [vmem:[%s14926_s1 + $0x8] sm:$0xff]  ;;  %v3895_v59 = vrot.slane %v11886_v60, 3 }
  0xe7   : > { %10148 = vmatprep.mubr.msk.bf16.mxu0 %vm1025_vm8, %v11689_v35  ;;  %10190 = vmatprep.mubr.msk.bf16.mxu1 %vm1025_vm8, %v11709_v4  ;;  %v4273_v35 = vld [vmem:[%s14926_s1 + $0x18] sm:$0xff]  ;;  %v11897_v4 = vsel %vm3883_vm15, %v3891_v37, %v3893_v12  ;;  %v4280_v37 = vld [vmem:[%s14926_s1 + $0x50] sm:$0xff] }
  0xe8   : > { %4313 = vperm.xlu0 %10716, %v4271_v3   ;;  %4323 = vperm.xlu1 %10717, %v4273_v35   ;;  %v11900_v44 = vsel %vm3883_vm15, %v3893_v12, %v3895_v59  ;;  %v11931_v58 = vsel %vm3883_vm15, %v3895_v59, %v3897_v45  ;;  %v3440_v12 = vrot.slane %v3438_v26, 2  ;;  %v14937_v59 = vrot.slane %v11962_v20, 3 }
  0xea   : > { %v11982_v45 = vsel %vm3883_vm15, %v3901_v17, %v14937_v59 }
  0xeb   : > { %14965 = vst [vmem:[#allocation11_spill] sm:$0xff] %v11982_v45 }
  0xec   : > { %v10020_v13 = vpop.f32.mrf.mxu1  ;;  %4328 = vperm.xlu0 %10716, %v4274_v46  }
  0xee   : > { %10149 = vmatmul.mubr.msk.bf16.gmra.mxu0 %vm1025_vm8, %v11700_v27  ;;  %10191 = vmatmul.mubr.msk.bf16.gmra.mxu1 %vm1025_vm8, %v11712_v54  ;;  %v1334_v48 = vpop.f32.mrf.mxu1  ;;  %v4275_v27 = vld [vmem:[%s14926_s1 + $0x28] sm:$0xff] }
  0xef   : > { %10152 = vmatprep.mubr.msk.bf16.mxu0 %vm1025_vm8, %v11717_v55  ;;  %10194 = vmatprep.mubr.msk.bf16.mxu1 %vm1025_vm8, %v11725_v36  ;;  %v4276_v55 = vld [vmem:[%s14926_s1 + $0x30] sm:$0xff] }
  0xf0   : > { %v10021_v54 = vpop.f32.mrf.mxu1  ;;  %4333 = vperm.xlu1 %10717, %v4275_v27   ;;  %4338 = vperm.xlu0 %10716, %v4276_v55   ;;  %v11975_v27 = vsel %vm3883_vm15, %v3899_v23, %v3901_v17  ;;  %v4282_v23 = vld [vmem:[%s14926_s1 + $0x60] sm:$0xff] }
  0xf1   : > { %14964 = vst [vmem:[#allocation10_spill] sm:$0xff] %v11975_v27 }
  0xf2   : > { %v1337_v36 = vpop.f32.mrf.mxu1 }
  0xf4   : > { %v10024_v18 = vpop.f32.mrf.mxu1  ;;  %4343 = vperm.xlu1 %10717, %v4277_v9   ;;  %4348 = vperm.xlu0 %10716, %v4278_v10   ;;  %v2402_v9 = vshll.u32 %v10756_v47, 16  ;;  %v3455_v10 = vshrl.u32 %v11840_v39, 16 }
  0xf5   : > { %v9982_v31 = vpop.f32.mrf.mxu0 }
  0xf6   : > { %v11933_v56 = vadd.f32 %v10020_v13, %v9982_v31  ;;  %10153 = vmatmul.mubr.msk.bf16.gmra.mxu0 %vm1025_vm8, %v11722_v24  ;;  %10195 = vmatmul.mubr.msk.bf16.gmra.mxu1 %vm1025_vm8, %v11728_v62  ;;  %v1350_v21 = vpop.f32.mrf.mxu1  ;;  %v3446_v62 = vshrl.u32 %v11838_v16, 16  ;;  %v3443_v13 = vrot.slane %v3441_v43, 3  ;;  %v2399_v31 = vshrl.u32 %v10756_v47, 16 }
  0xf7   : > { %v1118_v15 = vpop.f32.mrf.mxu0  ;;  %10156 = vmatprep.mubr.msk.bf16.mxu0 %vm1025_vm8, %v11733_v14  ;;  %10198 = vmatprep.mubr.msk.bf16.mxu1 %vm1025_vm8, %v11749_v53  ;;  %v4279_v14 = vld [vmem:[%s14926_s1 + $0x48] sm:$0xff] }
  0xf8   : > { %v11947_v7 = vadd.f32 %v1334_v48, %v1118_v15  ;;  %v10025_v53 = vpop.f32.mrf.mxu1  ;;  %4353 = vperm.xlu1 %10717, %v4279_v14   ;;  %v3448_v46 = vrot.slane %v3446_v62, 2  ;;  %v3451_v48 = vrot.slane %v3449_v1, 3  ;;  %4358 = vperm.xlu0 %10716, %v4280_v37   ;;  %v3464_v62 = vshrl.u32 %v11858_v40, 16  ;;  %v4284_v37 = vld [vmem:[%s14926_s1 + $0x70] sm:$0xff] }
  0xf9   : > { %v9983_v24 = vpop.f32.mrf.mxu0  ;;  %v3467_v1 = vshll.u32 %v11858_v40, 16 }
  0xfa   : > { %v11960_v6 = vadd.f32 %v10021_v54, %v9983_v24  ;;  %v1353_v3 = vpop.f32.mrf.mxu1  ;;  %v3444_v24 = vor.u32 %v3443_v13, %v3440_v12  ;;  %v3452_v43 = vor.u32 %v3451_v48, %v3448_v46  ;;  %v3457_v13 = vrot.slane %v3455_v10, 2 }
  0xfb   : > { %v1121_v19 = vpop.f32.mrf.mxu0  ;;  %v3466_v48 = vrot.slane %v3464_v62, 2 }
  0xfc   : > { %v11968_v0 = vadd.f32 %v1337_v36, %v1121_v19  ;;  %v10028_v55 = vpop.f32.mrf.mxu1  ;;  %4363 = vperm.xlu1 %10717, %v4281_v25   ;;  %4368 = vperm.xlu0 %10716, %v4282_v23   ;;  %v2401_v19 = vrot.slane %v2399_v31, 1  ;;  %v3453_v46 = vsel %vm3436_vm1, %v3444_v24, %v3452_v43  ;;  %v3469_v25 = vrot.slane %v3467_v1, 3 }
  0xfd   : > { %v9986_v35 = vpop.f32.mrf.mxu0  ;;  %v3482_v1 = vshrl.u32 %v11881_v42, 16 }
  0xfe   : > { %v11977_v54 = vadd.f32 %v10024_v18, %v9986_v35  ;;  %10157 = vmatmul.mubr.msk.bf16.gmra.mxu0 %vm1025_vm8, %v11740_v50  ;;  %10199 = vmatmul.mubr.msk.bf16.gmra.mxu1 %vm1025_vm8, %v11752_v28  ;;  %v1366_v15 = vpop.f32.mrf.mxu1  ;;  %v2719_v50 = vrot.slane %v10756_v47, 2  ;;  %v3458_v28 = vshll.u32 %v11840_v39, 16  ;;  %v2404_v47 = vrot.slane %v2402_v9, 2 }
  0xff   : > { %v1134_v36 = vpop.f32.mrf.mxu0  ;;  %10160 = vmatprep.mubr.msk.bf16.mxu0 %vm1025_vm8, %v11755_v22  ;;  %10202 = vmatprep.mubr.msk.bf16.mxu1 %vm1025_vm8, %v11771_v30  ;;  %v4283_v22 = vld [vmem:[%s14926_s1 + $0x68] sm:$0xff]  ;;  %v3470_v24 = vor.u32 %v3469_v25, %v3466_v48 }
 0x100   : > { %v11993_v18 = vadd.f32 %v1350_v21, %v1134_v36  ;;  %v10029_v30 = vpop.f32.mrf.mxu1  ;;  %4373 = vperm.xlu1 %10717, %v4283_v22   ;;  %v2720_v12 = vsel %vm2683_vm14, %v2717_v11, %v2719_v50  ;;  %4378 = vperm.xlu0 %10716, %v4284_v37   ;;  %v4285_v36 = vld [vmem:[%s14926_s1 + $0x78] sm:$0xff]  ;;  %v2405_v52 = vor.u32 %v2404_v47, %v2401_v19  ;;  %v4286_v11 = vld [vmem:[%s14926_s1 + $0x80] sm:$0xff]  ;;  %v3473_v50 = vshrl.u32 %v11860_v8, 16 }
 0x101   : > { %v9987_v26 = vpop.f32.mrf.mxu0  ;;  %v3485_v22 = vshll.u32 %v11881_v42, 16 }
 0x102   : > { %v12004_v21 = vadd.f32 %v10025_v53, %v9987_v26  ;;  %v1369_v35 = vpop.f32.mrf.mxu1  ;;  %v3460_v53 = vrot.slane %v3458_v28, 3  ;;  %v3123_v28 = vrot.slane %v11924_v34, 2  ;;  %v3124_v26 = vrot.slane %v11838_v16, 2  ;;  %v4288_v16 = vld [vmem:[%s14926_s1 + $0x90] sm:$0xff] }
 0x103   : > { %v1137_v14 = vpop.f32.mrf.mxu0  ;;  %v3475_v37 = vrot.slane %v3473_v50, 2 }
 0x104   : > { %v12009_v17 = vadd.f32 %v1353_v3, %v1137_v14  ;;  %4383 = vperm.xlu1 %10717, %v4285_v36   ;;  %v3461_v23 = vor.u32 %v3460_v53, %v3457_v13  ;;  %4388 = vperm.xlu0 %10716, %v4286_v11   ;;  %v2406_v14 = vsel %vm2236_vm13, %v11758_v38, %v2405_v52  ;;  %v4289_v38 = vld [vmem:[%s14926_s1 + $0x98] sm:$0xff]  ;;  %v3487_v36 = vrot.slane %v3485_v22, 3 }
 0x105   : > { %v3125_v53 = vsel %vm2683_vm14, %v3123_v28, %v3124_v26  ;;  %v3491_v52 = vshrl.u32 %v11886_v60, 16  ;;  %v3494_v11 = vshll.u32 %v11886_v60, 16  ;;  %v4291_v28 = vld [vmem:[%s14926_s1 + $0xa8] sm:$0xff]  ;;  %v3976_v22 = vsel %vm1080_vm0, %v11818_v57, 0  ;;  %v4293_v57 = vld [vmem:[%s14926_s1 + $0xb8] sm:$0xff] }
 0x106   : > { %10161 = vmatmul.mubr.msk.bf16.gmra.mxu0 %vm1025_vm8, %v11766_v5  ;;  %v9990_v3 = vpop.f32.mrf.mxu0  ;;  %10203 = vmatmul.mubr.msk.bf16.gmra.mxu1 %vm1025_vm8, %v2720_v12  ;;  %v3476_v5 = vshll.u32 %v11860_v8, 16  ;;  %v3462_v47 = vsel %vm3436_vm1, %v3452_v43, %v3461_v23  ;;  %v4290_v43 = vld [vmem:[%s14926_s1 + $0xa0] sm:$0xff]  ;;  %vm4543_vm0 = vcmask 123904  }
 0x107   : > { %10164 = vmatprep.mubr.msk.bf16.mxu0 %vm1025_vm8, %v11778_v51  ;;  %v12026_v31 = vadd.f32 %v10028_v55, %v9990_v3  ;;  %v10032_v9 = vpop.f32.mrf.mxu1  ;;  %10246 = vmatprep.mubr.msk.bf16.mxu1 %vm1025_vm8, %v3453_v46  ;;  %v4287_v51 = vld [vmem:[%s14926_s1 + $0x88] sm:$0xff]  ;;  %v3471_v46 = vsel %vm3436_vm1, %v3461_v23, %v3470_v24  ;;  %v3126_v3 = vrot.slane %v11840_v39, 2  ;;  %v3128_v23 = vrot.slane %v11858_v40, 2  ;;  %v4292_v40 = vld [vmem:[%s14926_s1 + $0xb0] sm:$0xff]  ;;  %vm12498_vm2 = vmand %vm4543_vm0, %vm255_vm3 }
 0x108   : > { %v1150_v10 = vpop.f32.mrf.mxu0  ;;  %4393 = vperm.xlu1 %10717, %v4287_v51   ;;  %v3478_v12 = vrot.slane %v3476_v5, 3  ;;  %4398 = vperm.xlu0 %10716, %v4288_v16   ;;  %v3500_v5 = vshrl.u32 %v11913_v41, 16  ;;  %vm4540_vm3 = vcmask 125952  }
 0x109   : > { %v12036_v55 = vadd.f32 %v1366_v15, %v1150_v10  ;;  %v1382_v62 = vpop.f32.mrf.mxu1  ;;  %v3503_v10 = vshll.u32 %v11913_v41, 16 }
 0x10a   : > { %v9991_v34 = vpop.f32.mrf.mxu0 }
 0x10b   : > { %v12045_v19 = vadd.f32 %v10029_v30, %v9991_v34  ;;  %v10033_v15 = vpop.f32.mrf.mxu1  ;;  %v3484_v30 = vrot.slane %v3482_v1, 2  ;;  %v3127_v34 = vsel %vm2683_vm14, %v3124_v26, %v3126_v3 }
 0x10c   : > { %v1153_v13 = vpop.f32.mrf.mxu0  ;;  %4403 = vperm.xlu1 %10717, %v4289_v38   ;;  %4408 = vperm.xlu0 %10716, %v4290_v43   ;;  %v3505_v38 = vrot.slane %v3503_v10, 3  ;;  %v4294_v43 = vld [vmem:[%s14926_s1 + $0xc0] sm:$0xff] }
 0x10d   : > { %v12053_v48 = vadd.f32 %v1369_v35, %v1153_v13  ;;  %v1385_v25 = vpop.f32.mrf.mxu1  ;;  %v3479_v35 = vor.u32 %v3478_v12, %v3475_v37  ;;  %v3488_v51 = vor.u32 %v3487_v36, %v3484_v30  ;;  %v3493_v37 = vrot.slane %v3491_v52, 2 }
 0x10e   : > { %10165 = vmatmul.mubr.msk.bf16.gmra.mxu0 %vm1025_vm8, %v2406_v14  ;;  %10247 = vmatmul.mubr.msk.bf16.vlgmr.msra.gmra.mxu1 %vm1025_vm8, %v3462_v47  ;;  %v3496_v12 = vrot.slane %v3494_v11, 3  ;;  %v3509_v11 = vshrl.u32 %v11918_v49, 16 }
 0x10f   : > { %10208 = vmatprep.mubr.msk.bf16.mxu0 %vm1025_vm8, %v3125_v53  ;;  %10250 = vmatprep.mubr.msk.bf16.mxu1 %vm1025_vm8, %v3471_v46  ;;  %v3480_v47 = vsel %vm3436_vm1, %v3470_v24, %v3479_v35  ;;  %v3502_v46 = vrot.slane %v3500_v5, 2  ;;  %v3489_v26 = vsel %vm3436_vm1, %v3479_v35, %v3488_v51  ;;  %v3132_v35 = vrot.slane %v11881_v42, 2  ;;  %v4295_v42 = vld [vmem:[%s14926_s1 + $0xc8] sm:$0xff] }
 0x110   : > { %v10036_v50 = vpop.f32.mrf.mxu1  ;;  %4413 = vperm.xlu1 %10717, %v4291_v28   ;;  %4418 = vperm.xlu0 %10716, %v4292_v40   ;;  %v3497_v52 = vor.u32 %v3496_v12, %v3493_v37  ;;  %v3518_v28 = vshrl.u32 %v11955_v2, 16 }
 0x111   : > { %v9994_v39 = vpop.f32.mrf.mxu0  ;;  %v3506_v10 = vor.u32 %v3505_v38, %v3502_v46 }
 0x112   : > { %v12071_v1 = vadd.f32 %v10032_v9, %v9994_v39  ;;  %v1398_v14 = vpop.f32.mrf.mxu1  ;;  %v3129_v9 = vsel %vm2683_vm14, %v3126_v3, %v3128_v23  ;;  %v3521_v39 = vshll.u32 %v11955_v2, 16  ;;  %v3498_v12 = vsel %vm3436_vm1, %v3488_v51, %v3497_v52 }
 0x113   : > { %v1166_v16 = vpop.f32.mrf.mxu0 }
 0x114   : > { %v12080_v13 = vadd.f32 %v1382_v62, %v1166_v16  ;;  %v10037_v53 = vpop.f32.mrf.mxu1  ;;  %4423 = vperm.xlu1 %10717, %v4293_v57   ;;  %v3130_v62 = vrot.slane %v11860_v8, 2  ;;  %4428 = vperm.xlu0 %10716, %v4294_v43   ;;  %v4296_v16 = vld [vmem:[%s14926_s1 + $0xd0] sm:$0xff]  ;;  %v4297_v43 = vld [vmem:[%s14926_s1 + $0xd8] sm:$0xff] }
 0x115   : > { %v9995_v30 = vpop.f32.mrf.mxu0 }
 0x116   : > { %10209 = vmatmul.mubr.msk.bf16.vlgmr.msra.gmra.mxu0 %vm1025_vm8, %v3127_v34  ;;  %v12088_v24 = vadd.f32 %v10033_v15, %v9995_v30  ;;  %10251 = vmatmul.mubr.msk.bf16.gmra.mxu1 %vm1025_vm8, %v3480_v47  ;;  %v1401_v36 = vpop.f32.mrf.mxu1  ;;  %v3512_v15 = vshll.u32 %v11918_v49, 16  ;;  %v3133_v37 = vsel %vm2683_vm14, %v3130_v62, %v3132_v35  ;;  %v3520_v30 = vrot.slane %v3518_v28, 2 }
 0x117   : > { %10283 = vmatpush3.bf16.msra.mxu0 %v3976_v22  ;;  %v1169_v3 = vpop.f32.mrf.mxu0  ;;  %10212 = vmatprep.mubr.msk.bf16.mxu0 %vm1025_vm8, %v3129_v9  ;;  %v3511_v9 = vrot.slane %v3509_v11, 2 }
 0x118   : > { %v12099_v5 = vadd.f32 %v1385_v25, %v1169_v3  ;;  %v10040_v8 = vpop.f32.mrf.mxu1  ;;  %10254 = vmatprep.mubr.msk.bf16.mxu1 %vm1025_vm8, %v3489_v26  ;;  %4433 = vperm.xlu1 %10717, %v4295_v42   ;;  %v3131_v25 = vsel %vm2683_vm14, %v3128_v23, %v3130_v62  ;;  %v3514_v46 = vrot.slane %v3512_v15, 3  ;;  %v3523_v26 = vrot.slane %v3521_v39, 3  ;;  %v12118_v23 = vld [vmem:[#allocation2 + $0x68] sm:$0xff]   ;;  %v4298_v62 = vld [vmem:[%s14926_s1 + $0xe0] sm:$0xff] }
 0x119   : > { %v9998_v22 = vpop.f32.mrf.mxu0  ;;  %14966 = vst [vmem:[#allocation12_spill] sm:$0xff] %v12118_v23  ;;  %4438 = vperm.xlu0 %10716, %v4296_v16   ;;  %v3136_v15 = vrot.slane %v11913_v41, 2  ;;  %v3530_v39 = vshll.u32 %v11962_v20, 16  ;;  %v4299_v16 = vld [vmem:[%s14926_s1 + $0xe8] sm:$0xff] }
 0x11a   : > { %v12107_v40 = vadd.f32 %v10036_v50, %v9998_v22  ;;  %v1414_v34 = vpop.f32.mrf.mxu1  ;;  %v3507_v50 = vsel %vm3436_vm1, %v3497_v52, %v3506_v10  ;;  %v3515_v28 = vor.u32 %v3514_v46, %v3511_v9  ;;  %v3524_v42 = vor.u32 %v3523_v26, %v3520_v30  ;;  %v12150_v30 = vld [vmem:[#allocation2 + $0x70] sm:$0xff]  }
 0x11b   : > { %v1182_v47 = vpop.f32.mrf.mxu0  ;;  %v3536_v22 = vshrl.u32 %v12118_v23, 16  ;;  %14967 = vst [vmem:[#allocation13_spill] sm:$0xff] %v12150_v30 }
 0x11c   : > { %v12115_v38 = vadd.f32 %v1398_v14, %v1182_v47  ;;  %v10041_v57 = vpop.f32.mrf.mxu1  ;;  %4443 = vperm.xlu1 %10717, %v4297_v43   ;;  %v3134_v14 = vrot.slane %v11886_v60, 2  ;;  %v3516_v9 = vsel %vm3436_vm1, %v3506_v10, %v3515_v28 }
 0x11d   : > { %v9999_v3 = vpop.f32.mrf.mxu0  ;;  %4448 = vperm.xlu0 %10716, %v4298_v62   ;;  %v3538_v62 = vrot.slane %v3536_v22, 2 }
 0x11e   : > { %10213 = vmatmul.mubr.msk.bf16.gmra.mxu0 %vm1025_vm8, %v3131_v25  ;;  %v12124_v51 = vadd.f32 %v10037_v53, %v9999_v3  ;;  %10255 = vmatmul.mubr.msk.bf16.gmra.mxu1 %vm1025_vm8, %v3498_v12  ;;  %v1417_v11 = vpop.f32.mrf.mxu1  ;;  %v3527_v53 = vshrl.u32 %v11962_v20, 16  ;;  %v3539_v25 = vshll.u32 %v12118_v23, 16  ;;  %v3135_v47 = vsel %vm2683_vm14, %v3132_v35, %v3134_v14 }
 0x11f   : > { %v1185_v52 = vpop.f32.mrf.mxu0  ;;  %10216 = vmatprep.mubr.msk.bf16.mxu0 %vm1025_vm8, %v3133_v37  ;;  %10258 = vmatprep.mubr.msk.bf16.mxu1 %vm1025_vm8, %v3507_v50  ;;  %v4300_v37 = vld [vmem:[%s14926_s1 + $0xf0] sm:$0xff]  ;;  %v3532_v50 = vrot.slane %v3530_v39, 3  ;;  %v3137_v43 = vsel %vm2683_vm14, %v3134_v14, %v3136_v15  ;;  %v3525_v3 = vsel %vm3436_vm1, %v3515_v28, %v3524_v42  ;;  %v3138_v14 = vrot.slane %v11918_v49, 2  ;;  %v4302_v28 = vld [vmem:[%s14926_s1 + $0x100] sm:$0xff] }
 0x120   : > { %v12136_v60 = vadd.f32 %v1401_v36, %v1185_v52  ;;  %4453 = vperm.xlu1 %10717, %v4299_v16   ;;  %v3529_v46 = vrot.slane %v3527_v53, 2  ;;  %v3541_v35 = vrot.slane %v3539_v25, 3  ;;  %v12154_v52 = vld [vmem:[#allocation2 + $0x78] sm:$0xff]   ;;  %v3545_v25 = vshrl.u32 %v12150_v30, 16 }
 0x121   : > { %14968 = vst [vmem:[#allocation14_spill] sm:$0xff] %v12154_v52  ;;  %4458 = vperm.xlu0 %10716, %v4300_v37   ;;  %v3140_v49 = vrot.slane %v11955_v2, 2  ;;  %v3139_v2 = vsel %vm2683_vm14, %v3136_v15, %v3138_v14  ;;  %v4305_v15 = vld [vmem:[%s14926_s1 + $0x118] sm:$0xff] }
 0x122   : > { %v10002_v41 = vpop.f32.mrf.mxu0  ;;  %v3542_v37 = vor.u32 %v3541_v35, %v3538_v62  ;;  %v3547_v62 = vrot.slane %v3545_v25, 2  ;;  %v3142_v25 = vrot.slane %v11962_v20, 2 }
 0x123   : > { %v12147_v36 = vadd.f32 %v10040_v8, %v10002_v41  ;;  %v10044_v12 = vpop.f32.mrf.mxu1  ;;  %v4301_v8 = vld [vmem:[%s14926_s1 + $0xf8] sm:$0xff]  ;;  %v3548_v41 = vshll.u32 %v12150_v30, 16 }
 0x124   : > { %v1198_v26 = vpop.f32.mrf.mxu0  ;;  %4463 = vperm.xlu1 %10717, %v4301_v8   ;;  %v12186_v8 = vld [vmem:[#allocation2 + $0x80] sm:$0xff]  }
 0x125   : > { %v12159_v16 = vadd.f32 %v1414_v34, %v1198_v26  ;;  %v1430_v10 = vpop.f32.mrf.mxu1  ;;  %v3533_v34 = vor.u32 %v3532_v50, %v3529_v46  ;;  %v3557_v26 = vshll.u32 %v12154_v52, 16  ;;  %4468 = vperm.xlu0 %10716, %v4302_v28   ;;  %v4304_v50 = vld [vmem:[%s14926_s1 + $0x110] sm:$0xff]  ;;  %v3550_v35 = vrot.slane %v3548_v41, 3 }
 0x126   : > { %10217 = vmatmul.mubr.msk.bf16.gmra.mxu0 %vm1025_vm8, %v3135_v47  ;;  %v10003_v53 = vpop.f32.mrf.mxu0  ;;  %10259 = vmatmul.mubr.msk.bf16.gmra.mxu1 %vm1025_vm8, %v3516_v9  ;;  %v3554_v9 = vshrl.u32 %v12154_v52, 16 }
 0x127   : > { %v12167_v39 = vadd.f32 %v10041_v57, %v10003_v53  ;;  %10220 = vmatprep.mubr.msk.bf16.mxu0 %vm1025_vm8, %v3137_v43  ;;  %v10045_v22 = vpop.f32.mrf.mxu1  ;;  %10262 = vmatprep.mubr.msk.bf16.mxu1 %vm1025_vm8, %v3525_v3  ;;  %v4303_v57 = vld [vmem:[%s14926_s1 + $0x108] sm:$0xff]  ;;  %v3534_v3 = vsel %vm3436_vm1, %v3524_v42, %v3533_v34  ;;  %v3141_v53 = vsel %vm2683_vm14, %v3138_v14, %v3140_v49  ;;  %v3559_v59 = vrot.slane %v3557_v26, 3 }
 0x128   : > { %v1201_v47 = vpop.f32.mrf.mxu0  ;;  %4473 = vperm.xlu1 %10717, %v4303_v57   ;;  %v12190_v57 = vld [vmem:[#allocation2 + $0x88] sm:$0xff]   ;;  %v3566_v26 = vshll.u32 %v12186_v8, 16 }
 0x129   : > { %v12179_v43 = vadd.f32 %v1417_v11, %v1201_v47  ;;  %v1433_v46 = vpop.f32.mrf.mxu1  ;;  %v3543_v11 = vsel %vm3436_vm1, %v3533_v34, %v3542_v37  ;;  %v3556_v47 = vrot.slane %v3554_v9, 2  ;;  %4478 = vperm.xlu0 %10716, %v4304_v50   ;;  %v3551_v34 = vor.u32 %v3550_v35, %v3547_v62 }
 0x12a   : > { %v3563_v9 = vshrl.u32 %v12186_v8, 16  ;;  %v3572_v20 = vshrl.u32 %v12190_v57, 16 }
 0x12b   : > { %14969 = vst [vmem:[#allocation15_spill] sm:$0xff] %v12179_v43  ;;  %v3560_v45 = vor.u32 %v3559_v59, %v3556_v47  ;;  %v3552_v35 = vsel %vm3436_vm1, %v3542_v37, %v3551_v34  ;;  %v3146_v37 = vrot.slane %v12150_v30, 2 }
 0x12c   : > { %v10048_v28 = vpop.f32.mrf.mxu1  ;;  %4483 = vperm.xlu1 %10717, %v4305_v15   ;;  %v3565_v27 = vrot.slane %v3563_v9, 2  ;;  %v3574_v43 = vrot.slane %v3572_v20, 2 }
 0x12d   : > { %v3561_v47 = vsel %vm3436_vm1, %v3551_v34, %v3560_v45 }
 0x12e   : > { %v10006_v42 = vpop.f32.mrf.mxu0  ;;  %10221 = vmatmul.mubr.msk.bf16.gmra.mxu0 %vm1025_vm8, %v3139_v2  ;;  %v1446_v41 = vpop.f32.mrf.mxu1  ;;  %10263 = vmatmul.mubr.msk.bf16.gmra.mxu1 %vm1025_vm8, %v3534_v3  ;;  %v3144_v2 = vrot.slane %v12118_v23, 2  ;;  %v3575_v3 = vshll.u32 %v12190_v57, 16 }
 0x12f   : > { %v12198_v14 = vadd.f32 %v10044_v12, %v10006_v42  ;;  %10224 = vmatprep.mubr.msk.bf16.mxu0 %vm1025_vm8, %v3141_v53  ;;  %10266 = vmatprep.mubr.msk.bf16.mxu1 %vm1025_vm8, %v3543_v11  ;;  %v3143_v53 = vsel %vm2683_vm14, %v3140_v49, %v3142_v25 }
 0x130   : > { %v1214_v50 = vpop.f32.mrf.mxu0  ;;  %v10049_v15 = vpop.f32.mrf.mxu1  ;;  %v3145_v59 = vsel %vm2683_vm14, %v3142_v25, %v3144_v2  ;;  %v3581_v25 = vshrl.u32 %v12213_v33, 16 }
 0x131   : > { %14970 = vst [vmem:[#allocation16_spill] sm:$0xff] %v12198_v14  ;;  %v12207_v12 = vadd.f32 %v1430_v10, %v1214_v50  ;;  %v3568_v14 = vrot.slane %v3566_v26, 3  ;;  %v3577_v10 = vrot.slane %v3575_v3, 3  ;;  %v12217_v50 = vld [vmem:[#allocation2 + $0x98] sm:$0xff]   ;;  %v3148_v26 = vrot.slane %v12154_v52, 2 }
 0x132   : > { %v10007_v42 = vpop.f32.mrf.mxu0  ;;  %v1449_v11 = vpop.f32.mrf.mxu1 }
 0x133   : > { %14971 = vst [vmem:[#allocation17_spill] sm:$0xff] %v12207_v12  ;;  %v12210_v62 = vadd.f32 %v10045_v22, %v10007_v42  ;;  %v3569_v20 = vor.u32 %v3568_v14, %v3565_v27  ;;  %v3578_v3 = vor.u32 %v3577_v10, %v3574_v43  ;;  %v3590_v42 = vshrl.u32 %v12217_v50, 16 }
 0x134   : > { %v1217_v23 = vpop.f32.mrf.mxu0  ;;  %v3149_v10 = vsel %vm2683_vm14, %v3146_v37, %v3148_v26 }
 0x135   : > { %v12219_v12 = vadd.f32 %v1433_v46, %v1217_v23  ;;  %v3584_v23 = vshll.u32 %v12213_v33, 16  ;;  %v3570_v14 = vsel %vm3436_vm1, %v3560_v45, %v3569_v20  ;;  %v3150_v45 = vrot.slane %v12186_v8, 2 }
 0x136   : > { %v10010_v49 = vpop.f32.mrf.mxu0  ;;  %10225 = vmatmul.mubr.msk.bf16.gmra.mxu0 %vm1025_vm8, %v3143_v53  ;;  %v10052_v22 = vpop.f32.mrf.mxu1  ;;  %10267 = vmatmul.mubr.msk.bf16.gmra.mxu1 %vm1025_vm8, %v3552_v35  ;;  %v3593_v53 = vshll.u32 %v12217_v50, 16 }
 0x137   : > { %14972 = vst [vmem:[#allocation18_spill] sm:$0xff] %v12219_v12  ;;  %v12224_v9 = vadd.f32 %v10048_v28, %v10010_v49  ;;  %10228 = vmatprep.mubr.msk.bf16.mxu0 %vm1025_vm8, %v3145_v59  ;;  %10270 = vmatprep.mubr.msk.bf16.mxu1 %vm1025_vm8, %v3561_v47  ;;  %v3147_v59 = vsel %vm2683_vm14, %v3144_v2, %v3146_v37  ;;  %v3583_v49 = vrot.slane %v3581_v25, 2  ;;  %v3586_v30 = vrot.slane %v3584_v23, 3 }
 0x138   : > { %v1230_v46 = vpop.f32.mrf.mxu0  ;;  %v1462_v34 = vpop.f32.mrf.mxu1 }
 0x139   : > { %14973 = vst [vmem:[#allocation19_spill] sm:$0xff] %v12224_v9  ;;  %v12233_v28 = vadd.f32 %v1446_v41, %v1230_v46  ;;  %v12239_v9 = vld [vmem:[#allocation2 + $0xa0] ss:$0 sps:$4 sm:$0x77]   ;;  %v3579_v41 = vsel %vm3436_vm1, %v3569_v20, %v3578_v3  ;;  %v3592_v46 = vrot.slane %v3590_v42, 2  ;;  %v3587_v37 = vor.u32 %v3586_v30, %v3583_v49 }
 0x13a   : > { %v10011_v35 = vpop.f32.mrf.mxu0  ;;  %v10053_v47 = vpop.f32.mrf.mxu1  ;;  %14975 = vst [vmem:[#allocation21_spill] sm:$0xff] %v12239_v9  ;;  %v3599_v20 = vshrl.u32 %v12239_v9, 16  ;;  %v3152_v42 = vrot.slane %v12190_v57, 2 }
 0x13b   : > { %14974 = vst [vmem:[#allocation20_spill] sm:$0xff] %v12233_v28  ;;  %v12236_v27 = vadd.f32 %v10049_v15, %v10011_v35  ;;  %v3595_v28 = vrot.slane %v3593_v53, 3 }
 0x13c   : > { %v1233_v52 = vpop.f32.mrf.mxu0  ;;  %v12241_v43 = vpop.f32.mrf.mxu1  ;;  %v3601_v30 = vrot.slane %v3599_v20, 2 }
 0x13d   : > { %14976 = vst [vmem:[#allocation22_spill] sm:$0xff] %v12241_v43  ;;  %v12245_v12 = vadd.f32 %v1449_v11, %v1233_v52  ;;  %v3602_v52 = vshll.u32 %v12239_v9, 16  ;;  %v3596_v53 = vor.u32 %v3595_v28, %v3592_v46  ;;  %v3153_v43 = vsel %vm2683_vm14, %v3150_v45, %v3152_v42 }
 0x13e   : > { %v10014_v2 = vpop.f32.mrf.mxu0  ;;  %10229 = vmatmul.mubr.msk.bf16.gmra.mxu0 %vm1025_vm8, %v3147_v59  ;;  %v10096_v15 = vpop.f32.mrf.mxu1  ;;  %10271 = vmatmul.mubr.msk.bf16.gmra.mxu1 %vm1025_vm8, %v3570_v14 }
 0x13f   : > { %v12250_v25 = vadd.f32 %v10052_v22, %v10014_v2  ;;  %10232 = vmatprep.mubr.msk.bf16.mxu0 %vm1025_vm8, %v3149_v10  ;;  %10274 = vmatprep.mubr.msk.bf16.mxu1 %vm1025_vm8, %v3579_v41  ;;  %v3151_v22 = vsel %vm2683_vm14, %v3148_v26, %v3150_v45  ;;  %v3588_v10 = vsel %vm3436_vm1, %v3578_v3, %v3587_v37  ;;  %v3604_v49 = vrot.slane %v3602_v52, 3 }
 0x140   : > { %v1246_v11 = vpop.f32.mrf.mxu0  ;;  %v2051_v23 = vpop.f32.mrf.mxu1  ;;  %v3597_v28 = vsel %vm3436_vm1, %v3587_v37, %v3596_v53  ;;  %v3154_v3 = vrot.slane %v12213_v33, 2  ;;  %v3156_v52 = vrot.slane %v12217_v50, 2 }
 0x141   : > { %v12257_v35 = vadd.f32 %v1462_v34, %v1246_v11 }
 0x142   : > { %v10015_v59 = vpop.f32.mrf.mxu0  ;;  %v10097_v14 = vpop.f32.mrf.mxu1 }
 0x143   : > { %v12260_v2 = vadd.f32 %v10053_v47, %v10015_v59  ;;  %v3605_v47 = vor.u32 %v3604_v49, %v3601_v30  ;;  %v3157_v49 = vsel %vm2683_vm14, %v3154_v3, %v3156_v52 }
 0x144   : > { %v12263_v41 = vpop.f32.mrf.mxu0  ;;  %v12266_v9 = vpop.f32.mrf.mxu1 }
 0x145   : > { %14977 = vst [vmem:[#allocation23_spill] sm:$0xff] %v12266_v9 }
 0x146   : > { %v10058_v34 = vpop.f32.mrf.mxu0  ;;  %10233 = vmatmul.mubr.msk.bf16.gmra.mxu0 %vm1025_vm8, %v3151_v22  ;;  %v10100_v46 = vpop.f32.mrf.mxu1  ;;  %10275 = vmatmul.mubr.msk.bf16.gmra.mxu1 %vm1025_vm8, %v3588_v10 }
 0x147   : > { %v1757_v26 = vadd.f32 %v10058_v34, %v11933_v56  ;;  %10236 = vmatprep.mubr.msk.bf16.mxu0 %vm1025_vm8, %v3153_v43  ;;  %10278 = vmatprep.mubr.msk.bf16.mxu1 %vm1025_vm8, %v3597_v28  ;;  %v3155_v43 = vsel %vm2683_vm14, %v3152_v42, %v3154_v3  ;;  %v10775_v34 = vld [vmem:[#allocation2 + $0xa0] ss:$0 sps:$4 sm:$0x33]   ;;  %v3606_v28 = vsel %vm3436_vm1, %v3596_v53, %v3605_v47 }
 0x148   : > { %v1612_v45 = vpop.f32.mrf.mxu0  ;;  %v2067_v20 = vpop.f32.mrf.mxu1  ;;  %v3158_v42 = vrot.slane %v10775_v34, 2 }
 0x149   : > { %v1755_v37 = vadd.f32 %v1612_v45, %v11947_v7  ;;  %v12277_v11 = vadd.f32 %v10096_v15, %v1757_v26 }
 0x14a   : > { %v10059_v59 = vpop.f32.mrf.mxu0  ;;  %v10101_v22 = vpop.f32.mrf.mxu1 }
 0x14b   : > { %v1758_v10 = vadd.f32 %v10059_v59, %v11960_v6  ;;  %v12280_v56 = vadd.f32 %v2051_v23, %v1755_v37 }
 0x14c   : > { %v1615_v30 = vpop.f32.mrf.mxu0  ;;  %v12285_v9 = vpop.f32.mrf.mxu1 }
 0x14d   : > { %v12288_v7 = vadd.f32 %v1615_v30, %v11968_v0  ;;  %v12290_v15 = vadd.f32 %v10097_v14, %v1758_v10  ;;  %v3159_v10 = vsel %vm2683_vm14, %v3156_v52, %v3158_v42 }
 0x14e   : > { %v10062_v26 = vpop.f32.mrf.mxu0  ;;  %10237 = vmatmul.mubr.msk.bf16.gmra.mxu0 %vm1025_vm8, %v3155_v43  ;;  %v10104_v6 = vpop.f32.mrf.mxu1  ;;  %10279 = vmatmul.mubr.msk.bf16.gmra.mxu1 %vm1025_vm8, %v3606_v28 }
 0x14f   : > { %v1761_v23 = vadd.f32 %v10062_v26, %v11977_v54  ;;  %10240 = vmatprep.mubr.msk.bf16.mxu0 %vm1025_vm8, %v3157_v49 }
 0x150   : > { %v1628_v53 = vpop.f32.mrf.mxu0  ;;  %v2083_v3 = vpop.f32.mrf.mxu1 }
 0x151   : > { %v1759_v47 = vadd.f32 %v1628_v53, %v11993_v18  ;;  %v12297_v45 = vadd.f32 %v10100_v46, %v1761_v23 }
 0x152   : > { %v10063_v0 = vpop.f32.mrf.mxu0  ;;  %v10105_v14 = vpop.f32.mrf.mxu1 }
 0x153   : > { %v1762_v37 = vadd.f32 %v10063_v0, %v12004_v21  ;;  %v12300_v59 = vadd.f32 %v2067_v20, %v1759_v47 }
 0x154   : > { %v1631_v43 = vpop.f32.mrf.mxu0  ;;  %v12303_v28 = vpop.f32.mrf.mxu1 }
 0x155   : > { %v12306_v54 = vadd.f32 %v1631_v43, %v12009_v17  ;;  %v12308_v34 = vadd.f32 %v10101_v22, %v1762_v37 }
 0x156   : > { %v10066_v30 = vpop.f32.mrf.mxu0  ;;  %10241 = vmatmul.mubr.msk.bf16.gmra.mxu0 %vm1025_vm8, %v3159_v10  ;;  %v10108_v18 = vpop.f32.mrf.mxu1 }
 0x157   : > { %v1765_v46 = vadd.f32 %v10066_v30, %v12026_v31  ;;  %10284 = vmatprep.mubr.msk.bf16.mxu0 %vm1025_vm8, %v11845_v63 }
 0x158   : > { %v1644_v21 = vpop.f32.mrf.mxu0  ;;  %v2099_v20 = vpop.f32.mrf.mxu1 }
 0x159   : > { %v1763_v52 = vadd.f32 %v1644_v21, %v12036_v55  ;;  %v12315_v49 = vadd.f32 %v10104_v6, %v1765_v46 }
 0x15a   : > { %v10067_v26 = vpop.f32.mrf.mxu0  ;;  %v10109_v17 = vpop.f32.mrf.mxu1 }
 0x15b   : > { %v1766_v22 = vadd.f32 %v10067_v26, %v12045_v19  ;;  %v12318_v23 = vadd.f32 %v2083_v3, %v1763_v52 }
 0x15c   : > { %v1647_v42 = vpop.f32.mrf.mxu0  ;;  %v12320_v53 = vpop.f32.mrf.mxu1 }
 0x15d   : > { %v12323_v31 = vadd.f32 %v1647_v42, %v12053_v48  ;;  %v12325_v47 = vadd.f32 %v10105_v14, %v1766_v22 }
 0x15e   : > { %v10070_v63 = vpop.f32.mrf.mxu0  ;;  %10285 = vmatmul.mubr.msk.bf16.vlgmr.msra.gmra.mxu0 %vm1025_vm8, %v11848_v29  ;;  %v10112_v55 = vpop.f32.mrf.mxu1 }
 0x15f   : > { %v1769_v6 = vadd.f32 %v10070_v63, %v12071_v1  ;;  %10288 = vmatprep.mubr.msk.bf16.mxu0 %vm1025_vm8, %v11865_v32 }
 0x160   : > { %v1660_v19 = vpop.f32.mrf.mxu0  ;;  %v2115_v3 = vpop.f32.mrf.mxu1 }
 0x161   : > { %v1767_v0 = vadd.f32 %v1660_v19, %v12080_v13  ;;  %v12333_v37 = vadd.f32 %v10108_v18, %v1769_v6 }
 0x162   : > { %v10071_v48 = vpop.f32.mrf.mxu0  ;;  %v10113_v10 = vpop.f32.mrf.mxu1 }
 0x163   : > { %v1770_v14 = vadd.f32 %v10071_v48, %v12088_v24  ;;  %v12336_v43 = vadd.f32 %v2099_v20, %v1767_v0 }
 0x164   : > { %v1663_v30 = vpop.f32.mrf.mxu0  ;;  %v12338_v29 = vpop.f32.mrf.mxu1 }
 0x165   : > { %v12341_v1 = vadd.f32 %v1663_v30, %v12099_v5  ;;  %v12343_v46 = vadd.f32 %v10109_v17, %v1770_v14  ;;  %v14980_v30 = vld [vmem:[#allocation15_spill] sm:$0xff] }
 0x166   : > { %v10074_v32 = vpop.f32.mrf.mxu0  ;;  %10289 = vmatmul.mubr.msk.bf16.gmra.mxu0 %vm1025_vm8, %v11868_v61  ;;  %v10116_v13 = vpop.f32.mrf.mxu1 }
 0x167   : > { %v1773_v18 = vadd.f32 %v10074_v32, %v12107_v40  ;;  %10292 = vmatprep.mubr.msk.bf16.mxu0 %vm1025_vm8, %v11897_v4 }
 0x168   : > { %v1676_v24 = vpop.f32.mrf.mxu0  ;;  %v2131_v21 = vpop.f32.mrf.mxu1 }
 0x169   : > { %v1771_v20 = vadd.f32 %v1676_v24, %v12115_v38  ;;  %v12351_v52 = vadd.f32 %v10112_v55, %v1773_v18  ;;  %v14981_v18 = vld [vmem:[#allocation8_spill] sm:$0xff] }
 0x16a   : > { %v10075_v5 = vpop.f32.mrf.mxu0  ;;  %v10117_v26 = vpop.f32.mrf.mxu1 }
 0x16b   : > { %v1774_v17 = vadd.f32 %v10075_v5, %v12124_v51  ;;  %v12354_v22 = vadd.f32 %v2115_v3, %v1771_v20  ;;  %v14983_v20 = vld [vmem:[#allocation10_spill] sm:$0xff]  ;;  %v14984_v5 = vld [vmem:[#allocation12_spill] sm:$0xff] }
 0x16c   : > { %v1679_v42 = vpop.f32.mrf.mxu0  ;;  %v12356_v61 = vpop.f32.mrf.mxu1 }
 0x16d   : > { %14978 = vst [vmem:[#allocation24_spill] sm:$0xff] %v12356_v61  ;;  %v12359_v40 = vadd.f32 %v1679_v42, %v12136_v60  ;;  %v12361_v63 = vadd.f32 %v10113_v10, %v1774_v17  ;;  %v3905_v17 = vrot.slane %v14984_v5, 3  ;;  %v14985_v42 = vld [vmem:[#allocation17_spill] sm:$0xff] }
 0x16e   : > { %v10078_v4 = vpop.f32.mrf.mxu0  ;;  %10293 = vmatmul.mubr.msk.bf16.gmra.mxu0 %vm1025_vm8, %v11900_v44  ;;  %v10120_v38 = vpop.f32.mrf.mxu1 }
 0x16f   : > { %v1777_v55 = vadd.f32 %v10078_v4, %v12147_v36  ;;  %10296 = vmatprep.mubr.msk.bf16.mxu0 %vm1025_vm8, %v11931_v58 }
 0x170   : > { %v1692_v51 = vpop.f32.mrf.mxu0  ;;  %v2147_v6 = vpop.f32.mrf.mxu1 }
 0x171   : > { %v1775_v19 = vadd.f32 %v1692_v51, %v12159_v16  ;;  %v12369_v3 = vadd.f32 %v10116_v13, %v1777_v55  ;;  %v14982_v13 = vld [vmem:[#allocation16_spill] sm:$0xff] }
 0x172   : > { %v10079_v60 = vpop.f32.mrf.mxu0  ;;  %v10121_v0 = vpop.f32.mrf.mxu1 }
 0x173   : > { %v1778_v48 = vadd.f32 %v10079_v60, %v12167_v39  ;;  %v12372_v10 = vadd.f32 %v2131_v21, %v1775_v19 }
 0x174   : > { %v1695_v14 = vpop.f32.mrf.mxu0  ;;  %v12374_v44 = vpop.f32.mrf.mxu1 }
 0x175   : > { %14979 = vst [vmem:[#allocation25_spill] sm:$0xff] %v12374_v44  ;;  %v12377_v36 = vadd.f32 %v1695_v14, %v14980_v30  ;;  %v12379_v32 = vadd.f32 %v10117_v26, %v1778_v48  ;;  %v14986_v14 = vld [vmem:[#allocation9_spill] sm:$0xff] }
 0x176   : > { %v10082_v58 = vpop.f32.mrf.mxu0  ;;  %10297 = vmatmul.mubr.msk.bf16.gmra.mxu0 %vm1025_vm8, %v14981_v18  ;;  %v10124_v16 = vpop.f32.mrf.mxu1  ;;  %v14987_v30 = vrot.slane %v14986_v14, 3 }
 0x177   : > { %v1781_v24 = vadd.f32 %v10082_v58, %v14982_v13  ;;  %10300 = vmatprep.mubr.msk.bf16.mxu0 %vm1025_vm8, %v14983_v20  ;;  %v14989_v13 = vld [vmem:[#allocation18_spill] sm:$0xff] }
 0x178   : > { %v1708_v39 = vpop.f32.mrf.mxu0  ;;  %v2163_v21 = vpop.f32.mrf.mxu1  ;;  %v3906_v58 = vsel %vm3883_vm15, %v14987_v30, %v3905_v17  ;;  %v14994_v30 = vld [vmem:[#allocation14_spill] sm:$0xff] }
 0x179   : > { %v1779_v4 = vadd.f32 %v1708_v39, %v14985_v42  ;;  %v12388_v55 = vadd.f32 %v10120_v38, %v1781_v24  ;;  %v14991_v24 = vld [vmem:[#allocation11_spill] sm:$0xff]  ;;  %v14993_v42 = vld [vmem:[#allocation13_spill] sm:$0xff] }
 0x17a   : > { %v10083_v26 = vpop.f32.mrf.mxu0  ;;  %v10125_v51 = vpop.f32.mrf.mxu1 }
 0x17b   : > { %v1782_v19 = vadd.f32 %v10083_v26, %v12210_v62  ;;  %v12391_v60 = vadd.f32 %v2147_v6, %v1779_v4  ;;  %v14992_v62 = vld [vmem:[#allocation19_spill] sm:$0xff]  ;;  %v3907_v4 = vrot.slane %v14993_v42, 3 }
 0x17c   : > { %v1711_v48 = vpop.f32.mrf.mxu0  ;;  %v12396_v18 = vpop.f32.mrf.mxu1  ;;  %v10778_v26 = vld [vmem:[%s14929_s4 + $0x8] sm:$0xff]  }
 0x17d   : > { %14988 = vst [vmem:[#allocation15_spill] sm:$0xff] %v12396_v18  ;;  %v12399_v20 = vadd.f32 %v1711_v48, %v14989_v13  ;;  %v12401_v5 = vadd.f32 %v10121_v0, %v1782_v19  ;;  %v3909_v0 = vrot.slane %v14994_v30, 3  ;;  %v14995_v19 = vld [vmem:[#allocation20_spill] sm:$0xff]  ;;  %10320 = vmatprep.subr.bf16.mxu1 %v10778_v26 }
 0x17e   : > { %v10086_v38 = vpop.f32.mrf.mxu0  ;;  %10301 = vmatmul.mubr.msk.bf16.gmra.mxu0 %vm1025_vm8, %v14991_v24  ;;  %v10128_v39 = vpop.f32.mrf.mxu1  ;;  %10321 = vmatpush3.bf16.msra.mxu1 %v10778_v26 }
 0x17f   : > { %14990 = vst [vmem:[#allocation8_spill] sm:$0xff] %v12399_v20  ;;  %v1785_v6 = vadd.f32 %v10086_v38, %v14992_v62  ;;  %10304 = vmatprep.mubr.msk.bf16.mxu0 %vm1025_vm8, %v3906_v58  ;;  %v3908_v62 = vsel %vm3883_vm15, %v3905_v17, %v3907_v4  ;;  %v3910_v20 = vsel %vm3883_vm15, %v3907_v4, %v3909_v0  ;;  %v3913_v4 = vrot.slane %v12190_v57, 3 }
 0x180   : > { %v1724_v14 = vpop.f32.mrf.mxu0  ;;  %v2179_v48 = vpop.f32.mrf.mxu1 }
 0x181   : > { %v1783_v13 = vadd.f32 %v1724_v14, %v14995_v19  ;;  %v12413_v18 = vadd.f32 %v10124_v16, %v1785_v6 }
 0x182   : > { %v10087_v24 = vpop.f32.mrf.mxu0  ;;  %v10129_v44 = vpop.f32.mrf.mxu1 }
 0x183   : > { %v1786_v58 = vadd.f32 %v10087_v24, %v12236_v27  ;;  %v12416_v38 = vadd.f32 %v2163_v21, %v1783_v13  ;;  %v3911_v21 = vrot.slane %v12186_v8, 3 }
 0x184   : > { %v1727_v42 = vpop.f32.mrf.mxu0  ;;  %v12420_v61 = vpop.f32.mrf.mxu1 }
 0x185   : > { %v12423_v30 = vadd.f32 %v1727_v42, %v12245_v12  ;;  %v12425_v16 = vadd.f32 %v10125_v51, %v1786_v58  ;;  %v3914_v8 = vsel %vm3883_vm15, %v3911_v21, %v3913_v4 }
 0x186   : > { %v10090_v6 = vpop.f32.mrf.mxu0  ;;  %10305 = vmatmul.mubr.msk.bf16.gmra.mxu0 %vm1025_vm8, %v3908_v62  ;;  %v10172_v26 = vpop.f32.mrf.mxu1 }
 0x187   : > { %v1789_v27 = vadd.f32 %v10090_v6, %v12250_v25  ;;  %10308 = vmatprep.mubr.msk.bf16.mxu0 %vm1025_vm8, %v3910_v20  ;;  %v3912_v25 = vsel %vm3883_vm15, %v3909_v0, %v3911_v21  ;;  %v3917_v6 = vrot.slane %v12217_v50, 3 }
 0x188   : > { %v1740_v17 = vpop.f32.mrf.mxu0  ;;  %v2812_v14 = vpop.f32.mrf.mxu1 }
 0x189   : > { %v1787_v19 = vadd.f32 %v1740_v17, %v12257_v35  ;;  %v12433_v12 = vadd.f32 %v10128_v39, %v1789_v27 }
 0x18a   : > { %v10091_v51 = vpop.f32.mrf.mxu0  ;;  %v10173_v13 = vpop.f32.mrf.mxu1 }
 0x18b   : > { %v1790_v24 = vadd.f32 %v10091_v51, %v12260_v2  ;;  %v12436_v58 = vadd.f32 %v2179_v48, %v1787_v19  ;;  %v3915_v2 = vrot.slane %v12213_v33, 3 }
 0x18c   : > { %v12439_v62 = vpop.f32.mrf.mxu0  ;;  %v12442_v20 = vpop.f32.mrf.mxu1 }
 0x18d   : > { %14996 = vst [vmem:[#allocation16_spill] sm:$0xff] %v12442_v20  ;;  %v12444_v42 = vadd.f32 %v10129_v44, %v1790_v24  ;;  %v3918_v33 = vsel %vm3883_vm15, %v3915_v2, %v3917_v6 }
 0x18e   : > { %v10134_v57 = vpop.f32.mrf.mxu0  ;;  %10309 = vmatmul.mubr.msk.bf16.gmra.mxu0 %vm1025_vm8, %v3912_v25  ;;  %v10176_v35 = vpop.f32.mrf.mxu1 }
 0x18f   : > { %v2643_v39 = vadd.f32 %v10134_v57, %v12277_v11  ;;  %10312 = vmatprep.mubr.msk.bf16.mxu0 %vm1025_vm8, %v3914_v8  ;;  %v3916_v11 = vsel %vm3883_vm15, %v3913_v4, %v3915_v2 }
 0x190   : > { %v2498_v48 = vpop.f32.mrf.mxu0  ;;  %v2828_v0 = vpop.f32.mrf.mxu1 }
 0x191   : > { %v2641_v27 = vadd.f32 %v2498_v48, %v12280_v56  ;;  %v12452_v21 = vadd.f32 %v10172_v26, %v2643_v39 }
 0x192   : > { %v10135_v44 = vpop.f32.mrf.mxu0  ;;  %v10177_v17 = vpop.f32.mrf.mxu1 }
 0x193   : > { %v2644_v19 = vadd.f32 %v10135_v44, %v12290_v15  ;;  %v12455_v51 = vadd.f32 %v2812_v14, %v2641_v27  ;;  %v14998_v15 = vld [vmem:[#allocation21_spill] sm:$0xff] }
 0x194   : > { %v12458_v24 = vpop.f32.mrf.mxu0  ;;  %v12461_v25 = vpop.f32.mrf.mxu1  ;;  %v3919_v14 = vrot.slane %v14998_v15, 3 }
 0x195   : > { %14997 = vst [vmem:[#allocation10_spill] sm:$0xff] %v12461_v25  ;;  %v12463_v8 = vadd.f32 %v10173_v13, %v2644_v19 }
 0x196   : > { %v10138_v50 = vpop.f32.mrf.mxu0  ;;  %10313 = vmatmul.mubr.msk.bf16.gmra.mxu0 %vm1025_vm8, %v3916_v11  ;;  %v10180_v56 = vpop.f32.mrf.mxu1  ;;  %v3920_v19 = vsel %vm3883_vm15, %v3917_v6, %v3919_v14 }
 0x197   : > { %v2647_v26 = vadd.f32 %v10138_v50, %v12297_v45  ;;  %10316 = vmatprep.mubr.msk.bf16.mxu0 %vm1025_vm8, %v3918_v33 }
 0x198   : > { %v2514_v57 = vpop.f32.mrf.mxu0  ;;  %v2844_v4 = vpop.f32.mrf.mxu1 }
 0x199   : > { %v2645_v39 = vadd.f32 %v2514_v57, %v12300_v59  ;;  %v12470_v48 = vadd.f32 %v10176_v35, %v2647_v26 }
 0x19a   : > { %v10139_v2 = vpop.f32.mrf.mxu0  ;;  %v10181_v27 = vpop.f32.mrf.mxu1 }
 0x19b   : > { %v2648_v13 = vadd.f32 %v10139_v2, %v12308_v34  ;;  %v12473_v44 = vadd.f32 %v2828_v0, %v2645_v39 }
 0x19c   : > { %v12476_v11 = vpop.f32.mrf.mxu0  ;;  %v12478_v45 = vpop.f32.mrf.mxu1 }
 0x19d   : > { %14999 = vst [vmem:[#allocation12_spill] sm:$0xff] %v12478_v45  ;;  %v12480_v33 = vadd.f32 %v10177_v17, %v2648_v13 }
 0x19e   : > { %v10142_v50 = vpop.f32.mrf.mxu0  ;;  %10317 = vmatmul.mubr.msk.bf16.gmra.mxu0 %vm1025_vm8, %v3920_v19  ;;  %v10184_v59 = vpop.f32.mrf.mxu1 }
 0x19f   : > { %v2651_v35 = vadd.f32 %v10142_v50, %v12315_v49 }
 0x1a0   : > { %v2530_v26 = vpop.f32.mrf.mxu0  ;;  %v2860_v15 = vpop.f32.mrf.mxu1 }
 0x1a1   : > { %v2649_v34 = vadd.f32 %v2530_v26, %v12318_v23  ;;  %v12485_v0 = vadd.f32 %v10180_v56, %v2651_v35  ;;  %v15001_v23 = vmov 0  ;;  %v4545_v56 = vld [vmem:[#allocation3 + $0x8] sm:$0x3] }
 0x1a2   : > { %v10143_v57 = vpop.f32.mrf.mxu0  ;;  %v10185_v6 = vpop.f32.mrf.mxu1  ;;  %v15002_v23 = vsel %vm12498_vm2, 4294967295, %v15001_v23  ;;  %v4546_v35 = vsel %vm12498_vm2, 0, %v4545_v56 }
 0x1a3   : > { %v2652_v14 = vadd.f32 %v10143_v57, %v12325_v47  ;;  %v12488_v39 = vadd.f32 %v2844_v4, %v2649_v34  ;;  %15003 = vst [vmem:[#allocation9_spill] sm:$0xff] %v15002_v23  ;;  %4547 = vst [vmem:[#allocation3 + $0x8] sm:$0x3] %v4546_v35 }
 0x1a4   : > { %v12490_v17 = vpop.f32.mrf.mxu0  ;;  %v12492_v2 = vpop.f32.mrf.mxu1 }
 0x1a5   : > { %15000 = vst [vmem:[#allocation17_spill] sm:$0xff] %v12492_v2  ;;  %v12494_v13 = vadd.f32 %v10181_v27, %v2652_v14 }
 0x1a6   : > { %v10146_v19 = vpop.f32.mrf.mxu0  ;;  %v10188_v49 = vpop.f32.mrf.mxu1 }
 0x1a7   : > { %v2655_v50 = vadd.f32 %v10146_v19, %v12333_v37 }
 0x1a8   : > { %v2546_v47 = vpop.f32.mrf.mxu0  ;;  %v2876_v4 = vpop.f32.mrf.mxu1 }
 0x1a9   : > { %v2653_v26 = vadd.f32 %v2546_v47, %v12336_v43  ;;  %v12505_v27 = vadd.f32 %v10184_v59, %v2655_v50 }
 0x1aa   : > { %v10147_v34 = vpop.f32.mrf.mxu0  ;;  %v10189_v57 = vpop.f32.mrf.mxu1 }
 0x1ab   : > { %v2656_v37 = vadd.f32 %v10147_v34, %v12343_v46  ;;  %v12508_v14 = vadd.f32 %v2860_v15, %v2653_v26  ;;  %v15005_v34 = vmov 0  }
 0x1ac   : > { %v12510_v19 = vpop.f32.mrf.mxu0  ;;  %v12512_v2 = vpop.f32.mrf.mxu1  ;;  %4541 = vst.msk [vmem:[#allocation3] sm:$0xf] %vm4540_vm3, %v15005_v34  ;;  %4542 = vst.msk [vmem:[#allocation3 + $0x4] sm:$0xf] %vm4540_vm3, %v15005_v34 }
 0x1ad   : > { %15004 = vst [vmem:[#allocation18_spill] sm:$0xff] %v12512_v2  ;;  %v12514_v45 = vadd.f32 %v10185_v6, %v2656_v37  ;;  %5080 = vst.msk [vmem:[#allocation3 + $0x9c] sm:$0xf] %vm4540_vm3, %v15005_v34 }
 0x1ae   : > { %v10150_v25 = vpop.f32.mrf.mxu0  ;;  %v10192_v23 = vpop.f32.mrf.mxu1  ;;  %5081 = vst.msk [vmem:[#allocation3 + $0xa0] sm:$0xf] %vm4540_vm3, %v15005_v34 }
 0x1af   : > { %v2659_v56 = vadd.f32 %v10150_v25, %v12351_v52 }
 0x1b0   : > { %v2562_v43 = vpop.f32.mrf.mxu0  ;;  %v2892_v59 = vpop.f32.mrf.mxu1 }
 0x1b1   : > { %v2657_v50 = vadd.f32 %v2562_v43, %v12354_v22  ;;  %v12518_v47 = vadd.f32 %v10188_v49, %v2659_v56 }
 0x1b2   : > { %v10151_v35 = vpop.f32.mrf.mxu0  ;;  %v10193_v46 = vpop.f32.mrf.mxu1 }
 0x1b3   : > { %v2660_v15 = vadd.f32 %v10151_v35, %v12361_v63  ;;  %v12521_v26 = vadd.f32 %v2876_v4, %v2657_v50 }
 0x1b4   : > { %v12531_v52 = vpop.f32.mrf.mxu0  ;;  %v12533_v22 = vpop.f32.mrf.mxu1 }
 0x1b5   : > { %15006 = vst [vmem:[#allocation11_spill] sm:$0xff] %v12531_v52  ;;  %15007 = vst [vmem:[#allocation19_spill] sm:$0xff] %v12533_v22  ;;  %v12535_v25 = vadd.f32 %v10189_v57, %v2660_v15 }
 0x1b6   : > { %v10154_v63 = vpop.f32.mrf.mxu0  ;;  %v10196_v6 = vpop.f32.mrf.mxu1 }
 0x1b7   : > { %v2663_v49 = vadd.f32 %v10154_v63, %v12369_v3 }
 0x1b8   : > { %v2578_v4 = vpop.f32.mrf.mxu0  ;;  %v2908_v37 = vpop.f32.mrf.mxu1 }
 0x1b9   : > { %v2661_v56 = vadd.f32 %v2578_v4, %v12372_v10  ;;  %v12539_v43 = vadd.f32 %v10192_v23, %v2663_v49 }
 0x1ba   : > { %v10155_v50 = vpop.f32.mrf.mxu0  ;;  %v10197_v35 = vpop.f32.mrf.mxu1 }
 0x1bb   : > { %v2664_v34 = vadd.f32 %v10155_v50, %v12379_v32  ;;  %v12542_v2 = vadd.f32 %v2892_v59, %v2661_v56 }
 0x1bc   : > { %v12544_v52 = vpop.f32.mrf.mxu0  ;;  %v12546_v57 = vpop.f32.mrf.mxu1 }
 0x1bd   : > { %15008 = vst [vmem:[#allocation13_spill] sm:$0xff] %v12544_v52  ;;  %15009 = vst [vmem:[#allocation14_spill] sm:$0xff] %v12546_v57  ;;  %v12548_v15 = vadd.f32 %v10193_v46, %v2664_v34 }
 0x1be   : > { %v10158_v22 = vpop.f32.mrf.mxu0  ;;  %v10200_v3 = vpop.f32.mrf.mxu1 }
 0x1bf   : > { %v2667_v63 = vadd.f32 %v10158_v22, %v12388_v55 }
 0x1c0   : > { %v2594_v20 = vpop.f32.mrf.mxu0  ;;  %v2924_v10 = vpop.f32.mrf.mxu1 }
 0x1c1   : > { %v2665_v23 = vadd.f32 %v2594_v20, %v12391_v60  ;;  %v12552_v49 = vadd.f32 %v10196_v6, %v2667_v63 }
 0x1c2   : > { %v10159_v4 = vpop.f32.mrf.mxu0  ;;  %v10201_v32 = vpop.f32.mrf.mxu1 }
 0x1c3   : > { %v2668_v59 = vadd.f32 %v10159_v4, %v12401_v5  ;;  %v12555_v56 = vadd.f32 %v2908_v37, %v2665_v23  ;;  %v10779_v5 = vld [vmem:[%s14929_s4] sm:$0xff]   ;;  %v5083_v4 = vld [vmem:[#allocation3 + $0x4] sm:$0xf] }
 0x1c4   : > { %v12557_v50 = vpop.f32.mrf.mxu0  ;;  %v12559_v46 = vpop.f32.mrf.mxu1  ;;  %v5082_v23 = vld [vmem:[#allocation3] sm:$0xf]  ;;  %10358 = vmatprep.subr.bf16.mxu0 %v10779_v5 }
 0x1c5   : > { %15010 = vst [vmem:[#allocation20_spill] sm:$0xff] %v12559_v46  ;;  %v12561_v34 = vadd.f32 %v10197_v35, %v2668_v59  ;;  %10359 = vmatpush3.bf16.msra.mxu0 %v10779_v5 }
 0x1c6   : > { %v10162_v57 = vpop.f32.mrf.mxu0  ;;  %v10204_v55 = vpop.f32.mrf.mxu1 }
 0x1c7   : > { %v2671_v22 = vadd.f32 %v10162_v57, %v12413_v18  ;;  %v12573_v18 = vcombine.low %v5082_v23, %v5083_v4 }
 0x1c8   : > { %v2610_v52 = vpop.f32.mrf.mxu0  ;;  %v2940_v60 = vpop.f32.mrf.mxu1 }
 0x1c9   : > { %v2669_v20 = vadd.f32 %v2610_v52, %v12416_v38  ;;  %v12565_v6 = vadd.f32 %v10200_v3, %v2671_v22  ;;  %10360 = vmatprep.mubr.msk.bf16.mxu0 %vm5371_vm4, %v12573_v18 }
 0x1ca   : > { %v10163_v37 = vpop.f32.mrf.mxu0  ;;  %v10205_v63 = vpop.f32.mrf.mxu1 }
 0x1cb   : > { %v2672_v35 = vadd.f32 %v10163_v37, %v12425_v16  ;;  %v12571_v59 = vadd.f32 %v2924_v10, %v2669_v20 }
 0x1cc   : > { %v12575_v57 = vpop.f32.mrf.mxu0  ;;  %v12577_v38 = vpop.f32.mrf.mxu1 }
 0x1cd   : > { %15011 = vst [vmem:[#allocation21_spill] sm:$0xff] %v12577_v38  ;;  %v12579_v52 = vadd.f32 %v10201_v32, %v2672_v35 }
 0x1ce   : > { %v10166_v3 = vpop.f32.mrf.mxu0  ;;  %v12581_v22 = vpop.f32.mrf.mxu1 }
 0x1cf   : > { %15012 = vst [vmem:[#allocation26_spill] sm:$0xff] %v12581_v22  ;;  %v2675_v16 = vadd.f32 %v10166_v3, %v12433_v12 }
 0x1d0   : > { %v2626_v10 = vpop.f32.mrf.mxu0  ;;  %v12586_v20 = vpop.f32.mrf.mxu1 }
 0x1d1   : > { %v2673_v37 = vadd.f32 %v2626_v10, %v12436_v58  ;;  %v12589_v23 = vadd.f32 %v10204_v55, %v2675_v16 }
 0x1d2   : > { %v10167_v4 = vpop.f32.mrf.mxu0  ;;  %v12591_v5 = vpop.f32.mrf.mxu1 }
 0x1d3   : > { %v2676_v32 = vadd.f32 %v10167_v4, %v12444_v42  ;;  %v12594_v35 = vadd.f32 %v2940_v60, %v2673_v37 }
 0x1d4   : > { %v12596_v22 = vpop.f32.mrf.mxu0  ;;  %v12598_v38 = vpop.f32.mrf.mxu1 }
 0x1d5   : > { %15013 = vst [vmem:[#allocation27_spill] sm:$0xff] %v12598_v38  ;;  %v12600_v46 = vadd.f32 %v10205_v63, %v2676_v32 }
 0x1d6   : > { %v10210_v12 = vpop.f32.mrf.mxu0  ;;  %v12602_v3 = vpop.f32.mrf.mxu1 }
 0x1d7   : > { %15014 = vst [vmem:[#allocation28_spill] sm:$0xff] %v12602_v3  ;;  %v12605_v58 = vadd.f32 %v10210_v12, %v12452_v21 }
 0x1d8   : > { %v3251_v55 = vpop.f32.mrf.mxu0  ;;  %v12607_v16 = vpop.f32.mrf.mxu1 }
 0x1d9   : > { %15015 = vst [vmem:[#allocation29_spill] sm:$0xff] %v12607_v16  ;;  %v12610_v10 = vadd.f32 %v3251_v55, %v12455_v51 }
 0x1da   : > { %v10211_v42 = vpop.f32.mrf.mxu0  ;;  %v12612_v60 = vpop.f32.mrf.mxu1 }
 0x1db   : > { %15016 = vst [vmem:[#allocation30_spill] sm:$0xff] %v12612_v60  ;;  %v12615_v37 = vadd.f32 %v10211_v42, %v12463_v8 }
 0x1dc   : > { %v12617_v63 = vpop.f32.mrf.mxu0  ;;  %v12619_v4 = vpop.f32.mrf.mxu1 }
 0x1dd   : > { %15017 = vst [vmem:[#allocation31_spill] sm:$0xff] %v12619_v4 }
 0x1de   : > { %v10214_v32 = vpop.f32.mrf.mxu0  ;;  %v12621_v3 = vpop.f32.mrf.mxu1 }
 0x1df   : > { %15018 = vst [vmem:[#allocation32_spill] sm:$0xff] %v12621_v3  ;;  %v12624_v21 = vadd.f32 %v10214_v32, %v12470_v48 }
 0x1e0   : > { %v3267_v12 = vpop.f32.mrf.mxu0  ;;  %v12626_v16 = vpop.f32.mrf.mxu1 }
 0x1e1   : > { %15019 = vst [vmem:[#allocation33_spill] sm:$0xff] %v12626_v16  ;;  %v12629_v51 = vadd.f32 %v3267_v12, %v12473_v44 }
 0x1e2   : > { %v10215_v55 = vpop.f32.mrf.mxu0  ;;  %v12631_v60 = vpop.f32.mrf.mxu1 }
 0x1e3   : > { %15020 = vst [vmem:[#allocation34_spill] sm:$0xff] %v12631_v60  ;;  %v12634_v8 = vadd.f32 %v10215_v55, %v12480_v33 }
 0x1e4   : > { %v12636_v42 = vpop.f32.mrf.mxu0  ;;  %v12638_v4 = vpop.f32.mrf.mxu1 }
 0x1e5   : > { %15021 = vst [vmem:[#allocation35_spill] sm:$0xff] %v12634_v8  ;;  %15022 = vst [vmem:[#allocation36_spill] sm:$0xff] %v12638_v4 }
 0x1e6   : > { %v10218_v3 = vpop.f32.mrf.mxu0  ;;  %v12640_v38 = vpop.f32.mrf.mxu1 }
 0x1e7   : > { %15023 = vst [vmem:[#allocation37_spill] sm:$0xff] %v12640_v38  ;;  %v12643_v48 = vadd.f32 %v10218_v3, %v12485_v0 }
 0x1e8   : > { %v3283_v32 = vpop.f32.mrf.mxu0  ;;  %v12645_v16 = vpop.f32.mrf.mxu1 }
 0x1e9   : > { %15024 = vst [vmem:[#allocation38_spill] sm:$0xff] %v12645_v16  ;;  %v12648_v44 = vadd.f32 %v3283_v32, %v12488_v39  ;;  %v12669_v39 = vld [vmem:[%s14929_s4 + $0x10] sm:$0xff]  }
 0x1ea   : > { %v10219_v12 = vpop.f32.mrf.mxu0  ;;  %v12650_v60 = vpop.f32.mrf.mxu1  ;;  %15029 = vst [vmem:[#allocation43_spill] sm:$0xff] %v12669_v39  ;;  %10396 = vmatprep.subr.bf16.mxu1 %v12669_v39 }
 0x1eb   : > { %15025 = vst [vmem:[#allocation39_spill] sm:$0xff] %v12650_v60  ;;  %v12653_v33 = vadd.f32 %v10219_v12, %v12494_v13 }
 0x1ec   : > { %v12655_v55 = vpop.f32.mrf.mxu0  ;;  %v12657_v4 = vpop.f32.mrf.mxu1 }
 0x1ed   : > { %15026 = vst [vmem:[#allocation40_spill] sm:$0xff] %v12657_v4 }
 0x1ee   : > { %v10222_v38 = vpop.f32.mrf.mxu0  ;;  %v12659_v8 = vpop.f32.mrf.mxu1 }
 0x1ef   : > { %15027 = vst [vmem:[#allocation41_spill] sm:$0xff] %v12659_v8  ;;  %v12662_v0 = vadd.f32 %v10222_v38, %v12505_v27 }
 0x1f0   : > { %v3299_v3 = vpop.f32.mrf.mxu0  ;;  %v12664_v16 = vpop.f32.mrf.mxu1 }
 0x1f1   : > { %15028 = vst [vmem:[#allocation42_spill] sm:$0xff] %v12664_v16  ;;  %v12672_v13 = vadd.f32 %v3299_v3, %v12508_v14 }
 0x1f2   : > { %v10223_v32 = vpop.f32.mrf.mxu0  ;;  %v12674_v12 = vpop.f32.mrf.mxu1 }
 0x1f3   : > { %15030 = vst [vmem:[#allocation44_spill] sm:$0xff] %v12672_v13  ;;  %15031 = vst [vmem:[#allocation45_spill] sm:$0xff] %v12674_v12  ;;  %v12678_v8 = vadd.f32 %v10223_v32, %v12514_v45 }
 0x1f4   : > { %v12680_v27 = vpop.f32.mrf.mxu0  ;;  %v12682_v38 = vpop.f32.mrf.mxu1 }
 0x1f5   : > { %15032 = vst [vmem:[#allocation46_spill] sm:$0xff] %v12682_v38 }
 0x1f6   : > { %v10226_v16 = vpop.f32.mrf.mxu0  ;;  %v12684_v4 = vpop.f32.mrf.mxu1 }
 0x1f7   : > { %15033 = vst [vmem:[#allocation47_spill] sm:$0xff] %v12684_v4  ;;  %v12687_v60 = vadd.f32 %v10226_v16, %v12518_v47 }
 0x1f8   : > { %v3315_v14 = vpop.f32.mrf.mxu0  ;;  %v12689_v3 = vpop.f32.mrf.mxu1 }
 0x1f9   : > { %15034 = vst [vmem:[#allocation48_spill] sm:$0xff] %v12689_v3  ;;  %v12692_v12 = vadd.f32 %v3315_v14, %v12521_v26 }
 0x1fa   : > { %v10227_v39 = vpop.f32.mrf.mxu0  ;;  %v12694_v13 = vpop.f32.mrf.mxu1 }
 0x1fb   : > { %15035 = vst [vmem:[#allocation49_spill] sm:$0xff] %v12694_v13  ;;  %v12697_v45 = vadd.f32 %v10227_v39, %v12535_v25 }
 0x1fc   : > { %v12699_v32 = vpop.f32.mrf.mxu0  ;;  %v12701_v38 = vpop.f32.mrf.mxu1 }
 0x1fd   : > { %15036 = vst [vmem:[#allocation50_spill] sm:$0xff] %v12697_v45  ;;  %15037 = vst [vmem:[#allocation51_spill] sm:$0xff] %v12701_v38 }
 0x1fe   : > { %v10230_v4 = vpop.f32.mrf.mxu0  ;;  %v12709_v26 = vpop.f32.mrf.mxu1 }
 0x1ff   : > { %v12704_v47 = vadd.f32 %v10230_v4, %v12539_v43  ;;  %15039 = vst [vmem:[#allocation53_spill] sm:$0xff] %v12709_v26 }
 0x200   : > { %v3331_v16 = vpop.f32.mrf.mxu0  ;;  %v12716_v39 = vpop.f32.mrf.mxu1 }
 0x201   : > { %v12707_v3 = vadd.f32 %v3331_v16, %v12542_v2  ;;  %15041 = vst [vmem:[#allocation55_spill] sm:$0xff] %v12716_v39  ;;  %v15045_v39 = vld [vmem:[#allocation22_spill] sm:$0xff] }
 0x202   : > { %v10231_v14 = vpop.f32.mrf.mxu0  ;;  %v12724_v2 = vpop.f32.mrf.mxu1 }
 0x203   : > { %15038 = vst [vmem:[#allocation52_spill] sm:$0xff] %v12707_v3  ;;  %v12712_v13 = vadd.f32 %v10231_v14, %v12548_v15  ;;  %15042 = vst [vmem:[#allocation56_spill] sm:$0xff] %v12724_v2  ;;  %v1466_v3 = vadd.f32 %v15045_v39, %v12263_v41  ;;  %v2199_v2 = vadd.f32 %v12285_v9, %v12306_v54  ;;  %v15047_v54 = vld [vmem:[#allocation24_spill] sm:$0xff]  ;;  %v15049_v39 = vld [vmem:[#allocation25_spill] sm:$0xff] }
 0x204   : > { %v12714_v25 = vpop.f32.mrf.mxu0  ;;  %v12731_v14 = vpop.f32.mrf.mxu1  ;;  %v2203_v41 = vadd.f32 %v12303_v28, %v12323_v31  ;;  %v2211_v9 = vadd.f32 %v12338_v29, %v12359_v40  ;;  %v15050_v31 = vld [vmem:[#allocation15_spill] sm:$0xff]  ;;  %v15051_v40 = vld [vmem:[#allocation16_spill] sm:$0xff] }
 0x205   : > { %15040 = vst [vmem:[#allocation54_spill] sm:$0xff] %v12712_v13  ;;  %15044 = vst [vmem:[#allocation58_spill] sm:$0xff] %v12731_v14 }
 0x206   : > { %v10234_v45 = vpop.f32.mrf.mxu0 }
 0x207   : > { %v12719_v38 = vadd.f32 %v10234_v45, %v12552_v49  ;;  %v15046_v49 = vld [vmem:[#allocation23_spill] sm:$0xff] }
 0x208   : > { %v3347_v43 = vpop.f32.mrf.mxu0  ;;  %v2195_v45 = vadd.f32 %v15046_v49, %v12288_v7  ;;  %v2207_v7 = vadd.f32 %v12320_v53, %v12341_v1  ;;  %v2223_v53 = vadd.f32 %v15050_v31, %v12423_v30  ;;  %v2650_v1 = vadd.f32 %v12490_v17, %v2203_v41  ;;  %v15054_v41 = vld [vmem:[#allocation10_spill] sm:$0xff] }
 0x209   : > { %v12722_v4 = vadd.f32 %v3347_v43, %v12555_v56  ;;  %v5218_v17 = vshrl.u32 %v12573_v18, 16 }
 0x20a   : > { %v10235_v16 = vpop.f32.mrf.mxu0  ;;  %v2654_v49 = vadd.f32 %v12510_v19, %v2207_v7  ;;  %v2670_v30 = vadd.f32 %v12575_v57, %v2223_v53  ;;  %v15058_v53 = vld [vmem:[#allocation19_spill] sm:$0xff] }
 0x20b   : > { %v12727_v26 = vadd.f32 %v10235_v16, %v12561_v34  ;;  %v1788_v34 = vadd.f32 %v12439_v62, %v1466_v3  ;;  %v2642_v16 = vadd.f32 %v12458_v24, %v2195_v45  ;;  %v2215_v62 = vadd.f32 %v15047_v54, %v12377_v36  ;;  %v15048_v3 = vld [vmem:[#allocation8_spill] sm:$0xff] }
 0x20c   : > { %v12729_v15 = vpop.f32.mrf.mxu0  ;;  %v2646_v24 = vadd.f32 %v12476_v11, %v2199_v2  ;;  %v2219_v28 = vadd.f32 %v15049_v39, %v15048_v3  ;;  %v15052_v11 = vld [vmem:[#allocation11_spill] sm:$0xff] }
 0x20d   : > { %15043 = vst [vmem:[#allocation57_spill] sm:$0xff] %v12727_v26  ;;  %v12747_v26 = vpop.f32.mrf.mxu1  ;;  %v2227_v29 = vadd.f32 %v12420_v61, %v1788_v34  ;;  %v2956_v36 = vadd.f32 %v15051_v40, %v2642_v16  ;;  %v2658_v2 = vadd.f32 %v15052_v11, %v2211_v9  ;;  %v15055_v16 = vld [vmem:[#allocation12_spill] sm:$0xff] }
 0x20e   : > { %v10238_v13 = vpop.f32.mrf.mxu0  ;;  %v2666_v54 = vadd.f32 %v12557_v50, %v2219_v28  ;;  %v2960_v7 = vadd.f32 %v15054_v41, %v2646_v24  ;;  %v2964_v9 = vadd.f32 %v15055_v16, %v2650_v1  ;;  %v15057_v28 = vld [vmem:[#allocation18_spill] sm:$0xff]  ;;  %v15068_v16 = vld [vmem:[#allocation31_spill] sm:$0xff] }
 0x20f   : > { %v12738_v56 = vadd.f32 %v10238_v13, %v12565_v6  ;;  %v5220_v13 = vshll.u32 %v12573_v18, 16  ;;  %v2674_v61 = vadd.f32 %v12596_v22, %v2227_v29  ;;  %v3395_v31 = vadd.f32 %v12617_v63, %v2956_v36  ;;  %v12789_v18 = vpop.permute.xlu0 %4308  ;;  %v15060_v29 = vld [vmem:[#allocation20_spill] sm:$0xff] }
 0x210   : > { %v3363_v43 = vpop.f32.mrf.mxu0  ;;  %v2972_v57 = vadd.f32 %v15057_v28, %v2658_v2  ;;  %v3403_v63 = vadd.f32 %v12655_v55, %v2964_v9  ;;  %v15061_v2 = vld [vmem:[#allocation21_spill] sm:$0xff]  ;;  %v15072_v28 = vld [vmem:[#allocation36_spill] sm:$0xff] }
 0x211   : > { %v12745_v14 = vadd.f32 %v3363_v43, %v12571_v59  ;;  %v5222_v19 = vrot.slane %v5220_v13, 1  ;;  %v3399_v13 = vadd.f32 %v12636_v42, %v2960_v7 }
 0x212   : > { %v10239_v6 = vpop.f32.mrf.mxu0 }
 0x213   : > { %v12760_v59 = vadd.f32 %v10239_v6, %v12579_v52  ;;  %v15053_v52 = vld [vmem:[#allocation13_spill] sm:$0xff]  ;;  %v12774_v6 = vpop.f32.mrf.mxu1  ;;  %v12800_v11 = vor.u32 %v5222_v19, %v5218_v17  ;;  %v15064_v17 = vld [vmem:[#allocation28_spill] sm:$0xff] }
 0x214   : > { %v12768_v45 = vpop.f32.mrf.mxu0  ;;  %v2662_v43 = vadd.f32 %v15053_v52, %v2215_v62  ;;  %v15056_v62 = vld [vmem:[#allocation17_spill] sm:$0xff]  ;;  %v12803_v52 = vadd.f32 %v15061_v2, %v2674_v61  ;;  %v12817_v19 = vadd.f32 %v15064_v17, %v12624_v21  ;;  %v4319_v21 = vpop.permute.xlu1 %4318  ;;  %v15076_v2 = vld [vmem:[#allocation39_spill] sm:$0xff] }
 0x215   : > { %v2968_v39 = vadd.f32 %v15056_v62, %v2654_v49  ;;  %v12792_v24 = vpop.f32.mrf.mxu1  ;;  %v2984_v49 = vadd.f32 %v15060_v29, %v2670_v30  ;;  %v15063_v30 = vld [vmem:[#allocation27_spill] sm:$0xff]  ;;  %v15069_v62 = vld [vmem:[#allocation32_spill] sm:$0xff]  ;;  %v15075_v29 = vld [vmem:[#allocation38_spill] sm:$0xff] }
 0x216   : > { %v10242_v3 = vpop.f32.mrf.mxu0  ;;  %v2976_v40 = vadd.f32 %v15058_v53, %v2662_v43  ;;  %v15062_v43 = vld [vmem:[#allocation26_spill] sm:$0xff]  ;;  %v3842_v55 = vadd.f32 %v15063_v30, %v3395_v31  ;;  %v12847_v53 = vadd.f32 %v15072_v28, %v3403_v63  ;;  %v15077_v30 = vld [vmem:[#allocation40_spill] sm:$0xff]  ;;  %v15083_v28 = vld [vmem:[#allocation47_spill] sm:$0xff] }
 0x217   : > { %v12782_v34 = vadd.f32 %v10242_v3, %v12589_v23  ;;  %v15059_v23 = vld [vmem:[#allocation14_spill] sm:$0xff]  ;;  %v3843_v42 = vadd.f32 %v15062_v43, %v12605_v58  ;;  %v3841_v3 = vadd.f32 %v12586_v20, %v12610_v10  ;;  %v3407_v41 = vadd.f32 %v12680_v27, %v2968_v39  ;;  %v15065_v58 = vld [vmem:[#allocation29_spill] sm:$0xff]  ;;  %v15066_v20 = vld [vmem:[#allocation35_spill] sm:$0xff]  ;;  %v3813_v9 = vpop.f32.mrf.mxu1 }
 0x218   : > { %v3379_v50 = vpop.f32.mrf.mxu0  ;;  %v2980_v1 = vadd.f32 %v15059_v23, %v2666_v54  ;;  %v3844_v54 = vadd.f32 %v12591_v5, %v12615_v37  ;;  %v12824_v61 = vadd.f32 %v15065_v58, %v12629_v51  ;;  %v12831_v5 = vadd.f32 %v15068_v16, %v3399_v13  ;;  %v15070_v39 = vld [vmem:[#allocation33_spill] sm:$0xff]  ;;  %v15071_v51 = vld [vmem:[#allocation34_spill] sm:$0xff] }
 0x219   : > { %v12795_v22 = vadd.f32 %v3379_v50, %v12594_v35  ;;  %v3411_v37 = vadd.f32 %v12699_v32, %v2972_v57  ;;  %v12836_v27 = vadd.f32 %v15069_v62, %v12643_v48  ;;  %v12840_v31 = vadd.f32 %v15070_v39, %v12648_v44  ;;  %v12852_v32 = vld [vmem:[%s14928_s3] ss:$0 sm:$0xff]  ;;  %v12854_v57 = vpop.permute.xlu0 %4313  ;;  %v15073_v48 = vld [vmem:[#allocation37_spill] sm:$0xff]  ;;  %v15074_v44 = vld [vmem:[#allocation44_spill] sm:$0xff] }
 0x21a   : > { %v10243_v36 = vpop.f32.mrf.mxu0  ;;  %v12844_v50 = vadd.f32 %v15071_v51, %v12653_v33  ;;  %v12858_v23 = vadd.f32 %v15073_v48, %v12662_v0  ;;  %v3415_v33 = vadd.f32 %v12714_v25, %v2976_v40  ;;  %v12867_v43 = vadd.f32 %v15076_v2, %v12678_v8  ;;  %v15078_v58 = vld [vmem:[#allocation41_spill] sm:$0xff]  ;;  %v15079_v0 = vld [vmem:[#allocation42_spill] sm:$0xff]  ;;  %v10280_v8 = vpop.f32.mrf.mxu1  ;;  %v15085_v48 = vld [vmem:[#allocation48_spill] sm:$0xff] }
 0x21b   : > { %v12810_v35 = vadd.f32 %v10243_v36, %v12600_v46  ;;  %v15067_v46 = vld [vmem:[#allocation30_spill] sm:$0xff]  ;;  %v12862_v36 = vadd.f32 %v15075_v29, %v15074_v44  ;;  %v12870_v17 = vadd.f32 %v15077_v30, %v3407_v41  ;;  %v15081_v39 = vld [vmem:[#allocation45_spill] sm:$0xff]  ;;  %v3419_v30 = vadd.f32 %v12729_v15, %v2980_v1  ;;  %v15092_v15 = vld [vmem:[#allocation56_spill] sm:$0xff] }
 0x21c   : > { %v12820_v7 = vpop.f32.mrf.mxu0  ;;  %v12828_v10 = vadd.f32 %v15067_v46, %v15066_v20  ;;  %v12874_v20 = vadd.f32 %v15078_v58, %v12687_v60  ;;  %v12878_v46 = vadd.f32 %v15079_v0, %v12692_v12  ;;  %v15080_v62 = vld [vmem:[#allocation50_spill] sm:$0xff]  ;;  %v12890_v60 = vadd.f32 %v15083_v28, %v12704_v47  ;;  %v15087_v29 = vld [vmem:[#allocation49_spill] sm:$0xff]  ;;  %v15088_v58 = vld [vmem:[#allocation51_spill] sm:$0xff] }
 0x21d   : > { %v12882_v25 = vadd.f32 %v15081_v39, %v15080_v62  ;;  %v15082_v40 = vld [vmem:[#allocation46_spill] sm:$0xff]  ;;  %v12902_v0 = vadd.f32 %v15088_v58, %v3415_v33  ;;  %v15089_v62 = vld [vmem:[#allocation53_spill] sm:$0xff]  ;;  %v3423_v33 = vadd.f32 %v12768_v45, %v2984_v49  ;;  %v12934_v45 = vadd.f32 %v12792_v24, %v12760_v59 }
 0x21e   : > { %v10286_v13 = vpop.f32.mrf.mxu0  ;;  %v15086_v44 = vld [vmem:[#allocation54_spill] sm:$0xff]  ;;  %v12907_v39 = vadd.f32 %v15089_v62, %v12719_v38  ;;  %v12930_v62 = vadd.f32 %v12774_v6, %v12745_v14 }
 0x21f   : > { %v4157_v63 = vadd.f32 %v10286_v13, %v3843_v42  ;;  %v12885_v42 = vadd.f32 %v15082_v40, %v3411_v37  ;;  %v15084_v13 = vld [vmem:[#allocation52_spill] sm:$0xff]  ;;  %v12898_v2 = vadd.f32 %v15087_v29, %v15086_v44  ;;  %v15090_v40 = vld [vmem:[#allocation55_spill] sm:$0xff] }
 0x220   : > { %v4012_v16 = vpop.f32.mrf.mxu0  ;;  %v12894_v12 = vadd.f32 %v15085_v48, %v15084_v13  ;;  %v12911_v28 = vadd.f32 %v15090_v40, %v12722_v4  ;;  %v15091_v13 = vld [vmem:[#allocation57_spill] sm:$0xff]  ;;  %v12918_v48 = vpop.permute.xlu0 %4328  ;;  %v12926_v4 = vadd.f32 %v12747_v26, %v12738_v56  ;;  %v12941_v26 = vadd.f32 %v10280_v8, %v12782_v34 }
 0x221   : > { %v4200_v41 = vadd.f32 %v12852_v32, %v4157_v63  ;;  %v4155_v51 = vadd.f32 %v4012_v16, %v3841_v3  ;;  %v4324_v16 = vpop.permute.xlu1 %4323  ;;  %v12915_v1 = vadd.f32 %v15092_v15, %v15091_v13 }
 0x222   : > { %v10287_v37 = vpop.f32.mrf.mxu0 }
 0x223   : > { %v4236_v63 = vmax.f32 %v4200_v41, 0.0  ;;  %v4198_v3 = vadd.f32 %v12852_v32, %v4155_v51  ;;  %v4158_v47 = vadd.f32 %v10287_v37, %v3844_v54  ;;  %v3826_v51 = vpop.f32.mrf.mxu1  ;;  %v15093_v37 = vld [vmem:[#allocation58_spill] sm:$0xff] }
 0x224   : > { %v4015_v41 = vpop.f32.mrf.mxu0  ;;  %v12922_v58 = vadd.f32 %v15093_v37, %v3419_v30  ;;  %v12944_v56 = vadd.f32 %v3826_v51, %v12795_v22  ;;  %v4339_v22 = vpop.permute.xlu0 %4338 }
 0x225   : > { %v4488_v54 = vmul.f32 %v4319_v21, %v4236_v63  ;;  %v4234_v44 = vmax.f32 %v4198_v3, 0.0  ;;  %v4201_v29 = vadd.f32 %v12852_v32, %v4158_v47  ;;  %v4156_v38 = vadd.f32 %v4015_v41, %v3842_v55  ;;  %v12953_v15 = vpop.permute.xlu1 %4333 }
 0x226   : > { %v10290_v49 = vpop.f32.mrf.mxu0  ;;  %v12938_v3 = vadd.f32 %v3813_v9, %v3423_v33 }
 0x227   : > { %v9459_v21 = vpack.c.bf16 %v4488_v54, %v4488_v54  ;;  %v4486_v63 = vmul.f32 %v12789_v18, %v4234_v44  ;;  %v4237_v55 = vmax.f32 %v4201_v29, 0.0  ;;  %v4199_v30 = vadd.f32 %v12852_v32, %v4156_v38  ;;  %v10281_v54 = vpop.f32.mrf.mxu1 }
 0x228   : > { %v4161_v14 = vadd.f32 %v10290_v49, %v12817_v19  ;;  %v4028_v6 = vpop.f32.mrf.mxu0  ;;  %v12949_v18 = vadd.f32 %v12820_v7, %v12803_v52 }
 0x229   : > { %v4658_v59 = vshrl.u32 %v9459_v21, 16  ;;  %v4661_v24 = vshll.u32 %v9459_v21, 16  ;;  %v9457_v47 = vpack.c.bf16 %v4486_v63, %v4486_v63  ;;  %v4489_v40 = vmul.f32 %v4324_v16, %v4237_v55  ;;  %v5036_v63 = vld [vmem:[#allocation3 + $0x8] sm:$0xe] }
 0x22a   : > { %v4235_v13 = vmax.f32 %v4199_v30, 0.0  ;;  %v4204_v9 = vadd.f32 %v12852_v32, %v4161_v14  ;;  %v4159_v34 = vadd.f32 %v4028_v6, %v12824_v61  ;;  %v10291_v8 = vpop.f32.mrf.mxu0  ;;  %v15094_v21 = vmov 0 }
 0x22b   : > { %v4660_v33 = vrot.slane %v4658_v59, 6  ;;  %v4663_v19 = vrot.slane %v4661_v24, 7  ;;  %v4639_v41 = vshrl.u32 %v9457_v47, 16  ;;  %v4642_v51 = vshll.u32 %v9457_v47, 16 }
 0x22c   : > { %v9460_v44 = vpack.c.bf16 %v4489_v40, %v4489_v40  ;;  %v4487_v16 = vmul.f32 %v12854_v57, %v4235_v13  ;;  %v4240_v29 = vmax.f32 %v4204_v9, 0.0  ;;  %v4202_v52 = vadd.f32 %v12852_v32, %v4159_v34  ;;  %v4031_v7 = vpop.f32.mrf.mxu0 }
 0x22d   : > { %v4664_v38 = vor.u32 %v4663_v19, %v4660_v33  ;;  %v4641_v37 = vrot.slane %v4639_v41, 6  ;;  %v4644_v49 = vrot.slane %v4642_v51, 7  ;;  %v4162_v61 = vadd.f32 %v10291_v8, %v12828_v10  ;;  %v4344_v33 = vpop.permute.xlu1 %4343 }
 0x22e   : > { %v15095_v21 = vsel %vm12960_vm6, 4294967295, %v15094_v21  ;;  %v4668_v55 = vshrl.u32 %v9460_v44, 16  ;;  %v4671_v30 = vshll.u32 %v9460_v44, 16  ;;  %v9458_v14 = vpack.c.bf16 %v4487_v16, %v4487_v16  ;;  %v10294_v6 = vpop.f32.mrf.mxu0  ;;  %v12971_v44 = vpop.permute.xlu0 %4348 }
 0x22f   : > { %15096 = vst [vmem:[#allocation22_spill] sm:$0xff] %v15095_v21  ;;  %v4492_v57 = vmul.f32 %v4339_v22, %v4240_v29  ;;  %v12965_v59 = vadd.f32 %v10281_v54, %v12810_v35  ;;  %v4645_v24 = vor.u32 %v4644_v49, %v4641_v37  ;;  %v4238_v47 = vmax.f32 %v4202_v52, 0.0 }
 0x230   : > { %v4205_v40 = vadd.f32 %v12852_v32, %v4162_v61  ;;  %v4670_v10 = vrot.slane %v4668_v55, 6  ;;  %v4673_v13 = vrot.slane %v4671_v30, 7  ;;  %v4648_v9 = vshrl.u32 %v9458_v14, 16  ;;  %v4044_v8 = vpop.f32.mrf.mxu0 }
 0x231   : > { %v4651_v34 = vshll.u32 %v9458_v14, 16  ;;  %v4666_v19 = vrot.slane %v4664_v38, 4  ;;  %v5037_v41 = vsel %vm12960_vm6, %v4645_v24, %v5036_v63  ;;  %v9463_v51 = vpack.c.bf16 %v4492_v57, %v4492_v57 }
 0x232   : > { %v4490_v22 = vmul.f32 %v12918_v48, %v4238_v47  ;;  %5038 = vst [vmem:[#allocation3 + $0x8] sm:$0xe] %v5037_v41  ;;  %v4674_v35 = vor.u32 %v4673_v13, %v4670_v10  ;;  %v4650_v54 = vrot.slane %v4648_v9, 6  ;;  %v4241_v29 = vmax.f32 %v4205_v40, 0.0  ;;  %v10295_v52 = vpop.f32.mrf.mxu0 }
 0x233   : > { %v4653_v16 = vrot.slane %v4651_v34, 7  ;;  %v4698_v37 = vshrl.u32 %v9463_v51, 16  ;;  %v4701_v49 = vshll.u32 %v9463_v51, 16  ;;  %v4160_v55 = vadd.f32 %v4031_v7, %v12831_v5 }
 0x234   : > { %v9461_v61 = vpack.c.bf16 %v4490_v22, %v4490_v22  ;;  %v4646_v30 = vrot.slane %v4645_v24, 4  ;;  %v4675_v63 = vsel %vm11069_vm10, %v4666_v19, %v4674_v35  ;;  %v4493_v21 = vmul.f32 %v4344_v33, %v4241_v29  ;;  %v4047_v48 = vpop.f32.mrf.mxu0  ;;  %v12980_v24 = vpop.permute.xlu1 %4353 }
 0x235   : > { %v4654_v57 = vor.u32 %v4653_v16, %v4650_v54  ;;  %5041 = vst.msk [vmem:[#allocation3 + $0x14] sm:$0xf] %vm4540_vm3, %v4675_v63  ;;  %v4700_v47 = vrot.slane %v4698_v37, 6  ;;  %v4703_v10 = vrot.slane %v4701_v49, 7  ;;  %v4203_v5 = vadd.f32 %v12852_v32, %v4160_v55  ;;  %v10801_v54 = vld [vmem:[%s14929_s4 + $0x18] sm:$0xff]   ;;  %v4359_v16 = vpop.permute.xlu0 %4358 }
 0x236   : > { %v4678_v13 = vshrl.u32 %v9461_v61, 16  ;;  %v4681_v9 = vshll.u32 %v9461_v61, 16  ;;  %v9464_v41 = vpack.c.bf16 %v4493_v21, %v4493_v21  ;;  %v10298_v7 = vpop.f32.mrf.mxu0  ;;  %v4165_v22 = vadd.f32 %v10294_v6, %v12836_v27  ;;  %10434 = vmatprep.subr.bf16.mxu0 %v10801_v54 }
 0x237   : > { %v4655_v40 = vsel %vm11069_vm10, %v4646_v30, %v4654_v57  ;;  %v4656_v34 = vrot.slane %v4654_v57, 4  ;;  %v12983_v33 = vor.u32 %v4703_v10, %v4700_v47  ;;  %v4239_v49 = vmax.f32 %v4203_v5, 0.0 }
 0x238   : > { %5039 = vst.msk [vmem:[#allocation3 + $0xc] sm:$0xf] %vm4540_vm3, %v4655_v40  ;;  %v4680_v19 = vrot.slane %v4678_v13, 6  ;;  %v4683_v51 = vrot.slane %v4681_v9, 7  ;;  %v4708_v29 = vshrl.u32 %v9464_v41, 16  ;;  %v4711_v37 = vshll.u32 %v9464_v41, 16  ;;  %v4060_v61 = vpop.f32.mrf.mxu0 }
 0x239   : > { %v4665_v21 = vsel %vm11069_vm10, %v4656_v34, %v4664_v38  ;;  %v4676_v55 = vrot.slane %v4674_v35, 4  ;;  %v4208_v63 = vadd.f32 %v12852_v32, %v4165_v22  ;;  %v4163_v27 = vadd.f32 %v4044_v8, %v12840_v31  ;;  %v4369_v22 = vpop.permute.xlu0 %4368 }
 0x23a   : > { %5040 = vst.msk [vmem:[#allocation3 + $0x10] sm:$0xf] %vm4540_vm3, %v4665_v21  ;;  %v4684_v30 = vor.u32 %v4683_v51, %v4680_v19  ;;  %v4710_v6 = vrot.slane %v4708_v29, 6  ;;  %v4713_v57 = vrot.slane %v4711_v37, 7  ;;  %v4491_v47 = vmul.f32 %v12953_v15, %v4239_v49  ;;  %v12996_v38 = vpop.f32.mrf.mxu0 }
 0x23b   : > { %v4166_v10 = vadd.f32 %v10295_v52, %v12844_v50  ;;  %v4706_v13 = vrot.slane %v12983_v33, 4  ;;  %v4244_v9 = vmax.f32 %v4208_v63, 0.0  ;;  %v4206_v40 = vadd.f32 %v12852_v32, %v4163_v27  ;;  %v4364_v52 = vpop.permute.xlu1 %4363 }
 0x23c   : > { %v4685_v35 = vsel %vm11069_vm10, %v4676_v55, %v4684_v30  ;;  %v13003_v31 = vor.u32 %v4713_v57, %v4710_v6  ;;  %v9462_v8 = vpack.c.bf16 %v4491_v47, %v4491_v47  ;;  %v4164_v15 = vadd.f32 %v4047_v48, %v12847_v53  ;;  %v13007_v50 = vpop.f32.mrf.mxu0 }
 0x23d   : > { %5042 = vst.msk [vmem:[#allocation3 + $0x18] sm:$0xf] %vm4540_vm3, %v4685_v35  ;;  %v4209_v34 = vadd.f32 %v12852_v32, %v4166_v10  ;;  %v4496_v41 = vmul.f32 %v4359_v16, %v4244_v9  ;;  %v4242_v5 = vmax.f32 %v4206_v40, 0.0  ;;  %v4169_v19 = vadd.f32 %v10298_v7, %v12858_v23 }
 0x23e   : > { %v4167_v51 = vadd.f32 %v4060_v61, %v12862_v36  ;;  %v4686_v21 = vrot.slane %v4684_v30, 4  ;;  %v4715_v29 = vsel %vm11069_vm10, %v4706_v13, %v13003_v31  ;;  %v4688_v37 = vshrl.u32 %v9462_v8, 16  ;;  %v13021_v63 = vpop.f32.mrf.mxu0 }
 0x23f   : > { %v4691_v49 = vshll.u32 %v9462_v8, 16  ;;  %v13014_v55 = vld [vmem:[#allocation3 + $0x8] sm:$0xff]   ;;  %5045 = vst.msk [vmem:[#allocation3 + $0x24] sm:$0xf] %vm4540_vm3, %v4715_v29  ;;  %v9467_v53 = vpack.c.bf16 %v4496_v41, %v4496_v41  ;;  %v4494_v48 = vmul.f32 %v12971_v44, %v4242_v5  ;;  %v4245_v16 = vmax.f32 %v4209_v34, 0.0  ;;  %v13029_v40 = vpop.permute.xlu1 %4373  ;;  %v4379_v5 = vpop.permute.xlu0 %4378 }
 0x240   : > { %v4207_v23 = vadd.f32 %v12852_v32, %v4164_v15  ;;  %v4690_v7 = vrot.slane %v4688_v37, 6  ;;  %v4212_v61 = vadd.f32 %v12852_v32, %v4169_v19  ;;  %v4210_v30 = vadd.f32 %v12852_v32, %v4167_v51  ;;  %10361 = vmatmul.mubr.msk.bf16.vlgmr.msra.gmra.mxu0 %vm5371_vm4, %v13014_v55  ;;  %v4076_v29 = vpop.f32.mrf.mxu0 }
 0x241   : > { %v4693_v36 = vrot.slane %v4691_v49, 7  ;;  %v13025_v27 = vld [vmem:[#allocation3 + $0x10] sm:$0xff]   ;;  %v4738_v6 = vshrl.u32 %v9467_v53, 16  ;;  %v4741_v57 = vshll.u32 %v9467_v53, 16  ;;  %v9465_v47 = vpack.c.bf16 %v4494_v48, %v4494_v48  ;;  %10435 = vmatpush3.bf16.msra.mxu0 %v10801_v54 }
 0x242   : > { %v4497_v44 = vmul.f32 %v4364_v52, %v4245_v16  ;;  %v4243_v13 = vmax.f32 %v4207_v23, 0.0  ;;  %v4248_v35 = vmax.f32 %v4212_v61, 0.0  ;;  %v4246_v9 = vmax.f32 %v4210_v30, 0.0  ;;  %10364 = vmatprep.mubr.msk.bf16.mxu0 %vm5371_vm4, %v13025_v27 }
 0x243   : > { %v4694_v10 = vor.u32 %v4693_v36, %v4690_v7  ;;  %v4740_v8 = vrot.slane %v4738_v6, 6  ;;  %v4743_v34 = vrot.slane %v4741_v57, 7  ;;  %v4718_v15 = vshrl.u32 %v9465_v47, 16 }
 0x244   : > { %v4721_v41 = vshll.u32 %v9465_v47, 16  ;;  %v9468_v52 = vpack.c.bf16 %v4497_v44, %v4497_v44  ;;  %v4495_v54 = vmul.f32 %v12980_v24, %v4243_v13  ;;  %v4500_v48 = vmul.f32 %v4379_v5, %v4248_v35  ;;  %v4384_v13 = vpop.permute.xlu1 %4383 }
 0x245   : > { %v4695_v19 = vsel %vm11069_vm10, %v4686_v21, %v4694_v10  ;;  %v4696_v51 = vrot.slane %v4694_v10, 4  ;;  %v4744_v37 = vor.u32 %v4743_v34, %v4740_v8  ;;  %v4720_v49 = vrot.slane %v4718_v15, 6  ;;  %v10303_v10 = vpop.f32.mrf.mxu0 }
 0x246   : > { %5043 = vst.msk [vmem:[#allocation3 + $0x1c] sm:$0xf] %vm4540_vm3, %v4695_v19  ;;  %v4723_v53 = vrot.slane %v4721_v41, 7  ;;  %v4748_v23 = vshrl.u32 %v9468_v52, 16  ;;  %v4751_v7 = vshll.u32 %v9468_v52, 16  ;;  %v9466_v36 = vpack.c.bf16 %v4495_v54, %v4495_v54 }
 0x247   : > { %v4705_v16 = vsel %vm11069_vm10, %v4696_v51, %v12983_v33  ;;  %v4716_v21 = vrot.slane %v13003_v31, 4  ;;  %v9471_v24 = vpack.c.bf16 %v4500_v48, %v4500_v48  ;;  %v4498_v30 = vmul.f32 %v4369_v22, %v4246_v9  ;;  %v4079_v48 = vpop.f32.mrf.mxu0 }
 0x248   : > { %5044 = vst.msk [vmem:[#allocation3 + $0x20] sm:$0xf] %vm4540_vm3, %v4705_v16  ;;  %v4724_v61 = vor.u32 %v4723_v53, %v4720_v49  ;;  %v4750_v6 = vrot.slane %v4748_v23, 6  ;;  %v4753_v57 = vrot.slane %v4751_v7, 7  ;;  %v4728_v47 = vshrl.u32 %v9466_v36, 16  ;;  %v4389_v23 = vpop.permute.xlu0 %4388 }
 0x249   : > { %v4731_v44 = vshll.u32 %v9466_v36, 16  ;;  %v4746_v35 = vrot.slane %v4744_v37, 4  ;;  %v4778_v8 = vshrl.u32 %v9471_v24, 16  ;;  %v4781_v34 = vshll.u32 %v9471_v24, 16 }
 0x24a   : > { %v4725_v33 = vsel %vm11069_vm10, %v4716_v21, %v4724_v61  ;;  %v4754_v31 = vor.u32 %v4753_v57, %v4750_v6  ;;  %v4730_v15 = vrot.slane %v4728_v47, 6  ;;  %v9469_v5 = vpack.c.bf16 %v4498_v30, %v4498_v30  ;;  %v13064_v30 = vpop.permute.xlu1 %4393 }
 0x24b   : > { %5046 = vst.msk [vmem:[#allocation3 + $0x28] sm:$0xf] %vm4540_vm3, %v4725_v33  ;;  %v4733_v41 = vrot.slane %v4731_v44, 7  ;;  %v4780_v19 = vrot.slane %v4778_v8, 6  ;;  %v4783_v22 = vrot.slane %v4781_v34, 7  ;;  %v4170_v9 = vadd.f32 %v12996_v38, %v12867_v43  ;;  %v13072_v8 = vpop.f32.mrf.mxu0 }
 0x24c   : > { %v4168_v51 = vadd.f32 %v13007_v50, %v12870_v17  ;;  %v4726_v52 = vrot.slane %v4724_v61, 4  ;;  %v4755_v54 = vsel %vm11069_vm10, %v4746_v35, %v4754_v31  ;;  %v4758_v53 = vshrl.u32 %v9469_v5, 16 }
 0x24d   : > { %v4734_v49 = vor.u32 %v4733_v41, %v4730_v15  ;;  %v13049_v16 = vld [vmem:[#allocation3 + $0x18] sm:$0xff]   ;;  %5049 = vst.msk [vmem:[#allocation3 + $0x34] sm:$0xf] %vm4540_vm3, %v4755_v54  ;;  %v13052_v7 = vor.u32 %v4783_v22, %v4780_v19  ;;  %v4761_v36 = vshll.u32 %v9469_v5, 16  ;;  %v4213_v43 = vadd.f32 %v12852_v32, %v4170_v9  ;;  %v4092_v54 = vpop.f32.mrf.mxu0 }
 0x24e   : > { %v4211_v38 = vadd.f32 %v12852_v32, %v4168_v51  ;;  %v4760_v21 = vrot.slane %v4758_v53, 6  ;;  %v4173_v61 = vadd.f32 %v13021_v63, %v12874_v20  ;;  %10365 = vmatmul.mubr.msk.bf16.gmra.mxu0 %vm5371_vm4, %v13049_v16  ;;  %v4756_v6 = vrot.slane %v4754_v31, 4 }
 0x24f   : > { %v4735_v17 = vsel %vm11069_vm10, %v4726_v52, %v4734_v49  ;;  %v4736_v50 = vrot.slane %v4734_v49, 4  ;;  %v13062_v24 = vld [vmem:[#allocation3 + $0x20] sm:$0xff]   ;;  %v4763_v57 = vrot.slane %v4761_v36, 7  ;;  %v4249_v47 = vmax.f32 %v4213_v43, 0.0  ;;  %v4404_v49 = vpop.permute.xlu1 %4403 }
 0x250   : > { %5047 = vst.msk [vmem:[#allocation3 + $0x2c] sm:$0xf] %vm4540_vm3, %v4735_v17  ;;  %v4247_v44 = vmax.f32 %v4211_v38, 0.0  ;;  %v4216_v33 = vadd.f32 %v12852_v32, %v4173_v61  ;;  %v4171_v20 = vadd.f32 %v4076_v29, %v12878_v46  ;;  %v4174_v63 = vadd.f32 %v10303_v10, %v12882_v25  ;;  %10368 = vmatprep.mubr.msk.bf16.mxu0 %vm5371_vm4, %v13062_v24  ;;  %v4399_v29 = vpop.permute.xlu0 %4398 }
 0x251   : > { %v4745_v35 = vsel %vm11069_vm10, %v4736_v50, %v4744_v37  ;;  %v4764_v34 = vor.u32 %v4763_v57, %v4760_v21  ;;  %v4501_v31 = vmul.f32 %v4384_v13, %v4249_v47  ;;  %v5233_v41 = vshll.u32 %v13025_v27, 16 }
 0x252   : > { %5048 = vst.msk [vmem:[#allocation3 + $0x30] sm:$0xf] %vm4540_vm3, %v4745_v35  ;;  %v4499_v15 = vmul.f32 %v13029_v40, %v4247_v44  ;;  %v4786_v37 = vrot.slane %v13052_v7, 4  ;;  %v4252_v5 = vmax.f32 %v4216_v33, 0.0  ;;  %v4214_v46 = vadd.f32 %v12852_v32, %v4171_v20 }
 0x253   : > { %v4217_v25 = vadd.f32 %v12852_v32, %v4174_v63  ;;  %v4765_v10 = vsel %vm11069_vm10, %v4756_v6, %v4764_v34  ;;  %v4766_v19 = vrot.slane %v4764_v34, 4  ;;  %v9472_v22 = vpack.c.bf16 %v4501_v31, %v4501_v31  ;;  %v10307_v31 = vpop.f32.mrf.mxu0 }
 0x254   : > { %v9470_v9 = vpack.c.bf16 %v4499_v15, %v4499_v15  ;;  %5050 = vst.msk [vmem:[#allocation3 + $0x38] sm:$0xf] %vm4540_vm3, %v4765_v10  ;;  %v4504_v13 = vmul.f32 %v4399_v29, %v4252_v5  ;;  %v4250_v40 = vmax.f32 %v4214_v46, 0.0  ;;  %v13085_v52 = vrot.slane %v5233_v41, 1 }
 0x255   : > { %v4253_v51 = vmax.f32 %v4217_v25, 0.0  ;;  %v4788_v53 = vshrl.u32 %v9472_v22, 16  ;;  %v4791_v36 = vshll.u32 %v9472_v22, 16  ;;  %v4172_v61 = vadd.f32 %v4079_v48, %v12885_v42 }
 0x256   : > { %v4768_v43 = vshrl.u32 %v9470_v9, 16  ;;  %v4771_v38 = vshll.u32 %v9470_v9, 16  ;;  %v9475_v17 = vpack.c.bf16 %v4504_v13, %v4504_v13  ;;  %v4502_v50 = vmul.f32 %v4389_v23, %v4250_v40 }
 0x257   : > { %v4505_v21 = vmul.f32 %v4404_v49, %v4253_v51  ;;  %v13088_v6 = vld [vmem:[#allocation3 + $0x28] sm:$0xff]   ;;  %v4790_v57 = vrot.slane %v4788_v53, 6  ;;  %v4793_v47 = vrot.slane %v4791_v36, 7  ;;  %v4215_v42 = vadd.f32 %v12852_v32, %v4172_v61  ;;  %v4095_v36 = vpop.f32.mrf.mxu0 }
 0x258   : > { %v4770_v44 = vrot.slane %v4768_v43, 6  ;;  %v4773_v35 = vrot.slane %v4771_v38, 7  ;;  %v4818_v33 = vshrl.u32 %v9475_v17, 16  ;;  %v4821_v20 = vshll.u32 %v9475_v17, 16  ;;  %10369 = vmatmul.mubr.msk.bf16.gmra.mxu0 %vm5371_vm4, %v13088_v6  ;;  %v4409_v43 = vpop.permute.xlu0 %4408 }
 0x259   : > { %v9473_v63 = vpack.c.bf16 %v4502_v50, %v4502_v50  ;;  %v9476_v34 = vpack.c.bf16 %v4505_v21, %v4505_v21  ;;  %v13092_v15 = vld [vmem:[#allocation3 + $0x30] sm:$0xff]   ;;  %v4794_v23 = vor.u32 %v4793_v47, %v4790_v57  ;;  %v5225_v48 = vshll.u32 %v13014_v55, 16 }
 0x25a   : > { %v4774_v41 = vor.u32 %v4773_v35, %v4770_v44  ;;  %v4820_v5 = vrot.slane %v4818_v33, 6  ;;  %v4823_v46 = vrot.slane %v4821_v20, 7  ;;  %10372 = vmatprep.mubr.msk.bf16.mxu0 %vm5371_vm4, %v13092_v15  ;;  %v4251_v17 = vmax.f32 %v4215_v42, 0.0 }
 0x25b   : > { %v4798_v25 = vshrl.u32 %v9473_v63, 16  ;;  %v4801_v29 = vshll.u32 %v9473_v63, 16  ;;  %v4795_v10 = vsel %vm11069_vm10, %v4786_v37, %v4794_v23  ;;  %v4796_v22 = vrot.slane %v4794_v23, 4  ;;  %v4414_v23 = vpop.permute.xlu1 %4413 }
 0x25c   : > { %v4775_v9 = vsel %vm11069_vm10, %v4766_v19, %v4774_v41  ;;  %v4776_v13 = vrot.slane %v4774_v41, 4  ;;  %5053 = vst.msk [vmem:[#allocation3 + $0x44] sm:$0xf] %vm4540_vm3, %v4795_v10  ;;  %v13104_v40 = vor.u32 %v4823_v46, %v4820_v5  ;;  %v4828_v53 = vshrl.u32 %v9476_v34, 16  ;;  %v10805_v41 = vld [vmem:[%s14929_s4 + $0x20] sm:$0xff]   ;;  %v4419_v5 = vpop.permute.xlu0 %4418 }
 0x25d   : > { %5051 = vst.msk [vmem:[#allocation3 + $0x3c] sm:$0xf] %vm4540_vm3, %v4775_v9  ;;  %v4800_v51 = vrot.slane %v4798_v25, 6  ;;  %v4803_v49 = vrot.slane %v4801_v29, 7  ;;  %v4831_v38 = vshll.u32 %v9476_v34, 16  ;;  %v5227_v50 = vrot.slane %v5225_v48, 1  ;;  %v10310_v34 = vpop.f32.mrf.mxu0 }
 0x25e   : > { %v4785_v37 = vsel %vm11069_vm10, %v4776_v13, %v13052_v7  ;;  %v4826_v19 = vrot.slane %v13104_v40, 4  ;;  %v4830_v61 = vrot.slane %v4828_v53, 6  ;;  %v5229_v57 = vshrl.u32 %v13014_v55, 16 }
 0x25f   : > { %5052 = vst.msk [vmem:[#allocation3 + $0x40] sm:$0xf] %vm4540_vm3, %v4785_v37  ;;  %v13111_v21 = vor.u32 %v4803_v49, %v4800_v51  ;;  %v4833_v47 = vrot.slane %v4831_v38, 7  ;;  %v4503_v44 = vmul.f32 %v13064_v30, %v4251_v17  ;;  %v5228_v35 = vsel %vm876_vm11, %v12800_v11, %v5227_v50  ;;  %v13149_v13 = vpop.f32.mrf.mxu0 }
 0x260   : > { %v4177_v7 = vadd.f32 %v13072_v8, %v12890_v60  ;;  %v5231_v63 = vor.u32 %v5229_v57, %v5227_v50  ;;  %10322 = vmatprep.mubr.msk.bf16.mxu1 %vm5371_vm4, %v5228_v35  ;;  %v4175_v55 = vadd.f32 %v4092_v54, %v12894_v12  ;;  %v4178_v8 = vadd.f32 %v10307_v31, %v12898_v2 }
 0x261   : > { %v4805_v33 = vsel %vm11069_vm10, %v4796_v22, %v13111_v21  ;;  %v4806_v20 = vrot.slane %v13111_v21, 4  ;;  %v13126_v30 = vor.u32 %v4833_v47, %v4830_v61  ;;  %v9474_v11 = vpack.c.bf16 %v4503_v44, %v4503_v44  ;;  %v15098_v22 = vld [vmem:[#allocation43_spill] sm:$0xff]  ;;  %v4424_v21 = vpop.permute.xlu1 %4423 }
 0x262   : > { %5054 = vst.msk [vmem:[#allocation3 + $0x48] sm:$0xf] %vm4540_vm3, %v4805_v33  ;;  %v4220_v60 = vadd.f32 %v12852_v32, %v4177_v7  ;;  %v5236_v42 = vsel %vm876_vm11, %v5231_v63, %v13085_v52  ;;  %v4218_v12 = vadd.f32 %v12852_v32, %v4175_v55  ;;  %v4176_v54 = vadd.f32 %v4095_v36, %v12902_v0  ;;  %v10311_v63 = vpop.f32.mrf.mxu0  ;;  %v13161_v55 = vpop.permute.xlu0 %4428 }
 0x263   : > { %v5237_v48 = vshrl.u32 %v13025_v27, 16  ;;  %v4835_v46 = vsel %vm11069_vm10, %v4826_v19, %v13126_v30  ;;  %v4836_v2 = vrot.slane %v13126_v30, 4  ;;  %v4808_v31 = vshrl.u32 %v9474_v11, 16  ;;  %10323 = vmatmul.mubr.msk.bf16.vlgmr.msra.gmra.mxu1 %vm5371_vm4, %v5236_v42 }
 0x264   : > { %v4811_v25 = vshll.u32 %v9474_v11, 16  ;;  %v13143_v29 = vld [vmem:[#allocation3 + $0x38] sm:$0xff]   ;;  %5057 = vst.msk [vmem:[#allocation3 + $0x54] sm:$0xf] %vm4540_vm3, %v4835_v46  ;;  %v4256_v10 = vmax.f32 %v4220_v60, 0.0  ;;  %10397 = vmatpush3.bf16.msra.mxu1 %v15098_v22  ;;  %v4254_v0 = vmax.f32 %v4218_v12, 0.0  ;;  %v4221_v27 = vadd.f32 %v12852_v32, %v4178_v8 }
 0x265   : > { %v4219_v9 = vadd.f32 %v12852_v32, %v4176_v54  ;;  %v4810_v51 = vrot.slane %v4808_v31, 6  ;;  %v5239_v53 = vor.u32 %v5237_v48, %v13085_v52  ;;  %v5241_v36 = vshll.u32 %v13049_v16, 16  ;;  %10373 = vmatmul.mubr.msk.bf16.gmra.mxu0 %vm5371_vm4, %v13143_v29  ;;  %10472 = vmatprep.subr.bf16.mxu1 %v10805_v41  ;;  %v4111_v31 = vpop.f32.mrf.mxu0 }
 0x266   : > { %v4813_v49 = vrot.slane %v4811_v25, 7  ;;  %v13155_v37 = vld [vmem:[#allocation3 + $0x40] sm:$0xff]   ;;  %v4508_v38 = vmul.f32 %v4419_v5, %v4256_v10  ;;  %v4506_v17 = vmul.f32 %v4409_v43, %v4254_v0  ;;  %v4257_v50 = vmax.f32 %v4221_v27, 0.0 }
 0x267   : > { %v4255_v19 = vmax.f32 %v4219_v9, 0.0  ;;  %v5243_v57 = vrot.slane %v5241_v36, 1  ;;  %v5245_v47 = vshrl.u32 %v13049_v16, 16  ;;  %v4181_v44 = vadd.f32 %v10310_v34, %v12907_v39  ;;  %10376 = vmatprep.mubr.msk.bf16.mxu0 %vm5371_vm4, %v13155_v37 }
 0x268   : > { %v4814_v61 = vor.u32 %v4813_v49, %v4810_v51  ;;  %v9479_v52 = vpack.c.bf16 %v4508_v38, %v4508_v38  ;;  %v9477_v35 = vpack.c.bf16 %v4506_v17, %v4506_v17  ;;  %v4509_v7 = vmul.f32 %v4424_v21, %v4257_v50  ;;  %v4439_v49 = vpop.permute.xlu0 %4438 }
 0x269   : > { %v4507_v33 = vmul.f32 %v4414_v23, %v4255_v19  ;;  %v5244_v60 = vsel %vm876_vm11, %v5239_v53, %v5243_v57  ;;  %v5247_v8 = vor.u32 %v5245_v47, %v5243_v57  ;;  %v3829_v53 = vpop.f32.mrf.mxu1  ;;  %v10314_v47 = vpop.f32.mrf.mxu0 }
 0x26a   : > { %v4815_v43 = vsel %vm11069_vm10, %v4806_v20, %v4814_v61  ;;  %v4816_v11 = vrot.slane %v4814_v61, 4  ;;  %v4858_v39 = vshrl.u32 %v9479_v52, 16  ;;  %v4861_v16 = vshll.u32 %v9479_v52, 16  ;;  %10326 = vmatprep.mubr.msk.bf16.mxu1 %vm5371_vm4, %v5244_v60 }
 0x26b   : > { %5055 = vst.msk [vmem:[#allocation3 + $0x4c] sm:$0xf] %vm4540_vm3, %v4815_v43  ;;  %v4838_v34 = vshrl.u32 %v9477_v35, 16  ;;  %v4841_v41 = vshll.u32 %v9477_v35, 16  ;;  %v9480_v42 = vpack.c.bf16 %v4509_v7, %v4509_v7  ;;  %v9478_v12 = vpack.c.bf16 %v4507_v33, %v4507_v33  ;;  %v4434_v43 = vpop.permute.xlu1 %4433 }
 0x26c   : > { %v4825_v23 = vsel %vm11069_vm10, %v4816_v11, %v13104_v40  ;;  %v4224_v20 = vadd.f32 %v12852_v32, %v4181_v44  ;;  %v4860_v54 = vrot.slane %v4858_v39, 6  ;;  %v4863_v48 = vrot.slane %v4861_v16, 7 }
 0x26d   : > { %5056 = vst.msk [vmem:[#allocation3 + $0x50] sm:$0xf] %vm4540_vm3, %v4825_v23  ;;  %v4840_v5 = vrot.slane %v4838_v34, 6  ;;  %v4843_v46 = vrot.slane %v4841_v41, 7  ;;  %v4868_v25 = vshrl.u32 %v9480_v42, 16  ;;  %v4871_v10 = vshll.u32 %v9480_v42, 16  ;;  %v4124_v41 = vpop.f32.mrf.mxu0 }
 0x26e   : > { %v4848_v22 = vshrl.u32 %v9478_v12, 16  ;;  %v4851_v0 = vshll.u32 %v9478_v12, 16  ;;  %v4864_v27 = vor.u32 %v4863_v48, %v4860_v54  ;;  %v4260_v51 = vmax.f32 %v4224_v20, 0.0  ;;  %v13211_v42 = vld [vmem:[%s14928_s3] ss:$0 sm:$0xff] }
 0x26f   : > { %v4844_v9 = vor.u32 %v4843_v46, %v4840_v5  ;;  %v5249_v40 = vshll.u32 %v13062_v24, 16  ;;  %v4870_v36 = vrot.slane %v4868_v25, 6  ;;  %v4873_v38 = vrot.slane %v4871_v10, 7  ;;  %v13219_v5 = vpop.permute.xlu0 %4448 }
 0x270   : > { %v4850_v17 = vrot.slane %v4848_v22, 6  ;;  %v4853_v50 = vrot.slane %v4851_v0, 7  ;;  %v4866_v19 = vrot.slane %v4864_v27, 4  ;;  %v4512_v57 = vmul.f32 %v4439_v49, %v4260_v51  ;;  %v4444_v22 = vpop.permute.xlu1 %4443 }
 0x271   : > { %v4845_v21 = vsel %vm11069_vm10, %v4836_v2, %v4844_v9  ;;  %v4846_v61 = vrot.slane %v4844_v9, 4  ;;  %v13179_v44 = vor.u32 %v4873_v38, %v4870_v36  ;;  %v5251_v35 = vrot.slane %v5249_v40, 1  ;;  %v10315_v40 = vpop.f32.mrf.mxu0 }
 0x272   : > { %5058 = vst.msk [vmem:[#allocation3 + $0x58] sm:$0xf] %vm4540_vm3, %v4845_v21  ;;  %v4854_v52 = vor.u32 %v4853_v50, %v4850_v17  ;;  %v4179_v7 = vadd.f32 %v13149_v13, %v12911_v28  ;;  %v13183_v33 = vld [vmem:[#allocation3 + $0x48] sm:$0xff]   ;;  %v13186_v30 = vadd.f32 %v3829_v53, %v12949_v18  ;;  %v9483_v11 = vpack.c.bf16 %v4512_v57, %v4512_v57 }
 0x273   : > { %v4182_v2 = vadd.f32 %v10311_v63, %v12915_v1  ;;  %v4180_v60 = vadd.f32 %v4111_v31, %v12922_v58  ;;  %v4875_v39 = vsel %vm11069_vm10, %v4866_v19, %v13179_v44  ;;  %v5253_v28 = vshrl.u32 %v13062_v24, 16  ;;  %10377 = vmatmul.mubr.msk.bf16.gmra.mxu0 %vm5371_vm4, %v13183_v33 }
 0x274   : > { %v4855_v16 = vsel %vm11069_vm10, %v4846_v61, %v4854_v52  ;;  %v4856_v34 = vrot.slane %v4854_v52, 4  ;;  %v13198_v18 = vld [vmem:[#allocation3 + $0x50] sm:$0xff]   ;;  %5061 = vst.msk [vmem:[#allocation3 + $0x64] sm:$0xf] %vm4540_vm3, %v4875_v39  ;;  %v4898_v1 = vshrl.u32 %v9483_v11, 16  ;;  %v4901_v58 = vshll.u32 %v9483_v11, 16 }
 0x275   : > { %5059 = vst.msk [vmem:[#allocation3 + $0x5c] sm:$0xf] %vm4540_vm3, %v4855_v16  ;;  %v5252_v13 = vsel %vm876_vm11, %v5247_v8, %v5251_v35  ;;  %v4222_v63 = vadd.f32 %v12852_v32, %v4179_v7  ;;  %v4876_v23 = vrot.slane %v13179_v44, 4  ;;  %v4225_v12 = vadd.f32 %v13211_v42, %v4182_v2  ;;  %10380 = vmatprep.mubr.msk.bf16.mxu0 %vm5371_vm4, %v13198_v18 }
 0x276   : > { %v4865_v24 = vsel %vm11069_vm10, %v4856_v34, %v4864_v27  ;;  %10327 = vmatmul.mubr.msk.bf16.gmra.mxu1 %vm5371_vm4, %v5252_v13  ;;  %v4223_v20 = vadd.f32 %v13211_v42, %v4180_v60  ;;  %v4900_v32 = vrot.slane %v4898_v1, 6  ;;  %v4903_v8 = vrot.slane %v4901_v58, 7  ;;  %v4454_v13 = vpop.permute.xlu1 %4453 }
 0x277   : > { %5060 = vst.msk [vmem:[#allocation3 + $0x60] sm:$0xf] %vm4540_vm3, %v4865_v24  ;;  %v4258_v54 = vmax.f32 %v4222_v63, 0.0  ;;  %v5257_v48 = vshll.u32 %v13088_v6, 16  ;;  %v4261_v46 = vmax.f32 %v4225_v12, 0.0  ;;  %v5261_v25 = vshrl.u32 %v13088_v6, 16 }
 0x278   : > { %v4259_v31 = vmax.f32 %v4223_v20, 0.0  ;;  %v4185_v10 = vadd.f32 %v10314_v47, %v12926_v4  ;;  %v5255_v27 = vor.u32 %v5253_v28, %v5251_v35  ;;  %v5265_v51 = vshll.u32 %v13092_v15, 16 }
 0x279   : > { %v4510_v0 = vmul.f32 %v13161_v55, %v4258_v54  ;;  %v5259_v9 = vrot.slane %v5257_v48, 1  ;;  %v4513_v49 = vmul.f32 %v4444_v22, %v4261_v46  ;;  %v4183_v38 = vadd.f32 %v4124_v41, %v12930_v62  ;;  %v4127_v62 = vpop.f32.mrf.mxu0  ;;  %v13245_v48 = vld [vmem:[%s14929_s4 + $0x28] sm:$0xff]  }
 0x27a   : > { %v4511_v53 = vmul.f32 %v4434_v43, %v4259_v31  ;;  %v4228_v36 = vadd.f32 %v13211_v42, %v4185_v10  ;;  %v4904_v17 = vor.u32 %v4903_v8, %v4900_v32  ;;  %v5267_v61 = vrot.slane %v5265_v51, 1  ;;  %v4459_v43 = vpop.permute.xlu0 %4458  ;;  %10510 = vmatprep.subr.bf16.mxu0 %v13245_v48 }
 0x27b   : > { %v9481_v50 = vpack.c.bf16 %v4510_v0, %v4510_v0  ;;  %v5260_v6 = vsel %vm876_vm11, %v5255_v27, %v5259_v9  ;;  %v5263_v19 = vor.u32 %v5261_v25, %v5259_v9  ;;  %v9484_v4 = vpack.c.bf16 %v4513_v49, %v4513_v49  ;;  %v10318_v54 = vpop.f32.mrf.mxu0 }
 0x27c   : > { %v9482_v21 = vpack.c.bf16 %v4511_v53, %v4511_v53  ;;  %10330 = vmatprep.mubr.msk.bf16.mxu1 %vm5371_vm4, %v5260_v6  ;;  %v4264_v55 = vmax.f32 %v4228_v36, 0.0  ;;  %v13229_v57 = vld [vmem:[#allocation3 + $0x58] sm:$0xff]   ;;  %v4226_v35 = vadd.f32 %v13211_v42, %v4183_v38  ;;  %v4186_v7 = vadd.f32 %v10315_v40, %v12934_v45 }
 0x27d   : > { %v4878_v47 = vshrl.u32 %v9481_v50, 16  ;;  %v4881_v52 = vshll.u32 %v9481_v50, 16  ;;  %v4908_v11 = vshrl.u32 %v9484_v4, 16  ;;  %v4911_v2 = vshll.u32 %v9484_v4, 16  ;;  %10381 = vmatmul.mubr.msk.bf16.gmra.mxu0 %vm5371_vm4, %v13229_v57  ;;  %v4140_v38 = vpop.f32.mrf.mxu0  ;;  %v4464_v50 = vpop.permute.xlu1 %4463 }
 0x27e   : > { %v4888_v60 = vshrl.u32 %v9482_v21, 16  ;;  %v4891_v39 = vshll.u32 %v9482_v21, 16  ;;  %v4516_v28 = vmul.f32 %v4459_v43, %v4264_v55  ;;  %v5268_v1 = vsel %vm876_vm11, %v5263_v19, %v5267_v61  ;;  %v13236_v58 = vld [vmem:[#allocation3 + $0x60] sm:$0xff]  }
 0x27f   : > { %v4880_v16 = vrot.slane %v4878_v47, 6  ;;  %v4883_v34 = vrot.slane %v4881_v52, 7  ;;  %v4910_v63 = vrot.slane %v4908_v11, 6  ;;  %v4913_v41 = vrot.slane %v4911_v2, 7  ;;  %10331 = vmatmul.mubr.msk.bf16.gmra.mxu1 %vm5371_vm4, %v5268_v1  ;;  %10384 = vmatprep.mubr.msk.bf16.mxu0 %vm5371_vm4, %v13236_v58  ;;  %v4469_v52 = vpop.permute.xlu0 %4468 }
 0x280   : > { %v4890_v45 = vrot.slane %v4888_v60, 6  ;;  %v4893_v24 = vrot.slane %v4891_v39, 7  ;;  %v9487_v20 = vpack.c.bf16 %v4516_v28, %v4516_v28  ;;  %v4262_v32 = vmax.f32 %v4226_v35, 0.0  ;;  %v10319_v39 = vpop.f32.mrf.mxu0 }
 0x281   : > { %v4884_v12 = vor.u32 %v4883_v34, %v4880_v16  ;;  %v4229_v8 = vadd.f32 %v13211_v42, %v4186_v7  ;;  %v4906_v46 = vrot.slane %v4904_v17, 4  ;;  %v13247_v31 = vor.u32 %v4913_v41, %v4910_v63 }
 0x282   : > { %v4894_v25 = vor.u32 %v4893_v24, %v4890_v45  ;;  %v4184_v10 = vadd.f32 %v4127_v62, %v12938_v3  ;;  %v4938_v27 = vshrl.u32 %v9487_v20, 16  ;;  %v4941_v9 = vshll.u32 %v9487_v20, 16 }
 0x283   : > { %v4885_v22 = vsel %vm11069_vm10, %v4876_v23, %v4884_v12  ;;  %v4886_v0 = vrot.slane %v4884_v12, 4  ;;  %v4915_v51 = vsel %vm11069_vm10, %v4906_v46, %v13247_v31  ;;  %v4514_v49 = vmul.f32 %v13219_v5, %v4262_v32  ;;  %v4474_v32 = vpop.permute.xlu1 %4473 }
 0x284   : > { %5062 = vst.msk [vmem:[#allocation3 + $0x68] sm:$0xf] %vm4540_vm3, %v4885_v22  ;;  %v4896_v40 = vrot.slane %v4894_v25, 4  ;;  %v5269_v3 = vshrl.u32 %v13092_v15, 16  ;;  %5065 = vst.msk [vmem:[#allocation3 + $0x74] sm:$0xf] %vm4540_vm3, %v4915_v51  ;;  %v4227_v15 = vadd.f32 %v13211_v42, %v4184_v10  ;;  %v4189_v43 = vadd.f32 %v10318_v54, %v12941_v26  ;;  %v4479_v10 = vpop.permute.xlu0 %4478 }
 0x285   : > { %v4895_v44 = vsel %vm11069_vm10, %v4886_v0, %v4894_v25  ;;  %v4940_v23 = vrot.slane %v4938_v27, 6  ;;  %v4943_v53 = vrot.slane %v4941_v9, 7  ;;  %v4265_v36 = vmax.f32 %v4229_v8, 0.0 }
 0x286   : > { %v4916_v6 = vrot.slane %v13247_v31, 4  ;;  %v4905_v19 = vsel %vm11069_vm10, %v4896_v40, %v4904_v17  ;;  %5063 = vst.msk [vmem:[#allocation3 + $0x6c] sm:$0xf] %vm4540_vm3, %v4895_v44  ;;  %v9485_v5 = vpack.c.bf16 %v4514_v49, %v4514_v49  ;;  %v5271_v55 = vor.u32 %v5269_v3, %v5267_v61  ;;  %v4143_v31 = vpop.f32.mrf.mxu0 }
 0x287   : > { %5064 = vst.msk [vmem:[#allocation3 + $0x70] sm:$0xf] %vm4540_vm3, %v4905_v19  ;;  %v13270_v4 = vor.u32 %v4943_v53, %v4940_v23  ;;  %v4517_v21 = vmul.f32 %v4464_v50, %v4265_v36  ;;  %v5273_v47 = vshll.u32 %v13143_v29, 16  ;;  %v4263_v62 = vmax.f32 %v4227_v15, 0.0 }
 0x288   : > { %v4918_v35 = vshrl.u32 %v9485_v5, 16  ;;  %v4921_v7 = vshll.u32 %v9485_v5, 16  ;;  %v5277_v2 = vshrl.u32 %v13143_v29, 16  ;;  %v5281_v60 = vshll.u32 %v13155_v37, 16 }
 0x289   : > { %v9488_v17 = vpack.c.bf16 %v4517_v21, %v4517_v21  ;;  %v5275_v11 = vrot.slane %v5273_v47, 1  ;;  %v4515_v28 = vmul.f32 %v4454_v13, %v4263_v62  ;;  %v4232_v61 = vadd.f32 %v13211_v42, %v4189_v43 }
 0x28a   : > { %v4920_v16 = vrot.slane %v4918_v35, 6  ;;  %v4923_v34 = vrot.slane %v4921_v7, 7  ;;  %v5283_v20 = vrot.slane %v5281_v60, 1  ;;  %v4187_v46 = vadd.f32 %v4140_v38, %v12944_v56 }
 0x28b   : > { %v4948_v1 = vshrl.u32 %v9488_v17, 16  ;;  %v4951_v63 = vshll.u32 %v9488_v17, 16  ;;  %v5276_v41 = vsel %vm876_vm11, %v5271_v55, %v5275_v11  ;;  %v5279_v45 = vor.u32 %v5277_v2, %v5275_v11  ;;  %v4484_v55 = vpop.permute.xlu1 %4483 }
 0x28c   : > { %v4924_v24 = vor.u32 %v4923_v34, %v4920_v16  ;;  %v9486_v12 = vpack.c.bf16 %v4515_v28, %v4515_v28  ;;  %10334 = vmatprep.mubr.msk.bf16.mxu1 %vm5371_vm4, %v5276_v41  ;;  %v4268_v26 = vmax.f32 %v4232_v61, 0.0  ;;  %v4190_v13 = vadd.f32 %v10319_v39, %v12965_v59 }
 0x28d   : > { %v4950_v8 = vrot.slane %v4948_v1, 6  ;;  %v4953_v54 = vrot.slane %v4951_v63, 7  ;;  %v13281_v25 = vld [vmem:[#allocation3 + $0x68] sm:$0xff]   ;;  %v4946_v22 = vrot.slane %v13270_v4, 4  ;;  %v5284_v59 = vsel %vm876_vm11, %v5279_v45, %v5283_v20 }
 0x28e   : > { %v4925_v0 = vsel %vm11069_vm10, %v4916_v6, %v4924_v24  ;;  %v4928_v27 = vshrl.u32 %v9486_v12, 16  ;;  %v4931_v9 = vshll.u32 %v9486_v12, 16  ;;  %v13286_v51 = vld [vmem:[#allocation3 + $0x70] sm:$0xff]   ;;  %v4520_v56 = vmul.f32 %v4479_v10, %v4268_v26  ;;  %10385 = vmatmul.mubr.msk.bf16.gmra.mxu0 %vm5371_vm4, %v13281_v25  ;;  %10335 = vmatmul.mubr.msk.bf16.gmra.mxu1 %vm5371_vm4, %v5284_v59 }
 0x28f   : > { %5066 = vst.msk [vmem:[#allocation3 + $0x78] sm:$0xf] %vm4540_vm3, %v4925_v0  ;;  %v13289_v40 = vor.u32 %v4953_v54, %v4950_v8  ;;  %v4230_v49 = vadd.f32 %v13211_v42, %v4187_v46  ;;  %v4233_v23 = vadd.f32 %v13211_v42, %v4190_v13  ;;  %v4188_v53 = vadd.f32 %v4143_v31, %v13186_v30 }
 0x290   : > { %v4930_v3 = vrot.slane %v4928_v27, 6  ;;  %v4933_v44 = vrot.slane %v4931_v9, 7  ;;  %10388 = vmatprep.mubr.msk.bf16.mxu0 %vm5371_vm4, %v13286_v51  ;;  %v4926_v36 = vrot.slane %v4924_v24, 4  ;;  %v9491_v50 = vpack.c.bf16 %v4520_v56, %v4520_v56 }
 0x291   : > { %v4955_v38 = vsel %vm11069_vm10, %v4946_v22, %v13289_v40  ;;  %v4266_v6 = vmax.f32 %v4230_v49, 0.0  ;;  %v4269_v5 = vmax.f32 %v4233_v23, 0.0  ;;  %v4231_v15 = vadd.f32 %v13211_v42, %v4188_v53  ;;  %v5074_v22 = vld [vmem:[#allocation3 + $0x98] sm:$0x3] }
 0x292   : > { %5069 = vst.msk [vmem:[#allocation3 + $0x84] sm:$0xf] %vm4540_vm3, %v4955_v38  ;;  %v4934_v19 = vor.u32 %v4933_v44, %v4930_v3  ;;  %v5285_v21 = vshrl.u32 %v13155_v37, 16  ;;  %v4978_v30 = vshrl.u32 %v9491_v50, 16  ;;  %v4981_v47 = vshll.u32 %v9491_v50, 16 }
 0x293   : > { %v4518_v35 = vmul.f32 %v4469_v52, %v4266_v6  ;;  %v5289_v7 = vshll.u32 %v13183_v33, 16  ;;  %v4521_v17 = vmul.f32 %v4484_v55, %v4269_v5  ;;  %v4267_v11 = vmax.f32 %v4231_v15, 0.0 }
 0x294   : > { %v4935_v62 = vsel %vm11069_vm10, %v4926_v36, %v4934_v19  ;;  %v4936_v43 = vrot.slane %v4934_v19, 4  ;;  %v4980_v2 = vrot.slane %v4978_v30, 6  ;;  %v4983_v60 = vrot.slane %v4981_v47, 7  ;;  %v10849_v47 = vld [vmem:[#allocation3 + $0x4] sm:$0xf] }
 0x295   : > { %5067 = vst.msk [vmem:[#allocation3 + $0x7c] sm:$0xf] %vm4540_vm3, %v4935_v62  ;;  %v9489_v39 = vpack.c.bf16 %v4518_v35, %v4518_v35  ;;  %v5287_v42 = vor.u32 %v5285_v21, %v5283_v20  ;;  %v9492_v34 = vpack.c.bf16 %v4521_v17, %v4521_v17  ;;  %v4519_v52 = vmul.f32 %v4474_v32, %v4267_v11 }
 0x296   : > { %v4945_v16 = vsel %vm11069_vm10, %v4936_v43, %v13270_v4  ;;  %v5291_v28 = vrot.slane %v5289_v7, 1  ;;  %v4956_v61 = vrot.slane %v13289_v40, 4  ;;  %v4984_v1 = vor.u32 %v4983_v60, %v4980_v2  ;;  %v5822_v40 = vld [vmem:[#allocation3] sm:$0xe] }
 0x297   : > { %5068 = vst.msk [vmem:[#allocation3 + $0x80] sm:$0xf] %vm4540_vm3, %v4945_v16  ;;  %v4958_v63 = vshrl.u32 %v9489_v39, 16  ;;  %v4961_v41 = vshll.u32 %v9489_v39, 16  ;;  %v4988_v45 = vshrl.u32 %v9492_v34, 16  ;;  %v4991_v24 = vshll.u32 %v9492_v34, 16 }
 0x298   : > { %v9490_v12 = vpack.c.bf16 %v4519_v52, %v4519_v52  ;;  %v5292_v26 = vsel %vm876_vm11, %v5287_v42, %v5291_v28  ;;  %v4986_v20 = vrot.slane %v4984_v1, 4  ;;  %v5293_v4 = vshrl.u32 %v13183_v33, 16  ;;  %v13347_v16 = vld [vmem:[#allocation3 + $0xc] sm:$0xf] }
 0x299   : > { %v4960_v8 = vrot.slane %v4958_v63, 6  ;;  %v4963_v54 = vrot.slane %v4961_v41, 7  ;;  %10338 = vmatprep.mubr.msk.bf16.mxu1 %vm5371_vm4, %v5292_v26  ;;  %v4990_v32 = vrot.slane %v4988_v45, 6  ;;  %v4993_v46 = vrot.slane %v4991_v24, 7  ;;  %v6139_v45 = vld [vmem:[#allocation3 + $0x8] sm:$0xe] }
 0x29a   : > { %v4968_v13 = vshrl.u32 %v9490_v12, 16  ;;  %v4971_v31 = vshll.u32 %v9490_v12, 16  ;;  %v5295_v0 = vor.u32 %v5293_v4, %v5291_v28  ;;  %v5297_v27 = vshll.u32 %v13198_v18, 16  ;;  %v13353_v28 = vld [vmem:[#allocation3 + $0x10] sm:$0xff]  }
 0x29b   : > { %v4964_v10 = vor.u32 %v4963_v54, %v4960_v8  ;;  %v5305_v9 = vshll.u32 %v13229_v57, 16  ;;  %v4994_v56 = vor.u32 %v4993_v46, %v4990_v32  ;;  %v5301_v3 = vshrl.u32 %v13198_v18, 16  ;;  %v13365_v8 = vld [vmem:[#allocation3 + $0x20] sm:$0xff]  }
 0x29c   : > { %v4970_v59 = vrot.slane %v4968_v13, 6  ;;  %v4973_v49 = vrot.slane %v4971_v31, 7  ;;  %v13321_v44 = vld [vmem:[#allocation3 + $0x78] sm:$0xff]   ;;  %v5299_v36 = vrot.slane %v5297_v27, 1  ;;  %v5313_v5 = vshll.u32 %v13236_v58, 16 }
 0x29d   : > { %v4965_v23 = vsel %vm11069_vm10, %v4956_v61, %v4964_v10  ;;  %v4966_v53 = vrot.slane %v4964_v10, 4  ;;  %v5307_v38 = vrot.slane %v5305_v9, 1  ;;  %v4995_v50 = vsel %vm11069_vm10, %v4986_v20, %v4994_v56  ;;  %10389 = vmatmul.mubr.msk.bf16.gmra.mxu0 %vm5371_vm4, %v13321_v44  ;;  %v13363_v20 = vld [vmem:[#allocation3 + $0x18] sm:$0xff]  }
 0x29e   : > { %5070 = vst.msk [vmem:[#allocation3 + $0x88] sm:$0xf] %vm4540_vm3, %v4965_v23  ;;  %v4996_v6 = vrot.slane %v4994_v56, 4  ;;  %v4974_v19 = vor.u32 %v4973_v49, %v4970_v59  ;;  %v13331_v15 = vld [vmem:[#allocation3 + $0x80] sm:$0xff]   ;;  %5073 = vst.msk [vmem:[#allocation3 + $0x94] sm:$0xf] %vm4540_vm3, %v4995_v50  ;;  %v5300_v21 = vsel %vm876_vm11, %v5295_v0, %v5299_v36  ;;  %v5303_v55 = vor.u32 %v5301_v3, %v5299_v36 }
 0x29f   : > { %v5309_v30 = vshrl.u32 %v13229_v57, 16  ;;  %v9229_v35 = vcombine.low %v5822_v40, %v10849_v47  ;;  %10339 = vmatmul.mubr.msk.bf16.gmra.mxu1 %vm5371_vm4, %v5300_v21  ;;  %v5315_v11 = vrot.slane %v5313_v5, 1  ;;  %10392 = vmatprep.mubr.msk.bf16.mxu0 %vm5371_vm4, %v13331_v15  ;;  %v5321_v39 = vshll.u32 %v13281_v25, 16  ;;  %v13374_v0 = vld [vmem:[#allocation3 + $0x30] sm:$0xff]   ;;  %v10850_v49 = vld [vmem:[#allocation3 + $0x8] sm:$0xff]   ;;  %v13389_v21 = vld [vmem:[#allocation3 + $0x38] sm:$0xff]  }
 0x2a0   : > { %v5075_v62 = vsel %vm12498_vm2, %v4996_v6, %v5074_v22  ;;  %v4975_v43 = vsel %vm11069_vm10, %v4966_v53, %v4974_v19  ;;  %v4976_v17 = vrot.slane %v4974_v19, 4  ;;  %v5308_v2 = vsel %vm876_vm11, %v5303_v55, %v5307_v38  ;;  %v13372_v22 = vld [vmem:[#allocation3 + $0x28] sm:$0xff]   ;;  %v10851_v55 = vld [vmem:[#allocation3 + $0x10] sm:$0xff]   ;;  %v13435_v23 = vld [vmem:[#allocation3 + $0x58] sm:$0xff]  }
 0x2a1   : > { %5076 = vst [vmem:[#allocation3 + $0x98] sm:$0x3] %v5075_v62  ;;  %5071 = vst.msk [vmem:[#allocation3 + $0x8c] sm:$0xf] %vm4540_vm3, %v4975_v43  ;;  %v5311_v60 = vor.u32 %v5309_v30, %v5307_v38  ;;  %v5329_v42 = vshll.u32 %v13286_v51, 16  ;;  %10342 = vmatprep.mubr.msk.bf16.mxu1 %vm5371_vm4, %v5308_v2  ;;  %v5317_v52 = vshrl.u32 %v13236_v58, 16 }
 0x2a2   : > { %v4985_v34 = vsel %vm11069_vm10, %v4976_v17, %v4984_v1  ;;  %v5323_v61 = vrot.slane %v5321_v39, 1  ;;  %v5325_v63 = vshrl.u32 %v13281_v25, 16  ;;  %v5337_v41 = vshll.u32 %v13321_v44, 16  ;;  %v13396_v43 = vld [vmem:[#allocation3 + $0x40] sm:$0xff]   ;;  %v10852_v17 = vld [vmem:[#allocation3 + $0x18] sm:$0xff]  }
 0x2a3   : > { %5072 = vst.msk [vmem:[#allocation3 + $0x90] sm:$0xf] %vm4540_vm3, %v4985_v34  ;;  %v5829_v24 = vrot.slane %v9229_v35, 1  ;;  %v5319_v12 = vor.u32 %v5317_v52, %v5315_v11  ;;  %v5333_v26 = vshrl.u32 %v13286_v51, 16  ;;  %v5345_v14 = vshll.u32 %v13331_v15, 16  ;;  %v10853_v39 = vld [vmem:[#allocation3 + $0x20] sm:$0xff]  }
 0x2a4   : > { %v13361_v1 = vcombine.low %v6139_v45, %v13347_v16  ;;  %v5316_v54 = vsel %vm876_vm11, %v5311_v60, %v5315_v11  ;;  %v5331_v4 = vrot.slane %v5329_v42, 1  ;;  %v5341_v32 = vshrl.u32 %v13321_v44, 16 }
 0x2a5   : > { %v5324_v46 = vsel %vm876_vm11, %v5319_v12, %v5323_v61  ;;  %v5339_v13 = vrot.slane %v5337_v41, 1  ;;  %v6273_v10 = vrot.slane %v13353_v28, 1  ;;  %v5327_v27 = vor.u32 %v5325_v63, %v5323_v61  ;;  %v10854_v63 = vld [vmem:[#allocation3 + $0x28] sm:$0xff]  }
 0x2a6   : > { %v6272_v31 = vrot.slane %v13361_v1, 1  ;;  %v5347_v9 = vrot.slane %v5345_v14, 1  ;;  %v5349_v40 = vshrl.u32 %v13331_v15, 16  ;;  %v5830_v3 = vrot.slane %v10850_v49, 1 }
 0x2a7   : > { %10343 = vmatmul.mubr.msk.bf16.gmra.mxu1 %vm5371_vm4, %v5316_v54  ;;  %v5335_v36 = vor.u32 %v5333_v26, %v5331_v4  ;;  %v6275_v38 = vrot.slane %v13363_v20, 1  ;;  %v5343_v50 = vor.u32 %v5341_v32, %v5339_v13  ;;  %v6277_v5 = vrot.slane %v13365_v8, 1  ;;  %v13408_v54 = vld [vmem:[#allocation3 + $0x48] sm:$0xff]  }
 0x2a8   : > { %v5077_v56 = vld [vmem:[#allocation3 + $0x98] sm:$0xe]  ;;  %v13378_v59 = vld [vmem:[#allocation3 + $0x88] sm:$0xff]   ;;  %10346 = vmatprep.mubr.msk.bf16.mxu1 %vm5371_vm4, %v5324_v46  ;;  %v6274_v6 = vsel %vm1483_vm12, %v6272_v31, %v6273_v10  ;;  %v5832_v30 = vrot.slane %v10851_v55, 1  ;;  %v5332_v47 = vsel %vm876_vm11, %v5327_v27, %v5331_v4  ;;  %v5351_v7 = vor.u32 %v5349_v40, %v5347_v9  ;;  %v13428_v40 = vld [vmem:[#allocation3 + $0x50] sm:$0xff]  }
 0x2a9   : > { %v5078_v53 = vsel %vm12960_vm6, 0, %v5077_v56  ;;  %10393 = vmatmul.mubr.msk.bf16.gmra.mxu0 %vm5371_vm4, %v13378_v59  ;;  %v5353_v19 = vshll.u32 %v13378_v59, 16  ;;  %v5340_v35 = vsel %vm876_vm11, %v5335_v36, %v5339_v13  ;;  %v5834_v11 = vrot.slane %v10852_v17, 1  ;;  %v13410_v4 = vld [vmem:[#allocation3 + $0x8] sm:$0xc] }
 0x2aa   : > { %5079 = vst [vmem:[#allocation3 + $0x98] sm:$0xe] %v5078_v53  ;;  %10436 = vmatprep.mubr.msk.bf16.mxu0 %vm5371_vm4, %v6274_v6  ;;  %v13394_v62 = vld [vmem:[#allocation3 + $0x90] ss:$0 sps:$4 sm:$0x11]   ;;  %v6279_v2 = vrot.slane %v13372_v22, 1  ;;  %v13402_v61 = vsel %vm1483_vm12, %v5829_v24, %v5830_v3  ;;  %v5348_v45 = vsel %vm876_vm11, %v5343_v50, %v5347_v9  ;;  %v6276_v12 = vsel %vm1483_vm12, %v6273_v10, %v6275_v38 }
 0x2ab   : > { %v6281_v60 = vrot.slane %v13374_v0, 1  ;;  %v5836_v42 = vrot.slane %v10853_v39, 1  ;;  %v5355_v34 = vrot.slane %v5353_v19, 1  ;;  %v5361_v52 = vshll.u32 %v13394_v62, 16  ;;  %v13437_v53 = vld [vmem:[#allocation3 + $0x60] sm:$0xff]  }
 0x2ac   : > { %v5838_v41 = vrot.slane %v10854_v63, 1  ;;  %v6278_v26 = vsel %vm1483_vm12, %v6275_v38, %v6277_v5  ;;  %v6283_v14 = vrot.slane %v13389_v21, 1  ;;  %v5357_v32 = vshrl.u32 %v13378_v59, 16  ;;  %v10855_v38 = vld [vmem:[#allocation3 + $0x30] sm:$0xff]  }
 0x2ad   : > { %v13414_v46 = vsel %vm1483_vm12, %v5830_v3, %v5832_v30  ;;  %v6285_v24 = vrot.slane %v13396_v43, 1  ;;  %v9313_v13 = vcombine.low %v13410_v4, %v13347_v16  ;;  %v13421_v31 = vsel %vm1483_vm12, %v5832_v30, %v5834_v11 }
 0x2ae   : > { %v6280_v10 = vsel %vm1483_vm12, %v6277_v5, %v6279_v2  ;;  %v6282_v27 = vsel %vm1483_vm12, %v6279_v2, %v6281_v60  ;;  %v13426_v9 = vsel %vm1483_vm12, %v5834_v11, %v5836_v42  ;;  %v5356_v56 = vsel %vm876_vm11, %v5351_v7, %v5355_v34  ;;  %v13445_v5 = vld [vmem:[#allocation3 + $0x68] sm:$0xff]   ;;  %v13457_v11 = vld [vmem:[#allocation3 + $0x70] sm:$0xff]  }
 0x2af   : > { %10347 = vmatmul.mubr.msk.bf16.gmra.mxu1 %vm5371_vm4, %v5332_v47  ;;  %v5359_v49 = vor.u32 %v5357_v32, %v5355_v34  ;;  %v5363_v16 = vrot.slane %v5361_v52, 1  ;;  %v13433_v3 = vsel %vm1483_vm12, %v5836_v42, %v5838_v41  ;;  %v13441_v36 = vsel %vm1483_vm12, %v6281_v60, %v6283_v14 }
 0x2b0   : > { %10350 = vmatprep.mubr.msk.bf16.mxu1 %vm5371_vm4, %v5340_v35  ;;  %v5840_v50 = vrot.slane %v10855_v38, 1  ;;  %v14948_v6 = vrot.slane %v13143_v29, 1  ;;  %v6287_v19 = vrot.slane %v13408_v54, 1  ;;  %v13449_v55 = vsel %vm1483_vm12, %v6283_v14, %v6285_v24 }
 0x2b1   : > { %10437 = vmatmul.mubr.msk.bf16.vlgmr.msra.gmra.mxu0 %vm5371_vm4, %v6276_v12  ;;  %v14947_v30 = vrot.slane %v13183_v33, 1  ;;  %v5848_v47 = vrot.slane %v13198_v18, 1  ;;  %v5850_v35 = vrot.slane %v13229_v57, 1  ;;  %v6289_v7 = vrot.slane %v13428_v40, 1 }
 0x2b2   : > { %10440 = vmatprep.mubr.msk.bf16.mxu0 %vm5371_vm4, %v6278_v26  ;;  %10511 = vmatpush3.bf16.msra.mxu0 %v13245_v48  ;;  %v5852_v2 = vrot.slane %v13236_v58, 1  ;;  %v5854_v60 = vrot.slane %v13281_v25, 1  ;;  %v5364_v39 = vsel %vm876_vm11, %v5359_v49, %v5363_v16  ;;  %v6291_v42 = vrot.slane %v13435_v23, 1 }
 0x2b3   : > { %v13466_v18 = vsel %vm1483_vm12, %v14947_v30, %v5848_v47  ;;  %v13469_v57 = vsel %vm1483_vm12, %v5848_v47, %v5850_v35  ;;  %v6293_v48 = vrot.slane %v13437_v53, 1  ;;  %v6295_v34 = vrot.slane %v13445_v5, 1 }
 0x2b4   : > { %v13474_v58 = vsel %vm1483_vm12, %v5850_v35, %v5852_v2  ;;  %v13477_v25 = vsel %vm1483_vm12, %v5852_v2, %v5854_v60  ;;  %v13480_v52 = vsel %vm1483_vm12, %v5838_v41, %v5840_v50  ;;  %v13485_v63 = vsel %vm1483_vm12, %v5840_v50, %v14948_v6 }
 0x2b5   : > { %v5856_v12 = vrot.slane %v13286_v51, 1  ;;  %v5858_v26 = vrot.slane %v13321_v44, 1  ;;  %v13491_v14 = vsel %vm1483_vm12, %v6285_v24, %v6287_v19  ;;  %v14946_v4 = vrot.slane %v13457_v11, 1 }
 0x2b6   : > { %v5860_v32 = vrot.slane %v13331_v15, 1  ;;  %v5862_v41 = vrot.slane %v13378_v59, 1  ;;  %v13498_v49 = vsel %vm1483_vm12, %v6287_v19, %v6289_v7  ;;  %v13501_v51 = vsel %vm1483_vm12, %v6289_v7, %v6291_v42 }
 0x2b7   : > { %10351 = vmatmul.mubr.msk.bf16.gmra.mxu1 %vm5371_vm4, %v5348_v45  ;;  %v13504_v44 = vsel %vm1483_vm12, %v5854_v60, %v5856_v12  ;;  %v13507_v45 = vsel %vm1483_vm12, %v5856_v12, %v5858_v26  ;;  %v13511_v15 = vsel %vm1483_vm12, %v6291_v42, %v6293_v48  ;;  %v13514_v59 = vsel %vm1483_vm12, %v6293_v48, %v6295_v34 }
 0x2b8   : > { %10354 = vmatprep.mubr.msk.bf16.mxu1 %vm5371_vm4, %v5356_v56  ;;  %v13517_v24 = vsel %vm1483_vm12, %v5858_v26, %v5860_v32  ;;  %v13520_v56 = vsel %vm1483_vm12, %v5860_v32, %v5862_v41  ;;  %v7039_v16 = vrot.slane %v9313_v13, 2  ;;  %v7040_v38 = vrot.slane %v13353_v28, 2 }
 0x2b9   : > { %10441 = vmatmul.mubr.msk.bf16.gmra.mxu0 %vm5371_vm4, %v6280_v10  ;;  %v5864_v50 = vrot.slane %v13394_v62, 1  ;;  %v6590_v10 = vshrl.u32 %v13361_v1, 16  ;;  %v13529_v19 = vsel %vm1483_vm12, %v6295_v34, %v14946_v4  ;;  %v6593_v47 = vshll.u32 %v13361_v1, 16  ;;  %v13681_v4 = vld [vmem:[#allocation3 + $0x88] sm:$0xff]  }
 0x2ba   : > { %10444 = vmatprep.mubr.msk.bf16.mxu0 %vm5371_vm4, %v6282_v27  ;;  %v6598_v35 = vshrl.u32 %v13353_v28, 16  ;;  %v6601_v7 = vshll.u32 %v13353_v28, 16  ;;  %v13535_v27 = vsel %vm2683_vm14, %v7039_v16, %v7040_v38  ;;  %v7042_v2 = vrot.slane %v13363_v20, 2 }
 0x2bb   : > { %v13538_v13 = vsel %vm1483_vm12, %v5862_v41, %v5864_v50  ;;  %v6592_v62 = vrot.slane %v6590_v10, 1  ;;  %v6595_v60 = vrot.slane %v6593_v47, 2  ;;  %v7044_v34 = vrot.slane %v13365_v8, 2 }
 0x2bc   : > { %v6600_v42 = vrot.slane %v6598_v35, 1  ;;  %v6603_v48 = vrot.slane %v6601_v7, 2  ;;  %v13543_v1 = vsel %vm2683_vm14, %v7040_v38, %v7042_v2  ;;  %v6607_v12 = vshrl.u32 %v13363_v20, 16 }
 0x2bd   : > { %v6610_v28 = vshll.u32 %v13363_v20, 16  ;;  %v6616_v26 = vshrl.u32 %v13365_v8, 16  ;;  %v6596_v32 = vor.u32 %v6595_v60, %v6592_v62  ;;  %v13550_v16 = vsel %vm2683_vm14, %v7042_v2, %v7044_v34 }
 0x2be   : > { %v6604_v41 = vor.u32 %v6603_v48, %v6600_v42  ;;  %v6619_v50 = vshll.u32 %v13365_v8, 16  ;;  %v6609_v38 = vrot.slane %v6607_v12, 1  ;;  %v7046_v35 = vrot.slane %v13372_v22, 2 }
 0x2bf   : > { %10355 = vmatmul.mubr.msk.bf16.gmra.mxu1 %vm5371_vm4, %v5364_v39  ;;  %v6612_v10 = vrot.slane %v6610_v28, 2  ;;  %v6618_v47 = vrot.slane %v6616_v26, 1  ;;  %v7048_v7 = vrot.slane %v13374_v0, 2  ;;  %v6625_v62 = vshrl.u32 %v13372_v22, 16 }
 0x2c0   : > { %10398 = vmatprep.mubr.msk.bf16.mxu1 %vm5371_vm4, %v13402_v61  ;;  %v13559_v20 = vsel %vm2236_vm13, %v6596_v32, %v6604_v41  ;;  %v6621_v39 = vrot.slane %v6619_v50, 2  ;;  %v13566_v61 = vsel %vm2683_vm14, %v7044_v34, %v7046_v35  ;;  %v6628_v2 = vshll.u32 %v13372_v22, 16  ;;  %v13581_v22 = vld [vmem:[%s14929_s4 + $0x30] sm:$0xff]  }
 0x2c1   : > { %10445 = vmatmul.mubr.msk.bf16.gmra.mxu0 %vm5371_vm4, %v13441_v36  ;;  %v6613_v8 = vor.u32 %v6612_v10, %v6609_v38  ;;  %v6634_v60 = vshrl.u32 %v13374_v0, 16  ;;  %v13571_v42 = vsel %vm2683_vm14, %v7046_v35, %v7048_v7  ;;  %v6627_v48 = vrot.slane %v6625_v62, 1 }
 0x2c2   : > { %10448 = vmatprep.mubr.msk.bf16.mxu0 %vm5371_vm4, %v13449_v55  ;;  %v6622_v36 = vor.u32 %v6621_v39, %v6618_v47  ;;  %v6637_v12 = vshll.u32 %v13374_v0, 16  ;;  %v6630_v26 = vrot.slane %v6628_v2, 2  ;;  %v7050_v32 = vrot.slane %v13389_v21, 2 }
 0x2c3   : > { %v13575_v28 = vsel %vm2236_vm13, %v6604_v41, %v6613_v8  ;;  %v6636_v55 = vrot.slane %v6634_v60, 1  ;;  %v7052_v38 = vrot.slane %v13396_v43, 2  ;;  %v6643_v0 = vshrl.u32 %v13389_v21, 16  ;;  %v10856_v60 = vld [vmem:[%s14929_s4 + $0x20] sm:$0xff]  }
 0x2c4   : > { %v13584_v34 = vsel %vm2236_vm13, %v6613_v8, %v6622_v36  ;;  %v6639_v50 = vrot.slane %v6637_v12, 2  ;;  %v6631_v10 = vor.u32 %v6630_v26, %v6627_v48  ;;  %v13589_v41 = vsel %vm2683_vm14, %v7048_v7, %v7050_v32  ;;  %v13611_v12 = vld [vmem:[%s14929_s4 + $0x38] sm:$0xff]  }
 0x2c5   : > { %v6646_v47 = vshll.u32 %v13389_v21, 16  ;;  %v6652_v35 = vshrl.u32 %v13396_v43, 16  ;;  %v13596_v62 = vsel %vm2683_vm14, %v7050_v32, %v7052_v38  ;;  %v6645_v8 = vrot.slane %v6643_v0, 1  ;;  %10586 = vmatprep.subr.bf16.mxu0 %v13611_v12 }
 0x2c6   : > { %v6640_v39 = vor.u32 %v6639_v50, %v6636_v55  ;;  %v6655_v2 = vshll.u32 %v13396_v43, 16  ;;  %v13605_v21 = vsel %vm2236_vm13, %v6622_v36, %v6631_v10  ;;  %v7054_v48 = vrot.slane %v13408_v54, 2 }
 0x2c7   : > { %10399 = vmatmul.mubr.msk.bf16.vlgmr.msra.gmra.mxu1 %vm5371_vm4, %v13414_v46  ;;  %v6648_v7 = vrot.slane %v6646_v47, 2  ;;  %v6654_v46 = vrot.slane %v6652_v35, 1  ;;  %v7056_v36 = vrot.slane %v13428_v40, 2  ;;  %v6661_v26 = vshrl.u32 %v13408_v54, 16 }
 0x2c8   : > { %10473 = vmatpush3.bf16.msra.mxu1 %v10856_v60  ;;  %10402 = vmatprep.mubr.msk.bf16.mxu1 %vm5371_vm4, %v13421_v31  ;;  %v13617_v43 = vsel %vm2236_vm13, %v6631_v10, %v6640_v39  ;;  %v6657_v31 = vrot.slane %v6655_v2, 2  ;;  %v13624_v32 = vsel %vm2683_vm14, %v7052_v38, %v7054_v48  ;;  %v6664_v50 = vshll.u32 %v13408_v54, 16 }
 0x2c9   : > { %10449 = vmatmul.mubr.msk.bf16.gmra.mxu0 %vm5371_vm4, %v13491_v14  ;;  %10548 = vmatprep.subr.bf16.mxu1 %v13581_v22  ;;  %v6649_v55 = vor.u32 %v6648_v7, %v6645_v8  ;;  %v6670_v14 = vshrl.u32 %v13428_v40, 16  ;;  %v13630_v10 = vsel %vm2683_vm14, %v7054_v48, %v7056_v36  ;;  %v6663_v47 = vrot.slane %v6661_v26, 1 }
 0x2ca   : > { %10452 = vmatprep.mubr.msk.bf16.mxu0 %vm5371_vm4, %v13498_v49  ;;  %v6658_v0 = vor.u32 %v6657_v31, %v6654_v46  ;;  %v6673_v35 = vshll.u32 %v13428_v40, 16  ;;  %v6666_v49 = vrot.slane %v6664_v50, 2  ;;  %v7058_v38 = vrot.slane %v13435_v23, 2 }
 0x2cb   : > { %v13634_v2 = vsel %vm2236_vm13, %v6640_v39, %v6649_v55  ;;  %v6672_v8 = vrot.slane %v6670_v14, 1  ;;  %v7060_v7 = vrot.slane %v13437_v53, 2  ;;  %v6679_v46 = vshrl.u32 %v13435_v23, 16 }
 0x2cc   : > { %v13638_v54 = vsel %vm2236_vm13, %v6649_v55, %v6658_v0  ;;  %v6675_v60 = vrot.slane %v6673_v35, 2  ;;  %v6667_v48 = vor.u32 %v6666_v49, %v6663_v47  ;;  %v13643_v31 = vsel %vm2683_vm14, %v7056_v36, %v7058_v38  ;;  %v13655_v47 = vld [vmem:[#allocation3 + $0x78] sm:$0xff]  }
 0x2cd   : > { %v6682_v40 = vshll.u32 %v13435_v23, 16  ;;  %v6688_v39 = vshrl.u32 %v13437_v53, 16  ;;  %v13650_v55 = vsel %vm2683_vm14, %v7058_v38, %v7060_v7  ;;  %v6681_v50 = vrot.slane %v6679_v46, 1 }
 0x2ce   : > { %v6676_v26 = vor.u32 %v6675_v60, %v6672_v8  ;;  %v6691_v14 = vshll.u32 %v13437_v53, 16  ;;  %v13658_v36 = vsel %vm2236_vm13, %v6658_v0, %v6667_v48  ;;  %v7062_v49 = vrot.slane %v13445_v5, 2 }
 0x2cf   : > { %10403 = vmatmul.mubr.msk.bf16.gmra.mxu1 %vm5371_vm4, %v13426_v9  ;;  %v6684_v23 = vrot.slane %v6682_v40, 2  ;;  %v6690_v35 = vrot.slane %v6688_v39, 1  ;;  %v13663_v9 = vld [vmem:[#allocation3 + $0x80] sm:$0xff]   ;;  %v6697_v38 = vshrl.u32 %v13445_v5, 16  ;;  %v6700_v46 = vshll.u32 %v13445_v5, 16 }
 0x2d0   : > { %10406 = vmatprep.mubr.msk.bf16.mxu1 %vm5371_vm4, %v13433_v3  ;;  %v13666_v8 = vsel %vm2236_vm13, %v6667_v48, %v6676_v26  ;;  %v6693_v53 = vrot.slane %v6691_v14, 2  ;;  %v7064_v3 = vrot.slane %v13457_v11, 2  ;;  %v13673_v60 = vsel %vm2683_vm14, %v7060_v7, %v7062_v49 }
 0x2d1   : > { %10453 = vmatmul.mubr.msk.bf16.gmra.mxu0 %vm5371_vm4, %v13501_v51  ;;  %v6685_v0 = vor.u32 %v6684_v23, %v6681_v50  ;;  %v6706_v51 = vshrl.u32 %v13457_v11, 16  ;;  %v6699_v39 = vrot.slane %v6697_v38, 1  ;;  %v6709_v14 = vshll.u32 %v13457_v11, 16  ;;  %v13687_v23 = vld [vmem:[#allocation3 + $0x90] sm:$0xff]  }
 0x2d2   : > { %10456 = vmatprep.mubr.msk.bf16.mxu0 %vm5371_vm4, %v13511_v15  ;;  %v6694_v40 = vor.u32 %v6693_v53, %v6690_v35  ;;  %v13678_v48 = vsel %vm2683_vm14, %v7062_v49, %v7064_v3  ;;  %v6702_v15 = vrot.slane %v6700_v46, 2  ;;  %v7066_v7 = vrot.slane %v13655_v47, 2 }
 0x2d3   : > { %v13684_v30 = vsel %vm2236_vm13, %v6676_v26, %v6685_v0  ;;  %v6708_v50 = vrot.slane %v6706_v51, 1  ;;  %v6711_v35 = vrot.slane %v6709_v14, 2  ;;  %v7068_v49 = vrot.slane %v13663_v9, 2 }
 0x2d4   : > { %v13690_v5 = vsel %vm2236_vm13, %v6685_v0, %v6694_v40  ;;  %v6715_v53 = vshrl.u32 %v13655_v47, 16  ;;  %v6703_v38 = vor.u32 %v6702_v15, %v6699_v39  ;;  %v13695_v6 = vsel %vm2683_vm14, %v7064_v3, %v7066_v7 }
 0x2d5   : > { %15101 = vst [vmem:[#allocation23_spill] sm:$0xff] %v13690_v5  ;;  %v6718_v26 = vshll.u32 %v13655_v47, 16  ;;  %v6724_v46 = vshrl.u32 %v13663_v9, 16  ;;  %v6712_v51 = vor.u32 %v6711_v35, %v6708_v50  ;;  %v13702_v0 = vsel %vm2683_vm14, %v7066_v7, %v7068_v49 }
 0x2d6   : > { %v6717_v14 = vrot.slane %v6715_v53, 1  ;;  %v6727_v17 = vshll.u32 %v13663_v9, 16  ;;  %v13708_v3 = vsel %vm2236_vm13, %v6694_v40, %v6703_v38  ;;  %v7070_v5 = vrot.slane %v13681_v4, 2 }
 0x2d7   : > { %10407 = vmatmul.mubr.msk.bf16.gmra.mxu1 %vm5371_vm4, %v13480_v52  ;;  %15102 = vst [vmem:[#allocation24_spill] sm:$0xff] %v13708_v3  ;;  %v6720_v39 = vrot.slane %v6718_v26, 2  ;;  %v6726_v15 = vrot.slane %v6724_v46, 1  ;;  %v13714_v52 = vsel %vm2236_vm13, %v6703_v38, %v6712_v51  ;;  %v14949_v7 = vrot.slane %v13687_v23, 2 }
 0x2d8   : > { %10410 = vmatprep.mubr.msk.bf16.mxu1 %vm5371_vm4, %v13485_v63  ;;  %15103 = vst [vmem:[#allocation8_spill] sm:$0xff] %v13714_v52  ;;  %v6729_v50 = vrot.slane %v6727_v17, 2  ;;  %v6733_v35 = vshrl.u32 %v13681_v4, 16  ;;  %v13721_v40 = vsel %vm2683_vm14, %v7068_v49, %v7070_v5  ;;  %v6736_v53 = vshll.u32 %v13681_v4, 16 }
 0x2d9   : > { %10457 = vmatmul.mubr.msk.bf16.gmra.mxu0 %vm5371_vm4, %v13514_v59  ;;  %v6721_v63 = vor.u32 %v6720_v39, %v6717_v14  ;;  %v6742_v26 = vshrl.u32 %v13687_v23, 16  ;;  %v13728_v17 = vsel %vm2683_vm14, %v7070_v5, %v14949_v7  ;;  %v6745_v46 = vshll.u32 %v13687_v23, 16 }
 0x2da   : > { %10460 = vmatprep.mubr.msk.bf16.mxu0 %vm5371_vm4, %v13529_v19  ;;  %v6730_v59 = vor.u32 %v6729_v50, %v6726_v15  ;;  %v6735_v38 = vrot.slane %v6733_v35, 1  ;;  %v6299_v52 = vrot.slane %v13655_v47, 1  ;;  %v6738_v49 = vrot.slane %v6736_v53, 2 }
 0x2db   : > { %v13733_v19 = vsel %vm2236_vm13, %v6712_v51, %v6721_v63  ;;  %v6744_v14 = vrot.slane %v6742_v26, 1  ;;  %v6301_v39 = vrot.slane %v13663_v9, 1  ;;  %v6747_v15 = vrot.slane %v6745_v46, 2 }
 0x2dc   : > { %v13737_v3 = vsel %vm2236_vm13, %v6721_v63, %v6730_v59  ;;  %v15104_v50 = vrot.slane %v13155_v37, 1  ;;  %v15105_v5 = vrot.slane %v13143_v29, 1  ;;  %v6739_v7 = vor.u32 %v6738_v49, %v6735_v38  ;;  %v13823_v49 = vld [vmem:[#allocation3 + $0x50] sm:$0xff]  }
 0x2dd   : > { %v15106_v47 = vrot.slane %v13183_v33, 1  ;;  %v13750_v9 = vor.u32 %v6747_v15, %v6744_v14  ;;  %v15108_v63 = vrot.slane %v13457_v11, 1  ;;  %v6302_v38 = vsel %vm1483_vm12, %v6299_v52, %v6301_v39  ;;  %v13829_v15 = vld [vmem:[#allocation3 + $0x60] sm:$0xff]  }
 0x2de   : > { %v5845_v35 = vsel %vm1483_vm12, %v15105_v5, %v15104_v50  ;;  %v15107_v51 = vmov %v15104_v50  ;;  %v13757_v29 = vsel %vm2236_vm13, %v6730_v59, %v6739_v7  ;;  %v6303_v33 = vrot.slane %v13681_v4, 1  ;;  %v13803_v4 = vld [vmem:[#allocation3 + $0x14] sm:$0xf]  ;;  %v13831_v50 = vld [vmem:[#allocation3 + $0x68] sm:$0xff]  }
 0x2df   : > { %10411 = vmatmul.mubr.msk.bf16.gmra.mxu1 %vm5371_vm4, %v5845_v35  ;;  %v5847_v53 = vsel %vm1483_vm12, %v15107_v51, %v15106_v47  ;;  %v6300_v26 = vsel %vm1483_vm12, %v15108_v63, %v6299_v52  ;;  %v13763_v37 = vsel %vm2236_vm13, %v6739_v7, %v13750_v9  ;;  %v6305_v46 = vrot.slane %v13687_v23, 1  ;;  %v10820_v7 = vld [vmem:[#allocation3 + $0x98] ss:$0 sps:$4 sm:$0x11]   ;;  %v13838_v51 = vld [vmem:[#allocation3 + $0x70] sm:$0xff]   ;;  %v13842_v63 = vld [vmem:[#allocation3 + $0x80] sm:$0xff]  }
 0x2e0   : > { %10414 = vmatprep.mubr.msk.bf16.mxu1 %vm5371_vm4, %v5847_v53  ;;  %v6304_v11 = vsel %vm1483_vm12, %v6301_v39, %v6303_v33  ;;  %v6307_v59 = vrot.slane %v10820_v7, 1  ;;  %v13827_v39 = vld [vmem:[#allocation3 + $0x58] sm:$0xff]  }
 0x2e1   : > { %10461 = vmatmul.mubr.msk.bf16.gmra.mxu0 %vm5371_vm4, %v6300_v26  ;;  %v6306_v52 = vsel %vm1483_vm12, %v6303_v33, %v6305_v46  ;;  %v13840_v53 = vld [vmem:[#allocation3 + $0x78] sm:$0xff]  }
 0x2e2   : > { %10464 = vmatprep.mubr.msk.bf16.mxu0 %vm5371_vm4, %v6302_v38 }
 0x2e7   : > { %10415 = vmatmul.mubr.msk.bf16.gmra.mxu1 %vm5371_vm4, %v13466_v18  ;;  %v6308_v18 = vsel %vm1483_vm12, %v6305_v46, %v6307_v59  ;;  %v13851_v46 = vld [vmem:[#allocation3 + $0x88] sm:$0xff]   ;;  %v13865_v59 = vld [vmem:[#allocation3 + $0x90] sm:$0xff]  }
 0x2e8   : > { %10418 = vmatprep.mubr.msk.bf16.mxu1 %vm5371_vm4, %v13469_v57 }
 0x2e9   : > { %10465 = vmatmul.mubr.msk.bf16.gmra.mxu0 %vm5371_vm4, %v6304_v11 }
 0x2ea   : > { %10468 = vmatprep.mubr.msk.bf16.mxu0 %vm5371_vm4, %v6306_v52 }
 0x2ef   : > { %10419 = vmatmul.mubr.msk.bf16.gmra.mxu1 %vm5371_vm4, %v13474_v58  ;;  %v13799_v58 = vld [vmem:[#allocation3 + $0x18] sm:$0xff]  }
 0x2f0   : > { %10422 = vmatprep.mubr.msk.bf16.mxu1 %vm5371_vm4, %v13477_v25  ;;  %v8242_v25 = vld [vmem:[#allocation3 + $0x10] sm:$0x8] }
 0x2f1   : > { %10469 = vmatmul.mubr.msk.bf16.gmra.mxu0 %vm5371_vm4, %v6308_v18  ;;  %v13867_v18 = vld [vmem:[#allocation3 + $0xa0] ss:$0 sps:$4 sm:$0x77]  }
 0x2f2   : > { %10512 = vmatprep.mubr.msk.bf16.mxu0 %vm5371_vm4, %v13535_v27  ;;  %v13815_v27 = vld [vmem:[#allocation3 + $0x38] sm:$0xff]  }
 0x2f3   : > { %v8258_v38 = vrot.slane %v13815_v27, 3 }
 0x2f7   : > { %10423 = vmatmul.mubr.msk.bf16.gmra.mxu1 %vm5371_vm4, %v13504_v44 }
 0x2f8   : > { %10426 = vmatprep.mubr.msk.bf16.mxu1 %vm5371_vm4, %v13507_v45  ;;  %v13809_v45 = vld [vmem:[#allocation3 + $0x20] sm:$0xff]  }
 0x2f9   : > { %10513 = vmatmul.mubr.msk.bf16.vlgmr.msra.gmra.mxu0 %vm5371_vm4, %v13543_v1  ;;  %v13817_v1 = vld [vmem:[#allocation3 + $0x40] sm:$0xff]   ;;  %v8252_v5 = vrot.slane %v13809_v45, 3 }
 0x2fa   : > { %10516 = vmatprep.mubr.msk.bf16.mxu0 %vm5371_vm4, %v13550_v16  ;;  %10587 = vmatpush3.bf16.msra.mxu0 %v13611_v12  ;;  %v9397_v16 = vcombine.low %v8242_v25, %v13803_v4  ;;  %v8250_v12 = vrot.slane %v13799_v58, 3  ;;  %v8260_v33 = vrot.slane %v13817_v1, 3 }
 0x2fc   : > { %v13873_v25 = vsel %vm3883_vm15, %v8258_v38, %v8260_v33 }
 0x2fd   : > { %15114 = vst [vmem:[#allocation10_spill] sm:$0xff] %v13873_v25  ;;  %v8272_v25 = vrot.slane %v13838_v51, 3 }
 0x2ff   : > { %10427 = vmatmul.mubr.msk.bf16.gmra.mxu1 %vm5371_vm4, %v13517_v24  ;;  %v13811_v24 = vld [vmem:[#allocation3 + $0x28] sm:$0xff]  }
 0x300   : > { %10430 = vmatprep.mubr.msk.bf16.mxu1 %vm5371_vm4, %v13520_v56  ;;  %v13797_v57 = vpop.f32.mrf.mxu0  ;;  %v13813_v56 = vld [vmem:[#allocation3 + $0x30] sm:$0xff]   ;;  %v8254_v35 = vrot.slane %v13811_v24, 3 }
 0x301   : > { %10517 = vmatmul.mubr.msk.bf16.gmra.mxu0 %vm5371_vm4, %v13566_v61  ;;  %v13820_v61 = vld [vmem:[#allocation3 + $0x48] sm:$0xff]   ;;  %v8256_v47 = vrot.slane %v13813_v56, 3 }
 0x302   : > { %10520 = vmatprep.mubr.msk.bf16.mxu0 %vm5371_vm4, %v13571_v42  ;;  %v13807_v44 = vpop.f32.mrf.mxu0  ;;  %v8249_v42 = vrot.slane %v9397_v16, 3  ;;  %v13857_v11 = vsel %vm3883_vm15, %v8252_v5, %v8254_v35  ;;  %v8262_v7 = vrot.slane %v13820_v61, 3  ;;  %v8264_v16 = vrot.slane %v13823_v49, 3 }
 0x303   : > { %15111 = vst [vmem:[#allocation16_spill] sm:$0xff] %v13857_v11  ;;  %v13860_v52 = vsel %vm3883_vm15, %v8254_v35, %v8256_v47  ;;  %v8268_v35 = vrot.slane %v13829_v15, 3  ;;  %v8278_v11 = vrot.slane %v13851_v46, 3 }
 0x304   : > { %v13825_v14 = vpop.f32.mrf.mxu0  ;;  %v13845_v26 = vsel %vm3883_vm15, %v8249_v42, %v8250_v12  ;;  %15112 = vst [vmem:[#allocation11_spill] sm:$0xff] %v13860_v52  ;;  %v13878_v42 = vld [vmem:[#allocation3 + $0x98] sm:$0xff]  }
 0x305   : > { %15109 = vst [vmem:[#allocation25_spill] sm:$0xff] %v13845_v26 }
 0x307   : > { %10431 = vmatmul.mubr.msk.bf16.gmra.mxu1 %vm5371_vm4, %v13538_v13  ;;  %v13854_v13 = vsel %vm3883_vm15, %v8250_v12, %v8252_v5  ;;  %v5682_v12 = vpop.f32.mrf.mxu0  ;;  %v8266_v5 = vrot.slane %v13827_v39, 3 }
 0x308   : > { %10474 = vmatprep.mubr.msk.bf16.mxu1 %vm5371_vm4, %v13559_v20  ;;  %15110 = vst [vmem:[#allocation15_spill] sm:$0xff] %v13854_v13  ;;  %v13870_v20 = vsel %vm3883_vm15, %v8256_v47, %v8258_v38  ;;  %v8270_v47 = vrot.slane %v13831_v50, 3  ;;  %v13887_v38 = vsel %vm3883_vm15, %v8262_v7, %v8264_v16 }
 0x309   : > { %10521 = vmatmul.mubr.msk.bf16.gmra.mxu0 %vm5371_vm4, %v13589_v41  ;;  %15113 = vst [vmem:[#allocation13_spill] sm:$0xff] %v13870_v20  ;;  %v13881_v41 = vsel %vm3883_vm15, %v8260_v33, %v8262_v7  ;;  %15116 = vst [vmem:[#allocation17_spill] sm:$0xff] %v13887_v38  ;;  %v8274_v20 = vrot.slane %v13840_v53, 3  ;;  %v13893_v52 = vsel %vm3883_vm15, %v8264_v16, %v8266_v5  ;;  %v13905_v7 = vld [vmem:[%s14929_s4 + $0x40] sm:$0xff]  }
 0x30a   : > { %10524 = vmatprep.mubr.msk.bf16.mxu0 %vm5371_vm4, %v13596_v62  ;;  %15115 = vst [vmem:[#allocation12_spill] sm:$0xff] %v13881_v41  ;;  %v8276_v62 = vrot.slane %v13842_v63, 3  ;;  %15117 = vst [vmem:[#allocation18_spill] sm:$0xff] %v13893_v52  ;;  %v13896_v33 = vsel %vm3883_vm15, %v8266_v5, %v8268_v35  ;;  %v13899_v41 = vsel %vm3883_vm15, %v8268_v35, %v8270_v47  ;;  %v8280_v5 = vrot.slane %v13865_v59, 3 }
 0x30b   : > { %15118 = vst [vmem:[#allocation19_spill] sm:$0xff] %v13896_v33  ;;  %15119 = vst [vmem:[#allocation14_spill] sm:$0xff] %v13899_v41  ;;  %v13908_v38 = vsel %vm3883_vm15, %v8270_v47, %v8272_v25  ;;  %v13911_v13 = vsel %vm3883_vm15, %v8272_v25, %v8274_v20  ;;  %v8282_v33 = vrot.slane %v13878_v42, 3  ;;  %v8284_v52 = vrot.slane %v13867_v18, 3 }
 0x30c   : > { %15120 = vst [vmem:[#allocation20_spill] sm:$0xff] %v13908_v38  ;;  %15121 = vst [vmem:[#allocation21_spill] sm:$0xff] %v13911_v13  ;;  %v13914_v16 = vsel %vm3883_vm15, %v8274_v20, %v8276_v62  ;;  %v13920_v41 = vsel %vm3883_vm15, %v8276_v62, %v8278_v11  ;;  %v13927_v25 = vsel %vm3883_vm15, %v8278_v11, %v8280_v5  ;;  %v15129_v13 = vld [vmem:[#allocation8_spill] sm:$0xff] }
 0x30d   : > { %15122 = vst [vmem:[#allocation26_spill] sm:$0xff] %v13914_v16  ;;  %15123 = vst [vmem:[#allocation27_spill] sm:$0xff] %v13920_v41  ;;  %v13935_v47 = vsel %vm3883_vm15, %v8280_v5, %v8282_v33  ;;  %v13938_v62 = vsel %vm3883_vm15, %v8282_v33, %v8284_v52  ;;  %v7826_v41 = vshrl.u32 %v13811_v24, 16 }
 0x30e   : > { %v13917_v35 = vpop.f32.mrf.mxu0  ;;  %15124 = vst [vmem:[#allocation28_spill] sm:$0xff] %v13927_v25  ;;  %15125 = vst [vmem:[#allocation29_spill] sm:$0xff] %v13935_v47 }
 0x30f   : > { %10475 = vmatmul.mubr.msk.bf16.vlgmr.msra.gmra.mxu1 %vm5371_vm4, %v13575_v28  ;;  %15126 = vst [vmem:[#allocation35_spill] sm:$0xff] %v13938_v62  ;;  %v7817_v62 = vshrl.u32 %v13809_v45, 16 }
 0x310   : > { %10549 = vmatpush3.bf16.msra.mxu1 %v13581_v22  ;;  %10478 = vmatprep.mubr.msk.bf16.mxu1 %vm5371_vm4, %v13584_v34  ;;  %v13932_v20 = vpop.f32.mrf.mxu0 }
 0x311   : > { %10525 = vmatmul.mubr.msk.bf16.gmra.mxu0 %vm5371_vm4, %v13624_v32  ;;  %10624 = vmatprep.subr.bf16.mxu1 %v13905_v7  ;;  %v7819_v26 = vrot.slane %v7817_v62, 2 }
 0x312   : > { %10528 = vmatprep.mubr.msk.bf16.mxu0 %vm5371_vm4, %v13630_v10  ;;  %v13945_v28 = vpop.f32.mrf.mxu0 }
 0x314   : > { %v13947_v22 = vpop.f32.mrf.mxu0 }
 0x317   : > { %10479 = vmatmul.mubr.msk.bf16.gmra.mxu1 %vm5371_vm4, %v13605_v21 }
 0x318   : > { %10482 = vmatprep.mubr.msk.bf16.mxu1 %vm5371_vm4, %v13617_v43  ;;  %v13953_v34 = vpop.f32.mrf.mxu0 }
 0x319   : > { %10529 = vmatmul.mubr.msk.bf16.gmra.mxu0 %vm5371_vm4, %v13643_v31 }
 0x31a   : > { %10532 = vmatprep.mubr.msk.bf16.mxu0 %vm5371_vm4, %v13650_v55  ;;  %v13959_v32 = vpop.f32.mrf.mxu0 }
 0x31c   : > { %v13961_v10 = vpop.f32.mrf.mxu0 }
 0x31e   : > { %v13969_v21 = vpop.f32.mrf.mxu0 }
 0x31f   : > { %10483 = vmatmul.mubr.msk.bf16.gmra.mxu1 %vm5371_vm4, %v13634_v2 }
 0x320   : > { %10486 = vmatprep.mubr.msk.bf16.mxu1 %vm5371_vm4, %v13638_v54 }
 0x321   : > { %10533 = vmatmul.mubr.msk.bf16.gmra.mxu0 %vm5371_vm4, %v13673_v60 }
 0x322   : > { %10536 = vmatprep.mubr.msk.bf16.mxu0 %vm5371_vm4, %v13678_v48 }
 0x323   : > { %v10324_v43 = vpop.f32.mrf.mxu1 }
 0x324   : > { %v13974_v31 = vadd.f32 %v13797_v57, %v10324_v43  ;;  %v7349_v57 = vld [vmem:[#allocation3 + $0x10] sm:$0xc] }
 0x325   : > { %v5460_v55 = vpop.f32.mrf.mxu1  ;;  %v13976_v11 = vpop.f32.mrf.mxu0 }
 0x326   : > { %v13979_v2 = vadd.f32 %v13807_v44, %v5460_v55 }
 0x327   : > { %10487 = vmatmul.mubr.msk.bf16.gmra.mxu1 %vm5371_vm4, %v13658_v36  ;;  %v10325_v54 = vpop.f32.mrf.mxu1  ;;  %v13983_v60 = vpop.f32.mrf.mxu0  ;;  %v13997_v36 = vcombine.low %v7349_v57, %v13803_v4  ;;  %v14011_v4 = vld [vmem:[#allocation3 + $0x98] ss:$0 sps:$4 sm:$0x33]  }
 0x328   : > { %10490 = vmatprep.mubr.msk.bf16.mxu1 %vm5371_vm4, %v13666_v8  ;;  %v13988_v48 = vadd.f32 %v13825_v14, %v10325_v54  ;;  %v7808_v8 = vshrl.u32 %v13799_v58, 16  ;;  %v7811_v14 = vshll.u32 %v13799_v58, 16 }
 0x329   : > { %10537 = vmatmul.mubr.msk.bf16.gmra.mxu0 %vm5371_vm4, %v13695_v6  ;;  %v5463_v52 = vpop.f32.mrf.mxu1  ;;  %v13999_v33 = vpop.f32.mrf.mxu0  ;;  %v7800_v6 = vshrl.u32 %v13997_v36, 16  ;;  %v7803_v5 = vshll.u32 %v13997_v36, 16 }
 0x32a   : > { %10540 = vmatprep.mubr.msk.bf16.mxu0 %vm5371_vm4, %v13702_v0  ;;  %v13994_v44 = vadd.f32 %v5682_v12, %v5463_v52  ;;  %v15127_v0 = vld [vmem:[#allocation23_spill] sm:$0xff]  ;;  %v7810_v12 = vrot.slane %v7808_v8, 2  ;;  %v7813_v55 = vrot.slane %v7811_v14, 3  ;;  %v7074_v52 = vrot.slane %v14011_v4, 2  ;;  %v15128_v14 = vld [vmem:[#allocation24_spill] sm:$0xff] }
 0x32b   : > { %v14007_v43 = vpop.f32.mrf.mxu0  ;;  %v7805_v54 = vrot.slane %v7803_v5, 3 }
 0x32c   : > { %v7814_v25 = vor.u32 %v7813_v55, %v7810_v12  ;;  %v15130_v12 = vrot.slane %v13687_v23, 2 }
 0x32e   : > { %v7075_v55 = vsel %vm2683_vm14, %v15130_v12, %v7074_v52 }
 0x32f   : > { %10491 = vmatmul.mubr.msk.bf16.gmra.mxu1 %vm5371_vm4, %v13684_v30  ;;  %v7802_v30 = vrot.slane %v7800_v6, 2 }
 0x330   : > { %10494 = vmatprep.mubr.msk.bf16.mxu1 %vm5371_vm4, %v15127_v0  ;;  %v7820_v0 = vshll.u32 %v13809_v45, 16 }
 0x331   : > { %10541 = vmatmul.mubr.msk.bf16.gmra.mxu0 %vm5371_vm4, %v13721_v40  ;;  %v7829_v40 = vshll.u32 %v13811_v24, 16  ;;  %v7806_v5 = vor.u32 %v7805_v54, %v7802_v30  ;;  %v7828_v30 = vrot.slane %v7826_v41, 2  ;;  %v7844_v41 = vshrl.u32 %v13815_v27, 16 }
 0x332   : > { %10544 = vmatprep.mubr.msk.bf16.mxu0 %vm5371_vm4, %v13728_v17 }
 0x333   : > { %v14017_v57 = vpop.f32.mrf.mxu0  ;;  %v7831_v54 = vrot.slane %v7829_v40, 3  ;;  %v7847_v40 = vshll.u32 %v13815_v27, 16 }
 0x335   : > { %v14024_v8 = vpop.f32.mrf.mxu0 }
 0x336   : > { %v10328_v47 = vpop.f32.mrf.mxu1 }
 0x337   : > { %v14027_v17 = vadd.f32 %v13917_v35, %v10328_v47  ;;  %10495 = vmatmul.mubr.msk.bf16.gmra.mxu1 %vm5371_vm4, %v15128_v14  ;;  %v14031_v16 = vpop.f32.mrf.mxu0  ;;  %v7822_v35 = vrot.slane %v7820_v0, 3  ;;  %v7815_v47 = vsel %vm3436_vm1, %v7806_v5, %v7814_v25  ;;  %v7835_v0 = vshrl.u32 %v13813_v56, 16 }
 0x338   : > { %v5476_v6 = vpop.f32.mrf.mxu1  ;;  %10498 = vmatprep.mubr.msk.bf16.mxu1 %vm5371_vm4, %v15129_v13  ;;  %v7832_v5 = vor.u32 %v7831_v54, %v7828_v30  ;;  %v7846_v30 = vrot.slane %v7844_v41, 2  ;;  %v7849_v54 = vrot.slane %v7847_v40, 3  ;;  %v7856_v41 = vshll.u32 %v13817_v1, 16 }
 0x339   : > { %v14039_v38 = vadd.f32 %v13932_v20, %v5476_v6  ;;  %10545 = vmatmul.mubr.msk.bf16.gmra.mxu0 %vm5371_vm4, %v7075_v55  ;;  %v14047_v23 = vpop.f32.mrf.mxu0  ;;  %v7823_v62 = vor.u32 %v7822_v35, %v7819_v26  ;;  %v7838_v6 = vshll.u32 %v13813_v56, 16  ;;  %v7837_v55 = vrot.slane %v7835_v0, 2 }
 0x33a   : > { %v10329_v14 = vpop.f32.mrf.mxu1  ;;  %10588 = vmatprep.mubr.msk.bf16.mxu0 %vm5371_vm4, %v7815_v47 }
 0x33b   : > { %v14045_v13 = vadd.f32 %v13945_v28, %v10329_v14  ;;  %v7840_v35 = vrot.slane %v7838_v6, 3  ;;  %v7833_v14 = vsel %vm3436_vm1, %v7823_v62, %v7832_v5 }
 0x33c   : > { %v5479_v52 = vpop.f32.mrf.mxu1 }
 0x33d   : > { %v14050_v20 = vadd.f32 %v13947_v22, %v5479_v52  ;;  %v14056_v12 = vpop.f32.mrf.mxu0  ;;  %v7824_v22 = vsel %vm3436_vm1, %v7814_v25, %v7823_v62  ;;  %v6754_v52 = vshll.u32 %v14011_v4, 16  ;;  %v7841_v6 = vor.u32 %v7840_v35, %v7837_v55 }
 0x33e   : > { %v7853_v62 = vshrl.u32 %v13817_v1, 16  ;;  %v7858_v35 = vrot.slane %v7856_v41, 3 }
 0x33f   : > { %10499 = vmatmul.mubr.msk.bf16.gmra.mxu1 %vm5371_vm4, %v13733_v19  ;;  %v10332_v28 = vpop.f32.mrf.mxu1  ;;  %v6751_v19 = vshrl.u32 %v14011_v4, 16  ;;  %v7862_v4 = vshrl.u32 %v13820_v61, 16 }
 0x340   : > { %10502 = vmatprep.mubr.msk.bf16.mxu1 %vm5371_vm4, %v13737_v3  ;;  %v14063_v26 = vadd.f32 %v13953_v34, %v10332_v28  ;;  %v14074_v34 = vpop.f32.mrf.mxu0  ;;  %v7850_v28 = vor.u32 %v7849_v54, %v7846_v30  ;;  %v7855_v55 = vrot.slane %v7853_v62, 2  ;;  %v7482_v62 = vrot.slane %v13997_v36, 2 }
 0x341   : > { %10589 = vmatmul.mubr.msk.bf16.vlgmr.msra.gmra.mxu0 %vm5371_vm4, %v7824_v22  ;;  %v5492_v47 = vpop.f32.mrf.mxu1  ;;  %v6753_v22 = vrot.slane %v6751_v19, 1  ;;  %v7864_v54 = vrot.slane %v7862_v4, 2 }
 0x342   : > { %v14071_v3 = vadd.f32 %v13959_v32, %v5492_v47  ;;  %10592 = vmatprep.mubr.msk.bf16.mxu0 %vm5371_vm4, %v7833_v14  ;;  %v7865_v32 = vshll.u32 %v13820_v61, 16  ;;  %v6756_v47 = vrot.slane %v6754_v52, 2  ;;  %v7851_v30 = vsel %vm3436_vm1, %v7841_v6, %v7850_v28 }
 0x343   : > { %v10333_v25 = vpop.f32.mrf.mxu1 }
 0x344   : > { %15131 = vst [vmem:[#allocation30_spill] sm:$0xff] %v14071_v3  ;;  %v14077_v0 = vadd.f32 %v13961_v10, %v10333_v25  ;;  %v14086_v3 = vpop.f32.mrf.mxu0  ;;  %v7842_v10 = vsel %vm3436_vm1, %v7832_v5, %v7841_v6  ;;  %v7867_v19 = vrot.slane %v7865_v32, 3  ;;  %v7859_v25 = vor.u32 %v7858_v35, %v7855_v55 }
 0x345   : > { %v5495_v40 = vpop.f32.mrf.mxu1  ;;  %v7874_v5 = vshll.u32 %v13823_v49, 16  ;;  %v7883_v6 = vshll.u32 %v13827_v39, 16 }
 0x346   : > { %v14084_v14 = vadd.f32 %v13969_v21, %v5495_v40  ;;  %v6757_v21 = vor.u32 %v6756_v47, %v6753_v22  ;;  %v14096_v52 = vpop.f32.mrf.mxu0  ;;  %v7868_v41 = vor.u32 %v7867_v19, %v7864_v54  ;;  %v7880_v40 = vshrl.u32 %v13827_v39, 16 }
 0x347   : > { %10503 = vmatmul.mubr.msk.bf16.gmra.mxu1 %vm5371_vm4, %v13757_v29  ;;  %v7483_v29 = vrot.slane %v13799_v58, 2  ;;  %v7860_v36 = vsel %vm3436_vm1, %v7850_v28, %v7859_v25  ;;  %v7876_v55 = vrot.slane %v7874_v5, 3  ;;  %v7885_v54 = vrot.slane %v7883_v6, 3 }
 0x348   : > { %10506 = vmatprep.mubr.msk.bf16.mxu1 %vm5371_vm4, %v13763_v37  ;;  %v7871_v37 = vshrl.u32 %v13823_v49, 16  ;;  %v6758_v4 = vsel %vm2236_vm13, %v13750_v9, %v6757_v21  ;;  %v7869_v9 = vsel %vm3436_vm1, %v7859_v25, %v7868_v41  ;;  %v7485_v21 = vrot.slane %v13809_v45, 2 }
 0x349   : > { %10593 = vmatmul.mubr.msk.bf16.gmra.mxu0 %vm5371_vm4, %v7842_v10  ;;  %v7484_v58 = vsel %vm2683_vm14, %v7482_v62, %v7483_v29  ;;  %v7889_v25 = vshrl.u32 %v13829_v15, 16  ;;  %v7898_v45 = vshrl.u32 %v13831_v50, 16 }
 0x34a   : > { %10596 = vmatprep.mubr.msk.bf16.mxu0 %vm5371_vm4, %v7851_v30  ;;  %v7873_v10 = vrot.slane %v7871_v37, 2  ;;  %v7882_v30 = vrot.slane %v7880_v40, 2  ;;  %v7892_v40 = vshll.u32 %v13829_v15, 16 }
 0x34c   : > { %v7877_v5 = vor.u32 %v7876_v55, %v7873_v10  ;;  %v7891_v10 = vrot.slane %v7889_v25, 2  ;;  %v7894_v55 = vrot.slane %v7892_v40, 3  ;;  %v7919_v40 = vshll.u32 %v13840_v53, 16 }
 0x34e   : > { %v14106_v32 = vpop.f32.mrf.mxu0  ;;  %v10336_v22 = vpop.f32.mrf.mxu1 }
 0x34f   : > { %10507 = vmatmul.mubr.msk.bf16.gmra.mxu1 %vm5371_vm4, %v6758_v4  ;;  %v14112_v47 = vadd.f32 %v13976_v11, %v10336_v22  ;;  %v7487_v11 = vrot.slane %v13811_v24, 2  ;;  %v7886_v4 = vor.u32 %v7885_v54, %v7882_v30  ;;  %v7486_v22 = vsel %vm2683_vm14, %v7483_v29, %v7485_v21 }
 0x350   : > { %10550 = vmatprep.mubr.msk.bf16.mxu1 %vm5371_vm4, %v7484_v58  ;;  %v5508_v35 = vpop.f32.mrf.mxu1  ;;  %v14117_v19 = vpop.f32.mrf.mxu0  ;;  %v7489_v30 = vrot.slane %v13813_v56, 2  ;;  %v7895_v54 = vor.u32 %v7894_v55, %v7891_v10 }
 0x351   : > { %10597 = vmatmul.mubr.msk.bf16.gmra.mxu0 %vm5371_vm4, %v7860_v36  ;;  %v14121_v62 = vadd.f32 %v13983_v60, %v5508_v35  ;;  %v7901_v60 = vshll.u32 %v13831_v50, 16  ;;  %v7878_v36 = vsel %vm3436_vm1, %v7868_v41, %v7877_v5  ;;  %v7887_v35 = vsel %vm3436_vm1, %v7877_v5, %v7886_v4 }
 0x352   : > { %10600 = vmatprep.mubr.msk.bf16.mxu0 %vm5371_vm4, %v7869_v9  ;;  %v10337_v28 = vpop.f32.mrf.mxu1  ;;  %v14130_v58 = vpop.f32.mrf.mxu0  ;;  %v7910_v41 = vshll.u32 %v13838_v51, 16  ;;  %v7916_v5 = vshrl.u32 %v13840_v53, 16 }
 0x353   : > { %v14126_v37 = vadd.f32 %v13999_v33, %v10337_v28  ;;  %v7488_v33 = vsel %vm2683_vm14, %v7485_v21, %v7487_v11  ;;  %v7903_v9 = vrot.slane %v7901_v60, 3  ;;  %v7907_v21 = vshrl.u32 %v13838_v51, 16 }
 0x354   : > { %v5511_v6 = vpop.f32.mrf.mxu1  ;;  %v14145_v29 = vpop.f32.mrf.mxu0 }
 0x355   : > { %v14136_v24 = vadd.f32 %v14007_v43, %v5511_v6  ;;  %v7900_v43 = vrot.slane %v7898_v45, 2  ;;  %v7490_v6 = vsel %vm2683_vm14, %v7487_v11, %v7489_v30 }
 0x357   : > { %10551 = vmatmul.mubr.msk.bf16.vlgmr.msra.gmra.mxu1 %vm5371_vm4, %v7486_v22  ;;  %v7904_v25 = vor.u32 %v7903_v9, %v7900_v43  ;;  %v7896_v22 = vsel %vm3436_vm1, %v7886_v4, %v7895_v54  ;;  %v7921_v43 = vrot.slane %v7919_v40, 3  ;;  %v7495_v4 = vrot.slane %v13820_v61, 2 }
 0x358   : > { %10625 = vmatpush3.bf16.msra.mxu1 %v13905_v7  ;;  %10554 = vmatprep.mubr.msk.bf16.mxu1 %vm5371_vm4, %v7488_v33  ;;  %v7491_v7 = vrot.slane %v13815_v27, 2  ;;  %v7909_v33 = vrot.slane %v7907_v21, 2 }
 0x359   : > { %10601 = vmatmul.mubr.msk.bf16.gmra.mxu0 %vm5371_vm4, %v7878_v36  ;;  %v7912_v36 = vrot.slane %v7910_v41, 3  ;;  %v7905_v11 = vsel %vm3436_vm1, %v7895_v54, %v7904_v25  ;;  %v7925_v54 = vshrl.u32 %v13842_v63, 16 }
 0x35a   : > { %10604 = vmatprep.mubr.msk.bf16.mxu0 %vm5371_vm4, %v7887_v35  ;;  %v7492_v56 = vsel %vm2683_vm14, %v7489_v30, %v7491_v7  ;;  %v7918_v35 = vrot.slane %v7916_v5, 2 }
 0x35b   : > { %v7913_v41 = vor.u32 %v7912_v36, %v7909_v33 }
 0x35d   : > { %v14152_v28 = vpop.f32.mrf.mxu0  ;;  %v7914_v36 = vsel %vm3436_vm1, %v7904_v25, %v7913_v41  ;;  %v7499_v25 = vrot.slane %v13827_v39, 2 }
 0x35f   : > { %v10340_v45 = vpop.f32.mrf.mxu1  ;;  %10555 = vmatmul.mubr.msk.bf16.gmra.mxu1 %vm5371_vm4, %v7490_v6  ;;  %v14159_v27 = vpop.f32.mrf.mxu0  ;;  %v7928_v6 = vshll.u32 %v13842_v63, 16 }
 0x360   : > { %v14162_v60 = vadd.f32 %v14017_v57, %v10340_v45  ;;  %10558 = vmatprep.mubr.msk.bf16.mxu1 %vm5371_vm4, %v7492_v56  ;;  %v7493_v57 = vrot.slane %v13817_v1, 2  ;;  %v7934_v45 = vshrl.u32 %v13851_v46, 16  ;;  %v7937_v1 = vshll.u32 %v13851_v46, 16 }
 0x361   : > { %v5524_v10 = vpop.f32.mrf.mxu1  ;;  %10605 = vmatmul.mubr.msk.bf16.gmra.mxu0 %vm5371_vm4, %v7896_v22  ;;  %v14168_v55 = vpop.f32.mrf.mxu0 }
 0x362   : > { %v14171_v9 = vadd.f32 %v14024_v8, %v5524_v10  ;;  %10608 = vmatprep.mubr.msk.bf16.mxu0 %vm5371_vm4, %v7905_v11  ;;  %v7922_v8 = vor.u32 %v7921_v43, %v7918_v35  ;;  %v7494_v61 = vsel %vm2683_vm14, %v7491_v7, %v7493_v57  ;;  %v7496_v22 = vsel %vm2683_vm14, %v7493_v57, %v7495_v4 }
 0x363   : > { %v10341_v30 = vpop.f32.mrf.mxu1  ;;  %v14181_v40 = vpop.f32.mrf.mxu0  ;;  %v7927_v10 = vrot.slane %v7925_v54, 2  ;;  %v7930_v11 = vrot.slane %v7928_v6, 3  ;;  %v7936_v7 = vrot.slane %v7934_v45, 2  ;;  %v7946_v45 = vshll.u32 %v13865_v59, 16 }
 0x364   : > { %v14177_v21 = vadd.f32 %v14031_v16, %v10341_v30  ;;  %v7939_v30 = vrot.slane %v7937_v1, 3 }
 0x365   : > { %v5527_v5 = vpop.f32.mrf.mxu1 }
 0x366   : > { %v14186_v56 = vadd.f32 %v14047_v23, %v5527_v5  ;;  %v7923_v23 = vsel %vm3436_vm1, %v7913_v41, %v7922_v8  ;;  %v7943_v41 = vshrl.u32 %v13865_v59, 16 }
 0x367   : > { %v10344_v16 = vpop.f32.mrf.mxu1  ;;  %10559 = vmatmul.mubr.msk.bf16.gmra.mxu1 %vm5371_vm4, %v7494_v61  ;;  %v7931_v61 = vor.u32 %v7930_v11, %v7927_v10 }
 0x368   : > { %v14192_v33 = vadd.f32 %v14056_v12, %v10344_v16  ;;  %10562 = vmatprep.mubr.msk.bf16.mxu1 %vm5371_vm4, %v7496_v22  ;;  %v7497_v12 = vrot.slane %v13823_v49, 2  ;;  %v7940_v16 = vor.u32 %v7939_v30, %v7936_v7  ;;  %v7952_v49 = vshrl.u32 %v13878_v42, 16 }
 0x369   : > { %v5540_v35 = vpop.f32.mrf.mxu1  ;;  %v14196_v43 = vpop.f32.mrf.mxu0  ;;  %10609 = vmatmul.mubr.msk.bf16.gmra.mxu0 %vm5371_vm4, %v7914_v36  ;;  %v7955_v22 = vshll.u32 %v13878_v42, 16  ;;  %v7945_v7 = vrot.slane %v7943_v41, 2  ;;  %v7948_v30 = vrot.slane %v7946_v45, 3 }
 0x36a   : > { %v14201_v57 = vadd.f32 %v14074_v34, %v5540_v35  ;;  %10612 = vmatprep.mubr.msk.bf16.mxu0 %vm5371_vm4, %v7923_v23  ;;  %v7498_v36 = vsel %vm2683_vm14, %v7495_v4, %v7497_v12  ;;  %v7500_v10 = vsel %vm2683_vm14, %v7497_v12, %v7499_v25  ;;  %v7932_v23 = vsel %vm3436_vm1, %v7922_v8, %v7931_v61 }
 0x36b   : > { %v10345_v5 = vpop.f32.mrf.mxu1  ;;  %v14206_v54 = vpop.f32.mrf.mxu0  ;;  %v7941_v4 = vsel %vm3436_vm1, %v7931_v61, %v7940_v16  ;;  %v7957_v12 = vrot.slane %v7955_v22, 3  ;;  %v7503_v8 = vrot.slane %v13831_v50, 2  ;;  %v7961_v61 = vshrl.u32 %v13867_v18, 16 }
 0x36c   : > { %v14209_v6 = vadd.f32 %v14086_v3, %v10345_v5 }
 0x36d   : > { %v5543_v1 = vpop.f32.mrf.mxu1  ;;  %v14213_v34 = vpop.f32.mrf.mxu0 }
 0x36e   : > { %v14218_v39 = vadd.f32 %v14096_v52, %v5543_v1  ;;  %v7954_v1 = vrot.slane %v7952_v49, 2  ;;  %v7964_v49 = vshll.u32 %v13867_v18, 16 }
 0x36f   : > { %v10348_v3 = vpop.f32.mrf.mxu1  ;;  %10563 = vmatmul.mubr.msk.bf16.gmra.mxu1 %vm5371_vm4, %v7498_v36  ;;  %v14223_v11 = vpop.f32.mrf.mxu0 }
 0x370   : > { %v14226_v35 = vadd.f32 %v14106_v32, %v10348_v3  ;;  %10566 = vmatprep.mubr.msk.bf16.mxu1 %vm5371_vm4, %v7500_v10  ;;  %v7501_v32 = vrot.slane %v13829_v15, 2  ;;  %v7949_v10 = vor.u32 %v7948_v30, %v7945_v7  ;;  %v7963_v30 = vrot.slane %v7961_v61, 2 }
 0x371   : > { %v5556_v52 = vpop.f32.mrf.mxu1  ;;  %v14230_v5 = vpop.f32.mrf.mxu0  ;;  %10613 = vmatmul.mubr.msk.bf16.gmra.mxu0 %vm5371_vm4, %v7932_v23  ;;  %v7958_v23 = vor.u32 %v7957_v12, %v7954_v1  ;;  %v7966_v1 = vrot.slane %v7964_v49, 3 }
 0x372   : > { %v14235_v36 = vadd.f32 %v14117_v19, %v5556_v52  ;;  %10616 = vmatprep.mubr.msk.bf16.mxu0 %vm5371_vm4, %v7941_v4  ;;  %v7502_v52 = vsel %vm2683_vm14, %v7499_v25, %v7501_v32  ;;  %v7950_v18 = vsel %vm3436_vm1, %v7940_v16, %v7949_v10 }
 0x373   : > { %v10349_v3 = vpop.f32.mrf.mxu1  ;;  %v14240_v41 = vpop.f32.mrf.mxu0  ;;  %v7959_v25 = vsel %vm3436_vm1, %v7949_v10, %v7958_v23  ;;  %v7967_v49 = vor.u32 %v7966_v1, %v7963_v30 }
 0x374   : > { %v14243_v45 = vadd.f32 %v14130_v58, %v10349_v3  ;;  %v7504_v58 = vsel %vm2683_vm14, %v7501_v32, %v7503_v8  ;;  %v7505_v3 = vrot.slane %v13838_v51, 2 }
 0x375   : > { %v5559_v22 = vpop.f32.mrf.mxu1  ;;  %v14247_v19 = vpop.f32.mrf.mxu0 }
 0x376   : > { %v14250_v15 = vadd.f32 %v14145_v29, %v5559_v22  ;;  %v7507_v22 = vrot.slane %v13840_v53, 2 }
 0x377   : > { %v10352_v50 = vpop.f32.mrf.mxu1  ;;  %10567 = vmatmul.mubr.msk.bf16.gmra.mxu1 %vm5371_vm4, %v7502_v52  ;;  %v14255_v4 = vpop.f32.mrf.mxu0 }
 0x378   : > { %v14258_v7 = vadd.f32 %v14152_v28, %v10352_v50  ;;  %10570 = vmatprep.mubr.msk.bf16.mxu1 %vm5371_vm4, %v7504_v58  ;;  %v7508_v58 = vsel %vm2683_vm14, %v7505_v3, %v7507_v22 }
 0x379   : > { %v5572_v29 = vpop.f32.mrf.mxu1  ;;  %v14262_v12 = vpop.f32.mrf.mxu0  ;;  %10617 = vmatmul.mubr.msk.bf16.gmra.mxu0 %vm5371_vm4, %v7950_v18 }
 0x37a   : > { %v14267_v32 = vadd.f32 %v14159_v27, %v5572_v29  ;;  %10620 = vmatprep.mubr.msk.bf16.mxu0 %vm5371_vm4, %v7959_v25  ;;  %v7506_v27 = vsel %vm2683_vm14, %v7503_v8, %v7505_v3  ;;  %v7509_v8 = vrot.slane %v13842_v63, 2  ;;  %v7511_v25 = vrot.slane %v13851_v46, 2 }
 0x37b   : > { %v10353_v28 = vpop.f32.mrf.mxu1  ;;  %v14272_v16 = vpop.f32.mrf.mxu0 }
 0x37c   : > { %v14275_v61 = vadd.f32 %v14168_v55, %v10353_v28  ;;  %v7968_v55 = vsel %vm3436_vm1, %v7958_v23, %v7967_v49  ;;  %v7510_v49 = vsel %vm2683_vm14, %v7507_v22, %v7509_v8  ;;  %v7512_v63 = vsel %vm2683_vm14, %v7509_v8, %v7511_v25 }
 0x37d   : > { %v5575_v52 = vpop.f32.mrf.mxu1  ;;  %v14277_v50 = vpop.f32.mrf.mxu0 }
 0x37e   : > { %v14280_v10 = vadd.f32 %v14181_v40, %v5575_v52 }
 0x37f   : > { %v10356_v51 = vpop.f32.mrf.mxu1  ;;  %10571 = vmatmul.mubr.msk.bf16.gmra.mxu1 %vm5371_vm4, %v7506_v27  ;;  %v14285_v53 = vpop.f32.mrf.mxu0 }
 0x380   : > { %v14288_v18 = vadd.f32 %v14196_v43, %v10356_v51  ;;  %10574 = vmatprep.mubr.msk.bf16.mxu1 %vm5371_vm4, %v7508_v58 }
 0x381   : > { %v5588_v30 = vpop.f32.mrf.mxu1  ;;  %v14292_v1 = vpop.f32.mrf.mxu0  ;;  %10621 = vmatmul.mubr.msk.bf16.gmra.mxu0 %vm5371_vm4, %v7968_v55 }
 0x382   : > { %v14296_v40 = vadd.f32 %v14206_v54, %v5588_v30  ;;  %v7515_v30 = vrot.slane %v13878_v42, 2 }
 0x383   : > { %v10357_v29 = vpop.f32.mrf.mxu1  ;;  %v6435_v3 = vpop.f32.mrf.mxu0 }
 0x384   : > { %v14301_v43 = vadd.f32 %v14213_v34, %v10357_v29 }
 0x385   : > { %v5591_v28 = vpop.f32.mrf.mxu1  ;;  %v14303_v52 = vpop.f32.mrf.mxu0 }
 0x386   : > { %v14306_v23 = vadd.f32 %v14223_v11, %v5591_v28  ;;  %v7513_v11 = vrot.slane %v13865_v59, 2 }
 0x387   : > { %v10400_v27 = vpop.f32.mrf.mxu1  ;;  %10575 = vmatmul.mubr.msk.bf16.gmra.mxu1 %vm5371_vm4, %v7510_v49  ;;  %v14311_v54 = vpop.f32.mrf.mxu0 }
 0x388   : > { %v6105_v46 = vadd.f32 %v10400_v27, %v13974_v31  ;;  %10578 = vmatprep.mubr.msk.bf16.mxu1 %vm5371_vm4, %v7512_v63  ;;  %v10846_v63 = vld [vmem:[#allocation3 + $0xa0] ss:$0 sps:$4 sm:$0x33]   ;;  %v7516_v42 = vsel %vm2683_vm14, %v7513_v11, %v7515_v30 }
 0x389   : > { %v5960_v34 = vpop.f32.mrf.mxu1  ;;  %v14315_v51 = vpop.f32.mrf.mxu0 }
 0x38a   : > { %v6103_v58 = vadd.f32 %v5960_v34, %v13979_v2  ;;  %v14320_v22 = vadd.f32 %v14230_v5, %v6105_v46  ;;  %v7514_v2 = vsel %vm2683_vm14, %v7511_v25, %v7513_v11 }
 0x38b   : > { %v10401_v55 = vpop.f32.mrf.mxu1  ;;  %v6451_v8 = vpop.f32.mrf.mxu0 }
 0x38c   : > { %v6106_v29 = vadd.f32 %v10401_v55, %v13988_v48  ;;  %v14325_v31 = vadd.f32 %v14240_v41, %v6103_v58  ;;  %v7517_v58 = vrot.slane %v10846_v63, 2 }
 0x38d   : > { %v5963_v28 = vpop.f32.mrf.mxu1  ;;  %v10451_v49 = vpop.f32.mrf.mxu0 }
 0x38e   : > { %v6104_v27 = vadd.f32 %v5963_v28, %v13994_v44  ;;  %v14330_v59 = vadd.f32 %v14247_v19, %v6106_v29 }
 0x38f   : > { %v10404_v5 = vpop.f32.mrf.mxu1  ;;  %10579 = vmatmul.mubr.msk.bf16.gmra.mxu1 %vm5371_vm4, %v7514_v2  ;;  %v6454_v46 = vpop.f32.mrf.mxu0 }
 0x390   : > { %v6109_v48 = vadd.f32 %v10404_v5, %v14027_v17  ;;  %10582 = vmatprep.mubr.msk.bf16.mxu1 %vm5371_vm4, %v7516_v42  ;;  %v14337_v41 = vadd.f32 %v14255_v4, %v6104_v27  ;;  %v7518_v27 = vsel %vm2683_vm14, %v7515_v30, %v7517_v58  ;;  %v15132_v42 = vld [vmem:[#allocation25_spill] sm:$0xff] }
 0x391   : > { %v5976_v44 = vpop.f32.mrf.mxu1  ;;  %v10454_v34 = vpop.f32.mrf.mxu0 }
 0x392   : > { %v6107_v25 = vadd.f32 %v5976_v44, %v14039_v38  ;;  %v14341_v19 = vadd.f32 %v14262_v12, %v6109_v48 }
 0x393   : > { %v10405_v55 = vpop.f32.mrf.mxu1  ;;  %v6467_v29 = vpop.f32.mrf.mxu0 }
 0x394   : > { %v6110_v11 = vadd.f32 %v10405_v55, %v14045_v13  ;;  %v14345_v28 = vadd.f32 %v14272_v16, %v6107_v25 }
 0x395   : > { %v5979_v17 = vpop.f32.mrf.mxu1  ;;  %v10455_v2 = vpop.f32.mrf.mxu0 }
 0x396   : > { %v6108_v4 = vadd.f32 %v5979_v17, %v14050_v20  ;;  %v14350_v5 = vadd.f32 %v14277_v50, %v6110_v11  ;;  %v15133_v20 = vld [vmem:[#allocation30_spill] sm:$0xff] }
 0x397   : > { %v10408_v38 = vpop.f32.mrf.mxu1  ;;  %10583 = vmatmul.mubr.msk.bf16.gmra.mxu1 %vm5371_vm4, %v7518_v27  ;;  %v6470_v12 = vpop.f32.mrf.mxu0  ;;  %v15134_v27 = vld [vmem:[#allocation15_spill] sm:$0xff] }
 0x398   : > { %v6113_v63 = vadd.f32 %v10408_v38, %v14063_v26  ;;  %10626 = vmatprep.mubr.msk.bf16.mxu1 %vm5371_vm4, %v15132_v42  ;;  %v14357_v13 = vadd.f32 %v14285_v53, %v6108_v4 }
 0x399   : > { %v5992_v16 = vpop.f32.mrf.mxu1  ;;  %v10458_v48 = vpop.f32.mrf.mxu0 }
 0x39a   : > { %v6111_v44 = vadd.f32 %v5992_v16, %v15133_v20  ;;  %v14361_v30 = vadd.f32 %v14292_v1, %v6113_v63  ;;  %v15135_v63 = vld [vmem:[#allocation16_spill] sm:$0xff] }
 0x39b   : > { %v10409_v50 = vpop.f32.mrf.mxu1  ;;  %v6483_v25 = vpop.f32.mrf.mxu0 }
 0x39c   : > { %v6114_v58 = vadd.f32 %v10409_v50, %v14077_v0  ;;  %v14364_v55 = vadd.f32 %v6435_v3, %v6111_v44 }
 0x39d   : > { %v5995_v26 = vpop.f32.mrf.mxu1  ;;  %v10459_v11 = vpop.f32.mrf.mxu0 }
 0x39e   : > { %v6112_v17 = vadd.f32 %v5995_v26, %v14084_v14  ;;  %v14368_v53 = vadd.f32 %v14303_v52, %v6114_v58 }
 0x39f   : > { %v10412_v4 = vpop.f32.mrf.mxu1  ;;  %10627 = vmatmul.mubr.msk.bf16.vlgmr.msra.gmra.mxu1 %vm5371_vm4, %v15134_v27  ;;  %v6486_v38 = vpop.f32.mrf.mxu0  ;;  %v15137_v27 = vld [vmem:[#allocation13_spill] sm:$0xff] }
 0x3a0   : > { %v6117_v1 = vadd.f32 %v10412_v4, %v14112_v47  ;;  %10630 = vmatprep.mubr.msk.bf16.mxu1 %vm5371_vm4, %v15135_v63  ;;  %v14376_v0 = vadd.f32 %v14311_v54, %v6112_v17  ;;  %v15136_v17 = vld [vmem:[#allocation11_spill] sm:$0xff] }
 0x3a1   : > { %v6008_v3 = vpop.f32.mrf.mxu1  ;;  %v10462_v42 = vpop.f32.mrf.mxu0 }
 0x3a2   : > { %v6115_v14 = vadd.f32 %v6008_v3, %v14121_v62  ;;  %v14380_v52 = vadd.f32 %v14315_v51, %v6117_v1 }
 0x3a3   : > { %v10413_v16 = vpop.f32.mrf.mxu1  ;;  %v6499_v20 = vpop.f32.mrf.mxu0 }
 0x3a4   : > { %v6118_v44 = vadd.f32 %v10413_v16, %v14126_v37  ;;  %v14383_v50 = vadd.f32 %v6451_v8, %v6115_v14 }
 0x3a5   : > { %v6011_v47 = vpop.f32.mrf.mxu1  ;;  %v10463_v58 = vpop.f32.mrf.mxu0 }
 0x3a6   : > { %v6116_v26 = vadd.f32 %v6011_v47, %v14136_v24  ;;  %v14386_v4 = vadd.f32 %v10451_v49, %v6118_v44 }
 0x3a7   : > { %v10416_v54 = vpop.f32.mrf.mxu1  ;;  %10631 = vmatmul.mubr.msk.bf16.gmra.mxu1 %vm5371_vm4, %v15136_v17  ;;  %v6502_v62 = vpop.f32.mrf.mxu0 }
 0x3a8   : > { %v6121_v51 = vadd.f32 %v10416_v54, %v14162_v60  ;;  %10634 = vmatprep.mubr.msk.bf16.mxu1 %vm5371_vm4, %v15137_v27  ;;  %v14393_v1 = vadd.f32 %v6454_v46, %v6116_v26  ;;  %v15138_v26 = vld [vmem:[#allocation10_spill] sm:$0xff] }
 0x3a9   : > { %v6024_v37 = vpop.f32.mrf.mxu1  ;;  %v10466_v8 = vpop.f32.mrf.mxu0 }
 0x3aa   : > { %v6119_v63 = vadd.f32 %v6024_v37, %v14171_v9  ;;  %v14396_v3 = vadd.f32 %v10454_v34, %v6121_v51  ;;  %v15139_v34 = vld [vmem:[#allocation12_spill] sm:$0xff] }
 0x3ab   : > { %v10417_v24 = vpop.f32.mrf.mxu1  ;;  %v6515_v49 = vpop.f32.mrf.mxu0 }
 0x3ac   : > { %v6122_v14 = vadd.f32 %v10417_v24, %v14177_v21  ;;  %v14399_v16 = vadd.f32 %v6467_v29, %v6119_v63 }
 0x3ad   : > { %v6027_v44 = vpop.f32.mrf.mxu1  ;;  %v10467_v47 = vpop.f32.mrf.mxu0 }
 0x3ae   : > { %v6120_v60 = vadd.f32 %v6027_v44, %v14186_v56  ;;  %v14402_v54 = vadd.f32 %v10455_v2, %v6122_v14 }
 0x3af   : > { %v10420_v46 = vpop.f32.mrf.mxu1  ;;  %10635 = vmatmul.mubr.msk.bf16.gmra.mxu1 %vm5371_vm4, %v15138_v26  ;;  %v6518_v17 = vpop.f32.mrf.mxu0 }
 0x3b0   : > { %v6125_v9 = vadd.f32 %v10420_v46, %v14192_v33  ;;  %10638 = vmatprep.mubr.msk.bf16.mxu1 %vm5371_vm4, %v15139_v34  ;;  %v14409_v51 = vadd.f32 %v6470_v12, %v6120_v60  ;;  %v15140_v60 = vld [vmem:[#allocation17_spill] sm:$0xff] }
 0x3b1   : > { %v6040_v21 = vpop.f32.mrf.mxu1  ;;  %v10470_v29 = vpop.f32.mrf.mxu0 }
 0x3b2   : > { %v6123_v27 = vadd.f32 %v6040_v21, %v14201_v57  ;;  %v14412_v37 = vadd.f32 %v10458_v48, %v6125_v9  ;;  %v15141_v48 = vld [vmem:[#allocation18_spill] sm:$0xff] }
 0x3b3   : > { %v10421_v56 = vpop.f32.mrf.mxu1  ;;  %v6531_v2 = vpop.f32.mrf.mxu0 }
 0x3b4   : > { %v6126_v63 = vadd.f32 %v10421_v56, %v14209_v6  ;;  %v14415_v24 = vadd.f32 %v6483_v25, %v6123_v27 }
 0x3b5   : > { %v6043_v14 = vpop.f32.mrf.mxu1  ;;  %v10471_v44 = vpop.f32.mrf.mxu0 }
 0x3b6   : > { %v6124_v33 = vadd.f32 %v6043_v14, %v14218_v39  ;;  %v14418_v46 = vadd.f32 %v10459_v11, %v6126_v63 }
 0x3b7   : > { %v10424_v12 = vpop.f32.mrf.mxu1  ;;  %10639 = vmatmul.mubr.msk.bf16.gmra.mxu1 %vm5371_vm4, %v15140_v60  ;;  %v6534_v26 = vpop.f32.mrf.mxu0 }
 0x3b8   : > { %v6129_v57 = vadd.f32 %v10424_v12, %v14226_v35  ;;  %10642 = vmatprep.mubr.msk.bf16.mxu1 %vm5371_vm4, %v15141_v48  ;;  %v14425_v9 = vadd.f32 %v6486_v38, %v6124_v33  ;;  %v15142_v33 = vld [vmem:[#allocation19_spill] sm:$0xff] }
 0x3b9   : > { %v6056_v6 = vpop.f32.mrf.mxu1  ;;  %v10514_v25 = vpop.f32.mrf.mxu0 }
 0x3ba   : > { %v6127_v34 = vadd.f32 %v6056_v6, %v14235_v36  ;;  %v14428_v21 = vadd.f32 %v10462_v42, %v6129_v57  ;;  %v15143_v42 = vld [vmem:[#allocation14_spill] sm:$0xff] }
 0x3bb   : > { %v10425_v39 = vpop.f32.mrf.mxu1  ;;  %v7170_v11 = vpop.f32.mrf.mxu0 }
 0x3bc   : > { %v6130_v27 = vadd.f32 %v10425_v39, %v14243_v45  ;;  %v14431_v56 = vadd.f32 %v6499_v20, %v6127_v34 }
 0x3bd   : > { %v6059_v63 = vpop.f32.mrf.mxu1  ;;  %v10515_v14 = vpop.f32.mrf.mxu0 }
 0x3be   : > { %v6128_v35 = vadd.f32 %v6059_v63, %v14250_v15  ;;  %v14434_v12 = vadd.f32 %v10463_v58, %v6130_v27 }
 0x3bf   : > { %v10428_v38 = vpop.f32.mrf.mxu1  ;;  %10643 = vmatmul.mubr.msk.bf16.gmra.mxu1 %vm5371_vm4, %v15142_v33  ;;  %v7173_v60 = vpop.f32.mrf.mxu0 }
 0x3c0   : > { %v6133_v36 = vadd.f32 %v10428_v38, %v14258_v7  ;;  %10646 = vmatprep.mubr.msk.bf16.mxu1 %vm5371_vm4, %v15143_v42  ;;  %v14441_v57 = vadd.f32 %v6502_v62, %v6128_v35  ;;  %v15144_v35 = vld [vmem:[#allocation20_spill] sm:$0xff] }
 0x3c1   : > { %v6072_v45 = vpop.f32.mrf.mxu1  ;;  %v10518_v20 = vpop.f32.mrf.mxu0 }
 0x3c2   : > { %v6131_v48 = vadd.f32 %v6072_v45, %v14267_v32  ;;  %v14444_v6 = vadd.f32 %v10466_v8, %v6133_v36  ;;  %v15145_v8 = vld [vmem:[#allocation21_spill] sm:$0xff] }
 0x3c3   : > { %v10429_v15 = vpop.f32.mrf.mxu1  ;;  %v7186_v58 = vpop.f32.mrf.mxu0 }
 0x3c4   : > { %v6134_v34 = vadd.f32 %v10429_v15, %v14275_v61  ;;  %v14447_v39 = vadd.f32 %v6515_v49, %v6131_v48 }
 0x3c5   : > { %v6075_v27 = vpop.f32.mrf.mxu1  ;;  %v10519_v63 = vpop.f32.mrf.mxu0 }
 0x3c6   : > { %v6132_v7 = vadd.f32 %v6075_v27, %v14280_v10  ;;  %v14450_v38 = vadd.f32 %v10467_v47, %v6134_v34 }
 0x3c7   : > { %v10432_v62 = vpop.f32.mrf.mxu1  ;;  %10647 = vmatmul.mubr.msk.bf16.gmra.mxu1 %vm5371_vm4, %v15144_v35  ;;  %v7189_v33 = vpop.f32.mrf.mxu0 }
 0x3c8   : > { %v6137_v32 = vadd.f32 %v10432_v62, %v14288_v18  ;;  %10650 = vmatprep.mubr.msk.bf16.mxu1 %vm5371_vm4, %v15145_v8  ;;  %v14457_v36 = vadd.f32 %v6518_v17, %v6132_v7  ;;  %v15146_v7 = vld [vmem:[#allocation26_spill] sm:$0xff] }
 0x3c9   : > { %v6088_v61 = vpop.f32.mrf.mxu1  ;;  %v10522_v49 = vpop.f32.mrf.mxu0 }
 0x3ca   : > { %v6135_v42 = vadd.f32 %v6088_v61, %v14296_v40  ;;  %v14460_v45 = vadd.f32 %v10470_v29, %v6137_v32  ;;  %v15147_v29 = vld [vmem:[#allocation27_spill] sm:$0xff] }
 0x3cb   : > { %v10433_v10 = vpop.f32.mrf.mxu1  ;;  %v7202_v47 = vpop.f32.mrf.mxu0 }
 0x3cc   : > { %v6138_v48 = vadd.f32 %v10433_v10, %v14301_v43  ;;  %v14463_v15 = vadd.f32 %v6531_v2, %v6135_v42 }
 0x3cd   : > { %v6091_v34 = vpop.f32.mrf.mxu1  ;;  %v10523_v27 = vpop.f32.mrf.mxu0 }
 0x3ce   : > { %v6136_v18 = vadd.f32 %v6091_v34, %v14306_v23  ;;  %v14466_v62 = vadd.f32 %v10471_v44, %v6138_v48 }
 0x3cf   : > { %v10476_v17 = vpop.f32.mrf.mxu1  ;;  %10651 = vmatmul.mubr.msk.bf16.gmra.mxu1 %vm5371_vm4, %v15146_v7  ;;  %v7205_v35 = vpop.f32.mrf.mxu0 }
 0x3d0   : > { %v6998_v40 = vadd.f32 %v10476_v17, %v14320_v22  ;;  %10654 = vmatprep.mubr.msk.bf16.mxu1 %vm5371_vm4, %v15147_v29  ;;  %v14473_v32 = vadd.f32 %v6534_v26, %v6136_v18  ;;  %v15148_v18 = vld [vmem:[#allocation28_spill] sm:$0xff] }
 0x3d1   : > { %v6853_v43 = vpop.f32.mrf.mxu1  ;;  %v10526_v2 = vpop.f32.mrf.mxu0 }
 0x3d2   : > { %v6996_v8 = vadd.f32 %v6853_v43, %v14325_v31  ;;  %v14476_v61 = vadd.f32 %v10514_v25, %v6998_v40  ;;  %v15149_v25 = vld [vmem:[#allocation29_spill] sm:$0xff] }
 0x3d3   : > { %v10477_v23 = vpop.f32.mrf.mxu1  ;;  %v7218_v44 = vpop.f32.mrf.mxu0 }
 0x3d4   : > { %v6999_v42 = vadd.f32 %v10477_v23, %v14330_v59  ;;  %v14479_v10 = vadd.f32 %v7170_v11, %v6996_v8 }
 0x3d5   : > { %v6856_v48 = vpop.f32.mrf.mxu1  ;;  %v10527_v34 = vpop.f32.mrf.mxu0 }
 0x3d6   : > { %v6997_v22 = vadd.f32 %v6856_v48, %v14337_v41  ;;  %v14482_v17 = vadd.f32 %v10515_v14, %v6999_v42 }
 0x3d7   : > { %v10480_v26 = vpop.f32.mrf.mxu1  ;;  %10655 = vmatmul.mubr.msk.bf16.gmra.mxu1 %vm5371_vm4, %v15148_v18  ;;  %v7221_v7 = vpop.f32.mrf.mxu0 }
 0x3d8   : > { %v7002_v31 = vadd.f32 %v10480_v26, %v14341_v19  ;;  %10658 = vmatprep.mubr.msk.bf16.mxu1 %vm5371_vm4, %v15149_v25  ;;  %v14489_v40 = vadd.f32 %v7173_v60, %v6997_v22  ;;  %v15150_v22 = vld [vmem:[#allocation35_spill] sm:$0xff] }
 0x3d9   : > { %v6869_v59 = vpop.f32.mrf.mxu1  ;;  %v10530_v11 = vpop.f32.mrf.mxu0 }
 0x3da   : > { %v7000_v29 = vadd.f32 %v6869_v59, %v14345_v28  ;;  %v14492_v43 = vadd.f32 %v10518_v20, %v7002_v31 }
 0x3db   : > { %v10481_v41 = vpop.f32.mrf.mxu1  ;;  %v7234_v14 = vpop.f32.mrf.mxu0 }
 0x3dc   : > { %v7003_v8 = vadd.f32 %v10481_v41, %v14350_v5  ;;  %v14495_v23 = vadd.f32 %v7186_v58, %v7000_v29 }
 0x3dd   : > { %v6872_v42 = vpop.f32.mrf.mxu1  ;;  %v10531_v48 = vpop.f32.mrf.mxu0 }
 0x3de   : > { %v7001_v19 = vadd.f32 %v6872_v42, %v14357_v13  ;;  %v14498_v26 = vadd.f32 %v10519_v63, %v7003_v8 }
 0x3df   : > { %v10484_v60 = vpop.f32.mrf.mxu1  ;;  %10659 = vmatmul.mubr.msk.bf16.gmra.mxu1 %vm5371_vm4, %v15150_v22  ;;  %v7237_v18 = vpop.f32.mrf.mxu0 }
 0x3e0   : > { %v7006_v28 = vadd.f32 %v10484_v60, %v14361_v30  ;;  %v14503_v20 = vadd.f32 %v7189_v33, %v7001_v19 }
 0x3e1   : > { %v6885_v31 = vpop.f32.mrf.mxu1  ;;  %v10534_v25 = vpop.f32.mrf.mxu0 }
 0x3e2   : > { %v7004_v5 = vadd.f32 %v6885_v31, %v14364_v55  ;;  %v14506_v58 = vadd.f32 %v10522_v49, %v7006_v28 }
 0x3e3   : > { %v10485_v59 = vpop.f32.mrf.mxu1  ;;  %v7250_v29 = vpop.f32.mrf.mxu0 }
 0x3e4   : > { %v7007_v13 = vadd.f32 %v10485_v59, %v14368_v53  ;;  %v14509_v63 = vadd.f32 %v7202_v47, %v7004_v5 }
 0x3e5   : > { %v6888_v41 = vpop.f32.mrf.mxu1  ;;  %v10535_v8 = vpop.f32.mrf.mxu0 }
 0x3e6   : > { %v7005_v42 = vadd.f32 %v6888_v41, %v14376_v0  ;;  %v14512_v22 = vadd.f32 %v10523_v27, %v7007_v13 }
 0x3e7   : > { %v10488_v30 = vpop.f32.mrf.mxu1  ;;  %v7253_v33 = vpop.f32.mrf.mxu0 }
 0x3e8   : > { %v7010_v19 = vadd.f32 %v10488_v30, %v14380_v52  ;;  %v14515_v60 = vadd.f32 %v7205_v35, %v7005_v42 }
 0x3e9   : > { %v6901_v55 = vpop.f32.mrf.mxu1  ;;  %v10538_v49 = vpop.f32.mrf.mxu0 }
 0x3ea   : > { %v7008_v28 = vadd.f32 %v6901_v55, %v14383_v50  ;;  %v14518_v31 = vadd.f32 %v10526_v2, %v7010_v19 }
 0x3eb   : > { %v10489_v53 = vpop.f32.mrf.mxu1  ;;  %v7266_v47 = vpop.f32.mrf.mxu0 }
 0x3ec   : > { %v7011_v5 = vadd.f32 %v10489_v53, %v14386_v4  ;;  %v14521_v59 = vadd.f32 %v7218_v44, %v7008_v28 }
 0x3ed   : > { %v6904_v0 = vpop.f32.mrf.mxu1  ;;  %v10539_v35 = vpop.f32.mrf.mxu0 }
 0x3ee   : > { %v7009_v27 = vadd.f32 %v6904_v0, %v14393_v1  ;;  %v14524_v13 = vadd.f32 %v10527_v34, %v7011_v5 }
 0x3ef   : > { %v10492_v52 = vpop.f32.mrf.mxu1  ;;  %v7269_v4 = vpop.f32.mrf.mxu0 }
 0x3f0   : > { %v7014_v41 = vadd.f32 %v10492_v52, %v14396_v3  ;;  %v14527_v42 = vadd.f32 %v7221_v7, %v7009_v27 }
 0x3f1   : > { %v6917_v50 = vpop.f32.mrf.mxu1  ;;  %v10542_v3 = vpop.f32.mrf.mxu0 }
 0x3f2   : > { %v7012_v2 = vadd.f32 %v6917_v50, %v14399_v16  ;;  %v14530_v30 = vadd.f32 %v10530_v11, %v7014_v41 }
 0x3f3   : > { %v10493_v19 = vpop.f32.mrf.mxu1 }
 0x3f4   : > { %v7015_v44 = vadd.f32 %v10493_v19, %v14402_v54  ;;  %v14533_v55 = vadd.f32 %v7234_v14, %v7012_v2  ;;  %v7282_v54 = vpop.f32.mrf.mxu0 }
 0x3f5   : > { %v6920_v1 = vpop.f32.mrf.mxu1 }
 0x3f6   : > { %v7013_v34 = vadd.f32 %v6920_v1, %v14409_v51  ;;  %v14536_v28 = vadd.f32 %v10531_v48, %v7015_v44 }
 0x3f7   : > { %v10496_v53 = vpop.f32.mrf.mxu1 }
 0x3f8   : > { %v7018_v7 = vadd.f32 %v10496_v53, %v14412_v37  ;;  %v14539_v5 = vadd.f32 %v7237_v18, %v7013_v34  ;;  %v10543_v37 = vpop.f32.mrf.mxu0 }
 0x3f9   : > { %v6933_v16 = vpop.f32.mrf.mxu1 }
 0x3fa   : > { %v7016_v11 = vadd.f32 %v6933_v16, %v14415_v24  ;;  %v14542_v0 = vadd.f32 %v10534_v25, %v7018_v7 }
 0x3fb   : > { %v10497_v27 = vpop.f32.mrf.mxu1 }
 0x3fc   : > { %v7019_v14 = vadd.f32 %v10497_v27, %v14418_v46  ;;  %v14545_v52 = vadd.f32 %v7250_v29, %v7016_v11  ;;  %v7285_v46 = vpop.f32.mrf.mxu0 }
 0x3fd   : > { %v6936_v51 = vpop.f32.mrf.mxu1 }
 0x3fe   : > { %v7017_v48 = vadd.f32 %v6936_v51, %v14425_v9  ;;  %v14548_v41 = vadd.f32 %v10535_v8, %v7019_v14 }
 0x3ff   : > { %v10500_v50 = vpop.f32.mrf.mxu1 }
 0x400   : > { %v7022_v18 = vadd.f32 %v10500_v50, %v14428_v21  ;;  %v14551_v2 = vadd.f32 %v7253_v33, %v7017_v48  ;;  %v10546_v21 = vpop.f32.mrf.mxu0 }
 0x401   : > { %v6949_v24 = vpop.f32.mrf.mxu1 }
 0x402   : > { %v7020_v25 = vadd.f32 %v6949_v24, %v14431_v56  ;;  %v14554_v19 = vadd.f32 %v10538_v49, %v7022_v18  ;;  %v7298_v11 = vpop.f32.mrf.mxu0 }
 0x403   : > { %v10501_v44 = vpop.f32.mrf.mxu1 }
 0x404   : > { %v7023_v29 = vadd.f32 %v10501_v44, %v14434_v12  ;;  %v14557_v1 = vadd.f32 %v7266_v47, %v7020_v25  ;;  %v10547_v51 = vpop.f32.mrf.mxu0 }
 0x405   : > { %v6952_v9 = vpop.f32.mrf.mxu1 }
 0x406   : > { %v7021_v8 = vadd.f32 %v6952_v9, %v14441_v57  ;;  %v14560_v34 = vadd.f32 %v10539_v35, %v7023_v29  ;;  %v7301_v18 = vpop.f32.mrf.mxu0 }
 0x407   : > { %v10504_v53 = vpop.f32.mrf.mxu1 }
 0x408   : > { %v7026_v33 = vadd.f32 %v10504_v53, %v14444_v6  ;;  %v14563_v7 = vadd.f32 %v7269_v4, %v7021_v8  ;;  %v14586_v44 = vpop.f32.mrf.mxu0 }
 0x409   : > { %v6965_v56 = vpop.f32.mrf.mxu1 }
 0x40a   : > { %v7024_v49 = vadd.f32 %v6965_v56, %v14447_v39  ;;  %v14566_v16 = vadd.f32 %v10542_v3, %v7026_v33 }
 0x40b   : > { %v10505_v12 = vpop.f32.mrf.mxu1 }
 0x40c   : > { %v7027_v47 = vadd.f32 %v10505_v12, %v14450_v38  ;;  %v14569_v27 = vadd.f32 %v7282_v54, %v7024_v49 }
 0x40d   : > { %v6968_v57 = vpop.f32.mrf.mxu1 }
 0x40e   : > { %v7025_v35 = vadd.f32 %v6968_v57, %v14457_v36  ;;  %v14572_v14 = vadd.f32 %v10543_v37, %v7027_v47 }
 0x40f   : > { %v10508_v6 = vpop.f32.mrf.mxu1 }
 0x410   : > { %v7030_v4 = vadd.f32 %v10508_v6, %v14460_v45  ;;  %v14575_v48 = vadd.f32 %v7285_v46, %v7025_v35 }
 0x411   : > { %v6981_v39 = vpop.f32.mrf.mxu1 }
 0x412   : > { %v7028_v3 = vadd.f32 %v6981_v39, %v14463_v15  ;;  %v14578_v50 = vadd.f32 %v10546_v21, %v7030_v4 }
 0x413   : > { %v10509_v38 = vpop.f32.mrf.mxu1 }
 0x414   : > { %v7031_v54 = vadd.f32 %v10509_v38, %v14466_v62  ;;  %v14581_v24 = vadd.f32 %v7298_v11, %v7028_v3  ;;  %v14596_v62 = vpop.f32.mrf.mxu0 }
 0x415   : > { %v6984_v36 = vpop.f32.mrf.mxu1 }
 0x416   : > { %v7029_v37 = vadd.f32 %v6984_v36, %v14473_v32  ;;  %v14584_v25 = vadd.f32 %v10547_v51, %v7031_v54  ;;  %v14604_v33 = vpop.f32.mrf.mxu0 }
 0x417   : > { %v10552_v45 = vpop.f32.mrf.mxu1 }
 0x418   : > { %v14589_v46 = vadd.f32 %v10552_v45, %v14476_v61  ;;  %v14591_v15 = vadd.f32 %v7301_v18, %v7029_v37  ;;  %v14612_v11 = vpop.f32.mrf.mxu0 }
 0x419   : > { %v7613_v29 = vpop.f32.mrf.mxu1 }
 0x41a   : > { %v14594_v9 = vadd.f32 %v7613_v29, %v14479_v10  ;;  %v14620_v57 = vpop.f32.mrf.mxu0 }
 0x41b   : > { %v10553_v8 = vpop.f32.mrf.mxu1 }
 0x41c   : > { %v14599_v53 = vadd.f32 %v10553_v8, %v14482_v17  ;;  %v14628_v6 = vpop.f32.mrf.mxu0 }
 0x41d   : > { %v7616_v32 = vpop.f32.mrf.mxu1 }
 0x41e   : > { %v14602_v21 = vadd.f32 %v7616_v32, %v14489_v40  ;;  %v14636_v3 = vpop.f32.mrf.mxu0 }
 0x41f   : > { %v10556_v61 = vpop.f32.mrf.mxu1 }
 0x420   : > { %v14607_v56 = vadd.f32 %v10556_v61, %v14492_v43  ;;  %v14644_v54 = vpop.f32.mrf.mxu0 }
 0x421   : > { %v7629_v49 = vpop.f32.mrf.mxu1 }
 0x422   : > { %v14610_v10 = vadd.f32 %v7629_v49, %v14495_v23  ;;  %v14652_v45 = vpop.f32.mrf.mxu0 }
 0x423   : > { %v10557_v12 = vpop.f32.mrf.mxu1 }
 0x424   : > { %v14615_v17 = vadd.f32 %v10557_v12, %v14498_v26  ;;  %v14660_v32 = vpop.f32.mrf.mxu0 }
 0x425   : > { %v7632_v47 = vpop.f32.mrf.mxu1 }
 0x426   : > { %v14618_v40 = vadd.f32 %v7632_v47, %v14503_v20  ;;  %v14668_v12 = vpop.f32.mrf.mxu0 }
 0x427   : > { %v10560_v35 = vpop.f32.mrf.mxu1 }
 0x428   : > { %v14623_v43 = vadd.f32 %v10560_v35, %v14506_v58 }
 0x429   : > { %v7645_v51 = vpop.f32.mrf.mxu1 }
 0x42a   : > { %v14626_v23 = vadd.f32 %v7645_v51, %v14509_v63  ;;  %v14676_v51 = vpop.f32.mrf.mxu0 }
 0x42b   : > { %v10561_v4 = vpop.f32.mrf.mxu1 }
 0x42c   : > { %v14631_v26 = vadd.f32 %v10561_v4, %v14512_v22 }
 0x42d   : > { %v7648_v39 = vpop.f32.mrf.mxu1 }
 0x42e   : > { %v14634_v20 = vadd.f32 %v7648_v39, %v14515_v60 }
 0x42f   : > { %v10564_v18 = vpop.f32.mrf.mxu1 }
 0x430   : > { %v14639_v58 = vadd.f32 %v10564_v18, %v14518_v31  ;;  %v14684_v18 = vpop.f32.mrf.mxu0 }
 0x431   : > { %v7661_v38 = vpop.f32.mrf.mxu1 }
 0x432   : > { %v14642_v63 = vadd.f32 %v7661_v38, %v14521_v59 }
 0x433   : > { %v10565_v36 = vpop.f32.mrf.mxu1 }
 0x434   : > { %v14647_v22 = vadd.f32 %v10565_v36, %v14524_v13 }
 0x435   : > { %v7664_v37 = vpop.f32.mrf.mxu1 }
 0x436   : > { %v14650_v60 = vadd.f32 %v7664_v37, %v14527_v42  ;;  %v14692_v37 = vpop.f32.mrf.mxu0 }
 0x437   : > { %v10568_v29 = vpop.f32.mrf.mxu1 }
 0x438   : > { %v14655_v31 = vadd.f32 %v10568_v29, %v14530_v30 }
 0x439   : > { %v7677_v8 = vpop.f32.mrf.mxu1 }
 0x43a   : > { %v14658_v59 = vadd.f32 %v7677_v8, %v14533_v55 }
 0x43b   : > { %v10569_v61 = vpop.f32.mrf.mxu1 }
 0x43c   : > { %v14663_v13 = vadd.f32 %v10569_v61, %v14536_v28  ;;  %v14700_v61 = vpop.f32.mrf.mxu0 }
 0x43d   : > { %v7680_v49 = vpop.f32.mrf.mxu1 }
 0x43e   : > { %v14666_v42 = vadd.f32 %v7680_v49, %v14539_v5 }
 0x43f   : > { %v10572_v47 = vpop.f32.mrf.mxu1 }
 0x440   : > { %v14671_v30 = vadd.f32 %v10572_v47, %v14542_v0 }
 0x441   : > { %v7693_v35 = vpop.f32.mrf.mxu1 }
 0x442   : > { %v14674_v55 = vadd.f32 %v7693_v35, %v14545_v52  ;;  %v14708_v35 = vpop.f32.mrf.mxu0 }
 0x443   : > { %v10573_v4 = vpop.f32.mrf.mxu1 }
 0x444   : > { %v14679_v28 = vadd.f32 %v10573_v4, %v14548_v41 }
 0x445   : > { %v7696_v39 = vpop.f32.mrf.mxu1 }
 0x446   : > { %v14682_v5 = vadd.f32 %v7696_v39, %v14551_v2 }
 0x447   : > { %v10576_v38 = vpop.f32.mrf.mxu1 }
 0x448   : > { %v14687_v0 = vadd.f32 %v10576_v38, %v14554_v19  ;;  %v14716_v38 = vpop.f32.mrf.mxu0 }
 0x449   : > { %v7709_v36 = vpop.f32.mrf.mxu1 }
 0x44a   : > { %v14690_v52 = vadd.f32 %v7709_v36, %v14557_v1 }
 0x44b   : > { %v10577_v29 = vpop.f32.mrf.mxu1 }
 0x44c   : > { %v14695_v41 = vadd.f32 %v10577_v29, %v14560_v34 }
 0x44d   : > { %v7712_v8 = vpop.f32.mrf.mxu1 }
 0x44e   : > { %v14698_v2 = vadd.f32 %v7712_v8, %v14563_v7  ;;  %v14724_v8 = vpop.f32.mrf.mxu0 }
 0x44f   : > { %v10580_v49 = vpop.f32.mrf.mxu1 }
 0x450   : > { %v14703_v19 = vadd.f32 %v10580_v49, %v14566_v16 }
 0x451   : > { %v7725_v47 = vpop.f32.mrf.mxu1 }
 0x452   : > { %v14706_v1 = vadd.f32 %v7725_v47, %v14569_v27 }
 0x453   : > { %v10581_v4 = vpop.f32.mrf.mxu1 }
 0x454   : > { %v14711_v34 = vadd.f32 %v10581_v4, %v14572_v14  ;;  %v14734_v4 = vpop.f32.mrf.mxu0 }
 0x455   : > { %v7728_v39 = vpop.f32.mrf.mxu1 }
 0x456   : > { %v14714_v7 = vadd.f32 %v7728_v39, %v14575_v48 }
 0x457   : > { %v10584_v36 = vpop.f32.mrf.mxu1 }
 0x458   : > { %v14719_v16 = vadd.f32 %v10584_v36, %v14578_v50  ;;  %v8208_v50 = vadd.f32 %v14586_v44, %v14589_v46 }
 0x459   : > { %v7741_v29 = vpop.f32.mrf.mxu1 }
 0x45a   : > { %v14722_v27 = vadd.f32 %v7741_v29, %v14581_v24  ;;  %v8206_v24 = vadd.f32 %v14596_v62, %v14594_v9  ;;  %v8207_v9 = vadd.f32 %v14612_v11, %v14602_v21 }
 0x45b   : > { %v10585_v49 = vpop.f32.mrf.mxu1 }
 0x45c   : > { %15151 = vst [vmem:[#allocation31_spill] sm:$0xff] %v14722_v27  ;;  %v14727_v14 = vadd.f32 %v10585_v49, %v14584_v25  ;;  %v14741_v25 = vld [vmem:[%s14930_s5] ss:$0 sm:$0xff] }
 0x45d   : > { %v7744_v47 = vpop.f32.mrf.mxu1 }
 0x45e   : > { %15152 = vst [vmem:[#allocation32_spill] sm:$0xff] %v14727_v14  ;;  %v14730_v48 = vadd.f32 %v7744_v47, %v14591_v15  ;;  %v8209_v15 = vadd.f32 %v14604_v33, %v14599_v53  ;;  %v14746_v47 = vpop.f32.mrf.mxu0  ;;  %v8212_v53 = vadd.f32 %v14620_v57, %v14607_v56 }
 0x45f   : > { %v10628_v39 = vpop.f32.mrf.mxu1 }
 0x460   : > { %15153 = vst [vmem:[#allocation33_spill] sm:$0xff] %v14730_v48  ;;  %v8525_v36 = vadd.f32 %v10628_v39, %v8208_v50  ;;  %v14757_v33 = vpop.f32.mrf.mxu0 }
 0x461   : > { %v8380_v29 = vpop.f32.mrf.mxu1 }
 0x462   : > { %v8523_v49 = vadd.f32 %v8380_v29, %v8206_v24  ;;  %v8568_v46 = vadd.f32 %v14741_v25, %v8525_v36  ;;  %v8210_v36 = vadd.f32 %v14628_v6, %v14610_v10  ;;  %v14764_v56 = vpop.f32.mrf.mxu0 }
 0x463   : > { %v10629_v44 = vpop.f32.mrf.mxu1 }
 0x464   : > { %v8526_v50 = vadd.f32 %v10629_v44, %v8209_v15  ;;  %v8566_v39 = vadd.f32 %v14741_v25, %v8523_v49  ;;  %v8604_v15 = vmax.f32 %v8568_v46, 0.0  ;;  %v8213_v49 = vadd.f32 %v14636_v3, %v14615_v17 }
 0x465   : > { %v8383_v62 = vpop.f32.mrf.mxu1  ;;  %v8211_v46 = vadd.f32 %v14644_v54, %v14618_v40 }
 0x466   : > { %v8569_v24 = vadd.f32 %v14741_v25, %v8526_v50  ;;  %v8524_v29 = vadd.f32 %v8383_v62, %v8207_v9  ;;  %v8602_v50 = vmax.f32 %v8566_v39, 0.0 }
 0x467   : > { %v10632_v48 = vpop.f32.mrf.mxu1 }
 0x468   : > { %v8605_v44 = vmax.f32 %v8569_v24, 0.0  ;;  %v8567_v21 = vadd.f32 %v14741_v25, %v8524_v29  ;;  %v8529_v11 = vadd.f32 %v10632_v48, %v8212_v53  ;;  %v8216_v24 = vadd.f32 %v14652_v45, %v14623_v43  ;;  %v14777_v29 = vpop.f32.mrf.mxu0 }
 0x469   : > { %v8396_v14 = vpop.f32.mrf.mxu1 }
 0x46a   : > { %v9537_v9 = vpack.c.bf16 %v8605_v44, %v8604_v15  ;;  %v8603_v62 = vmax.f32 %v8567_v21, 0.0  ;;  %v8527_v27 = vadd.f32 %v8396_v14, %v8210_v36  ;;  %v8572_v6 = vadd.f32 %v14741_v25, %v8529_v11 }
 0x46b   : > { %v10633_v57 = vpop.f32.mrf.mxu1  ;;  %v8214_v36 = vadd.f32 %v14660_v32, %v14626_v23  ;;  %v8217_v21 = vadd.f32 %v14668_v12, %v14631_v26 }
 0x46c   : > { %9619 = vst [vmem:[%s14766_s12 + $0x8] sm:$0xff] %v9537_v9   ;;  %v9532_v10 = vpack.c.bf16 %v8603_v62, %v8602_v50  ;;  %v8530_v48 = vadd.f32 %v10633_v57, %v8213_v49  ;;  %v8570_v3 = vadd.f32 %v14741_v25, %v8527_v27  ;;  %v8608_v15 = vmax.f32 %v8572_v6, 0.0  ;;  %v14784_v50 = vpop.f32.mrf.mxu0 }
 0x46d   : > { %v8399_v17 = vpop.f32.mrf.mxu1  ;;  %v8215_v57 = vadd.f32 %v14676_v51, %v14634_v20 }
 0x46e   : > { %9533 = vst [vmem:[%s14766_s12] sm:$0xff] %v9532_v10   ;;  %v8573_v14 = vadd.f32 %v14741_v25, %v8530_v48  ;;  %v8528_v39 = vadd.f32 %v8399_v17, %v8211_v46  ;;  %v8606_v11 = vmax.f32 %v8570_v3, 0.0  ;;  %v8220_v48 = vadd.f32 %v14684_v18, %v14639_v58  ;;  %v14795_v46 = vpop.f32.mrf.mxu0 }
 0x46f   : > { %v10636_v53 = vpop.f32.mrf.mxu1  ;;  %v8218_v3 = vadd.f32 %v14692_v37, %v14642_v63 }
 0x470   : > { %v8609_v44 = vmax.f32 %v8573_v14, 0.0  ;;  %v8571_v40 = vadd.f32 %v14741_v25, %v8528_v39  ;;  %v8533_v54 = vadd.f32 %v10636_v53, %v8216_v24  ;;  %v8221_v53 = vadd.f32 %v14700_v61, %v14647_v22 }
 0x471   : > { %v8412_v27 = vpop.f32.mrf.mxu1 }
 0x472   : > { %v9547_v49 = vpack.c.bf16 %v8609_v44, %v8608_v15  ;;  %v8607_v43 = vmax.f32 %v8571_v40, 0.0  ;;  %v8531_v45 = vadd.f32 %v8412_v27, %v8214_v36  ;;  %v8576_v23 = vadd.f32 %v14741_v25, %v8533_v54  ;;  %v14802_v44 = vpop.f32.mrf.mxu0 }
 0x473   : > { %v10637_v9 = vpop.f32.mrf.mxu1  ;;  %v8219_v27 = vadd.f32 %v14708_v35, %v14650_v60 }
 0x474   : > { %9621 = vst [vmem:[%s14766_s12 + $0x18] sm:$0xff] %v9547_v49   ;;  %v9542_v62 = vpack.c.bf16 %v8607_v43, %v8606_v11  ;;  %v8534_v32 = vadd.f32 %v10637_v9, %v8217_v21  ;;  %v8574_v6 = vadd.f32 %v14741_v25, %v8531_v45  ;;  %v8612_v14 = vmax.f32 %v8576_v23, 0.0  ;;  %v10615_v43 = vpop.f32.mrf.mxu0 }
 0x475   : > { %v8415_v10 = vpop.f32.mrf.mxu1  ;;  %v8224_v49 = vadd.f32 %v14716_v38, %v14655_v31  ;;  %v8222_v9 = vadd.f32 %v14724_v8, %v14658_v59 }
 0x476   : > { %9620 = vst [vmem:[%s14766_s12 + $0x10] sm:$0xff] %v9542_v62   ;;  %v8577_v26 = vadd.f32 %v14741_v25, %v8534_v32  ;;  %v8532_v12 = vadd.f32 %v8415_v10, %v8215_v57  ;;  %v8610_v36 = vmax.f32 %v8574_v6, 0.0  ;;  %v8225_v57 = vadd.f32 %v14734_v4, %v14663_v13  ;;  %v8162_v38 = vpop.f32.mrf.mxu0 }
 0x477   : > { %v10640_v17 = vpop.f32.mrf.mxu1 }
 0x478   : > { %v8613_v39 = vmax.f32 %v8577_v26, 0.0  ;;  %v8575_v20 = vadd.f32 %v14741_v25, %v8532_v12  ;;  %v8537_v51 = vadd.f32 %v10640_v17, %v8220_v48  ;;  %v8223_v17 = vadd.f32 %v14746_v47, %v14666_v42 }
 0x479   : > { %v8428_v24 = vpop.f32.mrf.mxu1 }
 0x47a   : > { %v9557_v15 = vpack.c.bf16 %v8613_v39, %v8612_v14  ;;  %v8611_v58 = vmax.f32 %v8575_v20, 0.0  ;;  %v8535_v18 = vadd.f32 %v8428_v24, %v8218_v3  ;;  %v8580_v63 = vadd.f32 %v14741_v25, %v8537_v51  ;;  %v10618_v20 = vpop.f32.mrf.mxu0 }
 0x47b   : > { %v10641_v40 = vpop.f32.mrf.mxu1  ;;  %v8228_v39 = vadd.f32 %v14757_v33, %v14671_v30  ;;  %v8226_v24 = vadd.f32 %v14764_v56, %v14674_v55 }
 0x47c   : > { %9623 = vst [vmem:[%s14766_s12 + $0x28] sm:$0xff] %v9557_v15   ;;  %v9552_v54 = vpack.c.bf16 %v8611_v58, %v8610_v36  ;;  %v8538_v37 = vadd.f32 %v10641_v40, %v8221_v53  ;;  %v8578_v11 = vadd.f32 %v14741_v25, %v8535_v18  ;;  %v8616_v62 = vmax.f32 %v8580_v63, 0.0  ;;  %v8175_v33 = vpop.f32.mrf.mxu0 }
 0x47d   : > { %v8431_v21 = vpop.f32.mrf.mxu1  ;;  %v8229_v58 = vadd.f32 %v14777_v29, %v14679_v28 }
 0x47e   : > { %9622 = vst [vmem:[%s14766_s12 + $0x20] sm:$0xff] %v9552_v54   ;;  %v8581_v22 = vadd.f32 %v14741_v25, %v8538_v37  ;;  %v8536_v61 = vadd.f32 %v8431_v21, %v8219_v27  ;;  %v8614_v10 = vmax.f32 %v8578_v11, 0.0  ;;  %v8227_v27 = vadd.f32 %v14784_v50, %v14682_v5 }
 0x47f   : > { %v10644_v45 = vpop.f32.mrf.mxu1 }
 0x480   : > { %v8617_v23 = vmax.f32 %v8581_v22, 0.0  ;;  %v8579_v60 = vadd.f32 %v14741_v25, %v8536_v61  ;;  %v8541_v35 = vadd.f32 %v10644_v45, %v8224_v49  ;;  %v8232_v22 = vadd.f32 %v14795_v46, %v14687_v0  ;;  %v10619_v61 = vpop.f32.mrf.mxu0 }
 0x481   : > { %v8444_v32 = vpop.f32.mrf.mxu1  ;;  %v8230_v45 = vadd.f32 %v14802_v44, %v14690_v52  ;;  %v8231_v44 = vadd.f32 %v8162_v38, %v14698_v2 }
 0x482   : > { %v9567_v6 = vpack.c.bf16 %v8617_v23, %v8616_v62  ;;  %v8615_v26 = vmax.f32 %v8579_v60, 0.0  ;;  %v8539_v31 = vadd.f32 %v8444_v32, %v8222_v9  ;;  %v8584_v59 = vadd.f32 %v14741_v25, %v8541_v35  ;;  %v8178_v0 = vpop.f32.mrf.mxu0 }
 0x483   : > { %v10645_v12 = vpop.f32.mrf.mxu1  ;;  %v8233_v60 = vadd.f32 %v10615_v43, %v14695_v41  ;;  %v8236_v43 = vadd.f32 %v10618_v20, %v14703_v19 }
 0x484   : > { %9625 = vst [vmem:[%s14766_s12 + $0x38] sm:$0xff] %v9567_v6   ;;  %v9562_v48 = vpack.c.bf16 %v8615_v26, %v8614_v10  ;;  %v8542_v8 = vadd.f32 %v10645_v12, %v8225_v57  ;;  %v8582_v14 = vadd.f32 %v14741_v25, %v8539_v31  ;;  %v8620_v53 = vmax.f32 %v8584_v59, 0.0  ;;  %v10622_v59 = vpop.f32.mrf.mxu0 }
 0x485   : > { %v8447_v3 = vpop.f32.mrf.mxu1 }
 0x486   : > { %9624 = vst [vmem:[%s14766_s12 + $0x30] sm:$0xff] %v9562_v48   ;;  %v8585_v13 = vadd.f32 %v14741_v25, %v8542_v8  ;;  %v8540_v4 = vadd.f32 %v8447_v3, %v8223_v17  ;;  %v8618_v18 = vmax.f32 %v8582_v14, 0.0  ;;  %v8234_v17 = vadd.f32 %v8175_v33, %v14706_v1  ;;  %v15154_v33 = vld [vmem:[#allocation31_spill] sm:$0xff] }
 0x487   : > { %v10648_v51 = vpop.f32.mrf.mxu1 }
 0x488   : > { %v8621_v36 = vmax.f32 %v8585_v13, 0.0  ;;  %v8583_v42 = vadd.f32 %v14741_v25, %v8540_v4  ;;  %v8545_v47 = vadd.f32 %v10648_v51, %v8228_v39  ;;  %v8237_v4 = vadd.f32 %v10619_v61, %v14711_v34 }
 0x489   : > { %v8460_v15 = vpop.f32.mrf.mxu1 }
 0x48a   : > { %v9577_v40 = vpack.c.bf16 %v8621_v36, %v8620_v53  ;;  %v8619_v54 = vmax.f32 %v8583_v42, 0.0  ;;  %v8543_v30 = vadd.f32 %v8460_v15, %v8226_v24  ;;  %v8588_v55 = vadd.f32 %v14741_v25, %v8545_v47  ;;  %v8191_v36 = vpop.f32.mrf.mxu0 }
 0x48b   : > { %v10649_v63 = vpop.f32.mrf.mxu1  ;;  %v8235_v47 = vadd.f32 %v8178_v0, %v14714_v7 }
 0x48c   : > { %9627 = vst [vmem:[%s14766_s12 + $0x48] sm:$0xff] %v9577_v40   ;;  %v9572_v37 = vpack.c.bf16 %v8619_v54, %v8618_v18  ;;  %v8546_v56 = vadd.f32 %v10649_v63, %v8229_v58  ;;  %v8586_v11 = vadd.f32 %v14741_v25, %v8543_v30  ;;  %v8624_v9 = vmax.f32 %v8588_v55, 0.0  ;;  %v10623_v54 = vpop.f32.mrf.mxu0 }
 0x48d   : > { %v8463_v21 = vpop.f32.mrf.mxu1  ;;  %v8240_v40 = vadd.f32 %v10622_v59, %v14719_v16  ;;  %v8238_v63 = vadd.f32 %v8191_v36, %v15154_v33 }
 0x48e   : > { %9626 = vst [vmem:[%s14766_s12 + $0x40] sm:$0xff] %v9572_v37   ;;  %v8589_v28 = vadd.f32 %v14741_v25, %v8546_v56  ;;  %v8544_v29 = vadd.f32 %v8463_v21, %v8227_v27  ;;  %v8622_v35 = vmax.f32 %v8586_v11, 0.0  ;;  %v15155_v21 = vld [vmem:[#allocation32_spill] sm:$0xff]  ;;  %v8194_v16 = vpop.f32.mrf.mxu0 }
 0x48f   : > { %v10652_v49 = vpop.f32.mrf.mxu1  ;;  %v8241_v11 = vadd.f32 %v10623_v54, %v15155_v21 }
 0x490   : > { %v8625_v62 = vmax.f32 %v8589_v28, 0.0  ;;  %v8587_v5 = vadd.f32 %v14741_v25, %v8544_v29  ;;  %v8549_v50 = vadd.f32 %v10652_v49, %v8232_v22 }
 0x491   : > { %v8476_v23 = vpop.f32.mrf.mxu1 }
 0x492   : > { %v9587_v32 = vpack.c.bf16 %v8625_v62, %v8624_v9  ;;  %v8623_v57 = vmax.f32 %v8587_v5, 0.0  ;;  %v8547_v10 = vadd.f32 %v8476_v23, %v8230_v45  ;;  %v8592_v26 = vadd.f32 %v14741_v25, %v8549_v50  ;;  %v15156_v5 = vld [vmem:[#allocation33_spill] sm:$0xff] }
 0x493   : > { %v10653_v46 = vpop.f32.mrf.mxu1  ;;  %v8239_v50 = vadd.f32 %v8194_v16, %v15156_v5 }
 0x494   : > { %9629 = vst [vmem:[%s14766_s12 + $0x58] sm:$0xff] %v9587_v32   ;;  %v9582_v6 = vpack.c.bf16 %v8623_v57, %v8622_v35  ;;  %v8550_v52 = vadd.f32 %v10653_v46, %v8233_v60  ;;  %v8590_v12 = vadd.f32 %v14741_v25, %v8547_v10  ;;  %v8628_v3 = vmax.f32 %v8592_v26, 0.0 }
 0x495   : > { %v8479_v31 = vpop.f32.mrf.mxu1 }
 0x496   : > { %9628 = vst [vmem:[%s14766_s12 + $0x50] sm:$0xff] %v9582_v6   ;;  %v8593_v48 = vadd.f32 %v14741_v25, %v8550_v52  ;;  %v8548_v41 = vadd.f32 %v8479_v31, %v8231_v44  ;;  %v8626_v39 = vmax.f32 %v8590_v12, 0.0 }
 0x497   : > { %v10656_v8 = vpop.f32.mrf.mxu1 }
 0x498   : > { %v8629_v14 = vmax.f32 %v8593_v48, 0.0  ;;  %v8591_v13 = vadd.f32 %v14741_v25, %v8548_v41  ;;  %v8553_v2 = vadd.f32 %v10656_v8, %v8236_v43 }
 0x499   : > { %v8492_v38 = vpop.f32.mrf.mxu1 }
 0x49a   : > { %v9597_v51 = vpack.c.bf16 %v8629_v14, %v8628_v3  ;;  %v8627_v24 = vmax.f32 %v8591_v13, 0.0  ;;  %v8551_v53 = vadd.f32 %v8492_v38, %v8234_v17  ;;  %v8596_v42 = vadd.f32 %v14741_v25, %v8553_v2 }
 0x49b   : > { %v10657_v19 = vpop.f32.mrf.mxu1 }
 0x49c   : > { %9631 = vst [vmem:[%s14766_s12 + $0x68] sm:$0xff] %v9597_v51   ;;  %v9592_v20 = vpack.c.bf16 %v8627_v24, %v8626_v39  ;;  %v8554_v1 = vadd.f32 %v10657_v19, %v8237_v4  ;;  %v8594_v58 = vadd.f32 %v14741_v25, %v8551_v53  ;;  %v8632_v37 = vmax.f32 %v8596_v42, 0.0 }
 0x49d   : > { %v8495_v15 = vpop.f32.mrf.mxu1 }
 0x49e   : > { %9630 = vst [vmem:[%s14766_s12 + $0x60] sm:$0xff] %v9592_v20   ;;  %v8597_v18 = vadd.f32 %v14741_v25, %v8554_v1  ;;  %v8552_v34 = vadd.f32 %v8495_v15, %v8235_v47  ;;  %v8630_v28 = vmax.f32 %v8594_v58, 0.0 }
 0x49f   : > { %v10660_v30 = vpop.f32.mrf.mxu1 }
 0x4a0   : > { %v8633_v55 = vmax.f32 %v8597_v18, 0.0  ;;  %v8595_v56 = vadd.f32 %v14741_v25, %v8552_v34  ;;  %v8557_v7 = vadd.f32 %v10660_v30, %v8240_v40 }
 0x4a1   : > { %v8508_v27 = vpop.f32.mrf.mxu1 }
 0x4a2   : > { %v9607_v29 = vpack.c.bf16 %v8633_v55, %v8632_v37  ;;  %v8631_v22 = vmax.f32 %v8595_v56, 0.0  ;;  %v8555_v61 = vadd.f32 %v8508_v27, %v8238_v63  ;;  %v8600_v9 = vadd.f32 %v14741_v25, %v8557_v7 }
 0x4a3   : > { %v10661_v49 = vpop.f32.mrf.mxu1 }
 0x4a4   : > { %9633 = vst [vmem:[%s14766_s12 + $0x78] sm:$0xff] %v9607_v29   ;;  %v9602_v45 = vpack.c.bf16 %v8631_v22, %v8630_v28  ;;  %v8558_v62 = vadd.f32 %v10661_v49, %v8241_v11  ;;  %v8598_v60 = vadd.f32 %v14741_v25, %v8555_v61  ;;  %v8636_v57 = vmax.f32 %v8600_v9, 0.0 }
 0x4a5   : > { %v8511_v23 = vpop.f32.mrf.mxu1 }
 0x4a6   : > { %9632 = vst [vmem:[%s14766_s12 + $0x70] sm:$0xff] %v9602_v45   ;;  %v8601_v35 = vadd.f32 %v14741_v25, %v8558_v62  ;;  %v8556_v32 = vadd.f32 %v8511_v23, %v8239_v50  ;;  %v8634_v46 = vmax.f32 %v8598_v60, 0.0 }
 0x4a8   : > { %v8637_v10 = vmax.f32 %v8601_v35, 0.0  ;;  %v8599_v0 = vadd.f32 %v14741_v25, %v8556_v32 }
 0x4aa   : > { %v9617_v6 = vpack.c.bf16 %v8637_v10, %v8636_v57  ;;  %v8635_v26 = vmax.f32 %v8599_v0, 0.0 }
 0x4ac   : > { %9635 = vst [vmem:[%s14766_s12 + $0x88] sm:$0xff] %v9617_v6   ;;  %v9612_v52 = vpack.c.bf16 %v8635_v26, %v8634_v46 }
 0x4ae   : > { %9634 = vst [vmem:[%s14766_s12 + $0x80] sm:$0xff] %v9612_v52  }
 0x4af   : > { %10870 = shalt.err (!%p10867_p3)
}
 0x4b0   : > { %s10871_s28 = scalar_lea.hbm %s14880_s17, 2304  ;;  %s10875_s10 = scalar_lea.hbm %s14931_s6, 4608 }
 0x4b1   : > { %p10872_p4 = scmp.ne.s32.totalorder %s14880_s17, %s10871_s28  ;;  %p10876_p9 = scmp.lt.s32.totalorder %s14880_s17, %s14931_s6 }
 0x4b2   : > { %p10877_p10 = scmp.lt.s32.totalorder %s10875_s10, %s10871_s28 }
 0x4b3   : > { %p10873_p7 = pnand %p10872_p4, %p10996_p5 }
 0x4b4   : > { %p10878_p11 = por %p10877_p10, %p10876_p9 }
 0x4b5   : > { %p10874_p8 = pneg %p10873_p7 }
 0x4b7   : > { %p10879_p12 = pnand %p10878_p11, %p10874_p8 }
 0x4b9   : > { %10882 = shalt.err (!%p10879_p12)
}
 0x4ba   : > { %s10921_s13 = smov 64   ;;  %s10922_s15 = smov 4  }
 0x4bb   : > { %10674 = dma.vmem_to_hbm [thread:$0]  (%p10996_p5), %s14874_s14, 2304, %s14880_s17, %s14885_s18, %s10921_s13, %s10921_s13, %s10922_s15  }
 0x4bc PF: > { %p10680_p13 = scmp.ge.s32.totalorder %s10917_s24, 2  ;;  %s8847_s16 = sand.u32 1, %s10905_s21  }
 0x4bd   : > { %s8848_s25 = scalar_lea.sflag [#allocation5], %s8847_s16 }
 0x4be   : > { %p10677_p0 = pnand %p10680_p13, %p11000_p6 }
 0x4c0   : > { %p10678_p1 = pneg %p10677_p0 }
 0x4c2   : > { %10900 = dma.done.wait (%p10678_p1), %s8848_s25, 2304  }
 0x4c3   : > { %10902 = vsyncadd (%p10678_p1), %s8848_s25, 4294964992  ;;  %p16_p2 = scmp.ge.s32.totalorder %s10983_s27, 4   ;;  %s15157_s21 = smov %s10909_s22 }
 0x4c4   : > { %s15158_s22 = smov %s10913_s23  ;;  %s15159_s23 = smov %s10994_s30 }
 0x4c5   : > { %s15160_s24 = smov %s10983_s27  ;;  %18 = sbr.rel (!%p16_p2) target bundleno = 3 (0x3), region = 95 }
 0x4ca   :  { %8853 = vsyncpa [#allocation5], 1 }
 0x4cb   :  { %8855 = vsyncpa [#allocation5 + $0x1], 1 }

</bundles_post_ra>
